<compile_context>
chip_gen: v7x
topology: tpu7x:2x2x1
jax: 0.10.0
libtpu: 0.0.40
codegen_flags: <defaults>
</compile_context>

<pallas_src>
from functools import partial

import jax
import jax.numpy as jnp
from jax import lax
from jax.experimental import pallas as pl
from jax.experimental.pallas import tpu as pltpu

# MXU input precision: bf16 operands + f32 accumulation. Set to jnp.float32 for
# bit-faithful f32 semantics (the reference below emulates whichever is chosen).
MXU_DTYPE = jnp.bfloat16


def _vmem_limit_bytes():
    # Raise the 32 MiB scoped default toward physical VMEM, leaving headroom so the
    # same setting is safe on v7x (64 MiB/TC) and generous on v5e/v6e (128 MiB).
    try:
        cap = pltpu.get_tpu_info().vmem_capacity_bytes
    except Exception:
        cap = 64 * 1024 * 1024
    return int(min(cap - 8 * 1024 * 1024, 100 * 1024 * 1024))


def _pick_nb(n, ho, wo, c_out):
    """Images per grid step: grow the GEMM M dim (NB*ho*wo) toward >=256 while the
    per-step f32 up-conv output block stays modest; NB must divide n."""
    best = 1
    for cand in range(1, n + 1):
        if n % cand:
            continue
        if cand * (2 * ho) * (2 * wo) * c_out * 4 > 8 * 1024 * 1024:
            break
        best = cand
        if cand * ho * wo >= 256:
            break
    return best


# ----------------------------- Pallas kernels ------------------------------

def _down_up_kernel(xps_ref, wd_ref, wu_ref, u_ref, stats_ref, dpad_ref, *,
                    nb, ho, wo, c_in, c_mid, c_out):
    """Fused LeakyReLU(0.2) + Conv2d(4,2,1) + ReLU + ConvTranspose2d(4,2,1) with
    BatchNorm partial statistics; NB images per grid step.

    xps_ref:   (NB, 4, ho+1, wo+1, c_in) zero-padded input split into its four
               (row, col) parity sub-grids -> every tap slice is unit-stride.
    wd_ref:    (16*c_in, c_mid) down-conv weights, all 16 taps folded into K (bf16).
    wu_ref:    (4, 4*c_mid, c_out) up-conv weights: per output-parity phase, its
               4 taps folded into K (bf16).
    u_ref:     (NB, 2*ho, 2*wo, c_out) pre-BatchNorm up-conv output (f32).
    stats_ref: (1, 2, c_out) per-step partial [sum; sum_sq] of u.
    dpad_ref:  VMEM scratch (NB, ho+2, wo+2, c_mid) holding the zero-padded,
               ReLU'd, bf16 down-conv output (never touches HBM).
    """
    m = nb * ho * wo

    # ---- LeakyReLU once + single bf16 cast, then one K = 16*c_in GEMM ----
    xa = xps_ref[...]
    xa = jnp.where(xa > 0, xa, 0.2 * xa).astype(MXU_DTYPE)
    taps = []
    for ky in range(4):
        ry, ay = ky % 2, ky // 2
        for kx in range(4):
            rx, bx = kx % 2, kx // 2
            taps.append(xa[:, 2 * ry + rx, ay:ay + ho, bx:bx + wo, :])
    lhs = jnp.concatenate(taps, axis=-1).reshape(m, 16 * c_in)
    d = jnp.dot(lhs, wd_ref[...], preferred_element_type=jnp.float32)   # (M, c_mid)

    # ---- ReLU once, bf16 once, zero-pad inside VMEM (no HBM round trip) ----
    d = jnp.maximum(d, 0.0).astype(MXU_DTYPE).reshape(nb, ho, wo, c_mid)
    dpad_ref[...] = jnp.zeros_like(dpad_ref)
    dpad_ref[:, 1:1 + ho, 1:1 + wo, :] = d
    dp = dpad_ref[...]

    # ---- 4-phase transposed conv: one K = 4*c_mid GEMM per output parity ----
    phases = []
    s = jnp.zeros((1, c_out), jnp.float32)
    sq = jnp.zeros((1, c_out), jnp.float32)
    for py in range(2):
        row = []
        for px in range(2):
            ptaps = [dp[:, py + ty:py + ty + ho, px + tx:px + tx + wo, :]
                     for ty in range(2) for tx in range(2)]
            plhs = jnp.concatenate(ptaps, axis=-1).reshape(m, 4 * c_mid)
            acc = jnp.dot(plhs, wu_ref[2 * py + px],
                          preferred_element_type=jnp.float32)            # (M, c_out)
            # BN stats straight from the phase accumulators (order-invariant).
            s = s + jnp.sum(acc, axis=0, keepdims=True)
            sq = sq + jnp.sum(acc * acc, axis=0, keepdims=True)
            row.append(acc.reshape(nb, ho, wo, c_out))
        phases.append(row)
    stats_ref[0] = jnp.concatenate([s, sq], axis=0)

    # Interleave the four parity phases into the dense (2*ho, 2*wo) image.
    even = jnp.stack([phases[0][0], phases[0][1]], axis=3).reshape(nb, ho, 2 * wo, c_out)
    odd = jnp.stack([phases[1][0], phases[1][1]], axis=3).reshape(nb, ho, 2 * wo, c_out)
    u_ref[...] = jnp.stack([even, odd], axis=2).reshape(nb, 2 * ho, 2 * wo, c_out)


def _bn_concat_kernel(scale_ref, shift_ref, x_ref, u_ref, o_ref, *,
                      nb, c_in, c_out, hw):
    """Training-mode BatchNorm2d apply + skip-connection concat.

    scale/shift are (1, c_out) VMEM rows; BN is a single broadcast FMA over the
    whole (NB, H, W, c_out) block; the NCHW write happens as lane-dense
    (c_out, H*W) slabs (one small 2-D transpose per image, no per-channel loop).
    """
    o_ref[:, 0:c_in, :] = x_ref[...]                           # identity / skip half
    bn = u_ref[...] * scale_ref[...] + shift_ref[...]          # (NB, H, W, c_out)
    bn = bn.reshape(nb, hw, c_out)
    for b in range(nb):                                        # static unroll, NB small
        o_ref[b, c_in:c_in + c_out, :] = bn[b].T               # (c_out, H*W) lane-dense


# ------------------------------- forward ------------------------------------

def unet_skip_innermost(x, w_down, w_up, gamma, beta, eps=1e-5):
    """Forward of UnetSkipConnectionBlock(innermost=True, norm_layer=BatchNorm2d)."""
    n, c_in, h, w = x.shape
    c_mid = w_down.shape[0]            # inner_nc
    c_out = w_up.shape[1]              # outer_nc
    ho, wo = h // 2, w // 2
    hs, ws = ho + 1, wo + 1            # parity-split padded spatial size
    nb = _pick_nb(n, ho, wo, c_out)
    steps = n // nb

    cparams = pltpu.CompilerParams(dimension_semantics=("parallel",),
                                   vmem_limit_bytes=_vmem_limit_bytes())

    # One-time input prep in XLA: pad, NHWC, split into the four (row, col) parity
    # sub-grids so every in-kernel tap slice is unit-stride.
    xp = jnp.transpose(jnp.pad(x, ((0, 0), (0, 0), (1, 1), (1, 1))), (0, 2, 3, 1))
    xps = (xp.reshape(n, hs, 2, ws, 2, c_in)
             .transpose(0, 2, 4, 1, 3, 5)
             .reshape(n, 4, hs, ws, c_in))

    # Down-conv weights with the 16 taps folded into K: row (ky*4 + kx)*c_in + ci.
    w_dk = (jnp.transpose(w_down, (2, 3, 1, 0))
            .reshape(16 * c_in, c_mid).astype(MXU_DTYPE))

    # Transposed-conv weights: per output-parity phase (2*py+px), 4 taps folded
    # into K: w_uk[2*py+px, (2*ty+tx)*c_mid + ci, co] = w_up[ci, co, 3-py-2*ty, 3-px-2*tx]
    w_t = jnp.transpose(w_up, (2, 3, 0, 1))                       # (kH, kW, Cmid, Cout)
    k_idx = jnp.array([[3, 1], [2, 0]], dtype=jnp.int32)          # [parity, tap] -> k
    w_uk = (w_t[k_idx[:, None, :, None], k_idx[None, :, None, :]]
            .reshape(4, 4 * c_mid, c_out).astype(MXU_DTYPE))

    # ---- fused kernel: LeakyReLU + down conv + ReLU + 4-phase deconv + BN partials ----
    u, pstats = pl.pallas_call(
        partial(_down_up_kernel, nb=nb, ho=ho, wo=wo,
                c_in=c_in, c_mid=c_mid, c_out=c_out),
        out_shape=(jax.ShapeDtypeStruct((n, h, w, c_out), jnp.float32),
                   jax.ShapeDtypeStruct((steps, 2, c_out), jnp.float32)),
        grid=(steps,),
        in_specs=[
            pl.BlockSpec((nb, 4, hs, ws, c_in), lambda i: (i, 0, 0, 0, 0)),
            pl.BlockSpec((16 * c_in, c_mid), lambda i: (0, 0)),
            pl.BlockSpec((4, 4 * c_mid, c_out), lambda i: (0, 0, 0)),
        ],
        out_specs=(
            pl.BlockSpec((nb, h, w, c_out), lambda i: (i, 0, 0, 0)),
            pl.BlockSpec((1, 2, c_out), lambda i: (i, 0, 0)),
        ),
        scratch_shapes=[pltpu.VMEM((nb, ho + 2, wo + 2, c_mid), MXU_DTYPE)],
        compiler_params=cparams,
    )(xps, w_dk, w_uk)

    # Tiny O(C) scalar epilogue: reduce per-step partials, form BN scale/shift.
    # (E[x^2]-E[x]^2 in f32; fine at these scales, shifted variance at prod scale.)
    stats = jnp.sum(pstats, axis=0)
    msize = jnp.float32(n * h * w)
    mean = stats[0] / msize
    var = stats[1] / msize - mean * mean       # biased (training-mode) variance
    inv = lax.rsqrt(var + eps)
    scale = (gamma * inv).reshape(1, c_out)
    shift = (beta - mean * gamma * inv).reshape(1, c_out)

    # ---- BN apply + channel concat, lane-dense NCHW-flat output ----
    out = pl.pallas_call(
        partial(_bn_concat_kernel, nb=nb, c_in=c_in, c_out=c_out, hw=h * w),
        out_shape=jax.ShapeDtypeStruct((n, c_in + c_out, h * w), jnp.float32),
        grid=(steps,),
        in_specs=[
            pl.BlockSpec((1, c_out), lambda i: (0, 0)),          # scale (VMEM row)
            pl.BlockSpec((1, c_out), lambda i: (0, 0)),          # shift (VMEM row)
            pl.BlockSpec((nb, c_in, h * w), lambda i: (i, 0, 0)),
            pl.BlockSpec((nb, h, w, c_out), lambda i: (i, 0, 0, 0)),
        ],
        out_specs=pl.BlockSpec((nb, c_in + c_out, h * w), lambda i: (i, 0, 0)),
        compiler_params=cparams,
    )(scale, shift, x.reshape(n, c_in, h * w), u)
    return out.reshape(n, c_in + c_out, h, w)


# ----------------------------- pure-JAX reference ----------------------------

def _ref_forward(x, w_down, w_up, gamma, beta, eps=1e-5, operand_dtype=jnp.float32):
    """Reference with PyTorch forward semantics. `operand_dtype` emulates the kernel's
    MXU-operand rounding (bf16 inputs, f32 accumulation); float32 -> exact f32 path."""
    def q(t):
        return t.astype(operand_dtype).astype(jnp.float32)

    y = jnp.where(x > 0, x, 0.2 * x)
    d = lax.conv_general_dilated(q(y), q(w_down), (2, 2), ((1, 1), (1, 1)),
                                 dimension_numbers=("NCHW", "OIHW", "NCHW"))
    r = jnp.maximum(d, 0.0)
    w_conv = jnp.flip(w_up, axis=(2, 3)).transpose(1, 0, 2, 3)
    u = lax.conv_general_dilated(q(r), q(w_conv), (1, 1), ((2, 2), (2, 2)),
                                 lhs_dilation=(2, 2),
                                 dimension_numbers=("NCHW", "OIHW", "NCHW"))
    mean = u.mean(axis=(0, 2, 3), keepdims=True)
    var = ((u - mean) ** 2).mean(axis=(0, 2, 3), keepdims=True)
    un = (u - mean) / jnp.sqrt(var + eps)
    un = un * gamma.reshape(1, -1, 1, 1) + beta.reshape(1, -1, 1, 1)
    return jnp.concatenate([x, un], axis=1)


# ---------------------------------- main -------------------------------------

if __name__ == "__main__":
    outer_nc = 4      # == input_nc (input_nc defaults to outer_nc)
    inner_nc = 8
    N, H, W = 2, 16, 16

    key = jax.random.PRNGKey(0)
    k1, k2, k3, k4, k5 = jax.random.split(key, 5)

    x = jax.random.normal(k1, (N, outer_nc, H, W), dtype=jnp.float32)
    # Conv2d(input_nc, inner_nc, 4, 2, 1, bias=False) -> (Cout, Cin, kH, kW)
    w_down = 0.1 * jax.random.normal(k2, (inner_nc, outer_nc, 4, 4), dtype=jnp.float32)
    # ConvTranspose2d(inner_nc, outer_nc, 4, 2, 1, bias=False) -> (Cin, Cout, kH, kW)
    w_up = 0.1 * jax.random.normal(k3, (inner_nc, outer_nc, 4, 4), dtype=jnp.float32)
    # BatchNorm2d(outer_nc) affine params
    gamma = 1.0 + 0.1 * jax.random.normal(k4, (outer_nc,), dtype=jnp.float32)
    beta = 0.1 * jax.random.normal(k5, (outer_nc,), dtype=jnp.float32)

    out = jax.block_until_ready(
        jax.jit(unet_skip_innermost)(x, w_down, w_up, gamma, beta))
    ref = jax.block_until_ready(
        _ref_forward(x, w_down, w_up, gamma, beta, operand_dtype=MXU_DTYPE))

    assert out.shape == (N, 2 * outer_nc, H, W), out.shape
    max_err = float(jnp.max(jnp.abs(out - ref)))
    assert jnp.allclose(out, ref, atol=5e-3, rtol=5e-3), max_err
    print("KERNEL_OK")
</pallas_src>

<mosaic_0001>
module attributes {stable_mosaic.version = 11 : i64} {
  func.func @_bn_concat_kernel(%arg0: i32, %arg1: memref<1x4xf32, #tpu.memory_space<vmem>>, %arg2: memref<1x4xf32, #tpu.memory_space<vmem>>, %arg3: memref<2x4x256xf32, #tpu.memory_space<vmem>>, %arg4: memref<2x16x16x4xf32, #tpu.memory_space<vmem>>, %arg5: memref<2x8x256xf32, #tpu.memory_space<vmem>>) attributes {dimension_semantics = [#tpu.dimension_semantics<parallel>], iteration_bounds = array<i64: 1>, scalar_prefetch = 0 : i64, scratch_operands = 0 : i64, tpu.core_type = #tpu.core_type<tc>, window_params = [{pipeline_mode = #tpu.pipeline_mode<synchronous>, transform_indices = @transform_0, window_bounds = array<i64: 1, 4>}, {pipeline_mode = #tpu.pipeline_mode<synchronous>, transform_indices = @transform_1, window_bounds = array<i64: 1, 4>}, {transform_indices = @transform_2, window_bounds = array<i64: 2, 4, 256>}, {transform_indices = @transform_3, window_bounds = array<i64: 2, 16, 16, 4>}, {transform_indices = @transform_4, window_bounds = array<i64: 2, 8, 256>}]} {
    %c0 = arith.constant 0 : index
    %c0_0 = arith.constant 0 : index
    %c0_1 = arith.constant 0 : index
    %0 = vector.load %arg3[%c0, %c0_0, %c0_1] : memref<2x4x256xf32, #tpu.memory_space<vmem>>, vector<2x4x256xf32>
    %c0_2 = arith.constant 0 : index
    %c0_3 = arith.constant 0 : index
    %c0_4 = arith.constant 0 : index
    %1 = vector.load %arg5[%c0_2, %c0_3, %c0_4] : memref<2x8x256xf32, #tpu.memory_space<vmem>>, vector<2x4x256xf32>
    tpu.vector_store %arg5[%c0_2, %c0_3, %c0_4], %0 {strides = array<i32>} : memref<2x8x256xf32, #tpu.memory_space<vmem>>, vector<2x4x256xf32>,
    %c0_5 = arith.constant 0 : index
    %c0_6 = arith.constant 0 : index
    %c0_7 = arith.constant 0 : index
    %c0_8 = arith.constant 0 : index
    %2 = vector.load %arg4[%c0_5, %c0_6, %c0_7, %c0_8] : memref<2x16x16x4xf32, #tpu.memory_space<vmem>>, vector<2x16x16x4xf32>
    %c0_9 = arith.constant 0 : index
    %c0_10 = arith.constant 0 : index
    %3 = vector.load %arg1[%c0_9, %c0_10] : memref<1x4xf32, #tpu.memory_space<vmem>>, vector<1x4xf32>
    %4 = vector.shape_cast %3 : vector<1x4xf32> to vector<1x1x1x4xf32>
    %5 = vector.broadcast %4 : vector<1x1x1x4xf32> to vector<2x16x16x4xf32>
    %6 = arith.mulf %2, %5 : vector<2x16x16x4xf32>
    %c0_11 = arith.constant 0 : index
    %c0_12 = arith.constant 0 : index
    %7 = vector.load %arg2[%c0_11, %c0_12] : memref<1x4xf32, #tpu.memory_space<vmem>>, vector<1x4xf32>
    %8 = vector.shape_cast %7 : vector<1x4xf32> to vector<1x1x1x4xf32>
    %9 = vector.broadcast %8 : vector<1x1x1x4xf32> to vector<2x16x16x4xf32>
    %10 = arith.addf %6, %9 : vector<2x16x16x4xf32>
    %11 = vector.shape_cast %10 : vector<2x16x16x4xf32> to vector<2x256x4xf32>
    %12 = vector.extract_strided_slice %11 {offsets = [0, 0, 0], sizes = [1, 256, 4], strides = [1, 1, 1]} : vector<2x256x4xf32> to vector<1x256x4xf32>
    %13 = vector.shape_cast %12 : vector<1x256x4xf32> to vector<256x4xf32>
    %14 = tpu.transpose %13, [1, 0] : vector<256x4xf32> -> vector<4x256xf32>
    %c0_13 = arith.constant 0 : index
    %c4 = arith.constant 4 : index
    %c0_14 = arith.constant 0 : index
    %15 = vector.load %arg5[%c0_13, %c4, %c0_14] : memref<2x8x256xf32, #tpu.memory_space<vmem>>, vector<1x4x256xf32>
    %16 = vector.shape_cast %15 : vector<1x4x256xf32> to vector<4x256xf32>
    %17 = vector.shape_cast %14 : vector<4x256xf32> to vector<1x4x256xf32>
    tpu.vector_store %arg5[%c0_13, %c4, %c0_14], %17 {strides = array<i32>} : memref<2x8x256xf32, #tpu.memory_space<vmem>>, vector<1x4x256xf32>,
    %18 = vector.extract_strided_slice %11 {offsets = [1, 0, 0], sizes = [1, 256, 4], strides = [1, 1, 1]} : vector<2x256x4xf32> to vector<1x256x4xf32>
    %19 = vector.shape_cast %18 : vector<1x256x4xf32> to vector<256x4xf32>
    %20 = tpu.transpose %19, [1, 0] : vector<256x4xf32> -> vector<4x256xf32>
    %c1 = arith.constant 1 : index
    %c4_15 = arith.constant 4 : index
    %c0_16 = arith.constant 0 : index
    %21 = vector.load %arg5[%c1, %c4_15, %c0_16] : memref<2x8x256xf32, #tpu.memory_space<vmem>>, vector<1x4x256xf32>
    %22 = vector.shape_cast %21 : vector<1x4x256xf32> to vector<4x256xf32>
    %23 = vector.shape_cast %20 : vector<4x256xf32> to vector<1x4x256xf32>
    tpu.vector_store %arg5[%c1, %c4_15, %c0_16], %23 {strides = array<i32>} : memref<2x8x256xf32, #tpu.memory_space<vmem>>, vector<1x4x256xf32>,
    return
  }
  func.func @transform_0(%arg0: i32) -> (i32, i32) {
    %c0_i32 = arith.constant 0 : i32
    %c0_i32_0 = arith.constant 0 : i32
    %c0_i32_1 = arith.constant 0 : i32
    return %c0_i32, %c0_i32_0 : i32, i32
  }
  func.func @transform_1(%arg0: i32) -> (i32, i32) {
    %c0_i32 = arith.constant 0 : i32
    %c0_i32_0 = arith.constant 0 : i32
    %c0_i32_1 = arith.constant 0 : i32
    return %c0_i32, %c0_i32_0 : i32, i32
  }
  func.func @transform_2(%arg0: i32) -> (i32, i32, i32) {
    %c0_i32 = arith.constant 0 : i32
    %c0_i32_0 = arith.constant 0 : i32
    %c0_i32_1 = arith.constant 0 : i32
    return %arg0, %c0_i32, %c0_i32_0 : i32, i32, i32
  }
  func.func @transform_3(%arg0: i32) -> (i32, i32, i32, i32) {
    %c0_i32 = arith.constant 0 : i32
    %c0_i32_0 = arith.constant 0 : i32
    %c0_i32_1 = arith.constant 0 : i32
    %c0_i32_2 = arith.constant 0 : i32
    return %arg0, %c0_i32, %c0_i32_0, %c0_i32_1 : i32, i32, i32, i32
  }
  func.func @transform_4(%arg0: i32) -> (i32, i32, i32) {
    %c0_i32 = arith.constant 0 : i32
    %c0_i32_0 = arith.constant 0 : i32
    %c0_i32_1 = arith.constant 0 : i32
    return %arg0, %c0_i32, %c0_i32_0 : i32, i32, i32
  }
}

module attributes {stable_mosaic.version = 11 : i64} {
  func.func @_down_up_kernel(%arg0: i32, %arg1: memref<2x4x9x9x4xf32, #tpu.memory_space<vmem>>, %arg2: memref<64x8xbf16, #tpu.memory_space<vmem>>, %arg3: memref<4x32x4xbf16, #tpu.memory_space<vmem>>, %arg4: memref<2x16x16x4xf32, #tpu.memory_space<vmem>>, %arg5: memref<1x2x4xf32, #tpu.memory_space<vmem>>, %arg6: memref<2x10x10x8xbf16, #tpu.memory_space<vmem>>) attributes {dimension_semantics = [#tpu.dimension_semantics<parallel>], iteration_bounds = array<i64: 1>, scalar_prefetch = 0 : i64, scratch_operands = 1 : i64, tpu.core_type = #tpu.core_type<tc>, window_params = [{transform_indices = @transform_0, window_bounds = array<i64: 2, 4, 9, 9, 4>}, {pipeline_mode = #tpu.pipeline_mode<synchronous>, transform_indices = @transform_1, window_bounds = array<i64: 64, 8>}, {pipeline_mode = #tpu.pipeline_mode<synchronous>, transform_indices = @transform_2, window_bounds = array<i64: 4, 32, 4>}, {transform_indices = @transform_3, window_bounds = array<i64: 2, 16, 16, 4>}, {transform_indices = @transform_4, window_bounds = array<i64: 1, 2, 4>}]} {
    %c0 = arith.constant 0 : index
    %c0_0 = arith.constant 0 : index
    %c0_1 = arith.constant 0 : index
    %c0_2 = arith.constant 0 : index
    %c0_3 = arith.constant 0 : index
    %0 = vector.load %arg1[%c0, %c0_0, %c0_1, %c0_2, %c0_3] : memref<2x4x9x9x4xf32, #tpu.memory_space<vmem>>, vector<2x4x9x9x4xf32>
    %cst = arith.constant 0.000000e+00 : f32
    %1 = vector.broadcast %cst : f32 to vector<2x4x9x9x4xf32>
    %2 = arith.cmpf ogt, %0, %1 : vector<2x4x9x9x4xf32>
    %cst_4 = arith.constant 2.000000e-01 : f32
    %3 = vector.broadcast %cst_4 : f32 to vector<2x4x9x9x4xf32>
    %4 = arith.mulf %3, %0 : vector<2x4x9x9x4xf32>
    %5 = arith.select %2, %0, %4 : vector<2x4x9x9x4xi1>, vector<2x4x9x9x4xf32>
    %6 = arith.truncf %5 : vector<2x4x9x9x4xf32> to vector<2x4x9x9x4xbf16>
    %7 = vector.extract_strided_slice %6 {offsets = [0, 0, 0, 0, 0], sizes = [2, 1, 8, 8, 4], strides = [1, 1, 1, 1, 1]} : vector<2x4x9x9x4xbf16> to vector<2x1x8x8x4xbf16>
    %8 = vector.shape_cast %7 : vector<2x1x8x8x4xbf16> to vector<2x8x8x4xbf16>
    %9 = vector.extract_strided_slice %6 {offsets = [0, 1, 0, 0, 0], sizes = [2, 1, 8, 8, 4], strides = [1, 1, 1, 1, 1]} : vector<2x4x9x9x4xbf16> to vector<2x1x8x8x4xbf16>
    %10 = vector.shape_cast %9 : vector<2x1x8x8x4xbf16> to vector<2x8x8x4xbf16>
    %11 = vector.extract_strided_slice %6 {offsets = [0, 0, 0, 1, 0], sizes = [2, 1, 8, 8, 4], strides = [1, 1, 1, 1, 1]} : vector<2x4x9x9x4xbf16> to vector<2x1x8x8x4xbf16>
    %12 = vector.shape_cast %11 : vector<2x1x8x8x4xbf16> to vector<2x8x8x4xbf16>
    %13 = vector.extract_strided_slice %6 {offsets = [0, 1, 0, 1, 0], sizes = [2, 1, 8, 8, 4], strides = [1, 1, 1, 1, 1]} : vector<2x4x9x9x4xbf16> to vector<2x1x8x8x4xbf16>
    %14 = vector.shape_cast %13 : vector<2x1x8x8x4xbf16> to vector<2x8x8x4xbf16>
    %15 = vector.extract_strided_slice %6 {offsets = [0, 2, 0, 0, 0], sizes = [2, 1, 8, 8, 4], strides = [1, 1, 1, 1, 1]} : vector<2x4x9x9x4xbf16> to vector<2x1x8x8x4xbf16>
    %16 = vector.shape_cast %15 : vector<2x1x8x8x4xbf16> to vector<2x8x8x4xbf16>
    %17 = vector.extract_strided_slice %6 {offsets = [0, 3, 0, 0, 0], sizes = [2, 1, 8, 8, 4], strides = [1, 1, 1, 1, 1]} : vector<2x4x9x9x4xbf16> to vector<2x1x8x8x4xbf16>
    %18 = vector.shape_cast %17 : vector<2x1x8x8x4xbf16> to vector<2x8x8x4xbf16>
    %19 = vector.extract_strided_slice %6 {offsets = [0, 2, 0, 1, 0], sizes = [2, 1, 8, 8, 4], strides = [1, 1, 1, 1, 1]} : vector<2x4x9x9x4xbf16> to vector<2x1x8x8x4xbf16>
    %20 = vector.shape_cast %19 : vector<2x1x8x8x4xbf16> to vector<2x8x8x4xbf16>
    %21 = vector.extract_strided_slice %6 {offsets = [0, 3, 0, 1, 0], sizes = [2, 1, 8, 8, 4], strides = [1, 1, 1, 1, 1]} : vector<2x4x9x9x4xbf16> to vector<2x1x8x8x4xbf16>
    %22 = vector.shape_cast %21 : vector<2x1x8x8x4xbf16> to vector<2x8x8x4xbf16>
    %23 = vector.extract_strided_slice %6 {offsets = [0, 0, 1, 0, 0], sizes = [2, 1, 8, 8, 4], strides = [1, 1, 1, 1, 1]} : vector<2x4x9x9x4xbf16> to vector<2x1x8x8x4xbf16>
    %24 = vector.shape_cast %23 : vector<2x1x8x8x4xbf16> to vector<2x8x8x4xbf16>
    %25 = vector.extract_strided_slice %6 {offsets = [0, 1, 1, 0, 0], sizes = [2, 1, 8, 8, 4], strides = [1, 1, 1, 1, 1]} : vector<2x4x9x9x4xbf16> to vector<2x1x8x8x4xbf16>
    %26 = vector.shape_cast %25 : vector<2x1x8x8x4xbf16> to vector<2x8x8x4xbf16>
    %27 = vector.extract_strided_slice %6 {offsets = [0, 0, 1, 1, 0], sizes = [2, 1, 8, 8, 4], strides = [1, 1, 1, 1, 1]} : vector<2x4x9x9x4xbf16> to vector<2x1x8x8x4xbf16>
    %28 = vector.shape_cast %27 : vector<2x1x8x8x4xbf16> to vector<2x8x8x4xbf16>
    %29 = vector.extract_strided_slice %6 {offsets = [0, 1, 1, 1, 0], sizes = [2, 1, 8, 8, 4], strides = [1, 1, 1, 1, 1]} : vector<2x4x9x9x4xbf16> to vector<2x1x8x8x4xbf16>
    %30 = vector.shape_cast %29 : vector<2x1x8x8x4xbf16> to vector<2x8x8x4xbf16>
    %31 = vector.extract_strided_slice %6 {offsets = [0, 2, 1, 0, 0], sizes = [2, 1, 8, 8, 4], strides = [1, 1, 1, 1, 1]} : vector<2x4x9x9x4xbf16> to vector<2x1x8x8x4xbf16>
    %32 = vector.shape_cast %31 : vector<2x1x8x8x4xbf16> to vector<2x8x8x4xbf16>
    %33 = vector.extract_strided_slice %6 {offsets = [0, 3, 1, 0, 0], sizes = [2, 1, 8, 8, 4], strides = [1, 1, 1, 1, 1]} : vector<2x4x9x9x4xbf16> to vector<2x1x8x8x4xbf16>
    %34 = vector.shape_cast %33 : vector<2x1x8x8x4xbf16> to vector<2x8x8x4xbf16>
    %35 = vector.extract_strided_slice %6 {offsets = [0, 2, 1, 1, 0], sizes = [2, 1, 8, 8, 4], strides = [1, 1, 1, 1, 1]} : vector<2x4x9x9x4xbf16> to vector<2x1x8x8x4xbf16>
    %36 = vector.shape_cast %35 : vector<2x1x8x8x4xbf16> to vector<2x8x8x4xbf16>
    %37 = vector.extract_strided_slice %6 {offsets = [0, 3, 1, 1, 0], sizes = [2, 1, 8, 8, 4], strides = [1, 1, 1, 1, 1]} : vector<2x4x9x9x4xbf16> to vector<2x1x8x8x4xbf16>
    %38 = vector.shape_cast %37 : vector<2x1x8x8x4xbf16> to vector<2x8x8x4xbf16>
    %39 = tpu.concatenate %8, %10, %12, %14, %16, %18, %20, %22, %24, %26, %28, %30, %32, %34, %36, %38 in 3 : vector<2x8x8x4xbf16>, vector<2x8x8x4xbf16>, vector<2x8x8x4xbf16>, vector<2x8x8x4xbf16>, vector<2x8x8x4xbf16>, vector<2x8x8x4xbf16>, vector<2x8x8x4xbf16>, vector<2x8x8x4xbf16>, vector<2x8x8x4xbf16>, vector<2x8x8x4xbf16>, vector<2x8x8x4xbf16>, vector<2x8x8x4xbf16>, vector<2x8x8x4xbf16>, vector<2x8x8x4xbf16>, vector<2x8x8x4xbf16>, vector<2x8x8x4xbf16> -> vector<2x8x8x64xbf16>
    %40 = vector.shape_cast %39 : vector<2x8x8x64xbf16> to vector<128x64xbf16>
    %c0_5 = arith.constant 0 : index
    %c0_6 = arith.constant 0 : index
    %41 = vector.load %arg2[%c0_5, %c0_6] : memref<64x8xbf16, #tpu.memory_space<vmem>>, vector<64x8xbf16>
    %cst_7 = arith.constant dense<0.000000e+00> : vector<128x8xf32>
    %42 = tpu.matmul %40, %41, %cst_7 {dimension_numbers = #tpu.dot_dimension_numbers<[1], [0], [0], [1], [0, 0, 1, 1], [], []>} : vector<128x64xbf16>, vector<64x8xbf16>, vector<128x8xf32> -> vector<128x8xf32>
    %cst_8 = arith.constant 0.000000e+00 : f32
    %43 = vector.broadcast %cst_8 : f32 to vector<128x8xf32>
    %44 = arith.maximumf %42, %43 : vector<128x8xf32>
    %45 = arith.truncf %44 : vector<128x8xf32> to vector<128x8xbf16>
    %46 = vector.shape_cast %45 : vector<128x8xbf16> to vector<2x8x8x8xbf16>
    %cst_9 = arith.constant 0.000000e+00 : bf16
    %47 = vector.broadcast %cst_9 : bf16 to vector<2x10x10x8xbf16>
    %c0_10 = arith.constant 0 : index
    %c0_11 = arith.constant 0 : index
    %c0_12 = arith.constant 0 : index
    %c0_13 = arith.constant 0 : index
    %48 = vector.load %arg6[%c0_10, %c0_11, %c0_12, %c0_13] : memref<2x10x10x8xbf16, #tpu.memory_space<vmem>>, vector<2x10x10x8xbf16>
    tpu.vector_store %arg6[%c0_10, %c0_11, %c0_12, %c0_13], %47 {strides = array<i32>} : memref<2x10x10x8xbf16, #tpu.memory_space<vmem>>, vector<2x10x10x8xbf16>,
    %c0_14 = arith.constant 0 : index
    %c1 = arith.constant 1 : index
    %c1_15 = arith.constant 1 : index
    %c0_16 = arith.constant 0 : index
    %49 = vector.load %arg6[%c0_14, %c1, %c1_15, %c0_16] : memref<2x10x10x8xbf16, #tpu.memory_space<vmem>>, vector<2x8x8x8xbf16>
    tpu.vector_store %arg6[%c0_14, %c1, %c1_15, %c0_16], %46 {strides = array<i32>} : memref<2x10x10x8xbf16, #tpu.memory_space<vmem>>, vector<2x8x8x8xbf16>,
    %c0_17 = arith.constant 0 : index
    %c0_18 = arith.constant 0 : index
    %c0_19 = arith.constant 0 : index
    %c0_20 = arith.constant 0 : index
    %50 = vector.load %arg6[%c0_17, %c0_18, %c0_19, %c0_20] : memref<2x10x10x8xbf16, #tpu.memory_space<vmem>>, vector<2x10x10x8xbf16>
    %cst_21 = arith.constant 0.000000e+00 : f32
    %51 = vector.broadcast %cst_21 : f32 to vector<1x4xf32>
    %cst_22 = arith.constant 0.000000e+00 : f32
    %52 = vector.broadcast %cst_22 : f32 to vector<1x4xf32>
    %53 = vector.extract_strided_slice %50 {offsets = [0, 0, 0, 0], sizes = [2, 8, 8, 8], strides = [1, 1, 1, 1]} : vector<2x10x10x8xbf16> to vector<2x8x8x8xbf16>
    %54 = vector.extract_strided_slice %50 {offsets = [0, 0, 1, 0], sizes = [2, 8, 8, 8], strides = [1, 1, 1, 1]} : vector<2x10x10x8xbf16> to vector<2x8x8x8xbf16>
    %55 = vector.extract_strided_slice %50 {offsets = [0, 1, 0, 0], sizes = [2, 8, 8, 8], strides = [1, 1, 1, 1]} : vector<2x10x10x8xbf16> to vector<2x8x8x8xbf16>
    %56 = vector.extract_strided_slice %50 {offsets = [0, 1, 1, 0], sizes = [2, 8, 8, 8], strides = [1, 1, 1, 1]} : vector<2x10x10x8xbf16> to vector<2x8x8x8xbf16>
    %57 = tpu.concatenate %53, %54, %55, %56 in 3 : vector<2x8x8x8xbf16>, vector<2x8x8x8xbf16>, vector<2x8x8x8xbf16>, vector<2x8x8x8xbf16> -> vector<2x8x8x32xbf16>
    %58 = vector.shape_cast %57 : vector<2x8x8x32xbf16> to vector<128x32xbf16>
    %c0_23 = arith.constant 0 : index
    %c0_24 = arith.constant 0 : index
    %c0_25 = arith.constant 0 : index
    %59 = vector.load %arg3[%c0_23, %c0_24, %c0_25] : memref<4x32x4xbf16, #tpu.memory_space<vmem>>, vector<1x32x4xbf16>
    %60 = vector.shape_cast %59 : vector<1x32x4xbf16> to vector<32x4xbf16>
    %cst_26 = arith.constant dense<0.000000e+00> : vector<128x4xf32>
    %61 = tpu.matmul %58, %60, %cst_26 {dimension_numbers = #tpu.dot_dimension_numbers<[1], [0], [0], [1], [0, 0, 1, 1], [], []>} : vector<128x32xbf16>, vector<32x4xbf16>, vector<128x4xf32> -> vector<128x4xf32>
    %cst_27 = arith.constant dense<0.000000e+00> : vector<4xf32>
    %62 = vector.multi_reduction <add>, %61, %cst_27 [0] : vector<128x4xf32> to vector<4xf32>
    %63 = vector.shape_cast %62 : vector<4xf32> to vector<1x4xf32>
    %64 = arith.addf %51, %63 : vector<1x4xf32>
    %65 = arith.mulf %61, %61 : vector<128x4xf32>
    %cst_28 = arith.constant dense<0.000000e+00> : vector<4xf32>
    %66 = vector.multi_reduction <add>, %65, %cst_28 [0] : vector<128x4xf32> to vector<4xf32>
    %67 = vector.shape_cast %66 : vector<4xf32> to vector<1x4xf32>
    %68 = arith.addf %52, %67 : vector<1x4xf32>
    %69 = vector.shape_cast %61 : vector<128x4xf32> to vector<2x8x8x4xf32>
    %70 = vector.extract_strided_slice %50 {offsets = [0, 0, 1, 0], sizes = [2, 8, 8, 8], strides = [1, 1, 1, 1]} : vector<2x10x10x8xbf16> to vector<2x8x8x8xbf16>
    %71 = vector.extract_strided_slice %50 {offsets = [0, 0, 2, 0], sizes = [2, 8, 8, 8], strides = [1, 1, 1, 1]} : vector<2x10x10x8xbf16> to vector<2x8x8x8xbf16>
    %72 = vector.extract_strided_slice %50 {offsets = [0, 1, 1, 0], sizes = [2, 8, 8, 8], strides = [1, 1, 1, 1]} : vector<2x10x10x8xbf16> to vector<2x8x8x8xbf16>
    %73 = vector.extract_strided_slice %50 {offsets = [0, 1, 2, 0], sizes = [2, 8, 8, 8], strides = [1, 1, 1, 1]} : vector<2x10x10x8xbf16> to vector<2x8x8x8xbf16>
    %74 = tpu.concatenate %70, %71, %72, %73 in 3 : vector<2x8x8x8xbf16>, vector<2x8x8x8xbf16>, vector<2x8x8x8xbf16>, vector<2x8x8x8xbf16> -> vector<2x8x8x32xbf16>
    %75 = vector.shape_cast %74 : vector<2x8x8x32xbf16> to vector<128x32xbf16>
    %c1_29 = arith.constant 1 : index
    %c0_30 = arith.constant 0 : index
    %c0_31 = arith.constant 0 : index
    %76 = vector.load %arg3[%c1_29, %c0_30, %c0_31] : memref<4x32x4xbf16, #tpu.memory_space<vmem>>, vector<1x32x4xbf16>
    %77 = vector.shape_cast %76 : vector<1x32x4xbf16> to vector<32x4xbf16>
    %cst_32 = arith.constant dense<0.000000e+00> : vector<128x4xf32>
    %78 = tpu.matmul %75, %77, %cst_32 {dimension_numbers = #tpu.dot_dimension_numbers<[1], [0], [0], [1], [0, 0, 1, 1], [], []>} : vector<128x32xbf16>, vector<32x4xbf16>, vector<128x4xf32> -> vector<128x4xf32>
    %cst_33 = arith.constant dense<0.000000e+00> : vector<4xf32>
    %79 = vector.multi_reduction <add>, %78, %cst_33 [0] : vector<128x4xf32> to vector<4xf32>
    %80 = vector.shape_cast %79 : vector<4xf32> to vector<1x4xf32>
    %81 = arith.addf %64, %80 : vector<1x4xf32>
    %82 = arith.mulf %78, %78 : vector<128x4xf32>
    %cst_34 = arith.constant dense<0.000000e+00> : vector<4xf32>
    %83 = vector.multi_reduction <add>, %82, %cst_34 [0] : vector<128x4xf32> to vector<4xf32>
    %84 = vector.shape_cast %83 : vector<4xf32> to vector<1x4xf32>
    %85 = arith.addf %68, %84 : vector<1x4xf32>
    %86 = vector.shape_cast %78 : vector<128x4xf32> to vector<2x8x8x4xf32>
    %87 = vector.extract_strided_slice %50 {offsets = [0, 1, 0, 0], sizes = [2, 8, 8, 8], strides = [1, 1, 1, 1]} : vector<2x10x10x8xbf16> to vector<2x8x8x8xbf16>
    %88 = vector.extract_strided_slice %50 {offsets = [0, 1, 1, 0], sizes = [2, 8, 8, 8], strides = [1, 1, 1, 1]} : vector<2x10x10x8xbf16> to vector<2x8x8x8xbf16>
    %89 = vector.extract_strided_slice %50 {offsets = [0, 2, 0, 0], sizes = [2, 8, 8, 8], strides = [1, 1, 1, 1]} : vector<2x10x10x8xbf16> to vector<2x8x8x8xbf16>
    %90 = vector.extract_strided_slice %50 {offsets = [0, 2, 1, 0], sizes = [2, 8, 8, 8], strides = [1, 1, 1, 1]} : vector<2x10x10x8xbf16> to vector<2x8x8x8xbf16>
    %91 = tpu.concatenate %87, %88, %89, %90 in 3 : vector<2x8x8x8xbf16>, vector<2x8x8x8xbf16>, vector<2x8x8x8xbf16>, vector<2x8x8x8xbf16> -> vector<2x8x8x32xbf16>
    %92 = vector.shape_cast %91 : vector<2x8x8x32xbf16> to vector<128x32xbf16>
    %c2 = arith.constant 2 : index
    %c0_35 = arith.constant 0 : index
    %c0_36 = arith.constant 0 : index
    %93 = vector.load %arg3[%c2, %c0_35, %c0_36] : memref<4x32x4xbf16, #tpu.memory_space<vmem>>, vector<1x32x4xbf16>
    %94 = vector.shape_cast %93 : vector<1x32x4xbf16> to vector<32x4xbf16>
    %cst_37 = arith.constant dense<0.000000e+00> : vector<128x4xf32>
    %95 = tpu.matmul %92, %94, %cst_37 {dimension_numbers = #tpu.dot_dimension_numbers<[1], [0], [0], [1], [0, 0, 1, 1], [], []>} : vector<128x32xbf16>, vector<32x4xbf16>, vector<128x4xf32> -> vector<128x4xf32>
    %cst_38 = arith.constant dense<0.000000e+00> : vector<4xf32>
    %96 = vector.multi_reduction <add>, %95, %cst_38 [0] : vector<128x4xf32> to vector<4xf32>
    %97 = vector.shape_cast %96 : vector<4xf32> to vector<1x4xf32>
    %98 = arith.addf %81, %97 : vector<1x4xf32>
    %99 = arith.mulf %95, %95 : vector<128x4xf32>
    %cst_39 = arith.constant dense<0.000000e+00> : vector<4xf32>
    %100 = vector.multi_reduction <add>, %99, %cst_39 [0] : vector<128x4xf32> to vector<4xf32>
    %101 = vector.shape_cast %100 : vector<4xf32> to vector<1x4xf32>
    %102 = arith.addf %85, %101 : vector<1x4xf32>
    %103 = vector.shape_cast %95 : vector<128x4xf32> to vector<2x8x8x4xf32>
    %104 = vector.extract_strided_slice %50 {offsets = [0, 1, 1, 0], sizes = [2, 8, 8, 8], strides = [1, 1, 1, 1]} : vector<2x10x10x8xbf16> to vector<2x8x8x8xbf16>
    %105 = vector.extract_strided_slice %50 {offsets = [0, 1, 2, 0], sizes = [2, 8, 8, 8], strides = [1, 1, 1, 1]} : vector<2x10x10x8xbf16> to vector<2x8x8x8xbf16>
    %106 = vector.extract_strided_slice %50 {offsets = [0, 2, 1, 0], sizes = [2, 8, 8, 8], strides = [1, 1, 1, 1]} : vector<2x10x10x8xbf16> to vector<2x8x8x8xbf16>
    %107 = vector.extract_strided_slice %50 {offsets = [0, 2, 2, 0], sizes = [2, 8, 8, 8], strides = [1, 1, 1, 1]} : vector<2x10x10x8xbf16> to vector<2x8x8x8xbf16>
    %108 = tpu.concatenate %104, %105, %106, %107 in 3 : vector<2x8x8x8xbf16>, vector<2x8x8x8xbf16>, vector<2x8x8x8xbf16>, vector<2x8x8x8xbf16> -> vector<2x8x8x32xbf16>
    %109 = vector.shape_cast %108 : vector<2x8x8x32xbf16> to vector<128x32xbf16>
    %c3 = arith.constant 3 : index
    %c0_40 = arith.constant 0 : index
    %c0_41 = arith.constant 0 : index
    %110 = vector.load %arg3[%c3, %c0_40, %c0_41] : memref<4x32x4xbf16, #tpu.memory_space<vmem>>, vector<1x32x4xbf16>
    %111 = vector.shape_cast %110 : vector<1x32x4xbf16> to vector<32x4xbf16>
    %cst_42 = arith.constant dense<0.000000e+00> : vector<128x4xf32>
    %112 = tpu.matmul %109, %111, %cst_42 {dimension_numbers = #tpu.dot_dimension_numbers<[1], [0], [0], [1], [0, 0, 1, 1], [], []>} : vector<128x32xbf16>, vector<32x4xbf16>, vector<128x4xf32> -> vector<128x4xf32>
    %cst_43 = arith.constant dense<0.000000e+00> : vector<4xf32>
    %113 = vector.multi_reduction <add>, %112, %cst_43 [0] : vector<128x4xf32> to vector<4xf32>
    %114 = vector.shape_cast %113 : vector<4xf32> to vector<1x4xf32>
    %115 = arith.addf %98, %114 : vector<1x4xf32>
    %116 = arith.mulf %112, %112 : vector<128x4xf32>
    %cst_44 = arith.constant dense<0.000000e+00> : vector<4xf32>
    %117 = vector.multi_reduction <add>, %116, %cst_44 [0] : vector<128x4xf32> to vector<4xf32>
    %118 = vector.shape_cast %117 : vector<4xf32> to vector<1x4xf32>
    %119 = arith.addf %102, %118 : vector<1x4xf32>
    %120 = vector.shape_cast %112 : vector<128x4xf32> to vector<2x8x8x4xf32>
    %121 = tpu.concatenate %115, %119 in 0 : vector<1x4xf32>, vector<1x4xf32> -> vector<2x4xf32>
    %c0_45 = arith.constant 0 : index
    %c0_46 = arith.constant 0 : index
    %c0_47 = arith.constant 0 : index
    %122 = vector.load %arg5[%c0_45, %c0_46, %c0_47] : memref<1x2x4xf32, #tpu.memory_space<vmem>>, vector<1x2x4xf32>
    %123 = vector.shape_cast %122 : vector<1x2x4xf32> to vector<2x4xf32>
    %124 = vector.shape_cast %121 : vector<2x4xf32> to vector<1x2x4xf32>
    tpu.vector_store %arg5[%c0_45, %c0_46, %c0_47], %124 {strides = array<i32>} : memref<1x2x4xf32, #tpu.memory_space<vmem>>, vector<1x2x4xf32>,
    %125 = vector.shape_cast %69 : vector<2x8x8x4xf32> to vector<2x8x8x1x4xf32>
    %126 = vector.shape_cast %86 : vector<2x8x8x4xf32> to vector<2x8x8x1x4xf32>
    %127 = tpu.concatenate %125, %126 in 3 : vector<2x8x8x1x4xf32>, vector<2x8x8x1x4xf32> -> vector<2x8x8x2x4xf32>
    %128 = vector.shape_cast %127 : vector<2x8x8x2x4xf32> to vector<2x8x16x4xf32>
    %129 = vector.shape_cast %103 : vector<2x8x8x4xf32> to vector<2x8x8x1x4xf32>
    %130 = vector.shape_cast %120 : vector<2x8x8x4xf32> to vector<2x8x8x1x4xf32>
    %131 = tpu.concatenate %129, %130 in 3 : vector<2x8x8x1x4xf32>, vector<2x8x8x1x4xf32> -> vector<2x8x8x2x4xf32>
    %132 = vector.shape_cast %131 : vector<2x8x8x2x4xf32> to vector<2x8x16x4xf32>
    %133 = vector.shape_cast %128 : vector<2x8x16x4xf32> to vector<2x8x1x16x4xf32>
    %134 = vector.shape_cast %132 : vector<2x8x16x4xf32> to vector<2x8x1x16x4xf32>
    %135 = tpu.concatenate %133, %134 in 2 : vector<2x8x1x16x4xf32>, vector<2x8x1x16x4xf32> -> vector<2x8x2x16x4xf32>
    %136 = vector.shape_cast %135 : vector<2x8x2x16x4xf32> to vector<2x16x16x4xf32>
    %c0_48 = arith.constant 0 : index
    %c0_49 = arith.constant 0 : index
    %c0_50 = arith.constant 0 : index
    %c0_51 = arith.constant 0 : index
    %137 = vector.load %arg4[%c0_48, %c0_49, %c0_50, %c0_51] : memref<2x16x16x4xf32, #tpu.memory_space<vmem>>, vector<2x16x16x4xf32>
    tpu.vector_store %arg4[%c0_48, %c0_49, %c0_50, %c0_51], %136 {strides = array<i32>} : memref<2x16x16x4xf32, #tpu.memory_space<vmem>>, vector<2x16x16x4xf32>,
    return
  }
  func.func @transform_0(%arg0: i32) -> (i32, i32, i32, i32, i32) {
    %c0_i32 = arith.constant 0 : i32
    %c0_i32_0 = arith.constant 0 : i32
    %c0_i32_1 = arith.constant 0 : i32
    %c0_i32_2 = arith.constant 0 : i32
    %c0_i32_3 = arith.constant 0 : i32
    return %arg0, %c0_i32, %c0_i32_0, %c0_i32_1, %c0_i32_2 : i32, i32, i32, i32, i32
  }
  func.func @transform_1(%arg0: i32) -> (i32, i32) {
    %c0_i32 = arith.constant 0 : i32
    %c0_i32_0 = arith.constant 0 : i32
    %c0_i32_1 = arith.constant 0 : i32
    return %c0_i32, %c0_i32_0 : i32, i32
  }
  func.func @transform_2(%arg0: i32) -> (i32, i32, i32) {
    %c0_i32 = arith.constant 0 : i32
    %c0_i32_0 = arith.constant 0 : i32
    %c0_i32_1 = arith.constant 0 : i32
    %c0_i32_2 = arith.constant 0 : i32
    return %c0_i32, %c0_i32_0, %c0_i32_1 : i32, i32, i32
  }
  func.func @transform_3(%arg0: i32) -> (i32, i32, i32, i32) {
    %c0_i32 = arith.constant 0 : i32
    %c0_i32_0 = arith.constant 0 : i32
    %c0_i32_1 = arith.constant 0 : i32
    %c0_i32_2 = arith.constant 0 : i32
    return %arg0, %c0_i32, %c0_i32_0, %c0_i32_1 : i32, i32, i32, i32
  }
  func.func @transform_4(%arg0: i32) -> (i32, i32, i32) {
    %c0_i32 = arith.constant 0 : i32
    %c0_i32_0 = arith.constant 0 : i32
    %c0_i32_1 = arith.constant 0 : i32
    return %arg0, %c0_i32, %c0_i32_0 : i32, i32, i32
  }
}

</mosaic_0001>

<bundles_post_ra>
// kernel: unet_skip_innermost.3
= control target key start
LH: loop header
LB: loop body
LE: loop exit
PB: predicated region body
PF: predicated region fallthrough
CT: control target
= control target key end

     0   :  { %s908_s0 = inlined_call_operand.vmem [shape: f32[1,4], index: 0, kind: input, shape index: {}]   ;;  %s909_s1 = inlined_call_operand.vmem [shape: f32[1,4], index: 1, kind: input, shape index: {}]   ;;  %s910_s3 = inlined_call_operand.vmem [shape: f32[2,16,16,4], index: 3, kind: input, shape index: {}]   ;;  %s911_s2 = inlined_call_operand.vmem [shape: f32[2,4,256], index: 2, kind: input, shape index: {}]   ;;  %s912_s4 = inlined_call_operand.vmem [shape: f32[2,8,256], index: 4, kind: output, shape index: {}]  }
   0x1   :  { %v45_v0 = vld [vmem:[%s910_s3 + $0x80] sm:$0xff]  ;;  %v46_v5 = vld [vmem:[%s910_s3 + $0x88] sm:$0xff]  ;;  %v47_v10 = vld [vmem:[%s910_s3 + $0x90] sm:$0xff] }
   0x2   :  { %v421_v1 = vld [vmem:[%s908_s0] ss:$0 sm:$0xff]  ;;  %v30_v6 = vld [vmem:[%s910_s3 + $0x8] sm:$0xff]  ;;  %v31_v12 = vld [vmem:[%s910_s3 + $0x10] sm:$0xff] }
   0x3   :  { %v426_v2 = vld [vmem:[%s909_s1] ss:$0 sm:$0xff]  ;;  %v116_v3 = vmul.f32 %v421_v1, %v45_v0  ;;  %v117_v8 = vmul.f32 %v421_v1, %v46_v5  ;;  %v101_v9 = vmul.f32 %v421_v1, %v30_v6  ;;  %v118_v15 = vmul.f32 %v421_v1, %v47_v10  ;;  %v48_v18 = vld [vmem:[%s910_s3 + $0x98] sm:$0xff]  ;;  %v50_v22 = vld [vmem:[%s910_s3 + $0xa8] sm:$0xff] }
   0x4   :  { %v29_v4 = vld [vmem:[%s910_s3] sm:$0xff]  ;;  %v102_v17 = vmul.f32 %v421_v1, %v31_v12  ;;  %v32_v19 = vld [vmem:[%s910_s3 + $0x18] sm:$0xff]  ;;  %v34_v23 = vld [vmem:[%s910_s3 + $0x28] sm:$0xff]  ;;  %v119_v25 = vmul.f32 %v421_v1, %v48_v18  ;;  %v121_v34 = vmul.f32 %v421_v1, %v50_v22 }
   0x5   :  { %v100_v7 = vmul.f32 %v421_v1, %v29_v4  ;;  %v187_v11 = vadd.f32 %v426_v2, %v116_v3  ;;  %v188_v14 = vadd.f32 %v426_v2, %v117_v8  ;;  %v172_v16 = vadd.f32 %v426_v2, %v101_v9  ;;  %v49_v20 = vld [vmem:[%s910_s3 + $0xa0] sm:$0xff]  ;;  %v51_v26 = vld [vmem:[%s910_s3 + $0xb0] sm:$0xff]  ;;  %v52_v28 = vld [vmem:[%s910_s3 + $0xb8] sm:$0xff] }
   0x6   :  { %v33_v21 = vld [vmem:[%s910_s3 + $0x20] sm:$0xff]  ;;  %v189_v24 = vadd.f32 %v426_v2, %v118_v15  ;;  %v35_v27 = vld [vmem:[%s910_s3 + $0x30] sm:$0xff]  ;;  %v173_v29 = vadd.f32 %v426_v2, %v102_v17  ;;  %v103_v30 = vmul.f32 %v421_v1, %v32_v19  ;;  %v36_v31 = vld [vmem:[%s910_s3 + $0x38] sm:$0xff]  ;;  %v120_v32 = vmul.f32 %v421_v1, %v49_v20 }
   0x7   :  { %v171_v13 = vadd.f32 %v426_v2, %v100_v7  ;;  %267 = vxpose.xlu1.b32.start [1/16] (narrow) %v187_v11, 8  ;;  %v104_v33 = vmul.f32 %v421_v1, %v33_v21  ;;  %v53_v35 = vld [vmem:[%s910_s3 + $0xc0] sm:$0xff]  ;;  %v105_v36 = vmul.f32 %v421_v1, %v34_v23  ;;  %v122_v37 = vmul.f32 %v421_v1, %v51_v26  ;;  %v54_v45 = vld [vmem:[%s910_s3 + $0xc8] sm:$0xff]  ;;  %v79_v57 = vld [vmem:[%s910_s3 + $0x190] sm:$0xff] }
   0x8   :  { %v106_v38 = vmul.f32 %v421_v1, %v35_v27  ;;  %v123_v39 = vmul.f32 %v421_v1, %v52_v28  ;;  %v190_v40 = vadd.f32 %v426_v2, %v119_v25  ;;  %v107_v41 = vmul.f32 %v421_v1, %v36_v31  ;;  %v37_v44 = vld [vmem:[%s910_s3 + $0x40] sm:$0xff]  ;;  %v78_v51 = vld [vmem:[%s910_s3 + $0x188] sm:$0xff]  ;;  %v63_v58 = vld [vmem:[%s910_s3 + $0x110] sm:$0xff] }
   0x9   :  { %235 = vxpose.xlu0.b32.start [1/16] (narrow) %v171_v13, 8  ;;  %v174_v42 = vadd.f32 %v426_v2, %v103_v30  ;;  %v124_v43 = vmul.f32 %v421_v1, %v53_v35  ;;  %v77_v46 = vld [vmem:[%s910_s3 + $0x180] sm:$0xff]  ;;  %v191_v47 = vadd.f32 %v426_v2, %v120_v32  ;;  %v175_v48 = vadd.f32 %v426_v2, %v104_v33  ;;  %v62_v52 = vld [vmem:[%s910_s3 + $0x108] sm:$0xff]  ;;  %v80_v59 = vld [vmem:[%s910_s3 + $0x198] sm:$0xff] }
   0xa   :  { %v513_v49 = vadd.f32 %v426_v2, %v121_v34  ;;  %v61_v50 = vld [vmem:[%s910_s3 + $0x100] sm:$0xff]  ;;  %v525_v53 = vadd.f32 %v426_v2, %v105_v36  ;;  %v528_v54 = vadd.f32 %v426_v2, %v122_v37  ;;  %v531_v55 = vadd.f32 %v426_v2, %v106_v38  ;;  %v64_v0 = vld [vmem:[%s910_s3 + $0x118] sm:$0xff]  ;;  %v82_v13 = vld [vmem:[%s910_s3 + $0x1a8] sm:$0xff] }
   0xb   :  { %268 = vxpose.xlu1.b32.cont [2/16] (narrow) %v188_v14, 8  ;;  %v534_v56 = vadd.f32 %v426_v2, %v123_v39  ;;  %v546_v60 = vadd.f32 %v426_v2, %v107_v41  ;;  %v549_v61 = vmul.f32 %v421_v1, %v37_v44  ;;  %v552_v62 = vmul.f32 %v421_v1, %v54_v45  ;;  %v81_v7 = vld [vmem:[%s910_s3 + $0x1a0] sm:$0xff]  ;;  %v66_v14 = vld [vmem:[%s910_s3 + $0x128] sm:$0xff]  ;;  %v83_v19 = vld [vmem:[%s910_s3 + $0x1b0] sm:$0xff] }
   0xc   :  { %v148_v63 = vmul.f32 %v421_v1, %v77_v46  ;;  %v559_v3 = vadd.f32 %v426_v2, %v124_v43  ;;  %v132_v4 = vmul.f32 %v421_v1, %v61_v50  ;;  %v149_v5 = vmul.f32 %v421_v1, %v78_v51  ;;  %v65_v12 = vld [vmem:[%s910_s3 + $0x120] sm:$0xff]  ;;  %v67_v20 = vld [vmem:[%s910_s3 + $0x130] sm:$0xff]  ;;  %v84_v21 = vld [vmem:[%s910_s3 + $0x1b8] sm:$0xff] }
   0xd   :  { %236 = vxpose.xlu0.b32.cont [2/16] (narrow) %v172_v16, 8  ;;  %v133_v6 = vmul.f32 %v421_v1, %v62_v52  ;;  %v150_v9 = vmul.f32 %v421_v1, %v79_v57  ;;  %v134_v10 = vmul.f32 %v421_v1, %v63_v58  ;;  %v151_v11 = vmul.f32 %v421_v1, %v80_v59  ;;  %v68_v26 = vld [vmem:[%s910_s3 + $0x138] sm:$0xff]  ;;  %v85_v31 = vld [vmem:[%s910_s3 + $0x1c0] sm:$0xff]  ;;  %v631_v33 = vld [vmem:[%s911_s2 + $0x8] sm:$0xff] }
   0xe   :  { %v568_v8 = vadd.f32 %v426_v2, %v148_v63  ;;  %v583_v15 = vadd.f32 %v426_v2, %v132_v4  ;;  %v586_v16 = vadd.f32 %v426_v2, %v149_v5  ;;  %v135_v18 = vmul.f32 %v421_v1, %v64_v0  ;;  %v626_v32 = vld [vmem:[%s911_s2] sm:$0xff]  ;;  %v86_v39 = vld [vmem:[%s910_s3 + $0x1c8] sm:$0xff]  ;;  %27 = vst [vmem:[%s912_s4 + $0x10] sm:$0xf] %v631_v33  ;;  %v87_v45 = vld [vmem:[%s910_s3 + $0x1d0] sm:$0xff] }
   0xf   :  { %269 = vxpose.xlu1.b32.cont [3/16] (narrow) %v189_v24, 8  ;;  %v589_v17 = vadd.f32 %v426_v2, %v133_v6  ;;  %v602_v22 = vadd.f32 %v426_v2, %v150_v9  ;;  %v605_v23 = vadd.f32 %v426_v2, %v134_v10  ;;  %v608_v24 = vadd.f32 %v426_v2, %v151_v11  ;;  %v69_v38 = vld [vmem:[%s910_s3 + $0x140] sm:$0xff]  ;;  %v71_v46 = vld [vmem:[%s910_s3 + $0x150] sm:$0xff]  ;;  %v72_v57 = vld [vmem:[%s910_s3 + $0x158] sm:$0xff] }
  0x10   :  { %v152_v25 = vmul.f32 %v421_v1, %v81_v7  ;;  %v615_v27 = vadd.f32 %v426_v2, %v135_v18  ;;  %v136_v28 = vmul.f32 %v421_v1, %v65_v12  ;;  %v137_v30 = vmul.f32 %v421_v1, %v66_v14  ;;  %25 = vst [vmem:[%s912_s4] sm:$0xf] %v626_v32  ;;  %v89_v0 = vld [vmem:[%s910_s3 + $0x1e0] sm:$0xff]  ;;  %v90_v9 = vld [vmem:[%s910_s3 + $0x1e8] sm:$0xff]  ;;  %v91_v18 = vld [vmem:[%s910_s3 + $0x1f0] sm:$0xff] }
  0x11   :  { %237 = vxpose.xlu0.b32.cont [3/16] (narrow) %v173_v29, 8  ;;  %v153_v29 = vmul.f32 %v421_v1, %v82_v13  ;;  %v154_v35 = vmul.f32 %v421_v1, %v83_v19  ;;  %v138_v36 = vmul.f32 %v421_v1, %v67_v20  ;;  %v155_v37 = vmul.f32 %v421_v1, %v84_v21  ;;  %v73_v7 = vld [vmem:[%s910_s3 + $0x160] sm:$0xff]  ;;  %v74_v10 = vld [vmem:[%s910_s3 + $0x168] sm:$0xff]  ;;  %v75_v19 = vld [vmem:[%s910_s3 + $0x170] sm:$0xff] }
  0x12   :  { %v634_v34 = vadd.f32 %v426_v2, %v152_v25  ;;  %v657_v41 = vadd.f32 %v426_v2, %v136_v28  ;;  %v663_v43 = vadd.f32 %v426_v2, %v137_v30  ;;  %v139_v44 = vmul.f32 %v421_v1, %v68_v26  ;;  %v92_v20 = vld [vmem:[%s910_s3 + $0x1f8] sm:$0xff] }
  0x13   :  { %270 = vxpose.xlu1.b32.cont [4/16] (narrow) %v190_v40, 8  ;;  %v70_v40 = vld [vmem:[%s910_s3 + $0x148] sm:$0xff]  ;;  %v680_v50 = vadd.f32 %v426_v2, %v138_v36  ;;  %v683_v51 = vadd.f32 %v426_v2, %v155_v37  ;;  %v156_v52 = vmul.f32 %v421_v1, %v85_v31  ;;  %v157_v59 = vmul.f32 %v421_v1, %v86_v39 }
  0x14   :  { %v691_v58 = vadd.f32 %v426_v2, %v139_v44  ;;  %v141_v63 = vmul.f32 %v421_v1, %v70_v40  ;;  %v158_v5 = vmul.f32 %v421_v1, %v87_v45  ;;  %v143_v14 = vmul.f32 %v421_v1, %v72_v57  ;;  %v38_v36 = vld [vmem:[%s910_s3 + $0x48] sm:$0xff] }
  0x15   :  { %238 = vxpose.xlu0.b32.cont [4/16] (narrow) %v174_v42, 8  ;;  %v660_v42 = vadd.f32 %v426_v2, %v153_v29  ;;  %v700_v4 = vadd.f32 %v426_v2, %v156_v52  ;;  %v718_v12 = vadd.f32 %v426_v2, %v157_v59  ;;  %v160_v28 = vmul.f32 %v421_v1, %v89_v0  ;;  %v76_v29 = vld [vmem:[%s910_s3 + $0x178] sm:$0xff] }
  0x16   :  { %v721_v13 = vadd.f32 %v426_v2, %v141_v63  ;;  %v735_v21 = vadd.f32 %v426_v2, %v158_v5  ;;  %v749_v30 = vadd.f32 %v426_v2, %v143_v14  ;;  %v161_v31 = vmul.f32 %v421_v1, %v90_v9  ;;  %v57_v14 = vld [vmem:[%s910_s3 + $0xe0] sm:$0xff] }
  0x17   :  { %271 = vxpose.xlu1.b32.cont [5/16] (narrow) %v191_v47, 8  ;;  %v88_v47 = vld [vmem:[%s910_s3 + $0x1d8] sm:$0xff]  ;;  %v758_v37 = vadd.f32 %v426_v2, %v160_v28  ;;  %v163_v39 = vmul.f32 %v421_v1, %v92_v20  ;;  %v179_v59 = vadd.f32 %v426_v2, %v549_v61  ;;  %v109_v63 = vmul.f32 %v421_v1, %v38_v36 }
  0x18   :  { %v159_v6 = vmul.f32 %v421_v1, %v88_v47  ;;  %v767_v44 = vadd.f32 %v426_v2, %v161_v31  ;;  %v22_v5 = vcombine.high %v631_v33, %v631_v33  ;;  %v128_v20 = vmul.f32 %v421_v1, %v57_v14  ;;  %v42_v31 = vld [vmem:[%s910_s3 + $0x68] sm:$0xff] }
  0x19   :  { %239 = vxpose.xlu0.b32.cont [5/16] (narrow) %v175_v48, 8  ;;  %v677_v48 = vadd.f32 %v426_v2, %v154_v35  ;;  %v145_v35 = vmul.f32 %v421_v1, %v74_v10  ;;  %v781_v57 = vadd.f32 %v426_v2, %v163_v39  ;;  %v180_v33 = vadd.f32 %v426_v2, %v109_v63  ;;  %v59_v39 = vld [vmem:[%s910_s3 + $0xf0] sm:$0xff] }
  0x1a   :  { %v741_v26 = vadd.f32 %v426_v2, %v159_v6  ;;  %28 = vst [vmem:[%s912_s4 + $0x18] sm:$0xf] %v22_v5  ;;  %v56_v6 = vld [vmem:[%s910_s3 + $0xd8] sm:$0xff] }
  0x1b   :  { %272 = vxpose.xlu1.b32.cont [6/16] (narrow) %v513_v49, 8  ;;  %v140_v49 = vmul.f32 %v421_v1, %v69_v38  ;;  %v162_v38 = vmul.f32 %v421_v1, %v91_v18  ;;  %v770_v45 = vadd.f32 %v426_v2, %v145_v35  ;;  %v41_v18 = vld [vmem:[%s910_s3 + $0x60] sm:$0xff]  ;;  %v199_v35 = vadd.f32 %v426_v2, %v128_v20  ;;  %v60_v5 = vld [vmem:[%s910_s3 + $0xf8] sm:$0xff] }
  0x1d   :  { %240 = vxpose.xlu0.b32.cont [6/16] (narrow) %v525_v53, 8  ;;  %v142_v53 = vmul.f32 %v421_v1, %v71_v46  ;;  %v715_v11 = vadd.f32 %v426_v2, %v140_v49  ;;  %v147_v46 = vmul.f32 %v421_v1, %v76_v29  ;;  %v775_v47 = vadd.f32 %v426_v2, %v162_v38 }
  0x1e   :  { %v21_v49 = vcombine.high %v626_v32, %v626_v32  ;;  %v39_v32 = vld [vmem:[%s910_s3 + $0x50] sm:$0xff]  ;;  %v112_v29 = vmul.f32 %v421_v1, %v41_v18 }
  0x1f   :  { %273 = vxpose.xlu1.b32.cont [7/16] (narrow) %v528_v54, 8  ;;  %v738_v25 = vadd.f32 %v426_v2, %v142_v53  ;;  %v144_v54 = vmul.f32 %v421_v1, %v73_v7  ;;  %v793_v0 = vadd.f32 %v426_v2, %v147_v46  ;;  %v110_v53 = vmul.f32 %v421_v1, %v39_v32  ;;  %v40_v7 = vld [vmem:[%s910_s3 + $0x58] sm:$0xff]  ;;  %v43_v46 = vld [vmem:[%s910_s3 + $0x70] sm:$0xff] }
  0x20   :  { %26 = vst [vmem:[%s912_s4 + $0x8] sm:$0xf] %v21_v49  ;;  %v111_v10 = vmul.f32 %v421_v1, %v40_v7  ;;  %v183_v38 = vadd.f32 %v426_v2, %v112_v29  ;;  %v44_v32 = vld [vmem:[%s910_s3 + $0x78] sm:$0xff] }
  0x21   :  { %241 = vxpose.xlu0.b32.cont [7/16] (narrow) %v531_v55, 8  ;;  %v146_v55 = vmul.f32 %v421_v1, %v75_v19  ;;  %v764_v40 = vadd.f32 %v426_v2, %v144_v54  ;;  %v181_v9 = vadd.f32 %v426_v2, %v110_v53  ;;  %v58_v54 = vld [vmem:[%s910_s3 + $0xe8] sm:$0xff]  ;;  %v115_v53 = vmul.f32 %v421_v1, %v44_v32 }
  0x22   :  { %v182_v28 = vadd.f32 %v426_v2, %v111_v10  ;;  %v129_v36 = vmul.f32 %v421_v1, %v58_v54 }
  0x23   :  { %274 = vxpose.xlu1.b32.cont [8/16] (narrow) %v534_v56, 8  ;;  %v778_v52 = vadd.f32 %v426_v2, %v146_v55  ;;  %v55_v56 = vld [vmem:[%s910_s3 + $0xd0] sm:$0xff]  ;;  %v113_v55 = vmul.f32 %v421_v1, %v42_v31  ;;  %v186_v7 = vadd.f32 %v426_v2, %v115_v53 }
  0x24   :  { %v126_v61 = vmul.f32 %v421_v1, %v55_v56  ;;  %v200_v49 = vadd.f32 %v426_v2, %v129_v36  ;;  %v114_v56 = vmul.f32 %v421_v1, %v43_v46 }
  0x25   :  { %242 = vxpose.xlu0.b32.cont [8/16] (narrow) %v546_v60, 8  ;;  %v196_v60 = vadd.f32 %v426_v2, %v552_v62  ;;  %v127_v62 = vmul.f32 %v421_v1, %v56_v6  ;;  %v184_v63 = vadd.f32 %v426_v2, %v113_v55 }
  0x27   :  { %275 = vxpose.xlu1.b32.cont [9/16] (narrow) %v559_v3, 8  ;;  %v197_v3 = vadd.f32 %v426_v2, %v126_v61  ;;  %v198_v19 = vadd.f32 %v426_v2, %v127_v62  ;;  %v131_v61 = vmul.f32 %v421_v1, %v60_v5 }
  0x29   :  { %243 = vxpose.xlu0.b32.cont [9/16] (narrow) %v179_v59, 8  ;;  %v130_v59 = vmul.f32 %v421_v1, %v59_v39  ;;  %v202_v6 = vadd.f32 %v426_v2, %v131_v61 }
  0x2b   :  { %276 = vxpose.xlu1.b32.cont [10/16] (narrow) %v196_v60, 8  ;;  %v201_v60 = vadd.f32 %v426_v2, %v130_v59 }
  0x2d   :  { %244 = vxpose.xlu0.b32.cont [10/16] (narrow) %v180_v33, 8  ;;  %v185_v33 = vadd.f32 %v426_v2, %v114_v56 }
  0x2f   :  { %277 = vxpose.xlu1.b32.cont [11/16] (narrow) %v197_v3, 8 }
  0x31   :  { %245 = vxpose.xlu0.b32.cont [11/16] (narrow) %v181_v9, 8 }
  0x33   :  { %278 = vxpose.xlu1.b32.cont [12/16] (narrow) %v198_v19, 8 }
  0x35   :  { %246 = vxpose.xlu0.b32.cont [12/16] (narrow) %v182_v28, 8 }
  0x37   :  { %279 = vxpose.xlu1.b32.cont [13/16] (narrow) %v199_v35, 8 }
  0x39   :  { %247 = vxpose.xlu0.b32.cont [13/16] (narrow) %v183_v38, 8 }
  0x3b   :  { %280 = vxpose.xlu1.b32.cont [14/16] (narrow) %v200_v49, 8 }
  0x3d   :  { %248 = vxpose.xlu0.b32.cont [14/16] (narrow) %v184_v63, 8 }
  0x3f   :  { %281 = vxpose.xlu1.b32.cont [15/16] (narrow) %v201_v60, 8 }
  0x41   :  { %249 = vxpose.xlu0.b32.cont [15/16] (narrow) %v185_v33, 8 }
  0x43   :  { %282 = vxpose.xlu1.b32.end [16/16] (narrow) %v202_v6, 8 }
  0x45   :  { %250 = vxpose.xlu0.b32.end [16/16] (narrow) %v186_v7, 8 }
  0x47   :  { %339 = vxpose.xlu1.b32.start [1/16] (narrow) %v568_v8, 8 }
  0x49   :  { %307 = vxpose.xlu0.b32.start [1/16] (narrow) %v583_v15, 8 }
  0x4b   :  { %340 = vxpose.xlu1.b32.cont [2/16] (narrow) %v586_v16, 8 }
  0x4d   :  { %308 = vxpose.xlu0.b32.cont [2/16] (narrow) %v589_v17, 8 }
  0x4f   :  { %341 = vxpose.xlu1.b32.cont [3/16] (narrow) %v602_v22, 8 }
  0x51   :  { %309 = vxpose.xlu0.b32.cont [3/16] (narrow) %v605_v23, 8 }
  0x53   :  { %342 = vxpose.xlu1.b32.cont [4/16] (narrow) %v608_v24, 8 }
  0x55   :  { %310 = vxpose.xlu0.b32.cont [4/16] (narrow) %v615_v27, 8 }
  0x57   :  { %343 = vxpose.xlu1.b32.cont [5/16] (narrow) %v634_v34, 8 }
  0x59   :  { %311 = vxpose.xlu0.b32.cont [5/16] (narrow) %v657_v41, 8 }
  0x5b   :  { %344 = vxpose.xlu1.b32.cont [6/16] (narrow) %v660_v42, 8 }
  0x5d   :  { %312 = vxpose.xlu0.b32.cont [6/16] (narrow) %v663_v43, 8 }
  0x5f   :  { %345 = vxpose.xlu1.b32.cont [7/16] (narrow) %v677_v48, 8 }
  0x61   :  { %313 = vxpose.xlu0.b32.cont [7/16] (narrow) %v680_v50, 8 }
  0x63   :  { %346 = vxpose.xlu1.b32.cont [8/16] (narrow) %v683_v51, 8 }
  0x65   :  { %314 = vxpose.xlu0.b32.cont [8/16] (narrow) %v691_v58, 8 }
  0x67   :  { %347 = vxpose.xlu1.b32.cont [9/16] (narrow) %v700_v4, 8 }
  0x69   :  { %315 = vxpose.xlu0.b32.cont [9/16] (narrow) %v715_v11, 8 }
  0x6b   :  { %348 = vxpose.xlu1.b32.cont [10/16] (narrow) %v718_v12, 8 }
  0x6d   :  { %316 = vxpose.xlu0.b32.cont [10/16] (narrow) %v721_v13, 8 }
  0x6f   :  { %349 = vxpose.xlu1.b32.cont [11/16] (narrow) %v735_v21, 8 }
  0x71   :  { %317 = vxpose.xlu0.b32.cont [11/16] (narrow) %v738_v25, 8 }
  0x73   :  { %350 = vxpose.xlu1.b32.cont [12/16] (narrow) %v741_v26, 8 }
  0x75   :  { %318 = vxpose.xlu0.b32.cont [12/16] (narrow) %v749_v30, 8 }
  0x77   :  { %351 = vxpose.xlu1.b32.cont [13/16] (narrow) %v758_v37, 8 }
  0x79   :  { %319 = vxpose.xlu0.b32.cont [13/16] (narrow) %v764_v40, 8 }
  0x7b   :  { %352 = vxpose.xlu1.b32.cont [14/16] (narrow) %v767_v44, 8 }
  0x7d   :  { %320 = vxpose.xlu0.b32.cont [14/16] (narrow) %v770_v45, 8 }
  0x7f   :  { %353 = vxpose.xlu1.b32.cont [15/16] (narrow) %v775_v47, 8 }
  0x81   :  { %321 = vxpose.xlu0.b32.cont [15/16] (narrow) %v778_v52, 8 }
  0x83   :  { %354 = vxpose.xlu1.b32.end [16/16] (narrow) %v781_v57, 8 }
  0x85   :  { %322 = vxpose.xlu0.b32.end [16/16] (narrow) %v793_v0, 8 }
  0x87   :  { %v283_v1 = vpop.trf.xlu1 }
  0x88   :  { %v302_v2 = vrot.slane %v283_v1, 4 }
  0x89   :  { %v251_v8 = vpop.trf.xlu0 }
  0x8a   :  { %v301_v15 = vrot.slane %v251_v8, 4  ;;  %306 = vst [vmem:[%s912_s4 + $0x8] sm:$0xf0] %v302_v2 }
  0x8c   :  { %305 = vst [vmem:[%s912_s4] sm:$0xf0] %v301_v15 }
  0xc7   :  { %v355_v16 = vpop.trf.xlu1 }
  0xc8   :  { %v374_v17 = vrot.slane %v355_v16, 4 }
  0xc9   :  { %v323_v22 = vpop.trf.xlu0 }
  0xca   :  { %v373_v23 = vrot.slane %v323_v22, 4  ;;  %387 = vst [vmem:[%s912_s4 + $0x18] sm:$0xf0] %v374_v17 }
  0xcc   :  { %386 = vst [vmem:[%s912_s4 + $0x10] sm:$0xf0] %v373_v23 }

// kernel: unet_skip_innermost.2
= control target key start
LH: loop header
LB: loop body
LE: loop exit
PB: predicated region body
PF: predicated region fallthrough
CT: control target
= control target key end

     0   :  { %s11683_s7 = smov 4   ;;  %s11684_s22 = smov 8   ;;  %s18049_s0 = inlined_call_operand.vmem [shape: f32[2,4,9,9,4], index: 0, kind: input, shape index: {}]   ;;  %s18050_s1 = inlined_call_operand.vmem [shape: bf16[64,8], index: 1, kind: input, shape index: {}]   ;;  %s18051_s2 = inlined_call_operand.vmem [shape: bf16[4,32,4], index: 2, kind: input, shape index: {}]   ;;  %s18052_s3 = inlined_call_operand.vmem [shape: f32[2,16,16,4], index: 3, kind: output, shape index: {0}]   ;;  %s18053_s4 = inlined_call_operand.vmem [shape: f32[1,2,4], index: 4, kind: output, shape index: {1}]  }
   0x1   :  { %v39_v0 = vld [vmem:[%s18049_s0 + $0xb0] sm:$0xff]  ;;  %v40_v1 = vld [vmem:[%s18049_s0 + $0xb8] sm:$0x1]  ;;  %v41_v7 = vld [vmem:[%s18049_s0 + $0xc0] sm:$0xff]  ;;  %s11685_s10 = smov 12   ;;  %s11686_s28 = smov 16  }
   0x2   :  { %v35_v2 = vld [vmem:[%s18049_s0 + $0x90] sm:$0xff]  ;;  %vm183_vm0 = vcmp.gt.f32.partialorder %v39_v0, 0.0  ;;  %vm184_vm1 = vcmp.gt.f32.partialorder %v40_v1, 0.0  ;;  %v327_v3 = vmul.f32 0.2, %v39_v0  ;;  %v37_v12 = vld [vmem:[%s18049_s0 + $0xa0] sm:$0xff] }
   0x3   :  { %v328_v4 = vmul.f32 0.2, %v40_v1  ;;  %v36_v5 = vld [vmem:[%s18049_s0 + $0x98] sm:$0x1]  ;;  %vm179_vm2 = vcmp.gt.f32.partialorder %v35_v2, 0.0  ;;  %vm185_vm4 = vcmp.gt.f32.partialorder %v41_v7, 0.0 }
   0x4   :  { %v323_v6 = vmul.f32 0.2, %v35_v2  ;;  %v471_v8 = vsel %vm183_vm0, %v39_v0, %v327_v3  ;;  %vm180_vm3 = vcmp.gt.f32.partialorder %v36_v5, 0.0  ;;  %v324_v10 = vmul.f32 0.2, %v36_v5  ;;  %v19_v16 = vld [vmem:[%s18049_s0 + $0x10] sm:$0xff] }
   0x5   :  { %v472_v9 = vsel %vm184_vm1, %v40_v1, %v328_v4  ;;  %v42_v11 = vld [vmem:[%s18049_s0 + $0xc8] sm:$0x1]  ;;  %v329_v18 = vmul.f32 0.2, %v41_v7  ;;  %vm181_vm6 = vcmp.gt.f32.partialorder %v37_v12, 0.0  ;;  %v17_v23 = vld [vmem:[%s18049_s0] sm:$0xff] }
   0x6   :  { %v11747_v13 = vpack.c.bf16 %v472_v9, %v471_v8  ;;  %v467_v14 = vsel %vm179_vm2, %v35_v2, %v323_v6  ;;  %vm186_vm5 = vcmp.gt.f32.partialorder %v42_v11, 0.0  ;;  %v38_v15 = vld [vmem:[%s18049_s0 + $0xa8] sm:$0x1]  ;;  %v468_v17 = vsel %vm180_vm3, %v36_v5, %v324_v10  ;;  %v20_v26 = vld [vmem:[%s18049_s0 + $0x18] sm:$0x1]  ;;  %v23_v28 = vld [vmem:[%s18049_s0 + $0x30] sm:$0xff] }
   0x7   :  { %v330_v19 = vmul.f32 0.2, %v42_v11  ;;  %v11757_v20 = vpack.c.bf16 %v468_v17, %v467_v14  ;;  %vm182_vm7 = vcmp.gt.f32.partialorder %v38_v15, 0.0  ;;  %v325_v21 = vmul.f32 0.2, %v37_v12  ;;  %v21_v37 = vld [vmem:[%s18049_s0 + $0x20] sm:$0xff] }
   0x8   :  { %685 = vrot.lane.b32.xlu1 %v11747_v13, %s11683_s7  ;;  %v326_v22 = vmul.f32 0.2, %v38_v15  ;;  %v473_v24 = vsel %vm185_vm4, %v41_v7, %v329_v18  ;;  %vm163_vm8 = vcmp.gt.f32.partialorder %v19_v16, 0.0  ;;  %v307_v27 = vmul.f32 0.2, %v19_v16  ;;  %s11687_s8 = smov 20  }
   0x9   :  { %v474_v25 = vsel %vm186_vm5, %v42_v11, %v330_v19  ;;  %681 = vrot.lane.b32.xlu0 %v11757_v20, %s11683_s7  ;;  %v469_v30 = vsel %vm181_vm6, %v37_v12, %v325_v21  ;;  %vm164_vm9 = vcmp.gt.f32.partialorder %v20_v26, 0.0  ;;  %v18_v32 = vld [vmem:[%s18049_s0 + $0x8] sm:$0x1]  ;;  %v24_v33 = vld [vmem:[%s18049_s0 + $0x38] sm:$0x1]  ;;  %vm161_vm10 = vcmp.gt.f32.partialorder %v17_v23, 0.0 }
   0xa   :  { %v11770_v29 = vpack.c.bf16 %v474_v25, %v473_v24  ;;  %v470_v31 = vsel %vm182_vm7, %v38_v15, %v326_v22  ;;  %v308_v35 = vmul.f32 0.2, %v20_v26  ;;  %v451_v36 = vsel %vm163_vm8, %v19_v16, %v307_v27  ;;  %v22_v38 = vld [vmem:[%s18049_s0 + $0x28] sm:$0x1]  ;;  %v55_v11 = vld [vmem:[%s18049_s0 + $0x130] sm:$0xff]  ;;  %s11688_s9 = smov 24  }
   0xb   :  { %v11779_v34 = vpack.c.bf16 %v470_v31, %v469_v30  ;;  %vm162_vm11 = vcmp.gt.f32.partialorder %v18_v32, 0.0  ;;  %v305_v39 = vmul.f32 0.2, %v17_v23  ;;  %v306_v40 = vmul.f32 0.2, %v18_v32  ;;  %v59_v30 = vld [vmem:[%s18049_s0 + $0x150] sm:$0xff] }
   0xc   :  { %687 = vrot.lane.b32.xlu1 %v11770_v29, %s11683_s7  ;;  %vm167_vm12 = vcmp.gt.f32.partialorder %v23_v28, 0.0  ;;  %v452_v41 = vsel %vm164_vm9, %v20_v26, %v308_v35  ;;  %vm168_vm13 = vcmp.gt.f32.partialorder %v24_v33, 0.0  ;;  %v311_v42 = vmul.f32 0.2, %v23_v28  ;;  %v56_v17 = vld [vmem:[%s18049_s0 + $0x138] sm:$0x1] }
   0xd   :  { %v312_v43 = vmul.f32 0.2, %v24_v33  ;;  %683 = vrot.lane.b32.xlu0 %v11779_v34, %s11683_s7  ;;  %v11791_v44 = vpack.c.bf16 %v452_v41, %v451_v36  ;;  %v449_v45 = vsel %vm161_vm10, %v17_v23, %v305_v39  ;;  %v450_v46 = vsel %vm162_vm11, %v18_v32, %v306_v40  ;;  %v54_v23 = vld [vmem:[%s18049_s0 + $0x128] sm:$0x1]  ;;  %v60_v31 = vld [vmem:[%s18049_s0 + $0x158] sm:$0x1] }
   0xe   :  { %vm165_vm14 = vcmp.gt.f32.partialorder %v21_v37, 0.0  ;;  %v11793_v47 = vpack.c.bf16 %v450_v46, %v449_v45  ;;  %v455_v48 = vsel %vm167_vm12, %v23_v28, %v311_v42  ;;  %vm166_vm15 = vcmp.gt.f32.partialorder %v22_v38, 0.0  ;;  %v57_v36 = vld [vmem:[%s18049_s0 + $0x140] sm:$0xff]  ;;  %v74_v45 = vld [vmem:[%s18049_s0 + $0x1c8] sm:$0x1]  ;;  %s11689_s15 = smov 28  }
   0xf   :  { %v456_v49 = vsel %vm168_vm13, %v24_v33, %v312_v43  ;;  %v721_v50 = vshrl.u32 %v11791_v44, 16  ;;  %v723_v51 = vshll.u32 %v11791_v44, 16  ;;  %v309_v53 = vmul.f32 0.2, %v21_v37  ;;  %v73_v43 = vld [vmem:[%s18049_s0 + $0x1c0] sm:$0xff]  ;;  %s11690_s30 = smov 32  }
  0x10   :  { %v11797_v52 = vpack.c.bf16 %v456_v49, %v455_v48  ;;  %v714_v54 = vshrl.u32 %v11793_v47, 16  ;;  %v716_v55 = vshll.u32 %v11793_v47, 16  ;;  %v310_v56 = vmul.f32 0.2, %v22_v38  ;;  %s11691_s27 = smov 36   ;;  %s11692_s29 = smov 40  }
  0x11   :  { %v725_v57 = vrot.slane %v723_v51, 1  ;;  %v453_v60 = vsel %vm165_vm14, %v21_v37, %v309_v53  ;;  %v867_v63 = vshll.u32 %v11779_v34, 16  ;;  %v860_v3 = vshll.u32 %v11757_v20, 16  ;;  %v58_v37 = vld [vmem:[%s18049_s0 + $0x148] sm:$0x1]  ;;  %v71_v53 = vld [vmem:[%s18049_s0 + $0x1b0] sm:$0xff] }
  0x12   :  { %18195 = vst [vmem:[#allocation3_spill] sm:$0xff] %v11797_v52  ;;  %v735_v58 = vshrl.u32 %v11797_v52, 16  ;;  %v737_v59 = vshll.u32 %v11797_v52, 16  ;;  %v718_v61 = vrot.slane %v716_v55, 1  ;;  %v454_v62 = vsel %vm166_vm15, %v22_v38, %v310_v56  ;;  %s11693_s18 = smov 44   ;;  %s11694_s20 = smov 48  }
  0x13   :  { %v11804_v0 = vor.u32 %v725_v57, %v721_v50  ;;  %v11806_v2 = vpack.c.bf16 %v454_v62, %v453_v60  ;;  %v865_v5 = vshrl.u32 %v11779_v34, 16  ;;  %v869_v6 = vrot.slane %v867_v63, 1  ;;  %v77_v60 = vld [vmem:[%s18049_s0 + $0x1e0] sm:$0xff]  ;;  %s11695_s12 = smov 52   ;;  %s11696_s13 = smov 56  }
  0x14   :  { %v739_v1 = vrot.slane %v737_v59, 1  ;;  %v719_v4 = vor.u32 %v718_v61, %v714_v54  ;;  %v881_v10 = vshll.u32 %v11770_v29, 16  ;;  %v858_v14 = vshrl.u32 %v11757_v20, 16  ;;  %v53_v20 = vld [vmem:[%s18049_s0 + $0x120] sm:$0xff]  ;;  %v72_v54 = vld [vmem:[%s18049_s0 + $0x1b8] sm:$0x1] }
  0x15   :  { %827 = vrot.lane.b32.xlu1 %v11804_v0, %s11684_s22  ;;  %v728_v8 = vshrl.u32 %v11806_v2, 16  ;;  %v730_v9 = vshll.u32 %v11806_v2, 16  ;;  %v862_v15 = vrot.slane %v860_v3, 1  ;;  %v874_v16 = vshll.u32 %v11747_v13, 16  ;;  %v78_v61 = vld [vmem:[%s18049_s0 + $0x1e8] sm:$0x1] }
  0x16   :  { %v11812_v7 = vor.u32 %v739_v1, %v735_v58  ;;  %825 = vrot.lane.b32.xlu0 %v719_v4, %s11684_s22  ;;  %v11830_v19 = vor.u32 %v869_v6, %v865_v5  ;;  %v879_v21 = vshrl.u32 %v11770_v29, 16  ;;  %v883_v22 = vrot.slane %v881_v10, 1  ;;  %v75_v5 = vld [vmem:[%s18049_s0 + $0x1d0] sm:$0xff]  ;;  %v76_v6 = vld [vmem:[%s18049_s0 + $0x1d8] sm:$0x1]  ;;  %s11697_s26 = smov 60  }
  0x17   :  { %v732_v12 = vrot.slane %v730_v9, 1  ;;  %v872_v24 = vshrl.u32 %v11747_v13, 16  ;;  %v343_v25 = vmul.f32 0.2, %v55_v11  ;;  %v344_v26 = vmul.f32 0.2, %v56_v17 }
  0x18   :  { %v863_v27 = vor.u32 %v862_v15, %v858_v14  ;;  %v876_v28 = vrot.slane %v874_v16, 1  ;;  %vm199_vm0 = vcmp.gt.f32.partialorder %v55_v11, 0.0  ;;  %vm200_vm1 = vcmp.gt.f32.partialorder %v56_v17, 0.0 }
  0x19   :  { %831 = vrot.lane.b32.xlu1 %v11812_v7, %s11684_s22  ;;  %v11828_v18 = vor.u32 %v732_v12, %v728_v8  ;;  %v341_v32 = vmul.f32 0.2, %v53_v20  ;;  %v342_v33 = vmul.f32 0.2, %v54_v23  ;;  %v11850_v35 = vor.u32 %v883_v22, %v879_v21 }
  0x1a   :  { %vm197_vm2 = vcmp.gt.f32.partialorder %v53_v20, 0.0  ;;  %vm198_vm3 = vcmp.gt.f32.partialorder %v54_v23, 0.0  ;;  %v487_v38 = vsel %vm199_vm0, %v55_v11, %v343_v25  ;;  %v488_v39 = vsel %vm200_vm1, %v56_v17, %v344_v26 }
  0x1b   :  { %829 = vrot.lane.b32.xlu0 %v11828_v18, %s11684_s22  ;;  %v347_v40 = vmul.f32 0.2, %v59_v30  ;;  %v348_v41 = vmul.f32 0.2, %v60_v31  ;;  %v11859_v42 = vor.u32 %v876_v28, %v872_v24  ;;  %vm203_vm4 = vcmp.gt.f32.partialorder %v59_v30, 0.0 }
  0x1c   :  { %vm204_vm5 = vcmp.gt.f32.partialorder %v60_v31, 0.0  ;;  %v485_v46 = vsel %vm197_vm2, %v53_v20, %v341_v32  ;;  %v486_v48 = vsel %vm198_vm3, %v54_v23, %v342_v33  ;;  %v345_v49 = vmul.f32 0.2, %v57_v36 }
  0x1d   :  { %971 = vrot.lane.b32.xlu1 %v11830_v19, %s11685_s10  ;;  %v346_v50 = vmul.f32 0.2, %v58_v37  ;;  %v11869_v51 = vpack.c.bf16 %v488_v39, %v487_v38  ;;  %vm201_vm6 = vcmp.gt.f32.partialorder %v57_v36, 0.0  ;;  %vm202_vm7 = vcmp.gt.f32.partialorder %v58_v37, 0.0 }
  0x1e   :  { %v491_v55 = vsel %vm203_vm4, %v59_v30, %v347_v40  ;;  %v492_v56 = vsel %vm204_vm5, %v60_v31, %v348_v41  ;;  %v361_v57 = vmul.f32 0.2, %v73_v43  ;;  %v362_v58 = vmul.f32 0.2, %v74_v45 }
  0x1f   :  { %969 = vrot.lane.b32.xlu0 %v863_v27, %s11685_s10  ;;  %v611_v59 = vpack.c.bf16 %v486_v48, %v485_v46  ;;  %vm217_vm8 = vcmp.gt.f32.partialorder %v73_v43, 0.0  ;;  %vm218_vm9 = vcmp.gt.f32.partialorder %v74_v45, 0.0  ;;  %v489_v62 = vsel %vm201_vm6, %v57_v36, %v345_v49 }
  0x20   :  { %v490_v63 = vsel %vm202_vm7, %v58_v37, %v346_v50  ;;  %v359_v1 = vmul.f32 0.2, %v71_v53  ;;  %v360_v3 = vmul.f32 0.2, %v72_v54  ;;  %v11887_v4 = vpack.c.bf16 %v492_v56, %v491_v55 }
  0x21   :  { %975 = vrot.lane.b32.xlu1 %v11850_v35, %s11685_s10  ;;  %vm215_vm10 = vcmp.gt.f32.partialorder %v71_v53, 0.0  ;;  %vm216_vm11 = vcmp.gt.f32.partialorder %v72_v54, 0.0  ;;  %v505_v8 = vsel %vm217_vm8, %v73_v43, %v361_v57  ;;  %v506_v9 = vsel %vm218_vm9, %v74_v45, %v362_v58 }
  0x22   :  { %v365_v10 = vmul.f32 0.2, %v77_v60  ;;  %v366_v11 = vmul.f32 0.2, %v78_v61  ;;  %v11896_v12 = vpack.c.bf16 %v490_v63, %v489_v62  ;;  %vm221_vm12 = vcmp.gt.f32.partialorder %v77_v60, 0.0  ;;  %v45_v63 = vld [vmem:[%s18049_s0 + $0xe0] sm:$0xff] }
  0x23   :  { %973 = vrot.lane.b32.xlu0 %v11859_v42, %s11685_s10  ;;  %vm222_vm13 = vcmp.gt.f32.partialorder %v78_v61, 0.0  ;;  %v503_v14 = vsel %vm215_vm10, %v71_v53, %v359_v1  ;;  %v504_v15 = vsel %vm216_vm11, %v72_v54, %v360_v3  ;;  %v363_v16 = vmul.f32 0.2, %v75_v5 }
  0x24   :  { %v364_v17 = vmul.f32 0.2, %v76_v6  ;;  %v11900_v21 = vpack.c.bf16 %v506_v9, %v505_v8  ;;  %vm219_vm14 = vcmp.gt.f32.partialorder %v75_v5, 0.0  ;;  %vm220_vm15 = vcmp.gt.f32.partialorder %v76_v6, 0.0 }
  0x25   :  { %1019 = vrot.lane.b32.xlu1 %v11869_v51, %s11686_s28  ;;  %v1107_v22 = vshll.u32 %v11869_v51, 16  ;;  %v509_v20 = vsel %vm221_vm12, %v77_v60, %v365_v10  ;;  %v510_v23 = vsel %vm222_vm13, %v78_v61, %v366_v11  ;;  %v620_v24 = vpack.c.bf16 %v504_v15, %v503_v14  ;;  %v43_v10 = vld [vmem:[%s18049_s0 + $0xd0] sm:$0xff]  ;;  %v44_v11 = vld [vmem:[%s18049_s0 + $0xd8] sm:$0x1]  ;;  %v25_v15 = vld [vmem:[%s18049_s0 + $0x40] sm:$0xff] }
  0x26   :  { %v1100_v25 = vshll.u32 %v611_v59, 16  ;;  %v507_v26 = vsel %vm219_vm14, %v75_v5, %v363_v16  ;;  %v508_v27 = vsel %vm220_vm15, %v76_v6, %v364_v17  ;;  %v11907_v28 = vpack.c.bf16 %v510_v23, %v509_v20  ;;  %v46_v6 = vld [vmem:[%s18049_s0 + $0xe8] sm:$0x1]  ;;  %v28_v20 = vld [vmem:[%s18049_s0 + $0x58] sm:$0x1] }
  0x27   :  { %1017 = vrot.lane.b32.xlu0 %v611_v59, %s11686_s28  ;;  %v1105_v30 = vshrl.u32 %v11869_v51, 16  ;;  %v1109_v31 = vrot.slane %v1107_v22, 1  ;;  %v1121_v32 = vshll.u32 %v11887_v4, 16  ;;  %v11912_v33 = vpack.c.bf16 %v508_v27, %v507_v26  ;;  %v26_v17 = vld [vmem:[%s18049_s0 + $0x48] sm:$0x1]  ;;  %v27_v22 = vld [vmem:[%s18049_s0 + $0x50] sm:$0xff] }
  0x28   :  { %v1098_v36 = vshrl.u32 %v611_v59, 16  ;;  %v1102_v37 = vrot.slane %v1100_v25, 1  ;;  %v1114_v38 = vshll.u32 %v11896_v12, 16  ;;  %v1119_v40 = vshrl.u32 %v11887_v4, 16 }
  0x29   :  { %1023 = vrot.lane.b32.xlu1 %v11887_v4, %s11686_s28  ;;  %v11917_v39 = vor.u32 %v1109_v31, %v1105_v30  ;;  %v1123_v41 = vrot.slane %v1121_v32, 1  ;;  %v1251_v43 = vshll.u32 %v11900_v21, 16  ;;  %v1112_v46 = vshrl.u32 %v11896_v12, 16 }
  0x2a   :  { %v1103_v45 = vor.u32 %v1102_v37, %v1098_v36  ;;  %v1116_v48 = vrot.slane %v1114_v38, 1  ;;  %v1244_v49 = vshll.u32 %v620_v24, 16  ;;  %v1249_v53 = vshrl.u32 %v11900_v21, 16 }
  0x2b   :  { %1021 = vrot.lane.b32.xlu0 %v11896_v12, %s11686_s28  ;;  %v11926_v50 = vor.u32 %v1123_v41, %v1119_v40  ;;  %v1253_v54 = vrot.slane %v1251_v43, 1  ;;  %v1265_v55 = vshll.u32 %v11907_v28, 16  ;;  %v1242_v57 = vshrl.u32 %v620_v24, 16  ;;  %v49_v40 = vld [vmem:[%s18049_s0 + $0x100] sm:$0xff]  ;;  %v50_v41 = vld [vmem:[%s18049_s0 + $0x108] sm:$0x1] }
  0x2c   :  { %v11931_v56 = vor.u32 %v1116_v48, %v1112_v46  ;;  %v1246_v58 = vrot.slane %v1244_v49, 1  ;;  %v1258_v59 = vshll.u32 %v11912_v33, 16  ;;  %v1263_v61 = vshrl.u32 %v11907_v28, 16 }
  0x2d   :  { %1067 = vrot.lane.b32.xlu1 %v11900_v21, %s11687_s8  ;;  %v11936_v60 = vor.u32 %v1253_v54, %v1249_v53  ;;  %v1267_v62 = vrot.slane %v1265_v55, 1  ;;  %v1256_v3 = vshrl.u32 %v11912_v33, 16  ;;  %v333_v9 = vmul.f32 0.2, %v45_v63 }
  0x2e   :  { %v1247_v1 = vor.u32 %v1246_v58, %v1242_v57  ;;  %v1260_v5 = vrot.slane %v1258_v59, 1  ;;  %vm189_vm0 = vcmp.gt.f32.partialorder %v45_v63, 0.0  ;;  %v334_v14 = vmul.f32 0.2, %v46_v6  ;;  %v47_v57 = vld [vmem:[%s18049_s0 + $0xf0] sm:$0xff] }
  0x2f   :  { %1065 = vrot.lane.b32.xlu0 %v620_v24, %s11687_s8  ;;  %v11950_v8 = vor.u32 %v1267_v62, %v1263_v61  ;;  %vm190_vm1 = vcmp.gt.f32.partialorder %v46_v6, 0.0  ;;  %v331_v23 = vmul.f32 0.2, %v43_v10  ;;  %v332_v24 = vmul.f32 0.2, %v44_v11  ;;  %v31_v61 = vld [vmem:[%s18049_s0 + $0x70] sm:$0xff] }
  0x30   :  { %v11962_v16 = vor.u32 %v1260_v5, %v1256_v3  ;;  %v477_v25 = vsel %vm189_vm0, %v45_v63, %v333_v9  ;;  %vm187_vm2 = vcmp.gt.f32.partialorder %v43_v10, 0.0  ;;  %vm188_vm3 = vcmp.gt.f32.partialorder %v44_v11, 0.0  ;;  %v48_v58 = vld [vmem:[%s18049_s0 + $0xf8] sm:$0x1]  ;;  %v29_v9 = vld [vmem:[%s18049_s0 + $0x60] sm:$0xff] }
  0x31   :  { %1071 = vrot.lane.b32.xlu1 %v11907_v28, %s11687_s8  ;;  %v313_v26 = vmul.f32 0.2, %v25_v15  ;;  %v478_v27 = vsel %vm190_vm1, %v46_v6, %v334_v14  ;;  %v314_v30 = vmul.f32 0.2, %v26_v17  ;;  %v315_v31 = vmul.f32 0.2, %v27_v22 }
  0x32   :  { %v316_v32 = vmul.f32 0.2, %v28_v20  ;;  %vm169_vm4 = vcmp.gt.f32.partialorder %v25_v15, 0.0  ;;  %vm170_vm5 = vcmp.gt.f32.partialorder %v26_v17, 0.0  ;;  %vm171_vm6 = vcmp.gt.f32.partialorder %v27_v22, 0.0 }
  0x33   :  { %1069 = vrot.lane.b32.xlu0 %v11912_v33, %s11687_s8  ;;  %vm172_vm7 = vcmp.gt.f32.partialorder %v28_v20, 0.0  ;;  %v475_v36 = vsel %vm187_vm2, %v43_v10, %v331_v23  ;;  %v476_v37 = vsel %vm188_vm3, %v44_v11, %v332_v24  ;;  %v11979_v38 = vpack.c.bf16 %v478_v27, %v477_v25  ;;  %v32_v62 = vld [vmem:[%s18049_s0 + $0x78] sm:$0x1]  ;;  %v30_v10 = vld [vmem:[%s18049_s0 + $0x68] sm:$0x1] }
  0x34   :  { %v457_v43 = vsel %vm169_vm4, %v25_v15, %v313_v26  ;;  %v459_v46 = vsel %vm171_vm6, %v27_v22, %v315_v31  ;;  %v460_v48 = vsel %vm172_vm7, %v28_v20, %v316_v32  ;;  %v11989_v49 = vpack.c.bf16 %v476_v37, %v475_v36 }
  0x35   :  { %1211 = vrot.lane.b32.xlu1 %v11917_v39, %s11688_s9  ;;  %v337_v53 = vmul.f32 0.2, %v49_v40  ;;  %v338_v54 = vmul.f32 0.2, %v50_v41  ;;  %vm193_vm8 = vcmp.gt.f32.partialorder %v49_v40, 0.0  ;;  %vm194_vm9 = vcmp.gt.f32.partialorder %v50_v41, 0.0 }
  0x36   :  { %v12001_v59 = vpack.c.bf16 %v460_v48, %v459_v46  ;;  %v335_v3 = vmul.f32 0.2, %v47_v57  ;;  %v336_v5 = vmul.f32 0.2, %v48_v58  ;;  %vm191_vm10 = vcmp.gt.f32.partialorder %v47_v57, 0.0 }
  0x37   :  { %1209 = vrot.lane.b32.xlu0 %v1103_v45, %s11688_s9  ;;  %v458_v45 = vsel %vm170_vm5, %v26_v17, %v314_v30  ;;  %v481_v63 = vsel %vm193_vm8, %v49_v40, %v337_v53  ;;  %vm192_vm11 = vcmp.gt.f32.partialorder %v48_v58, 0.0  ;;  %v319_v11 = vmul.f32 0.2, %v31_v61 }
  0x38   :  { %v11993_v55 = vpack.c.bf16 %v458_v45, %v457_v43  ;;  %18197 = vst [vmem:[#allocation5_spill] sm:$0xff] %v12001_v59  ;;  %v751_v6 = vshll.u32 %v12001_v59, 16  ;;  %v320_v14 = vmul.f32 0.2, %v32_v62  ;;  %vm175_vm12 = vcmp.gt.f32.partialorder %v31_v61, 0.0 }
  0x39   :  { %1215 = vrot.lane.b32.xlu1 %v11926_v50, %s11688_s9  ;;  %vm176_vm13 = vcmp.gt.f32.partialorder %v32_v62, 0.0  ;;  %v479_v22 = vsel %vm191_vm10, %v47_v57, %v335_v3  ;;  %v480_v20 = vsel %vm192_vm11, %v48_v58, %v336_v5  ;;  %v317_v23 = vmul.f32 0.2, %v29_v9 }
  0x3a   :  { %18196 = vst [vmem:[#allocation4_spill] sm:$0xff] %v11993_v55  ;;  %v744_v17 = vshll.u32 %v11993_v55, 16  ;;  %v318_v24 = vmul.f32 0.2, %v30_v10  ;;  %v749_v25 = vshrl.u32 %v12001_v59, 16  ;;  %v753_v26 = vrot.slane %v751_v6, 1 }
  0x3b   :  { %1213 = vrot.lane.b32.xlu0 %v11931_v56, %s11688_s9  ;;  %vm173_vm14 = vcmp.gt.f32.partialorder %v29_v9, 0.0  ;;  %vm174_vm15 = vcmp.gt.f32.partialorder %v30_v10, 0.0  ;;  %v463_v27 = vsel %vm175_vm12, %v31_v61, %v319_v11  ;;  %v464_v30 = vsel %vm176_vm13, %v32_v62, %v320_v14 }
  0x3c   :  { %v12030_v31 = vpack.c.bf16 %v480_v20, %v479_v22  ;;  %v742_v32 = vshrl.u32 %v11993_v55, 16  ;;  %v746_v36 = vrot.slane %v744_v17, 1  ;;  %v461_v37 = vsel %vm173_vm14, %v29_v9, %v317_v23  ;;  %v61_v17 = vld [vmem:[%s18049_s0 + $0x160] sm:$0xff]  ;;  %v62_v22 = vld [vmem:[%s18049_s0 + $0x168] sm:$0x1] }
  0x3d   :  { %1355 = vrot.lane.b32.xlu1 %v11936_v60, %s11689_s15  ;;  %v462_v40 = vsel %vm174_vm15, %v30_v10, %v318_v24  ;;  %v888_v61 = vshll.u32 %v11989_v49, 16  ;;  %v64_v10 = vld [vmem:[%s18049_s0 + $0x178] sm:$0x1]  ;;  %vm205_vm2 = vcmp.gt.f32.partialorder %v61_v17, 0.0  ;;  %vm206_vm3 = vcmp.gt.f32.partialorder %v62_v22, 0.0 }
  0x3e   :  { %v747_v43 = vor.u32 %v746_v36, %v742_v32  ;;  %v12041_v45 = vpack.c.bf16 %v462_v40, %v461_v37  ;;  %v352_v23 = vmul.f32 0.2, %v64_v10  ;;  %v900_v24 = vshrl.u32 %v12030_v31, 16 }
  0x3f   :  { %1353 = vrot.lane.b32.xlu0 %v1247_v1, %s11689_s15  ;;  %v482_v1 = vsel %vm194_vm9, %v50_v41, %v338_v54  ;;  %v12037_v41 = vpack.c.bf16 %v464_v30, %v463_v27  ;;  %v895_v54 = vshll.u32 %v11979_v38, 16  ;;  %v890_v5 = vrot.slane %v888_v61, 1  ;;  %v82_v61 = vld [vmem:[%s18049_s0 + $0x208] sm:$0x1] }
  0x40   :  { %v12022_v15 = vpack.c.bf16 %v482_v1, %v481_v63  ;;  %18199 = vst [vmem:[#allocation7_spill] sm:$0xff] %v12041_v45  ;;  %v758_v46 = vshll.u32 %v12041_v45, 16  ;;  %v756_v57 = vshrl.u32 %v12041_v45, 16  ;;  %v893_v63 = vshrl.u32 %v11979_v38, 16 }
  0x41   :  { %1359 = vrot.lane.b32.xlu1 %v11950_v8, %s11689_s15  ;;  %18198 = vst [vmem:[#allocation6_spill] sm:$0xff] %v12037_v41  ;;  %v763_v48 = vshrl.u32 %v12037_v41, 16  ;;  %v897_v1 = vrot.slane %v895_v54, 1  ;;  %vm208_vm1 = vcmp.gt.f32.partialorder %v64_v10, 0.0  ;;  %v350_v27 = vmul.f32 0.2, %v62_v22 }
  0x42   :  { %v760_v58 = vrot.slane %v758_v46, 1  ;;  %v909_v9 = vshll.u32 %v12022_v15, 16  ;;  %v907_v11 = vshrl.u32 %v12022_v15, 16  ;;  %v496_v36 = vsel %vm208_vm1, %v64_v10, %v352_v23  ;;  %v65_v46 = vld [vmem:[%s18049_s0 + $0x180] sm:$0xff] }
  0x43   :  { %1357 = vrot.lane.b32.xlu0 %v11962_v16, %s11689_s15  ;;  %v12068_v6 = vor.u32 %v897_v1, %v893_v63  ;;  %v494_v40 = vsel %vm206_vm3, %v62_v22, %v350_v27  ;;  %v353_v1 = vmul.f32 0.2, %v65_v46  ;;  %vm209_vm6 = vcmp.gt.f32.partialorder %v65_v46, 0.0 }
  0x44   :  { %v12063_v3 = vor.u32 %v760_v58, %v756_v57  ;;  %v911_v14 = vrot.slane %v909_v9, 1  ;;  %v81_v58 = vld [vmem:[%s18049_s0 + $0x200] sm:$0xff]  ;;  %v80_v9 = vld [vmem:[%s18049_s0 + $0x1f8] sm:$0x1]  ;;  %vm226_vm9 = vcmp.gt.f32.partialorder %v82_v61, 0.0 }
  0x45   :  { %1403 = vrot.lane.b32.xlu1 %v11806_v2, %s11690_s30  ;;  %v369_v10 = vmul.f32 0.2, %v81_v58  ;;  %vm225_vm8 = vcmp.gt.f32.partialorder %v81_v58, 0.0  ;;  %v368_v22 = vmul.f32 0.2, %v80_v9  ;;  %vm224_vm11 = vcmp.gt.f32.partialorder %v80_v9, 0.0 }
  0x46   :  { %v12096_v30 = vor.u32 %v911_v14, %v907_v11  ;;  %v370_v11 = vmul.f32 0.2, %v82_v61 }
  0x47   :  { %1401 = vrot.lane.b32.xlu0 %v11791_v44, %s11690_s30 }
  0x49   :  { %691 = vrot.lane.b32.xlu1 %v11979_v38, %s11683_s7 }
  0x4b   :  { %689 = vrot.lane.b32.xlu0 %v11989_v49, %s11683_s7 }
  0x4d   :  { %1407 = vrot.lane.b32.xlu1 %v11993_v55, %s11690_s30 }
  0x4f   :  { %1405 = vrot.lane.b32.xlu0 %v11797_v52, %s11690_s30 }
  0x51   :  { %1437 = vrot.lane.b32.xlu1 %v11747_v13, %s11691_s27  ;;  %v12035_v13 = vor.u32 %v753_v26, %v749_v25  ;;  %v349_v26 = vmul.f32 0.2, %v61_v17 }
  0x53   :  { %1435 = vrot.lane.b32.xlu0 %v11779_v34, %s11691_s27  ;;  %v765_v34 = vshll.u32 %v12037_v41, 16  ;;  %v493_v37 = vsel %vm205_vm2, %v61_v17, %v349_v26 }
  0x55   :  { %695 = vrot.lane.b32.xlu1 %v12022_v15, %s11683_s7  ;;  %v767_v53 = vrot.slane %v765_v34, 1  ;;  %v67_v34 = vld [vmem:[%s18049_s0 + $0x190] sm:$0xff] }
  0x56   :  { %vm211_vm4 = vcmp.gt.f32.partialorder %v67_v34, 0.0 }
  0x57   :  { %693 = vrot.lane.b32.xlu0 %v12030_v31, %s11683_s7  ;;  %v12058_v62 = vor.u32 %v767_v53, %v763_v48  ;;  %v66_v48 = vld [vmem:[%s18049_s0 + $0x188] sm:$0x1]  ;;  %v355_v53 = vmul.f32 0.2, %v67_v34 }
  0x58   :  { %vm210_vm7 = vcmp.gt.f32.partialorder %v66_v48, 0.0 }
  0x59   :  { %835 = vrot.lane.b32.xlu1 %v12035_v13, %s11684_s22 }
  0x5b   :  { %833 = vrot.lane.b32.xlu0 %v747_v43, %s11684_s22 }
  0x5d   :  { %1441 = vrot.lane.b32.xlu1 %v11989_v49, %s11691_s27 }
  0x5f   :  { %1439 = vrot.lane.b32.xlu0 %v11770_v29, %s11691_s27  ;;  %v886_v29 = vshrl.u32 %v11989_v49, 16  ;;  %v63_v49 = vld [vmem:[%s18049_s0 + $0x170] sm:$0xff] }
  0x60   :  { %v351_v20 = vmul.f32 0.2, %v63_v49  ;;  %vm207_vm0 = vcmp.gt.f32.partialorder %v63_v49, 0.0 }
  0x61   :  { %1483 = vrot.lane.b32.xlu1 %v11828_v18, %s11692_s29  ;;  %v891_v18 = vor.u32 %v890_v5, %v886_v29  ;;  %v354_v29 = vmul.f32 0.2, %v66_v48  ;;  %v79_v5 = vld [vmem:[%s18049_s0 + $0x1f0] sm:$0xff] }
  0x62   :  { %v495_v32 = vsel %vm207_vm0, %v63_v49, %v351_v20  ;;  %v367_v17 = vmul.f32 0.2, %v79_v5  ;;  %vm223_vm10 = vcmp.gt.f32.partialorder %v79_v5, 0.0 }
  0x63   :  { %1481 = vrot.lane.b32.xlu0 %v11804_v0, %s11692_s29  ;;  %v902_v0 = vshll.u32 %v12030_v31, 16  ;;  %v498_v14 = vsel %vm210_vm7, %v66_v48, %v354_v29 }
  0x64   :  { %v511_v27 = vsel %vm223_vm10, %v79_v5, %v367_v17 }
  0x65   :  { %839 = vrot.lane.b32.xlu1 %v12058_v62, %s11684_s22  ;;  %v904_v25 = vrot.slane %v902_v0, 1  ;;  %v499_v0 = vsel %vm211_vm4, %v67_v34, %v355_v53 }
  0x67   :  { %837 = vrot.lane.b32.xlu0 %v12063_v3, %s11684_s22 }
  0x69   :  { %979 = vrot.lane.b32.xlu1 %v12068_v6, %s11685_s10 }
  0x6b   :  { %977 = vrot.lane.b32.xlu0 %v891_v18, %s11685_s10 }
  0x6d   :  { %1487 = vrot.lane.b32.xlu1 %v747_v43, %s11692_s29  ;;  %v12104_v43 = vpack.c.bf16 %v496_v36, %v495_v32  ;;  %v512_v32 = vsel %vm224_vm11, %v80_v9, %v368_v22 }
  0x6f   :  { %1485 = vrot.lane.b32.xlu0 %v11812_v7, %s11692_s29  ;;  %v12100_v7 = vor.u32 %v904_v25, %v900_v24  ;;  %v513_v25 = vsel %vm225_vm8, %v81_v58, %v369_v10  ;;  %v1135_v29 = vshll.u32 %v12104_v43, 16  ;;  %v1133_v17 = vshrl.u32 %v12104_v43, 16 }
  0x71   :  { %1529 = vrot.lane.b32.xlu1 %v11859_v42, %s11693_s18  ;;  %v12108_v42 = vpack.c.bf16 %v494_v40, %v493_v37  ;;  %v12165_v37 = vpack.c.bf16 %v512_v32, %v511_v27  ;;  %v86_v40 = vld [vmem:[%s18049_s0 + $0x228] sm:$0x1]  ;;  %v1137_v22 = vrot.slane %v1135_v29, 1 }
  0x72   :  { %v374_v53 = vmul.f32 0.2, %v86_v40  ;;  %vm230_vm13 = vcmp.gt.f32.partialorder %v86_v40, 0.0 }
  0x73   :  { %1527 = vrot.lane.b32.xlu0 %v11830_v19, %s11693_s18  ;;  %v68_v19 = vld [vmem:[%s18049_s0 + $0x198] sm:$0x1] }
  0x74   :  { %v356_v54 = vmul.f32 0.2, %v68_v19  ;;  %vm212_vm5 = vcmp.gt.f32.partialorder %v68_v19, 0.0  ;;  %v518_v9 = vsel %vm230_vm13, %v86_v40, %v374_v53 }
  0x75   :  { %983 = vrot.lane.b32.xlu1 %v12096_v30, %s11685_s10 }
  0x76   :  { %v500_v49 = vsel %vm212_vm5, %v68_v19, %v356_v54  ;;  %v83_v19 = vld [vmem:[%s18049_s0 + $0x210] sm:$0xff] }
  0x77   :  { %981 = vrot.lane.b32.xlu0 %v12100_v7, %s11685_s10  ;;  %v12149_v23 = vpack.c.bf16 %v500_v49, %v499_v0  ;;  %v371_v58 = vmul.f32 0.2, %v83_v19  ;;  %vm227_vm14 = vcmp.gt.f32.partialorder %v83_v19, 0.0  ;;  %v1128_v49 = vshll.u32 %v12108_v42, 16 }
  0x79   :  { %1027 = vrot.lane.b32.xlu1 %v12104_v43, %s11686_s28  ;;  %v515_v10 = vsel %vm227_vm14, %v83_v19, %v371_v58  ;;  %v1130_v27 = vrot.slane %v1128_v49, 1  ;;  %v1147_v53 = vshrl.u32 %v12149_v23, 16  ;;  %v1272_v49 = vshll.u32 %v12165_v37, 16 }
  0x7a   :  { %v12126_v57 = vpop.permute.xlu1 %685 }
  0x7b   :  { %1025 = vrot.lane.b32.xlu0 %v12108_v42, %s11686_s28  ;;  %v12134_v63 = vpop.permute.xlu0 %681 }
  0x7d   :  { %1533 = vrot.lane.b32.xlu1 %v891_v18, %s11693_s18  ;;  %v497_v18 = vsel %vm209_vm6, %v65_v46, %v353_v1  ;;  %v84_v46 = vld [vmem:[%s18049_s0 + $0x218] sm:$0x1] }
  0x7e   :  { %v12147_v20 = vpop.permute.xlu1 %687  ;;  %v12155_v26 = vpack.c.bf16 %v498_v14, %v497_v18  ;;  %vm228_vm15 = vcmp.gt.f32.partialorder %v84_v46, 0.0 }
  0x7f   :  { %1531 = vrot.lane.b32.xlu0 %v11850_v35, %s11693_s18  ;;  %18200 = vst [vmem:[#allocation8_spill] sm:$0xff] %v12147_v20  ;;  %v12151_v24 = vpop.permute.xlu0 %683  ;;  %v514_v35 = vsel %vm226_vm9, %v82_v61, %v370_v11  ;;  %v372_v61 = vmul.f32 0.2, %v84_v46 }
  0x81   :  { %1563 = vrot.lane.b32.xlu1 %v11896_v12, %s11694_s20  ;;  %v12159_v12 = vpack.c.bf16 %v514_v35, %v513_v25  ;;  %v516_v11 = vsel %vm228_vm15, %v84_v46, %v372_v61  ;;  %v1126_v35 = vshrl.u32 %v12108_v42, 16  ;;  %v1142_v46 = vshll.u32 %v12155_v26, 16 }
  0x82   :  { %v12208_v25 = vpack.c.bf16 %v516_v11, %v515_v10 }
  0x83   :  { %1561 = vrot.lane.b32.xlu0 %v11869_v51, %s11694_s20  ;;  %v85_v51 = vld [vmem:[%s18049_s0 + $0x220] sm:$0xff]  ;;  %v1279_v61 = vshll.u32 %v12159_v12, 16 }
  0x84   :  { %v373_v48 = vmul.f32 0.2, %v85_v51  ;;  %vm229_vm12 = vcmp.gt.f32.partialorder %v85_v51, 0.0 }
  0x85   :  { %1031 = vrot.lane.b32.xlu1 %v12149_v23, %s11686_s28 }
  0x86   :  { %v517_v5 = vsel %vm229_vm12, %v85_v51, %v373_v48 }
  0x87   :  { %1029 = vrot.lane.b32.xlu0 %v12155_v26, %s11686_s28  ;;  %v12163_v36 = vpop.permute.xlu1 %827  ;;  %v12201_v14 = vpack.c.bf16 %v518_v9, %v517_v5  ;;  %v1140_v5 = vshrl.u32 %v12155_v26, 16  ;;  %v1144_v9 = vrot.slane %v1142_v46, 1  ;;  %v11631_v46 = vld [vmem:[%s18050_s1] sm:$0xff]  }
  0x88   :  { %v12173_v34 = vpop.permute.xlu0 %825  ;;  %11505 = vmatprep.subr.bf16.mxu0 %v11631_v46 }
  0x89   :  { %1075 = vrot.lane.b32.xlu1 %v12159_v12, %s11687_s8  ;;  %11506 = vmatpush3.bf16.msra.mxu0 %v11631_v46 }
  0x8b   :  { %1073 = vrot.lane.b32.xlu0 %v12165_v37, %s11687_s8  ;;  %v12185_v54 = vpop.permute.xlu1 %831 }
  0x8c   :  { %18201 = vst [vmem:[#allocation9_spill] sm:$0xff] %v12185_v54 }
  0x8d   :  { %v12187_v1 = vpop.permute.xlu0 %829  ;;  %1567 = vrot.lane.b32.xlu1 %v12108_v42, %s11694_s20  ;;  %v1149_v42 = vshll.u32 %v12149_v23, 16 }
  0x8e   :  { %18202 = vst [vmem:[#allocation10_spill] sm:$0xff] %v12187_v1 }
  0x8f   :  { %1565 = vrot.lane.b32.xlu0 %v11887_v4, %s11694_s20  ;;  %v12194_v0 = vpop.permute.xlu1 %971  ;;  %v1151_v58 = vrot.slane %v1149_v42, 1  ;;  %v1274_v42 = vrot.slane %v1272_v49, 1  ;;  %v1286_v49 = vshll.u32 %v12208_v25, 16 }
  0x91   :  { %v12197_v18 = vpop.permute.xlu0 %969  ;;  %1597 = vrot.lane.b32.xlu1 %v11912_v33, %s11695_s12  ;;  %v12215_v33 = vor.u32 %v1137_v22, %v1133_v17  ;;  %v12246_v11 = vor.u32 %v1151_v58, %v1147_v53  ;;  %v1277_v17 = vshrl.u32 %v12159_v12, 16  ;;  %v1281_v22 = vrot.slane %v1279_v61, 1  ;;  %v11632_v58 = vld [vmem:[%s18050_s1 + $0x8] sm:$0xff]  }
  0x92   :  { %11507 = vmatprep.subr.bf16.mxu0 %v11632_v58  ;;  %v1288_v55 = vrot.slane %v1286_v49, 1 }
  0x93   :  { %1595 = vrot.lane.b32.xlu0 %v11900_v21, %s11695_s12  ;;  %v12206_v4 = vpop.permute.xlu1 %975  ;;  %v1131_v21 = vor.u32 %v1130_v27, %v1126_v35  ;;  %18207 = vst [vmem:[#allocation15_spill] sm:$0xff] %v12246_v11  ;;  %v12254_v27 = vor.u32 %v1144_v9, %v1140_v5  ;;  %v12263_v53 = vor.u32 %v1281_v22, %v1277_v17  ;;  %v1293_v5 = vshll.u32 %v12201_v14, 16  ;;  %v11633_v17 = vld [vmem:[%s18050_s1 + $0x10] sm:$0xff]  }
  0x94   :  { %18203 = vst [vmem:[#allocation11_spill] sm:$0xff] %v12206_v4  ;;  %11508 = vmatpush3.bf16.msra.mxu0 %v11632_v58  ;;  %v1284_v58 = vshrl.u32 %v12208_v25, 16 }
  0x95   :  { %v12211_v32 = vpop.permute.xlu0 %973  ;;  %1079 = vrot.lane.b32.xlu1 %v12201_v14, %s11687_s8  ;;  %18210 = vst [vmem:[#allocation18_spill] sm:$0xff] %v12263_v53  ;;  %11509 = vmatprep.subr.bf16.mxu0 %v11633_v17 }
  0x96   :  { %18204 = vst [vmem:[#allocation12_spill] sm:$0xff] %v12211_v32  ;;  %v12312_v49 = vor.u32 %v1288_v55, %v1284_v58 }
  0x97   :  { %1077 = vrot.lane.b32.xlu0 %v12208_v25, %s11687_s8  ;;  %v12219_v51 = vpop.permute.xlu1 %1019 }
  0x98   :  { %11510 = vmatpush3.bf16.msra.mxu0 %v11633_v17  ;;  %18216 = vst [vmem:[#allocation24_spill] sm:$0xff] %v12312_v49  ;;  %v110_v17 = vld [vmem:[%s18049_s0 + $0x2e8] sm:$0x1] }
  0x99   :  { %v12221_v40 = vpop.permute.xlu0 %1017  ;;  %1219 = vrot.lane.b32.xlu1 %v12215_v33, %s11688_s9  ;;  %v398_v55 = vmul.f32 0.2, %v110_v17  ;;  %vm254_vm1 = vcmp.gt.f32.partialorder %v110_v17, 0.0 }
  0x9b   :  { %1217 = vrot.lane.b32.xlu0 %v1131_v21, %s11688_s9  ;;  %v12227_v19 = vpop.permute.xlu1 %1023  ;;  %v542_v32 = vsel %vm254_vm1, %v110_v17, %v398_v55 }
  0x9c   :  { %18205 = vst [vmem:[#allocation13_spill] sm:$0xff] %v12227_v19  ;;  %v90_v19 = vld [vmem:[%s18049_s0 + $0x248] sm:$0x1] }
  0x9d   :  { %v12230_v48 = vpop.permute.xlu0 %1021  ;;  %1601 = vrot.lane.b32.xlu1 %v12165_v37, %s11695_s12  ;;  %v378_v17 = vmul.f32 0.2, %v90_v19  ;;  %vm234_vm9 = vcmp.gt.f32.partialorder %v90_v19, 0.0 }
  0x9e   :  { %18206 = vst [vmem:[#allocation14_spill] sm:$0xff] %v12230_v48 }
  0x9f   :  { %1599 = vrot.lane.b32.xlu0 %v11907_v28, %s11695_s12  ;;  %v12238_v29 = vpop.permute.xlu1 %1067  ;;  %v1270_v28 = vshrl.u32 %v12165_v37, 16 }
  0xa1   :  { %v12242_v10 = vpop.permute.xlu0 %1065  ;;  %1643 = vrot.lane.b32.xlu1 %v11931_v56, %s11696_s13  ;;  %v12269_v37 = vor.u32 %v1274_v42, %v1270_v28  ;;  %v1291_v28 = vshrl.u32 %v12201_v14, 16  ;;  %v1295_v42 = vrot.slane %v1293_v5, 1 }
  0xa3   :  { %1641 = vrot.lane.b32.xlu0 %v11917_v39, %s11696_s13  ;;  %v12252_v35 = vpop.permute.xlu1 %1071 }
  0xa4   :  { %18208 = vst [vmem:[#allocation16_spill] sm:$0xff] %v12252_v35 }
  0xa5   :  { %v12259_v56 = vpop.permute.xlu0 %1069  ;;  %1223 = vrot.lane.b32.xlu1 %v12246_v11, %s11688_s9 }
  0xa6   :  { %18209 = vst [vmem:[#allocation17_spill] sm:$0xff] %v12259_v56 }
  0xa7   :  { %1221 = vrot.lane.b32.xlu0 %v12254_v27, %s11688_s9  ;;  %v12267_v39 = vpop.permute.xlu1 %1211 }
  0xa9   :  { %v12274_v61 = vpop.permute.xlu0 %1209  ;;  %1363 = vrot.lane.b32.xlu1 %v12263_v53, %s11689_s15  ;;  %v11634_v53 = vld [vmem:[%s18050_s1 + $0x18] sm:$0xff]  }
  0xaa   :  { %11511 = vmatprep.subr.bf16.mxu0 %v11634_v53 }
  0xab   :  { %1361 = vrot.lane.b32.xlu0 %v12269_v37, %s11689_s15  ;;  %v12281_v9 = vpop.permute.xlu1 %1215  ;;  %11512 = vmatpush3.bf16.msra.mxu0 %v11634_v53  ;;  %v107_v53 = vld [vmem:[%s18049_s0 + $0x2d0] sm:$0xff] }
  0xac   :  { %18211 = vst [vmem:[#allocation19_spill] sm:$0xff] %v12281_v9  ;;  %v395_v56 = vmul.f32 0.2, %v107_v53  ;;  %vm251_vm2 = vcmp.gt.f32.partialorder %v107_v53, 0.0 }
  0xad   :  { %v12287_v22 = vpop.permute.xlu0 %1213  ;;  %1647 = vrot.lane.b32.xlu1 %v1131_v21, %s11696_s13  ;;  %v12303_v21 = vor.u32 %v1295_v42, %v1291_v28  ;;  %v33_v42 = vld [vmem:[%s18049_s0 + $0x80] sm:$0xff] }
  0xae   :  { %18212 = vst [vmem:[#allocation20_spill] sm:$0xff] %v12287_v22  ;;  %v321_v48 = vmul.f32 0.2, %v33_v42  ;;  %vm177_vm4 = vcmp.gt.f32.partialorder %v33_v42, 0.0 }
  0xaf   :  { %1645 = vrot.lane.b32.xlu0 %v11926_v50, %s11696_s13  ;;  %v12293_v46 = vpop.permute.xlu1 %1355  ;;  %18214 = vst [vmem:[#allocation22_spill] sm:$0xff] %v12303_v21  ;;  %v109_v50 = vld [vmem:[%s18049_s0 + $0x2e0] sm:$0xff] }
  0xb0   :  { %v397_v28 = vmul.f32 0.2, %v109_v50  ;;  %vm253_vm0 = vcmp.gt.f32.partialorder %v109_v50, 0.0 }
  0xb1   :  { %v12299_v22 = vpop.permute.xlu0 %1353  ;;  %1689 = vrot.lane.b32.xlu1 %v11962_v16, %s11697_s26 }
  0xb2   :  { %18213 = vst [vmem:[#allocation21_spill] sm:$0xff] %v12299_v22  ;;  %v541_v35 = vsel %vm253_vm0, %v109_v50, %v397_v28  ;;  %v539_v50 = vsel %vm251_vm2, %v107_v53, %v395_v56  ;;  %v111_v53 = vld [vmem:[%s18049_s0 + $0x2f0] sm:$0xff] }
  0xb3   :  { %1687 = vrot.lane.b32.xlu0 %v11936_v60, %s11697_s26  ;;  %v12310_v5 = vpop.permute.xlu1 %1359  ;;  %v108_v60 = vld [vmem:[%s18049_s0 + $0x2d8] sm:$0x1]  ;;  %vm255_vm12 = vcmp.gt.f32.partialorder %v111_v53, 0.0 }
  0xb4   :  { %18215 = vst [vmem:[#allocation23_spill] sm:$0xff] %v12310_v5  ;;  %v92_v5 = vld [vmem:[%s18049_s0 + $0x258] sm:$0x1]  ;;  %v396_v11 = vmul.f32 0.2, %v108_v60  ;;  %vm252_vm3 = vcmp.gt.f32.partialorder %v108_v60, 0.0 }
  0xb5   :  { %v12317_v16 = vpop.permute.xlu0 %1357  ;;  %1367 = vrot.lane.b32.xlu1 %v12303_v21, %s11689_s15  ;;  %v34_v21 = vld [vmem:[%s18049_s0 + $0x88] sm:$0x1]  ;;  %v380_v54 = vmul.f32 0.2, %v92_v5  ;;  %vm236_vm7 = vcmp.gt.f32.partialorder %v92_v5, 0.0 }
  0xb6   :  { %18217 = vst [vmem:[#allocation25_spill] sm:$0xff] %v12317_v16  ;;  %v91_v16 = vld [vmem:[%s18049_s0 + $0x250] sm:$0xff]  ;;  %v322_v4 = vmul.f32 0.2, %v34_v21  ;;  %vm178_vm5 = vcmp.gt.f32.partialorder %v34_v21, 0.0  ;;  %v540_v28 = vsel %vm252_vm3, %v108_v60, %v396_v11  ;;  %v465_v11 = vsel %vm177_vm4, %v33_v42, %v321_v48 }
  0xb7   :  { %1365 = vrot.lane.b32.xlu0 %v12312_v49, %s11689_s15  ;;  %v12332_v58 = vpop.permute.xlu1 %1403  ;;  %v89_v49 = vld [vmem:[%s18049_s0 + $0x240] sm:$0xff]  ;;  %v379_v1 = vmul.f32 0.2, %v91_v16  ;;  %vm235_vm6 = vcmp.gt.f32.partialorder %v91_v16, 0.0  ;;  %v112_v60 = vld [vmem:[%s18049_s0 + $0x2f8] sm:$0x1]  ;;  %v522_v42 = vsel %vm234_vm9, %v90_v19, %v378_v17 }
  0xb8   :  { %18218 = vst [vmem:[#allocation26_spill] sm:$0xff] %v12332_v58  ;;  %vm233_vm8 = vcmp.gt.f32.partialorder %v89_v49, 0.0  ;;  %v466_v56 = vsel %vm178_vm5, %v34_v21, %v322_v4  ;;  %vm256_vm13 = vcmp.gt.f32.partialorder %v112_v60, 0.0 }
  0xb9   :  { %v12346_v9 = vpop.permute.xlu0 %1401  ;;  %1411 = vrot.lane.b32.xlu1 %v12041_v45, %s11690_s30  ;;  %v113_v45 = vld [vmem:[%s18049_s0 + $0x300] sm:$0xff] }
  0xba   :  { %18219 = vst [vmem:[#allocation27_spill] sm:$0xff] %v12346_v9  ;;  %v377_v9 = vmul.f32 0.2, %v89_v49  ;;  %vm257_vm10 = vcmp.gt.f32.partialorder %v113_v45, 0.0  ;;  %v401_v4 = vmul.f32 0.2, %v113_v45 }
  0xbb   :  { %1409 = vrot.lane.b32.xlu0 %v12001_v59, %s11690_s30  ;;  %v12355_v22 = vpop.permute.xlu1 %691  ;;  %v12364_v59 = vpack.c.bf16 %v542_v32, %v541_v35  ;;  %v524_v32 = vsel %vm236_vm7, %v92_v5, %v380_v54  ;;  %v399_v54 = vmul.f32 0.2, %v111_v53  ;;  %v400_v5 = vmul.f32 0.2, %v112_v60 }
  0xbc   :  { %18220 = vst [vmem:[#allocation28_spill] sm:$0xff] %v12355_v22  ;;  %v114_v22 = vld [vmem:[%s18049_s0 + $0x308] sm:$0x1]  ;;  %v521_v21 = vsel %vm233_vm8, %v89_v49, %v377_v9  ;;  %v95_v9 = vld [vmem:[%s18049_s0 + $0x270] sm:$0xff]  ;;  %v96_v49 = vld [vmem:[%s18049_s0 + $0x278] sm:$0x1] }
  0xbd   :  { %v12360_v55 = vpop.permute.xlu0 %689  ;;  %1693 = vrot.lane.b32.xlu1 %v12269_v37, %s11697_s26  ;;  %18222 = vst [vmem:[#allocation30_spill] sm:$0xff] %v12364_v59  ;;  %v523_v37 = vsel %vm235_vm6, %v91_v16, %v379_v1  ;;  %v402_v48 = vmul.f32 0.2, %v114_v22  ;;  %v12387_v1 = vpack.c.bf16 %v466_v56, %v465_v11  ;;  %vm258_vm11 = vcmp.gt.f32.partialorder %v114_v22, 0.0 }
  0xbe   :  { %18221 = vst [vmem:[#allocation29_spill] sm:$0xff] %v12360_v55  ;;  %v12381_v55 = vpack.c.bf16 %v540_v28, %v539_v50  ;;  %v12389_v16 = vpack.c.bf16 %v524_v32, %v523_v37  ;;  %v12395_v19 = vpack.c.bf16 %v522_v42, %v521_v21  ;;  %v545_v50 = vsel %vm257_vm10, %v113_v45, %v401_v4  ;;  %v93_v32 = vld [vmem:[%s18049_s0 + $0x260] sm:$0xff]  ;;  %v94_v21 = vld [vmem:[%s18049_s0 + $0x268] sm:$0x1] }
  0xbf   :  { %1691 = vrot.lane.b32.xlu0 %v11950_v8, %s11697_s26  ;;  %v12379_v35 = vpop.permute.xlu1 %1407  ;;  %v546_v17 = vsel %vm258_vm11, %v114_v22, %v402_v48  ;;  %v543_v11 = vsel %vm255_vm12, %v111_v53, %v399_v54  ;;  %v544_v56 = vsel %vm256_vm13, %v112_v60, %v400_v5  ;;  %v383_v42 = vmul.f32 0.2, %v95_v9  ;;  %v51_v53 = vld [vmem:[%s18049_s0 + $0x110] sm:$0xff]  ;;  %v52_v60 = vld [vmem:[%s18049_s0 + $0x118] sm:$0x1] }
  0xc0   :  { %18223 = vst [vmem:[#allocation31_spill] sm:$0xff] %v12379_v35  ;;  %18225 = vst [vmem:[#allocation33_spill] sm:$0xff] %v12389_v16  ;;  %v779_v37 = vshll.u32 %v12389_v16, 16  ;;  %v384_v45 = vmul.f32 0.2, %v96_v49  ;;  %v772_v22 = vshll.u32 %v12395_v19, 16  ;;  %v12426_v48 = vpack.c.bf16 %v546_v17, %v545_v50 }
  0xc1   :  { %v12383_v52 = vpop.permute.xlu0 %1405  ;;  %699 = vrot.lane.b32.xlu1 %v12364_v59, %s11683_s7  ;;  %18227 = vst [vmem:[#allocation35_spill] sm:$0xff] %v12395_v19  ;;  %vm239_vm14 = vcmp.gt.f32.partialorder %v95_v9, 0.0  ;;  %vm240_vm15 = vcmp.gt.f32.partialorder %v96_v49, 0.0  ;;  %v12428_v54 = vpack.c.bf16 %v544_v56, %v543_v11  ;;  %v381_v5 = vmul.f32 0.2, %v93_v32 }
  0xc2   :  { %18224 = vst [vmem:[#allocation32_spill] sm:$0xff] %v12383_v52  ;;  %18230 = vst [vmem:[#allocation38_spill] sm:$0xff] %v12426_v48  ;;  %v781_v35 = vrot.slane %v779_v37, 1  ;;  %vm237_vm0 = vcmp.gt.f32.partialorder %v93_v32, 0.0  ;;  %vm238_vm1 = vcmp.gt.f32.partialorder %v94_v21, 0.0  ;;  %v527_v20 = vsel %vm239_vm14, %v95_v9, %v383_v42 }
  0xc3   :  { %697 = vrot.lane.b32.xlu0 %v12381_v55, %s11683_s7  ;;  %v12393_v8 = vpop.permute.xlu1 %1437  ;;  %18231 = vst [vmem:[#allocation39_spill] sm:$0xff] %v12428_v54  ;;  %v528_v58 = vsel %vm240_vm15, %v96_v49, %v384_v45  ;;  %v770_v17 = vshrl.u32 %v12395_v19, 16  ;;  %v774_v11 = vrot.slane %v772_v22, 1  ;;  %vm195_vm2 = vcmp.gt.f32.partialorder %v51_v53, 0.0 }
  0xc4   :  { %18226 = vst [vmem:[#allocation34_spill] sm:$0xff] %v12393_v8  ;;  %v340_v8 = vmul.f32 0.2, %v52_v60  ;;  %vm196_vm3 = vcmp.gt.f32.partialorder %v52_v60, 0.0  ;;  %v12446_v9 = vpack.c.bf16 %v528_v58, %v527_v20  ;;  %v1468_v19 = vshrl.u32 %v12387_v1, 16 }
  0xc5   :  { %v12404_v28 = vpop.permute.xlu0 %1435  ;;  %1415 = vrot.lane.b32.xlu1 %v12387_v1, %s11690_s30  ;;  %v775_v45 = vor.u32 %v774_v11, %v770_v17  ;;  %v1470_v11 = vshll.u32 %v12387_v1, 16 }
  0xc6   :  { %18228 = vst [vmem:[#allocation36_spill] sm:$0xff] %v12404_v28  ;;  %v339_v28 = vmul.f32 0.2, %v51_v53  ;;  %18236 = vst [vmem:[#allocation44_spill] sm:$0xff] %v12446_v9  ;;  %v793_v20 = vshll.u32 %v12446_v9, 16 }
  0xc7   :  { %1413 = vrot.lane.b32.xlu0 %v12037_v41, %s11690_s30  ;;  %v12417_v4 = vpop.permute.xlu1 %695  ;;  %v382_v41 = vmul.f32 0.2, %v94_v21 }
  0xc8   :  { %18229 = vst [vmem:[#allocation37_spill] sm:$0xff] %v12417_v4  ;;  %v777_v4 = vshrl.u32 %v12389_v16, 16  ;;  %v483_v49 = vsel %vm195_vm2, %v51_v53, %v339_v28  ;;  %v791_v28 = vshrl.u32 %v12446_v9, 16  ;;  %v916_v53 = vshll.u32 %v12381_v55, 16 }
  0xc9   :  { %v12430_v52 = vpop.permute.xlu0 %693  ;;  %1445 = vrot.lane.b32.xlu1 %v12030_v31, %s11691_s27  ;;  %v525_v31 = vsel %vm237_vm0, %v93_v32, %v381_v5  ;;  %v526_v56 = vsel %vm238_vm1, %v94_v21, %v382_v41  ;;  %v795_v21 = vrot.slane %v793_v20, 1 }
  0xca   :  { %18232 = vst [vmem:[#allocation40_spill] sm:$0xff] %v12430_v52  ;;  %v12444_v37 = vor.u32 %v781_v35, %v777_v4  ;;  %v12452_v22 = vpack.c.bf16 %v526_v56, %v525_v31  ;;  %v923_v4 = vshll.u32 %v12364_v59, 16 }
  0xcb   :  { %1443 = vrot.lane.b32.xlu0 %v11979_v38, %s11691_s27  ;;  %v12437_v50 = vpop.permute.xlu1 %835  ;;  %v484_v38 = vsel %vm196_vm3, %v52_v60, %v340_v8  ;;  %v12482_v56 = vor.u32 %v795_v21, %v791_v28  ;;  %v937_v21 = vshll.u32 %v12426_v48, 16 }
  0xcc   :  { %18233 = vst [vmem:[#allocation41_spill] sm:$0xff] %v12437_v50  ;;  %18235 = vst [vmem:[#allocation43_spill] sm:$0xff] %v12444_v37  ;;  %v12458_v32 = vpack.c.bf16 %v484_v38, %v483_v49  ;;  %v786_v35 = vshll.u32 %v12452_v22, 16  ;;  %v784_v5 = vshrl.u32 %v12452_v22, 16  ;;  %v921_v49 = vshrl.u32 %v12364_v59, 16 }
  0xcd   :  { %v12440_v52 = vpop.permute.xlu0 %833  ;;  %703 = vrot.lane.b32.xlu1 %v12426_v48, %s11683_s7  ;;  %18237 = vst [vmem:[#allocation45_spill] sm:$0xff] %v12452_v22  ;;  %18240 = vst [vmem:[#allocation48_spill] sm:$0xff] %v12482_v56  ;;  %v925_v38 = vrot.slane %v923_v4, 1 }
  0xce   :  { %18234 = vst [vmem:[#allocation42_spill] sm:$0xff] %v12440_v52  ;;  %v788_v17 = vrot.slane %v786_v35, 1 }
  0xcf   :  { %701 = vrot.lane.b32.xlu0 %v12428_v54, %s11683_s7  ;;  %v12450_v42 = vpop.permute.xlu1 %1441 }
  0xd0   :  { %v12490_v35 = vor.u32 %v788_v17, %v784_v5  ;;  %v127_v5 = vld [vmem:[%s18049_s0 + $0x370] sm:$0xff]  ;;  %v128_v17 = vld [vmem:[%s18049_s0 + $0x378] sm:$0x1] }
  0xd1   :  { %v12454_v41 = vpop.permute.xlu0 %1439  ;;  %843 = vrot.lane.b32.xlu1 %v12444_v37, %s11684_s22  ;;  %vm271_vm4 = vcmp.gt.f32.partialorder %v127_v5, 0.0  ;;  %vm272_vm5 = vcmp.gt.f32.partialorder %v128_v17, 0.0 }
  0xd2   :  { %18242 = vst [vmem:[#allocation50_spill] sm:$0xff] %v12490_v35 }
  0xd3   :  { %841 = vrot.lane.b32.xlu0 %v775_v45, %s11684_s22  ;;  %v12462_v58 = vpop.permute.xlu1 %1483  ;;  %v914_v45 = vshrl.u32 %v12381_v55, 16 }
  0xd5   :  { %v12465_v8 = vpop.permute.xlu0 %1481  ;;  %1449 = vrot.lane.b32.xlu1 %v12458_v32, %s11691_s27 }
  0xd7   :  { %1447 = vrot.lane.b32.xlu0 %v12022_v15, %s11691_s27  ;;  %v12474_v60 = vpop.permute.xlu1 %839  ;;  %v918_v15 = vrot.slane %v916_v53, 1  ;;  %v930_v53 = vshll.u32 %v12428_v54, 16 }
  0xd8   :  { %18238 = vst [vmem:[#allocation46_spill] sm:$0xff] %v12474_v60 }
  0xd9   :  { %v12478_v31 = vpop.permute.xlu0 %837  ;;  %1491 = vrot.lane.b32.xlu1 %v12063_v3, %s11692_s29  ;;  %v12497_v3 = vor.u32 %v925_v38, %v921_v49  ;;  %v125_v49 = vld [vmem:[%s18049_s0 + $0x360] sm:$0xff]  ;;  %v126_v38 = vld [vmem:[%s18049_s0 + $0x368] sm:$0x1] }
  0xda   :  { %18239 = vst [vmem:[#allocation47_spill] sm:$0xff] %v12478_v31  ;;  %v1472_v31 = vrot.slane %v1470_v11, 1  ;;  %vm269_vm6 = vcmp.gt.f32.partialorder %v125_v49, 0.0  ;;  %vm270_vm7 = vcmp.gt.f32.partialorder %v126_v38, 0.0 }
  0xdb   :  { %1489 = vrot.lane.b32.xlu0 %v12035_v13, %s11692_s29  ;;  %v12488_v20 = vpop.permute.xlu1 %979  ;;  %18244 = vst [vmem:[#allocation52_spill] sm:$0xff] %v12497_v3  ;;  %v919_v13 = vor.u32 %v918_v15, %v914_v45  ;;  %v415_v45 = vmul.f32 0.2, %v127_v5  ;;  %v416_v15 = vmul.f32 0.2, %v128_v17 }
  0xdc   :  { %18241 = vst [vmem:[#allocation49_spill] sm:$0xff] %v12488_v20  ;;  %v1473_v1 = vor.u32 %v1472_v31, %v1468_v19  ;;  %v935_v19 = vshrl.u32 %v12426_v48, 16  ;;  %v939_v31 = vrot.slane %v937_v21, 1  ;;  %v413_v21 = vmul.f32 0.2, %v125_v49 }
  0xdd   :  { %v12493_v60 = vpop.permute.xlu0 %977  ;;  %847 = vrot.lane.b32.xlu1 %v12482_v56, %s11684_s22  ;;  %v414_v20 = vmul.f32 0.2, %v126_v38  ;;  %v70_v48 = vld [vmem:[%s18049_s0 + $0x1a8] sm:$0x1] }
  0xde   :  { %18243 = vst [vmem:[#allocation51_spill] sm:$0xff] %v12493_v60  ;;  %v932_v60 = vrot.slane %v930_v53, 1  ;;  %v12537_v50 = vor.u32 %v939_v31, %v935_v19  ;;  %v557_v37 = vsel %vm269_vm6, %v125_v49, %v413_v21  ;;  %v1514_v19 = vshrl.u32 %v12458_v32, 16  ;;  %v129_v31 = vld [vmem:[%s18049_s0 + $0x380] sm:$0xff] }
  0xdf   :  { %845 = vrot.lane.b32.xlu0 %v12490_v35, %s11684_s22  ;;  %v12501_v55 = vpop.permute.xlu1 %1487  ;;  %vm273_vm10 = vcmp.gt.f32.partialorder %v129_v31, 0.0  ;;  %v358_v16 = vmul.f32 0.2, %v70_v48  ;;  %vm214_vm1 = vcmp.gt.f32.partialorder %v70_v48, 0.0 }
  0xe0   :  { %18247 = vst [vmem:[#allocation55_spill] sm:$0xff] %v12537_v50 }
  0xe1   :  { %v12503_v28 = vpop.permute.xlu0 %1485  ;;  %987 = vrot.lane.b32.xlu1 %v12497_v3, %s11685_s10  ;;  %v559_v3 = vsel %vm271_vm4, %v127_v5, %v415_v45  ;;  %v145_v45 = vld [vmem:[%s18049_s0 + $0x400] sm:$0xff] }
  0xe2   :  { %vm289_vm12 = vcmp.gt.f32.partialorder %v145_v45, 0.0 }
  0xe3   :  { %985 = vrot.lane.b32.xlu0 %v919_v13, %s11685_s10  ;;  %v12509_v4 = vpop.permute.xlu1 %1529 }
  0xe5   :  { %v12518_v11 = vpop.permute.xlu0 %1527  ;;  %1495 = vrot.lane.b32.xlu1 %v1473_v1, %s11692_s29  ;;  %v928_v1 = vshrl.u32 %v12428_v54, 16 }
  0xe7   :  { %1493 = vrot.lane.b32.xlu0 %v12058_v62, %s11692_s29  ;;  %v12530_v13 = vpop.permute.xlu1 %983  ;;  %v1516_v62 = vshll.u32 %v12458_v32, 16  ;;  %v12544_v56 = vor.u32 %v932_v60, %v928_v1  ;;  %v131_v60 = vld [vmem:[%s18049_s0 + $0x390] sm:$0xff] }
  0xe8   :  { %18245 = vst [vmem:[#allocation53_spill] sm:$0xff] %v12530_v13  ;;  %v560_v13 = vsel %vm272_vm5, %v128_v17, %v416_v15  ;;  %vm275_vm8 = vcmp.gt.f32.partialorder %v131_v60, 0.0  ;;  %v146_v15 = vld [vmem:[%s18049_s0 + $0x408] sm:$0x1] }
  0xe9   :  { %v12533_v52 = vpop.permute.xlu0 %981  ;;  %1537 = vrot.lane.b32.xlu1 %v12100_v7, %s11693_s18  ;;  %18249 = vst [vmem:[#allocation57_spill] sm:$0xff] %v12544_v56  ;;  %v12550_v7 = vpack.c.bf16 %v560_v13, %v559_v3  ;;  %v1518_v5 = vrot.slane %v1516_v62, 1  ;;  %v417_v13 = vmul.f32 0.2, %v129_v31  ;;  %v143_v62 = vld [vmem:[%s18049_s0 + $0x3f0] sm:$0xff]  ;;  %vm290_vm13 = vcmp.gt.f32.partialorder %v146_v15, 0.0 }
  0xea   :  { %18246 = vst [vmem:[#allocation54_spill] sm:$0xff] %v12533_v52  ;;  %v558_v52 = vsel %vm270_vm7, %v126_v38, %v414_v20  ;;  %v132_v20 = vld [vmem:[%s18049_s0 + $0x398] sm:$0x1]  ;;  %vm287_vm14 = vcmp.gt.f32.partialorder %v143_v62, 0.0 }
  0xeb   :  { %1535 = vrot.lane.b32.xlu0 %v12068_v6, %s11693_s18  ;;  %v12542_v53 = vpop.permute.xlu1 %1027  ;;  %v12557_v17 = vpack.c.bf16 %v558_v52, %v557_v37  ;;  %v1519_v32 = vor.u32 %v1518_v5, %v1514_v19  ;;  %v130_v52 = vld [vmem:[%s18049_s0 + $0x388] sm:$0x1]  ;;  %v419_v37 = vmul.f32 0.2, %v131_v60  ;;  %v420_v49 = vmul.f32 0.2, %v132_v20 }
  0xec   :  { %18248 = vst [vmem:[#allocation56_spill] sm:$0xff] %v12542_v53  ;;  %vm276_vm9 = vcmp.gt.f32.partialorder %v132_v20, 0.0  ;;  %v418_v1 = vmul.f32 0.2, %v130_v52  ;;  %vm274_vm11 = vcmp.gt.f32.partialorder %v130_v52, 0.0  ;;  %v561_v59 = vsel %vm273_vm10, %v129_v31, %v417_v13 }
  0xed   :  { %v12546_v35 = vpop.permute.xlu0 %1025  ;;  %991 = vrot.lane.b32.xlu1 %v12537_v50, %s11685_s10  ;;  %v144_v19 = vld [vmem:[%s18049_s0 + $0x3f8] sm:$0x1]  ;;  %v563_v5 = vsel %vm275_vm8, %v131_v60, %v419_v37  ;;  %v433_v53 = vmul.f32 0.2, %v145_v45  ;;  %v434_v50 = vmul.f32 0.2, %v146_v15 }
  0xee   :  { %18250 = vst [vmem:[#allocation58_spill] sm:$0xff] %v12546_v35  ;;  %v564_v35 = vsel %vm276_vm9, %v132_v20, %v420_v49  ;;  %v562_v60 = vsel %vm274_vm11, %v130_v52, %v418_v1  ;;  %v431_v20 = vmul.f32 0.2, %v143_v62  ;;  %v432_v37 = vmul.f32 0.2, %v144_v19 }
  0xef   :  { %989 = vrot.lane.b32.xlu0 %v12544_v56, %s11685_s10  ;;  %v12555_v6 = vpop.permute.xlu1 %1533  ;;  %vm288_vm15 = vcmp.gt.f32.partialorder %v144_v19, 0.0  ;;  %v578_v54 = vsel %vm290_vm13, %v146_v15, %v434_v50  ;;  %v12614_v52 = vpack.c.bf16 %v562_v60, %v561_v59  ;;  %v150_v15 = vld [vmem:[%s18049_s0 + $0x428] sm:$0x1]  ;;  %vm18110_vm8 = vcmask 31744  }
  0xf0   :  { %v575_v13 = vsel %vm287_vm14, %v143_v62, %v431_v20  ;;  %v576_v1 = vsel %vm288_vm15, %v144_v19, %v432_v37  ;;  %vm294_vm3 = vcmp.gt.f32.partialorder %v150_v15, 0.0  ;;  %v1163_v20 = vshll.u32 %v12550_v7, 16 }
  0xf1   :  { %v12565_v3 = vpop.permute.xlu0 %1531  ;;  %1035 = vrot.lane.b32.xlu1 %v12550_v7, %s11686_s28  ;;  %v12626_v59 = vpack.c.bf16 %v576_v1, %v575_v13  ;;  %vm1752_vm9 = vcmask 64512   ;;  %vm18109_vm10 = vcmask 97280   ;;  %vm1818_vm11 = vcmask 130048  }
  0xf2   :  { %vm1884_vm13 = vcmask 195584   ;;  %vm18081_vm14 = vcmask 228352   ;;  %vm18079_vm15 = vcmask 261120  }
  0xf3   :  { %1033 = vrot.lane.b32.xlu0 %v12557_v17, %s11686_s28  ;;  %v12577_v38 = vpop.permute.xlu1 %1563 }
  0xf5   :  { %v12585_v21 = vpop.permute.xlu0 %1561  ;;  %1541 = vrot.lane.b32.xlu1 %v1519_v32, %s11693_s18  ;;  %v69_v32 = vld [vmem:[%s18049_s0 + $0x1a0] sm:$0xff] }
  0xf6   :  { %v357_v9 = vmul.f32 0.2, %v69_v32  ;;  %vm213_vm0 = vcmp.gt.f32.partialorder %v69_v32, 0.0 }
  0xf7   :  { %1539 = vrot.lane.b32.xlu0 %v12096_v30, %s11693_s18  ;;  %v12596_v56 = vpop.permute.xlu1 %1031  ;;  %v12608_v30 = vpack.c.bf16 %v564_v35, %v563_v5 }
  0xf8   :  { %18251 = vst [vmem:[#allocation59_spill] sm:$0xff] %v12596_v56  ;;  %v577_v56 = vsel %vm289_vm12, %v145_v45, %v433_v53  ;;  %v501_v50 = vsel %vm213_vm0, %v69_v32, %v357_v9  ;;  %v502_v53 = vsel %vm214_vm1, %v70_v48, %v358_v16  ;;  %v149_v45 = vld [vmem:[%s18049_s0 + $0x420] sm:$0xff]  ;;  %v147_v48 = vld [vmem:[%s18049_s0 + $0x410] sm:$0xff]  ;;  %vm1851_vm12 = vcmask 162816  }
  0xf9   :  { %v12604_v49 = vpop.permute.xlu0 %1029  ;;  %1571 = vrot.lane.b32.xlu1 %v12155_v26, %s11694_s20  ;;  %v12620_v35 = vpack.c.bf16 %v578_v54, %v577_v56  ;;  %v12638_v16 = vpack.c.bf16 %v502_v53, %v501_v50  ;;  %v148_v54 = vld [vmem:[%s18049_s0 + $0x418] sm:$0x1]  ;;  %v437_v9 = vmul.f32 0.2, %v149_v45  ;;  %v438_v56 = vmul.f32 0.2, %v150_v15 }
  0xfa   :  { %18252 = vst [vmem:[#allocation60_spill] sm:$0xff] %v12604_v49  ;;  %vm293_vm2 = vcmp.gt.f32.partialorder %v149_v45, 0.0  ;;  %v435_v5 = vmul.f32 0.2, %v147_v48  ;;  %v436_v32 = vmul.f32 0.2, %v148_v54 }
  0xfb   :  { %1569 = vrot.lane.b32.xlu0 %v12104_v43, %s11694_s20  ;;  %v12612_v31 = vpop.permute.xlu1 %1075  ;;  %vm291_vm4 = vcmp.gt.f32.partialorder %v147_v48, 0.0  ;;  %vm292_vm5 = vcmp.gt.f32.partialorder %v148_v54, 0.0  ;;  %v581_v37 = vsel %vm293_vm2, %v149_v45, %v437_v9  ;;  %v582_v13 = vsel %vm294_vm3, %v150_v15, %v438_v56  ;;  %v87_v53 = vld [vmem:[%s18049_s0 + $0x230] sm:$0xff]  ;;  %v88_v49 = vld [vmem:[%s18049_s0 + $0x238] sm:$0x1] }
  0xfc   :  { %18253 = vst [vmem:[#allocation61_spill] sm:$0xff] %v12612_v31  ;;  %v1156_v50 = vshll.u32 %v12557_v17, 16  ;;  %v580_v31 = vsel %vm292_vm5, %v148_v54, %v436_v32  ;;  %v1161_v45 = vshrl.u32 %v12550_v7, 16  ;;  %v1165_v15 = vrot.slane %v1163_v20, 1 }
  0xfd   :  { %v12616_v26 = vpop.permute.xlu0 %1073  ;;  %1039 = vrot.lane.b32.xlu1 %v12608_v30, %s11686_s28  ;;  %v1154_v9 = vshrl.u32 %v12557_v17, 16  ;;  %v375_v56 = vmul.f32 0.2, %v87_v53  ;;  %vm231_vm6 = vcmp.gt.f32.partialorder %v87_v53, 0.0  ;;  %vm232_vm7 = vcmp.gt.f32.partialorder %v88_v49, 0.0 }
  0xfe   :  { %18254 = vst [vmem:[#allocation62_spill] sm:$0xff] %v12616_v26  ;;  %v579_v26 = vsel %vm291_vm4, %v147_v48, %v435_v5  ;;  %v1158_v54 = vrot.slane %v1156_v50, 1  ;;  %v12684_v5 = vor.u32 %v1165_v15, %v1161_v45  ;;  %v1721_v15 = vsel %vm18110_vm8, %v11793_v47, %v12134_v63 }
  0xff   :  { %1037 = vrot.lane.b32.xlu0 %v12614_v52, %s11686_s28  ;;  %v12624_v43 = vpop.permute.xlu1 %1567  ;;  %v12678_v48 = vpack.c.bf16 %v580_v31, %v579_v26  ;;  %v519_v17 = vsel %vm231_vm6, %v87_v53, %v375_v56  ;;  %v1175_v53 = vshrl.u32 %v12608_v30, 16  ;;  %vm18080_vm0 = vcmask 293888  }
 0x100   :  { %v1159_v20 = vor.u32 %v1158_v54, %v1154_v9  ;;  %v1723_v9 = vsel %vm18110_vm8, %v11791_v44, %v12151_v24  ;;  %v1754_v47 = vsel %vm1752_vm9, %v1721_v15, %v12173_v34  ;;  %v1305_v63 = vshrl.u32 %v12620_v35, 16 }
 0x101   :  { %v12634_v62 = vpop.permute.xlu0 %1565  ;;  %1083 = vrot.lane.b32.xlu1 %v12620_v35, %s11687_s8  ;;  %v1756_v56 = vsel %vm1752_vm9, %v1723_v9, %v12163_v36  ;;  %v1787_v36 = vsel %vm18109_vm10, %v1754_v47, %v12197_v18  ;;  %v1630_v34 = vshll.u32 %v12638_v16, 16  ;;  %vm2016_vm1 = vcmask 326656   ;;  %v18257_v9 = vld [vmem:[#allocation26_spill] sm:$0xff] }
 0x102   :  { %18255 = vst [vmem:[#allocation63_spill] sm:$0xff] %v12634_v62  ;;  %v1789_v44 = vsel %vm18109_vm10, %v1756_v56, %v12194_v0  ;;  %v1820_v0 = vsel %vm1818_vm11, %v1787_v36, %v12221_v40  ;;  %vm18082_vm2 = vcmask 359424   ;;  %v1725_v40 = vsel %vm18110_vm8, %v11806_v2, %v12126_v57  ;;  %v18261_v47 = vld [vmem:[#allocation34_spill] sm:$0xff] }
 0x103   :  { %1081 = vrot.lane.b32.xlu0 %v12626_v59, %s11687_s8  ;;  %v12648_v19 = vpop.permute.xlu1 %1597  ;;  %v1628_v2 = vshrl.u32 %v12638_v16, 16  ;;  %v1632_v57 = vrot.slane %v1630_v34, 1  ;;  %vm18085_vm3 = vcmask 392192   ;;  %vm18084_vm4 = vcmask 424960  }
 0x104   :  { %vm18083_vm5 = vcmask 457728   ;;  %vm2181_vm6 = vcmask 490496  }
 0x105   :  { %v12650_v60 = vpop.permute.xlu0 %1595  ;;  %1575 = vrot.lane.b32.xlu1 %v12638_v16, %s11694_s20 }
 0x107   :  { %1573 = vrot.lane.b32.xlu0 %v12149_v23, %s11694_s20  ;;  %v12657_v1 = vpop.permute.xlu1 %1079  ;;  %v12670_v23 = vpack.c.bf16 %v582_v13, %v581_v37  ;;  %v1177_v37 = vshll.u32 %v12608_v30, 16  ;;  %v1170_v13 = vshll.u32 %v12614_v52, 16 }
 0x108   :  { %18256 = vst [vmem:[#allocation64_spill] sm:$0xff] %v12657_v1  ;;  %v376_v1 = vmul.f32 0.2, %v88_v49 }
 0x109   :  { %v12666_v22 = vpop.permute.xlu0 %1077  ;;  %1605 = vrot.lane.b32.xlu1 %v12208_v25, %s11695_s12  ;;  %v1179_v45 = vrot.slane %v1177_v37, 1 }
 0x10a   :  { %v520_v32 = vsel %vm232_vm7, %v88_v49, %v376_v1  ;;  %v1307_v1 = vshll.u32 %v12620_v35, 16  ;;  %vm2286_vm7 = vcmask 523264  }
 0x10b   :  { %1603 = vrot.lane.b32.xlu0 %v12159_v12, %s11695_s12  ;;  %v12676_v62 = vpop.permute.xlu1 %1219  ;;  %v12694_v26 = vpack.c.bf16 %v520_v32, %v519_v17  ;;  %v1168_v17 = vshrl.u32 %v12614_v52, 16  ;;  %v1172_v32 = vrot.slane %v1170_v13, 1  ;;  %v12734_v13 = vor.u32 %v1179_v45, %v1175_v53 }
 0x10c   :  { %v1309_v24 = vrot.slane %v1307_v1, 1  ;;  %v1298_v53 = vshrl.u32 %v12626_v59, 16 }
 0x10d   :  { %v12680_v25 = vpop.permute.xlu0 %1217  ;;  %1087 = vrot.lane.b32.xlu1 %v12670_v23, %s11687_s8 }
 0x10e   :  { %v12757_v15 = vor.u32 %v1309_v24, %v1305_v63 }
 0x10f   :  { %1085 = vrot.lane.b32.xlu0 %v12678_v48, %s11687_s8  ;;  %v12688_v12 = vpop.permute.xlu1 %1601 }
 0x111   :  { %v12690_v31 = vpop.permute.xlu0 %1599  ;;  %1227 = vrot.lane.b32.xlu1 %v12684_v5, %s11688_s9 }
 0x113   :  { %1225 = vrot.lane.b32.xlu0 %v1159_v20, %s11688_s9  ;;  %v12698_v49 = vpop.permute.xlu1 %1643  ;;  %v1300_v20 = vshll.u32 %v12626_v59, 16 }
 0x115   :  { %v12702_v50 = vpop.permute.xlu0 %1641  ;;  %1609 = vrot.lane.b32.xlu1 %v12694_v26, %s11695_s12  ;;  %v1302_v45 = vrot.slane %v1300_v20, 1 }
 0x117   :  { %1607 = vrot.lane.b32.xlu0 %v12201_v14, %s11695_s12  ;;  %v12717_v54 = vpop.permute.xlu1 %1223  ;;  %v1822_v14 = vsel %vm1818_vm11, %v1789_v44, %v12219_v51  ;;  %v18262_v44 = vld [vmem:[#allocation27_spill] sm:$0xff]  ;;  %v1303_v36 = vor.u32 %v1302_v45, %v1298_v53  ;;  %v1633_v53 = vor.u32 %v1632_v57, %v1628_v2  ;;  %v18264_v45 = vld [vmem:[#allocation9_spill] sm:$0xff] }
 0x118   :  { %v1855_v1 = vsel %vm1851_vm12, %v1822_v14, %v12238_v29  ;;  %v1853_v29 = vsel %vm1851_vm12, %v1820_v0, %v12242_v10  ;;  %v18258_v10 = vld [vmem:[#allocation8_spill] sm:$0xff] }
 0x119   :  { %v12730_v37 = vpop.permute.xlu0 %1221  ;;  %1651 = vrot.lane.b32.xlu1 %v12254_v27, %s11696_s13  ;;  %v1888_v18 = vsel %vm1884_vm13, %v1855_v1, %v12267_v39  ;;  %v12747_v27 = vor.u32 %v1172_v32, %v1168_v17  ;;  %v18259_v17 = vld [vmem:[#allocation3_spill] sm:$0xff]  ;;  %v18260_v32 = vld [vmem:[#allocation21_spill] sm:$0xff]  ;;  %v18263_v14 = vld [vmem:[#allocation36_spill] sm:$0xff]  ;;  %v1321_v1 = vshll.u32 %v12670_v23, 16 }
 0x11a   :  { %v1921_v39 = vsel %vm18081_vm14, %v1888_v18, %v12293_v46  ;;  %v1727_v46 = vsel %vm18110_vm8, %v18259_v17, %v18258_v10 }
 0x11b   :  { %1649 = vrot.lane.b32.xlu0 %v12215_v33, %s11696_s13  ;;  %v12745_v51 = vpop.permute.xlu1 %1363  ;;  %v1886_v33 = vsel %vm1884_vm13, %v1853_v29, %v12274_v61  ;;  %v1954_v56 = vsel %vm18079_vm15, %v1921_v39, %v18257_v9  ;;  %v1760_v39 = vsel %vm1752_vm9, %v1727_v46, %v18264_v45  ;;  %v1323_v46 = vrot.slane %v1321_v1, 1  ;;  %v18272_v1 = vld [vmem:[#allocation15_spill] sm:$0xff]  ;;  %v18273_v45 = vld [vmem:[#allocation17_spill] sm:$0xff] }
 0x11c   :  { %v1919_v20 = vsel %vm18081_vm14, %v1886_v33, %v18260_v32  ;;  %v1987_v61 = vsel %vm18080_vm0, %v1954_v56, %v18261_v47  ;;  %v18267_v32 = vld [vmem:[#allocation12_spill] sm:$0xff] }
 0x11d   :  { %v12763_v59 = vpop.permute.xlu0 %1361  ;;  %1231 = vrot.lane.b32.xlu1 %v12734_v13, %s11688_s9  ;;  %v1952_v63 = vsel %vm18079_vm15, %v1919_v20, %v18262_v44  ;;  %v2020_v24 = vsel %vm2016_vm1, %v1987_v61, %v12462_v58  ;;  %v1676_v44 = vshll.u32 %v12694_v26, 16 }
 0x11e   :  { %v1985_v34 = vsel %vm18080_vm0, %v1952_v63, %v18263_v14  ;;  %v2053_v0 = vsel %vm18082_vm2, %v2020_v24, %v12509_v4  ;;  %v18265_v4 = vld [vmem:[#allocation10_spill] sm:$0xff]  ;;  %v18270_v24 = vld [vmem:[#allocation16_spill] sm:$0xff] }
 0x11f   :  { %1229 = vrot.lane.b32.xlu0 %v12747_v27, %s11688_s9  ;;  %v12781_v16 = vpop.permute.xlu1 %1647  ;;  %v2018_v18 = vsel %vm2016_vm1, %v1985_v34, %v12465_v8  ;;  %v2086_v58 = vsel %vm18085_vm3, %v2053_v0, %v12577_v38  ;;  %v1758_v33 = vsel %vm1752_vm9, %v1725_v40, %v18265_v4  ;;  %v18266_v38 = vld [vmem:[#allocation11_spill] sm:$0xff]  ;;  %v1314_v40 = vshll.u32 %v12678_v48, 16 }
 0x120   :  { %v2051_v9 = vsel %vm18082_vm2, %v2018_v18, %v12518_v11  ;;  %v2119_v8 = vsel %vm18084_vm4, %v2086_v58, %v12648_v19  ;;  %v1793_v56 = vsel %vm18109_vm10, %v1760_v39, %v18266_v38  ;;  %v1319_v19 = vshrl.u32 %v12670_v23, 16  ;;  %v18271_v34 = vld [vmem:[#allocation19_spill] sm:$0xff]  ;;  %v18276_v38 = vld [vmem:[#allocation20_spill] sm:$0xff] }
 0x121   :  { %v12792_v29 = vpop.permute.xlu0 %1645  ;;  %1371 = vrot.lane.b32.xlu1 %v12757_v15, %s11689_s15  ;;  %v2084_v10 = vsel %vm18085_vm3, %v2051_v9, %v12585_v21  ;;  %v2152_v2 = vsel %vm18083_vm5, %v2119_v8, %v12698_v49  ;;  %v1791_v20 = vsel %vm18109_vm10, %v1758_v33, %v18267_v32  ;;  %v18268_v21 = vld [vmem:[#allocation13_spill] sm:$0xff]  ;;  %v1312_v58 = vshrl.u32 %v12678_v48, 16  ;;  %v18274_v4 = vld [vmem:[#allocation23_spill] sm:$0xff] }
 0x122   :  { %v2117_v11 = vsel %vm18084_vm4, %v2084_v10, %v12650_v60  ;;  %v1826_v47 = vsel %vm1818_vm11, %v1793_v56, %v18268_v21  ;;  %v18269_v60 = vld [vmem:[#allocation14_spill] sm:$0xff]  ;;  %v12840_v9 = vor.u32 %v1323_v46, %v1319_v19  ;;  %v117_v8 = vld [vmem:[%s18049_s0 + $0x320] sm:$0xff]  ;;  %v18279_v19 = vld [vmem:[#allocation25_spill] sm:$0xff] }
 0x123   :  { %1369 = vrot.lane.b32.xlu0 %v1303_v36, %s11689_s15  ;;  %v1690_v57 = vpop.permute.xlu1 %1689  ;;  %v2150_v49 = vsel %vm18083_vm5, %v2117_v11, %v12702_v50  ;;  %v1824_v63 = vsel %vm1818_vm11, %v1791_v20, %v18269_v60  ;;  %v1859_v36 = vsel %vm1851_vm12, %v1826_v47, %v18270_v24  ;;  %v18277_v10 = vld [vmem:[#allocation31_spill] sm:$0xff]  ;;  %v1674_v11 = vshrl.u32 %v12694_v26, 16  ;;  %v118_v20 = vld [vmem:[%s18049_s0 + $0x328] sm:$0x1] }
 0x124   :  { %v2185_v17 = vsel %vm2181_vm6, %v2152_v2, %v1690_v57  ;;  %v1892_v0 = vsel %vm1884_vm13, %v1859_v36, %v18271_v34  ;;  %v1857_v39 = vsel %vm1851_vm12, %v1824_v63, %v18273_v45  ;;  %18275 = vst [vmem:[#allocation26_spill] sm:$0xff] %v12840_v9  ;;  %v18280_v21 = vld [vmem:[#allocation32_spill] sm:$0xff]  ;;  %v405_v60 = vmul.f32 0.2, %v117_v8  ;;  %v99_v45 = vld [vmem:[%s18049_s0 + $0x290] sm:$0xff] }
 0x125   :  { %v1688_v61 = vpop.permute.xlu0 %1687  ;;  %1655 = vrot.lane.b32.xlu1 %v1633_v53, %s11696_s13  ;;  %v1316_v53 = vrot.slane %v1314_v40, 1  ;;  %v1925_v33 = vsel %vm18081_vm14, %v1892_v0, %v18274_v4  ;;  %v1890_v56 = vsel %vm1884_vm13, %v1857_v39, %v18276_v38  ;;  %v18278_v40 = vld [vmem:[#allocation24_spill] sm:$0xff]  ;;  %v406_v0 = vmul.f32 0.2, %v118_v20  ;;  %v100_v39 = vld [vmem:[%s18049_s0 + $0x298] sm:$0x1] }
 0x126   :  { %v2183_v14 = vsel %vm2181_vm6, %v2150_v49, %v1688_v61  ;;  %v1958_v2 = vsel %vm18079_vm15, %v1925_v33, %v18277_v10  ;;  %v1923_v46 = vsel %vm18081_vm14, %v1890_v56, %v18279_v19  ;;  %v18281_v61 = vld [vmem:[#allocation18_spill] sm:$0xff]  ;;  %v18283_v10 = vld [vmem:[#allocation45_spill] sm:$0xff]  ;;  %v387_v19 = vmul.f32 0.2, %v99_v45 }
 0x127   :  { %1653 = vrot.lane.b32.xlu0 %v18272_v1, %s11696_s13  ;;  %v12833_v50 = vpop.permute.xlu1 %1367  ;;  %v11243_v18 = vcombine.low %v2183_v14, %v2185_v17  ;;  %v1678_v17 = vrot.slane %v1676_v44, 1  ;;  %v1991_v32 = vsel %vm18080_vm0, %v1958_v2, %v12450_v42  ;;  %v1956_v47 = vsel %vm18079_vm15, %v1923_v46, %v18280_v21  ;;  %v115_v42 = vld [vmem:[%s18049_s0 + $0x310] sm:$0xff] }
 0x128   :  { %v2024_v49 = vsel %vm2016_vm1, %v1991_v32, %v12501_v55  ;;  %v12870_v44 = vor.u32 %v1316_v53, %v1312_v58  ;;  %v1989_v63 = vsel %vm18080_vm0, %v1956_v47, %v12454_v41  ;;  %vm261_vm15 = vcmp.gt.f32.partialorder %v117_v8, 0.0  ;;  %v116_v55 = vld [vmem:[%s18049_s0 + $0x318] sm:$0x1]  ;;  %v18284_v32 = vld [vmem:[#allocation33_spill] sm:$0xff] }
 0x129   :  { %11513 = vmatprep.mubr.msk.bf16.mxu0 %vm2286_vm7, %v11243_v18  ;;  %v12850_v57 = vpop.permute.xlu0 %1365  ;;  %1697 = vrot.lane.b32.xlu1 %v18278_v40, %s11697_s26  ;;  %v2057_v24 = vsel %vm18082_vm2, %v2024_v49, %v12555_v6  ;;  %v2022_v36 = vsel %vm2016_vm1, %v1989_v63, %v12503_v28  ;;  %v1679_v41 = vor.u32 %v1678_v17, %v1674_v11  ;;  %vm262_vm0 = vcmp.gt.f32.partialorder %v118_v20, 0.0  ;;  %v97_v28 = vld [vmem:[%s18049_s0 + $0x280] sm:$0xff] }
 0x12a   :  { %v2090_v14 = vsel %vm18085_vm3, %v2057_v24, %v12624_v43  ;;  %v2055_v6 = vsel %vm18082_vm2, %v2022_v36, %v12565_v3  ;;  %vm259_vm14 = vcmp.gt.f32.partialorder %v115_v42, 0.0  ;;  %v98_v43 = vld [vmem:[%s18049_s0 + $0x288] sm:$0x1]  ;;  %v18282_v18 = vld [vmem:[#allocation63_spill] sm:$0xff]  ;;  %vm260_vm2 = vcmp.gt.f32.partialorder %v116_v55, 0.0  ;;  %v18288_v36 = vld [vmem:[#allocation22_spill] sm:$0xff] }
 0x12b   :  { %1695 = vrot.lane.b32.xlu0 %v18281_v61, %s11697_s26  ;;  %v12868_v26 = vpop.permute.xlu1 %1411  ;;  %v2123_v1 = vsel %vm18084_vm4, %v2090_v14, %v12688_v12  ;;  %v2088_v58 = vsel %vm18085_vm3, %v2055_v6, %v18282_v18  ;;  %v549_v12 = vsel %vm261_vm15, %v117_v8, %v405_v60  ;;  %v403_v33 = vmul.f32 0.2, %v115_v42  ;;  %v121_v61 = vld [vmem:[%s18049_s0 + $0x340] sm:$0xff]  ;;  %v122_v60 = vld [vmem:[%s18049_s0 + $0x348] sm:$0x1] }
 0x12c   :  { %v2156_v53 = vsel %vm18083_vm5, %v2123_v1, %v12781_v16  ;;  %v2121_v4 = vsel %vm18084_vm4, %v2088_v58, %v12690_v31  ;;  %v404_v38 = vmul.f32 0.2, %v116_v55  ;;  %v550_v2 = vsel %vm262_vm0, %v118_v20, %v406_v0 }
 0x12d   :  { %v12886_v34 = vpop.permute.xlu0 %1409  ;;  %1375 = vrot.lane.b32.xlu1 %v12840_v9, %s11689_s15  ;;  %v2154_v56 = vsel %vm18083_vm5, %v2121_v4, %v12792_v29  ;;  %v385_v40 = vmul.f32 0.2, %v97_v28  ;;  %v386_v11 = vmul.f32 0.2, %v98_v43  ;;  %vm241_vm15 = vcmp.gt.f32.partialorder %v97_v28, 0.0 }
 0x12e   :  { %v388_v31 = vmul.f32 0.2, %v100_v39  ;;  %vm242_vm5 = vcmp.gt.f32.partialorder %v98_v43, 0.0  ;;  %vm243_vm4 = vcmp.gt.f32.partialorder %v99_v45, 0.0  ;;  %vm244_vm3 = vcmp.gt.f32.partialorder %v100_v39, 0.0 }
 0x12f   :  { %1373 = vrot.lane.b32.xlu0 %v12870_v44, %s11689_s15  ;;  %v1694_v3 = vpop.permute.xlu1 %1693  ;;  %v547_v29 = vsel %vm259_vm14, %v115_v42, %v403_v33  ;;  %v548_v20 = vsel %vm260_vm2, %v116_v55, %v404_v38  ;;  %v12932_v49 = vpack.c.bf16 %v550_v2, %v549_v12  ;;  %v529_v42 = vsel %vm241_vm15, %v97_v28, %v385_v40  ;;  %v119_v28 = vld [vmem:[%s18049_s0 + $0x330] sm:$0xff]  ;;  %v104_v12 = vld [vmem:[%s18049_s0 + $0x2b8] sm:$0x1] }
 0x130   :  { %v2189_v16 = vsel %vm2181_vm6, %v2156_v53, %v1694_v3  ;;  %v530_v63 = vsel %vm242_vm5, %v98_v43, %v386_v11  ;;  %v531_v24 = vsel %vm243_vm4, %v99_v45, %v387_v19  ;;  %v532_v55 = vsel %vm244_vm3, %v100_v39, %v388_v31  ;;  %v120_v43 = vld [vmem:[%s18049_s0 + $0x338] sm:$0x1]  ;;  %v103_v3 = vld [vmem:[%s18049_s0 + $0x2b0] sm:$0xff]  ;;  %v18291_v11 = vld [vmem:[#allocation44_spill] sm:$0xff] }
 0x131   :  { %v1692_v8 = vpop.permute.xlu0 %1691  ;;  %1419 = vrot.lane.b32.xlu1 %v18283_v10, %s11690_s30  ;;  %18287 = vst [vmem:[#allocation21_spill] sm:$0xff] %v12932_v49  ;;  %v409_v0 = vmul.f32 0.2, %v121_v61  ;;  %v410_v6 = vmul.f32 0.2, %v122_v60  ;;  %v12951_v18 = vpack.c.bf16 %v530_v63, %v529_v42  ;;  %vm265_vm14 = vcmp.gt.f32.partialorder %v121_v61, 0.0 }
 0x132   :  { %v2187_v17 = vsel %vm2181_vm6, %v2154_v56, %v1692_v8  ;;  %vm266_vm0 = vcmp.gt.f32.partialorder %v122_v60, 0.0  ;;  %v12959_v58 = vpack.c.bf16 %v532_v55, %v531_v24  ;;  %v407_v4 = vmul.f32 0.2, %v119_v28  ;;  %v101_v56 = vld [vmem:[%s18049_s0 + $0x2a0] sm:$0xff]  ;;  %v102_v8 = vld [vmem:[%s18049_s0 + $0x2a8] sm:$0x1] }
 0x133   :  { %v11244_v46 = vcombine.low %v2187_v17, %v2189_v16  ;;  %1417 = vrot.lane.b32.xlu0 %v18284_v32, %s11690_s30  ;;  %v12924_v21 = vpop.permute.xlu1 %699  ;;  %18289 = vst [vmem:[#allocation34_spill] sm:$0xff] %v12951_v18  ;;  %v553_v45 = vsel %vm265_vm14, %v121_v61, %v409_v0  ;;  %v554_v39 = vsel %vm266_vm0, %v122_v60, %v410_v6  ;;  %v408_v16 = vmul.f32 0.2, %v120_v43  ;;  %v18295_v42 = vld [vmem:[#allocation39_spill] sm:$0xff]  ;;  %v18296_v0 = vld [vmem:[#allocation30_spill] sm:$0xff]  ;;  %v18316_v32 = vld [vmem:[#allocation57_spill] sm:$0xff] }
 0x134   :  { %18285 = vst [vmem:[#allocation8_spill] sm:$0xff] %v12924_v21  ;;  %18290 = vst [vmem:[#allocation27_spill] sm:$0xff] %v12959_v58  ;;  %vm263_vm2 = vcmp.gt.f32.partialorder %v119_v28, 0.0  ;;  %vm264_vm3 = vcmp.gt.f32.partialorder %v120_v43, 0.0  ;;  %v807_v38 = vshll.u32 %v12959_v58, 16  ;;  %v12986_v19 = vpack.c.bf16 %v554_v39, %v553_v45 }
 0x135   :  { %11514 = vmatmul.mubr.msk.bf16.vlgmr.msra.gmra.mrb[0].mxu0 %vm2286_vm7, %v11244_v46  ;;  %v12929_v47 = vpop.permute.xlu0 %697  ;;  %1701 = vrot.lane.b32.xlu1 %v1679_v41, %s11697_s26  ;;  %v12945_v41 = vpack.c.bf16 %v548_v20, %v547_v29  ;;  %v391_v2 = vmul.f32 0.2, %v103_v3  ;;  %v392_v40 = vmul.f32 0.2, %v104_v12  ;;  %v800_v31 = vshll.u32 %v12951_v18, 16 }
 0x136   :  { %18286 = vst [vmem:[#allocation3_spill] sm:$0xff] %v12929_v47  ;;  %18293 = vst [vmem:[#allocation9_spill] sm:$0xff] %v12986_v19  ;;  %vm247_vm4 = vcmp.gt.f32.partialorder %v103_v3, 0.0  ;;  %vm248_vm5 = vcmp.gt.f32.partialorder %v104_v12, 0.0  ;;  %v551_v46 = vsel %vm263_vm2, %v119_v28, %v407_v4  ;;  %v552_v29 = vsel %vm264_vm3, %v120_v43, %v408_v16 }
 0x137   :  { %1699 = vrot.lane.b32.xlu0 %v18288_v36, %s11697_s26  ;;  %v12943_v14 = vpop.permute.xlu1 %1415  ;;  %v389_v20 = vmul.f32 0.2, %v101_v56  ;;  %v390_v61 = vmul.f32 0.2, %v102_v8  ;;  %v805_v63 = vshrl.u32 %v12959_v58, 16  ;;  %v809_v24 = vrot.slane %v807_v38, 1 }
 0x138   :  { %vm245_vm15 = vcmp.gt.f32.partialorder %v101_v56, 0.0  ;;  %vm246_vm14 = vcmp.gt.f32.partialorder %v102_v8, 0.0  ;;  %v535_v55 = vsel %vm247_vm4, %v103_v3, %v391_v2  ;;  %v536_v36 = vsel %vm248_vm5, %v104_v12, %v392_v40 }
 0x139   :  { %v12947_v1 = vpop.permute.xlu0 %1413  ;;  %707 = vrot.lane.b32.xlu1 %v12932_v49, %s11683_s7  ;;  %v12998_v28 = vpack.c.bf16 %v552_v29, %v551_v46  ;;  %v798_v43 = vshrl.u32 %v12951_v18, 16  ;;  %v802_v45 = vrot.slane %v800_v31, 1  ;;  %v533_v39 = vsel %vm245_vm15, %v101_v56, %v389_v20 }
 0x13a   :  { %v534_v4 = vsel %vm246_vm14, %v102_v8, %v390_v61  ;;  %v13005_v38 = vor.u32 %v809_v24, %v805_v63  ;;  %v13007_v3 = vpack.c.bf16 %v536_v36, %v535_v55  ;;  %v18303_v63 = vld [vmem:[#allocation38_spill] sm:$0xff] }
 0x13b   :  { %705 = vrot.lane.b32.xlu0 %v12945_v41, %s11683_s7  ;;  %v12963_v53 = vpop.permute.xlu1 %1445  ;;  %18298 = vst [vmem:[#allocation12_spill] sm:$0xff] %v12998_v28  ;;  %v803_v2 = vor.u32 %v802_v45, %v798_v43  ;;  %v13013_v40 = vpack.c.bf16 %v534_v4, %v533_v39  ;;  %v18306_v45 = vld [vmem:[#allocation50_spill] sm:$0xff]  ;;  %v949_v4 = vshrl.u32 %v12932_v49, 16 }
 0x13c   :  { %18300 = vst [vmem:[#allocation14_spill] sm:$0xff] %v13005_v38  ;;  %18301 = vst [vmem:[#allocation16_spill] sm:$0xff] %v13007_v3  ;;  %v821_v56 = vshll.u32 %v13007_v3, 16  ;;  %v819_v20 = vshrl.u32 %v13007_v3, 16 }
 0x13d   :  { %v12971_v33 = vpop.permute.xlu0 %1443  ;;  %1423 = vrot.lane.b32.xlu1 %v12951_v18, %s11690_s30  ;;  %18302 = vst [vmem:[#allocation19_spill] sm:$0xff] %v13013_v40  ;;  %v814_v46 = vshll.u32 %v13013_v40, 16  ;;  %v812_v55 = vshrl.u32 %v13013_v40, 16  ;;  %v18308_v18 = vld [vmem:[#allocation43_spill] sm:$0xff] }
 0x13e   :  { %v823_v61 = vrot.slane %v821_v56, 1 }
 0x13f   :  { %1421 = vrot.lane.b32.xlu0 %v18291_v11, %s11690_s30  ;;  %v12984_v17 = vpop.permute.xlu1 %703  ;;  %v816_v36 = vrot.slane %v814_v46, 1  ;;  %v942_v46 = vshrl.u32 %v12945_v41, 16 }
 0x140   :  { %18292 = vst [vmem:[#allocation36_spill] sm:$0xff] %v12984_v17  ;;  %v13040_v39 = vor.u32 %v823_v61, %v819_v20  ;;  %v18313_v17 = vld [vmem:[#allocation48_spill] sm:$0xff] }
 0x141   :  { %v12989_v60 = vpop.permute.xlu0 %701  ;;  %1453 = vrot.lane.b32.xlu1 %v18295_v42, %s11691_s27  ;;  %v951_v42 = vshll.u32 %v12932_v49, 16 }
 0x142   :  { %18294 = vst [vmem:[#allocation10_spill] sm:$0xff] %v12989_v60  ;;  %18307 = vst [vmem:[#allocation23_spill] sm:$0xff] %v13040_v39 }
 0x143   :  { %1451 = vrot.lane.b32.xlu0 %v18296_v0, %s11691_s27  ;;  %v12996_v6 = vpop.permute.xlu1 %843  ;;  %v944_v0 = vshll.u32 %v12945_v41, 16  ;;  %v953_v56 = vrot.slane %v951_v42, 1 }
 0x144   :  { %18297 = vst [vmem:[#allocation11_spill] sm:$0xff] %v12996_v6 }
 0x145   :  { %v13001_v16 = vpop.permute.xlu0 %841  ;;  %711 = vrot.lane.b32.xlu1 %v12986_v19, %s11683_s7  ;;  %v946_v10 = vrot.slane %v944_v0, 1  ;;  %v13054_v20 = vor.u32 %v953_v56, %v949_v4  ;;  %v135_v0 = vld [vmem:[%s18049_s0 + $0x3b0] sm:$0xff]  ;;  %v963_v4 = vshrl.u32 %v12986_v19, 16 }
 0x146   :  { %18299 = vst [vmem:[#allocation13_spill] sm:$0xff] %v13001_v16  ;;  %vm279_vm0 = vcmp.gt.f32.partialorder %v135_v0, 0.0 }
 0x147   :  { %709 = vrot.lane.b32.xlu0 %v12998_v28, %s11683_s7  ;;  %v13011_v12 = vpop.permute.xlu1 %1449  ;;  %18312 = vst [vmem:[#allocation25_spill] sm:$0xff] %v13054_v20 }
 0x149   :  { %v13015_v31 = vpop.permute.xlu0 %1447  ;;  %851 = vrot.lane.b32.xlu1 %v13005_v38, %s11684_s22 }
 0x14b   :  { %849 = vrot.lane.b32.xlu0 %v803_v2, %s11684_s22  ;;  %v13021_v8 = vpop.permute.xlu1 %1491 }
 0x14d   :  { %v13024_v29 = vpop.permute.xlu0 %1489  ;;  %1457 = vrot.lane.b32.xlu1 %v12945_v41, %s11691_s27  ;;  %v965_v41 = vshll.u32 %v12986_v19, 16 }
 0x14f   :  { %1455 = vrot.lane.b32.xlu0 %v18303_v63, %s11691_s27  ;;  %v13032_v24 = vpop.permute.xlu1 %847  ;;  %v967_v56 = vrot.slane %v965_v41, 1 }
 0x150   :  { %18304 = vst [vmem:[#allocation15_spill] sm:$0xff] %v13032_v24  ;;  %v13047_v24 = vor.u32 %v816_v36, %v812_v55  ;;  %v958_v36 = vshll.u32 %v12998_v28, 16 }
 0x151   :  { %v13036_v43 = vpop.permute.xlu0 %845  ;;  %1499 = vrot.lane.b32.xlu1 %v18306_v45, %s11692_s29  ;;  %v13094_v21 = vor.u32 %v967_v56, %v963_v4  ;;  %v154_v4 = vld [vmem:[%s18049_s0 + $0x448] sm:$0x1] }
 0x152   :  { %18305 = vst [vmem:[#allocation17_spill] sm:$0xff] %v13036_v43  ;;  %18310 = vst [vmem:[#allocation31_spill] sm:$0xff] %v13047_v24  ;;  %v134_v43 = vld [vmem:[%s18049_s0 + $0x3a8] sm:$0x1]  ;;  %v960_v16 = vrot.slane %v958_v36, 1 }
 0x153   :  { %1497 = vrot.lane.b32.xlu0 %v18308_v18, %s11692_s29  ;;  %v13045_v63 = vpop.permute.xlu1 %987  ;;  %v947_v18 = vor.u32 %v946_v10, %v942_v46  ;;  %v136_v10 = vld [vmem:[%s18049_s0 + $0x3b8] sm:$0x1]  ;;  %v133_v46 = vld [vmem:[%s18049_s0 + $0x3a0] sm:$0xff]  ;;  %v422_v6 = vmul.f32 0.2, %v134_v43  ;;  %18317 = vst [vmem:[#allocation63_spill] sm:$0xff] %v13094_v21 }
 0x154   :  { %18309 = vst [vmem:[#allocation20_spill] sm:$0xff] %v13045_v63  ;;  %v424_v11 = vmul.f32 0.2, %v136_v10  ;;  %vm280_vm2 = vcmp.gt.f32.partialorder %v136_v10, 0.0  ;;  %v421_v41 = vmul.f32 0.2, %v133_v46 }
 0x155   :  { %v13050_v60 = vpop.permute.xlu0 %985  ;;  %855 = vrot.lane.b32.xlu1 %v13040_v39, %s11684_s22  ;;  %vm277_vm3 = vcmp.gt.f32.partialorder %v133_v46, 0.0  ;;  %vm278_vm4 = vcmp.gt.f32.partialorder %v134_v43, 0.0 }
 0x156   :  { %18311 = vst [vmem:[#allocation24_spill] sm:$0xff] %v13050_v60  ;;  %v423_v60 = vmul.f32 0.2, %v135_v0  ;;  %v565_v38 = vsel %vm277_vm3, %v133_v46, %v421_v41  ;;  %v151_v41 = vld [vmem:[%s18049_s0 + $0x430] sm:$0xff]  ;;  %vm298_vm3 = vcmp.gt.f32.partialorder %v154_v4, 0.0 }
 0x157   :  { %853 = vrot.lane.b32.xlu0 %v13047_v24, %s11684_s22  ;;  %v13058_v61 = vpop.permute.xlu1 %1495  ;;  %v566_v24 = vsel %vm278_vm4, %v134_v43, %v422_v6  ;;  %v140_v6 = vld [vmem:[%s18049_s0 + $0x3d8] sm:$0x1]  ;;  %v439_v3 = vmul.f32 0.2, %v151_v41  ;;  %vm295_vm4 = vcmp.gt.f32.partialorder %v151_v41, 0.0 }
 0x158   :  { %vm284_vm15 = vcmp.gt.f32.partialorder %v140_v6, 0.0 }
 0x159   :  { %v13060_v42 = vpop.permute.xlu0 %1493  ;;  %995 = vrot.lane.b32.xlu1 %v13054_v20, %s11685_s10  ;;  %v567_v20 = vsel %vm279_vm0, %v135_v0, %v423_v60  ;;  %v13112_v60 = vpack.c.bf16 %v566_v24, %v565_v38  ;;  %v138_v38 = vld [vmem:[%s18049_s0 + $0x3c8] sm:$0x1] }
 0x15a   :  { %v426_v46 = vmul.f32 0.2, %v138_v38  ;;  %vm282_vm0 = vcmp.gt.f32.partialorder %v138_v38, 0.0 }
 0x15b   :  { %993 = vrot.lane.b32.xlu0 %v947_v18, %s11685_s10  ;;  %v13066_v55 = vpop.permute.xlu1 %1537 }
 0x15d   :  { %v13075_v45 = vpop.permute.xlu0 %1535  ;;  %1503 = vrot.lane.b32.xlu1 %v803_v2, %s11692_s29  ;;  %v956_v2 = vshrl.u32 %v12998_v28, 16  ;;  %v570_v28 = vsel %vm282_vm0, %v138_v38, %v426_v46  ;;  %v583_v38 = vsel %vm295_vm4, %v151_v41, %v439_v3  ;;  %v156_v3 = vld [vmem:[%s18049_s0 + $0x458] sm:$0x1]  ;;  %vm18107_vm4 = vcmask 57344  }
 0x15e   :  { %v444_v41 = vmul.f32 0.2, %v156_v3 }
 0x15f   :  { %1501 = vrot.lane.b32.xlu0 %v18313_v17, %s11692_s29  ;;  %v13087_v63 = vpop.permute.xlu1 %991  ;;  %v568_v17 = vsel %vm280_vm2, %v136_v10, %v424_v11  ;;  %v13100_v36 = vor.u32 %v960_v16, %v956_v2  ;;  %v139_v16 = vld [vmem:[%s18049_s0 + $0x3d0] sm:$0xff]  ;;  %v153_v10 = vld [vmem:[%s18049_s0 + $0x440] sm:$0xff] }
 0x160   :  { %18314 = vst [vmem:[#allocation32_spill] sm:$0xff] %v13087_v63  ;;  %v18318_v63 = vld [vmem:[#allocation52_spill] sm:$0xff]  ;;  %v427_v24 = vmul.f32 0.2, %v139_v16  ;;  %vm283_vm5 = vcmp.gt.f32.partialorder %v139_v16, 0.0  ;;  %vm297_vm2 = vcmp.gt.f32.partialorder %v153_v10, 0.0 }
 0x161   :  { %v13090_v47 = vpop.permute.xlu0 %989  ;;  %1545 = vrot.lane.b32.xlu1 %v18316_v32, %s11693_s18  ;;  %18320 = vst [vmem:[#allocation39_spill] sm:$0xff] %v13100_v36  ;;  %v13106_v32 = vpack.c.bf16 %v568_v17, %v567_v20  ;;  %v428_v20 = vmul.f32 0.2, %v140_v6  ;;  %v152_v17 = vld [vmem:[%s18049_s0 + $0x438] sm:$0x1] }
 0x162   :  { %18315 = vst [vmem:[#allocation18_spill] sm:$0xff] %v13090_v47  ;;  %v571_v47 = vsel %vm283_vm5, %v139_v16, %v427_v24  ;;  %v440_v9 = vmul.f32 0.2, %v152_v17  ;;  %vm296_vm5 = vcmp.gt.f32.partialorder %v152_v17, 0.0 }
 0x163   :  { %1543 = vrot.lane.b32.xlu0 %v18318_v63, %s11693_s18  ;;  %v13098_v39 = vpop.permute.xlu1 %1035  ;;  %18322 = vst [vmem:[#allocation38_spill] sm:$0xff] %v13106_v32  ;;  %v137_v63 = vld [vmem:[%s18049_s0 + $0x3c0] sm:$0xff]  ;;  %v1189_v40 = vshrl.u32 %v13106_v32, 16 }
 0x164   :  { %18319 = vst [vmem:[#allocation22_spill] sm:$0xff] %v13098_v39  ;;  %v425_v56 = vmul.f32 0.2, %v137_v63  ;;  %vm281_vm14 = vcmp.gt.f32.partialorder %v137_v63, 0.0  ;;  %v441_v39 = vmul.f32 0.2, %v153_v10 }
 0x165   :  { %v13102_v19 = vpop.permute.xlu0 %1033  ;;  %999 = vrot.lane.b32.xlu1 %v13094_v21, %s11685_s10  ;;  %v442_v21 = vmul.f32 0.2, %v154_v4 }
 0x166   :  { %18321 = vst [vmem:[#allocation30_spill] sm:$0xff] %v13102_v19  ;;  %v572_v19 = vsel %vm284_vm15, %v140_v6, %v428_v20  ;;  %v585_v6 = vsel %vm297_vm2, %v153_v10, %v441_v39  ;;  %v584_v20 = vsel %vm296_vm5, %v152_v17, %v440_v9  ;;  %v158_v9 = vld [vmem:[%s18049_s0 + $0x468] sm:$0x1]  ;;  %vm300_vm2 = vcmp.gt.f32.partialorder %v156_v3, 0.0 }
 0x167   :  { %997 = vrot.lane.b32.xlu0 %v13100_v36, %s11685_s10  ;;  %v13110_v11 = vpop.permute.xlu1 %1541  ;;  %v18323_v36 = vld [vmem:[#allocation55_spill] sm:$0xff]  ;;  %v13157_v16 = vpack.c.bf16 %v572_v19, %v571_v47  ;;  %v586_v24 = vsel %vm298_vm3, %v154_v4, %v442_v21  ;;  %v13175_v47 = vpack.c.bf16 %v584_v20, %v583_v38  ;;  %v446_v10 = vmul.f32 0.2, %v158_v9 }
 0x168   :  { %v1184_v20 = vshll.u32 %v13112_v60, 16  ;;  %vm18108_vm3 = vcmask 60416   ;;  %vm18349_vm5 = vcmask 228352  }
 0x169   :  { %v13120_v43 = vpop.permute.xlu0 %1539  ;;  %1043 = vrot.lane.b32.xlu1 %v13106_v32, %s11686_s28  ;;  %18326 = vst [vmem:[#allocation48_spill] sm:$0xff] %v13157_v16 }
 0x16b   :  { %1041 = vrot.lane.b32.xlu0 %v13112_v60, %s11686_s28  ;;  %v13132_v0 = vpop.permute.xlu1 %1571 }
 0x16d   :  { %v13140_v2 = vpop.permute.xlu0 %1569  ;;  %1549 = vrot.lane.b32.xlu1 %v947_v18, %s11693_s18  ;;  %v569_v18 = vsel %vm281_vm14, %v137_v63, %v425_v56  ;;  %vm302_vm14 = vcmp.gt.f32.partialorder %v158_v9, 0.0 }
 0x16e   :  { %v13163_v63 = vpack.c.bf16 %v570_v28, %v569_v18  ;;  %v155_v28 = vld [vmem:[%s18049_s0 + $0x450] sm:$0xff]  ;;  %v1191_v18 = vshll.u32 %v13106_v32, 16 }
 0x16f   :  { %1547 = vrot.lane.b32.xlu0 %v18323_v36, %s11693_s18  ;;  %v13151_v49 = vpop.permute.xlu1 %1039  ;;  %v443_v46 = vmul.f32 0.2, %v155_v28  ;;  %vm299_vm0 = vcmp.gt.f32.partialorder %v155_v28, 0.0  ;;  %v18343_v32 = vld [vmem:[#allocation49_spill] sm:$0xff] }
 0x170   :  { %18324 = vst [vmem:[#allocation50_spill] sm:$0xff] %v13151_v49  ;;  %18328 = vst [vmem:[#allocation52_spill] sm:$0xff] %v13163_v63  ;;  %v588_v49 = vsel %vm300_vm2, %v156_v3, %v444_v41  ;;  %v1186_v3 = vrot.slane %v1184_v20, 1  ;;  %v18336_v41 = vld [vmem:[#allocation28_spill] sm:$0xff]  ;;  %v1203_v20 = vshrl.u32 %v13157_v16, 16 }
 0x171   :  { %v13153_v58 = vpop.permute.xlu0 %1037  ;;  %1579 = vrot.lane.b32.xlu1 %v12614_v52, %s11694_s20  ;;  %v13169_v52 = vpack.c.bf16 %v586_v24, %v585_v6  ;;  %v590_v24 = vsel %vm302_vm14, %v158_v9, %v446_v10  ;;  %vm18351_vm14 = vmmov %vm18349_vm5 }
 0x172   :  { %18325 = vst [vmem:[#allocation43_spill] sm:$0xff] %v13153_v58  ;;  %v587_v58 = vsel %vm299_vm0, %v155_v28, %v443_v46  ;;  %v1182_v28 = vshrl.u32 %v13112_v60, 16  ;;  %vm18352_vm0 = vcmask 293888  }
 0x173   :  { %1577 = vrot.lane.b32.xlu0 %v12550_v7, %s11694_s20  ;;  %v13161_v36 = vpop.permute.xlu1 %1083  ;;  %v157_v7 = vld [vmem:[%s18049_s0 + $0x460] sm:$0xff]  ;;  %v13218_v9 = vpack.c.bf16 %v588_v49, %v587_v58  ;;  %v1205_v49 = vshll.u32 %v13157_v16, 16 }
 0x174   :  { %18327 = vst [vmem:[#allocation57_spill] sm:$0xff] %v13161_v36  ;;  %v445_v39 = vmul.f32 0.2, %v157_v7  ;;  %vm301_vm15 = vcmp.gt.f32.partialorder %v157_v7, 0.0 }
 0x175   :  { %v13165_v56 = vpop.permute.xlu0 %1081  ;;  %1047 = vrot.lane.b32.xlu1 %v13157_v16, %s11686_s28  ;;  %v1328_v16 = vshll.u32 %v13175_v47, 16 }
 0x176   :  { %18329 = vst [vmem:[#allocation55_spill] sm:$0xff] %v13165_v56  ;;  %v589_v6 = vsel %vm301_vm15, %v157_v7, %v445_v39  ;;  %v1193_v7 = vrot.slane %v1191_v18, 1  ;;  %v18337_v18 = vld [vmem:[#allocation5_spill] sm:$0xff]  ;;  %vm18350_vm15 = vcmask 261120  }
 0x177   :  { %1045 = vrot.lane.b32.xlu0 %v13163_v63, %s11686_s28  ;;  %v13173_v21 = vpop.permute.xlu1 %1575  ;;  %v13211_v36 = vpack.c.bf16 %v590_v24, %v589_v6  ;;  %v1731_v6 = vsel %vm18110_vm8, %v18337_v18, %v18336_v41  ;;  %vm18353_vm2 = vmmov %vm18350_vm15 }
 0x179   :  { %v13183_v19 = vpop.permute.xlu0 %1573  ;;  %1091 = vrot.lane.b32.xlu1 %v13169_v52, %s11687_s8 }
 0x17b   :  { %1089 = vrot.lane.b32.xlu0 %v13175_v47, %s11687_s8  ;;  %v13195_v4 = vpop.permute.xlu1 %1605 }
 0x17d   :  { %v13197_v17 = vpop.permute.xlu0 %1603  ;;  %1583 = vrot.lane.b32.xlu1 %v13112_v60, %s11694_s20  ;;  %v11698_v60 = vmov 0  }
 0x17e   :  { %2480 = vst.msk [vmem:[#allocation2 + $0x18] sm:$0xf] %vm18108_vm3, %v11698_v60  ;;  %2473 = vst.msk [vmem:[#allocation2] sm:$0xf] %vm18108_vm3, %v11698_v60 }
 0x17f   :  { %1581 = vrot.lane.b32.xlu0 %v12608_v30, %s11694_s20  ;;  %v13204_v38 = vpop.permute.xlu1 %1087  ;;  %2481 = vst.msk [vmem:[#allocation2 + $0x1c] sm:$0x1] %vm18107_vm4, %v11698_v60  ;;  %2475 = vst.msk [vmem:[#allocation2 + $0x4] sm:$0x1] %vm18107_vm4, %v11698_v60 }
 0x180   :  { %18330 = vst [vmem:[#allocation65_spill] sm:$0xff] %v13204_v38  ;;  %2476 = vst.msk [vmem:[#allocation2 + $0x8] sm:$0xf] %vm18108_vm3, %v11698_v60 }
 0x181   :  { %v13207_v56 = vpop.permute.xlu0 %1085  ;;  %1613 = vrot.lane.b32.xlu1 %v12678_v48, %s11695_s12  ;;  %v13225_v48 = vor.u32 %v1193_v7, %v1189_v40  ;;  %v1198_v40 = vshll.u32 %v13163_v63, 16  ;;  %2477 = vst.msk [vmem:[#allocation2 + $0xc] sm:$0x1] %vm18107_vm4, %v11698_v60  ;;  %2479 = vst.msk [vmem:[#allocation2 + $0x14] sm:$0x1] %vm18107_vm4, %v11698_v60  ;;  %v1207_v7 = vrot.slane %v1205_v49, 1 }
 0x182   :  { %18331 = vst [vmem:[#allocation66_spill] sm:$0xff] %v13207_v56  ;;  %2478 = vst.msk [vmem:[#allocation2 + $0x10] sm:$0xf] %vm18108_vm3, %v11698_v60  ;;  %v18339_v56 = vld [vmem:[#allocation4_spill] sm:$0xff] }
 0x183   :  { %1611 = vrot.lane.b32.xlu0 %v12620_v35, %s11695_s12  ;;  %v13216_v30 = vpop.permute.xlu1 %1227  ;;  %18334 = vst [vmem:[#allocation69_spill] sm:$0xff] %v13225_v48  ;;  %v13231_v35 = vor.u32 %v1186_v3, %v1182_v28  ;;  %2482 = vst.msk [vmem:[#allocation2 + $0x20] sm:$0xf] %vm18108_vm3, %v11698_v60  ;;  %v1335_v28 = vshll.u32 %v13169_v52, 16  ;;  %v18338_v3 = vld [vmem:[#allocation29_spill] sm:$0xff]  ;;  %v1200_v49 = vrot.slane %v1198_v40, 1 }
 0x184   :  { %18332 = vst [vmem:[#allocation67_spill] sm:$0xff] %v13216_v30  ;;  %2483 = vst.msk [vmem:[#allocation2 + $0x24] sm:$0x1] %vm18107_vm4, %v11698_v60  ;;  %v1729_v38 = vsel %vm18110_vm8, %v18339_v56, %v18338_v3  ;;  %v18341_v30 = vld [vmem:[#allocation42_spill] sm:$0xff]  ;;  %v18344_v56 = vld [vmem:[#allocation51_spill] sm:$0xff] }
 0x185   :  { %v13221_v39 = vpop.permute.xlu0 %1225  ;;  %1095 = vrot.lane.b32.xlu1 %v13211_v36, %s11687_s8  ;;  %2484 = vst.msk [vmem:[#allocation2 + $0x28] sm:$0xf] %vm18108_vm3, %v11698_v60  ;;  %2486 = vst.msk [vmem:[#allocation2 + $0x30] sm:$0xf] %vm18108_vm3, %v11698_v60  ;;  %v1762_v41 = vsel %vm1752_vm9, %v1729_v38, %v18341_v30  ;;  %v1333_v30 = vshrl.u32 %v13169_v52, 16  ;;  %v1337_v40 = vrot.slane %v1335_v28, 1 }
 0x186   :  { %18333 = vst [vmem:[#allocation68_spill] sm:$0xff] %v13221_v39  ;;  %2485 = vst.msk [vmem:[#allocation2 + $0x2c] sm:$0x1] %vm18107_vm4, %v11698_v60  ;;  %v18340_v39 = vld [vmem:[#allocation41_spill] sm:$0xff]  ;;  %v1795_v3 = vsel %vm18109_vm10, %v1762_v41, %v18344_v56  ;;  %v18348_v28 = vld [vmem:[#allocation62_spill] sm:$0xff] }
 0x187   :  { %1093 = vrot.lane.b32.xlu0 %v13218_v9, %s11687_s8  ;;  %v13229_v10 = vpop.permute.xlu1 %1609  ;;  %2487 = vst.msk [vmem:[#allocation2 + $0x34] sm:$0x1] %vm18107_vm4, %v11698_v60  ;;  %2489 = vst.msk [vmem:[#allocation2 + $0x3c] sm:$0x1] %vm18107_vm4, %v11698_v60 }
 0x188   :  { %2488 = vst.msk [vmem:[#allocation2 + $0x38] sm:$0xf] %vm18108_vm3, %v11698_v60  ;;  %2490 = vst.msk [vmem:[#allocation2 + $0x40] sm:$0xf] %vm18108_vm3, %v11698_v60 }
 0x189   :  { %v13233_v46 = vpop.permute.xlu0 %1607  ;;  %1235 = vrot.lane.b32.xlu1 %v13225_v48, %s11688_s9  ;;  %2491 = vst.msk [vmem:[#allocation2 + $0x44] sm:$0x1] %vm18107_vm4, %v11698_v60  ;;  %2493 = vst.msk [vmem:[#allocation2 + $0x4c] sm:$0x1] %vm18107_vm4, %v11698_v60  ;;  %v1196_v48 = vshrl.u32 %v13163_v63, 16 }
 0x18a   :  { %18335 = vst [vmem:[#allocation70_spill] sm:$0xff] %v13233_v46  ;;  %2492 = vst.msk [vmem:[#allocation2 + $0x48] sm:$0xf] %vm18108_vm3, %v11698_v60 }
 0x18b   :  { %1233 = vrot.lane.b32.xlu0 %v13231_v35, %s11688_s9  ;;  %v13240_v58 = vpop.permute.xlu1 %1651  ;;  %2494 = vst.msk [vmem:[#allocation2 + $0x50] sm:$0xf] %vm18108_vm3, %v11698_v60  ;;  %2496 = vst.msk [vmem:[#allocation2 + $0x58] sm:$0xf] %vm18108_vm3, %v11698_v60 }
 0x18c   :  { %2495 = vst.msk [vmem:[#allocation2 + $0x54] sm:$0x1] %vm18107_vm4, %v11698_v60  ;;  %2497 = vst.msk [vmem:[#allocation2 + $0x5c] sm:$0x1] %vm18107_vm4, %v11698_v60 }
 0x18d   :  { %2498 = vst.msk [vmem:[#allocation2 + $0x60] sm:$0xf] %vm18108_vm3, %v11698_v60  ;;  %2500 = vst.msk [vmem:[#allocation2 + $0x68] sm:$0xf] %vm18108_vm3, %v11698_v60  ;;  %v13286_v24 = vpop.permute.xlu0 %1649  ;;  %1617 = vrot.lane.b32.xlu1 %v13175_v47, %s11695_s12 }
 0x18e   :  { %2499 = vst.msk [vmem:[#allocation2 + $0x64] sm:$0x1] %vm18107_vm4, %v11698_v60  ;;  %2501 = vst.msk [vmem:[#allocation2 + $0x6c] sm:$0x1] %vm18107_vm4, %v11698_v60 }
 0x18f   :  { %2502 = vst.msk [vmem:[#allocation2 + $0x70] sm:$0xf] %vm18108_vm3, %v11698_v60  ;;  %2504 = vst.msk [vmem:[#allocation2 + $0x78] sm:$0xf] %vm18108_vm3, %v11698_v60  ;;  %1615 = vrot.lane.b32.xlu0 %v12670_v23, %s11695_s12  ;;  %v13301_v18 = vpop.permute.xlu1 %1231  ;;  %v13315_v23 = vor.u32 %v1207_v7, %v1203_v20  ;;  %v1326_v20 = vshrl.u32 %v13175_v47, 16  ;;  %v1330_v7 = vrot.slane %v1328_v16, 1 }
 0x190   :  { %2503 = vst.msk [vmem:[#allocation2 + $0x74] sm:$0x1] %vm18107_vm4, %v11698_v60  ;;  %2505 = vst.msk [vmem:[#allocation2 + $0x7c] sm:$0x1] %vm18107_vm4, %v11698_v60 }
 0x191   :  { %2506 = vst.msk [vmem:[#allocation2 + $0x80] sm:$0xf] %vm18108_vm3, %v11698_v60  ;;  %2508 = vst.msk [vmem:[#allocation2 + $0x88] sm:$0xf] %vm18108_vm3, %v11698_v60  ;;  %v13311_v38 = vpop.permute.xlu0 %1229  ;;  %1659 = vrot.lane.b32.xlu1 %v12747_v27, %s11696_s13  ;;  %v13328_v27 = vor.u32 %v1200_v49, %v1196_v48  ;;  %v13343_v48 = vor.u32 %v1337_v40, %v1333_v30  ;;  %v13357_v47 = vor.u32 %v1330_v7, %v1326_v20  ;;  %v18359_v40 = vld [vmem:[#allocation40_spill] sm:$0xff]  ;;  %v18364_v20 = vld [vmem:[#allocation47_spill] sm:$0xff] }
 0x192   :  { %2507 = vst.msk [vmem:[#allocation2 + $0x84] sm:$0x1] %vm18107_vm4, %v11698_v60  ;;  %2509 = vst.msk [vmem:[#allocation2 + $0x8c] sm:$0x1] %vm18107_vm4, %v11698_v60 }
 0x193   :  { %2510 = vst.msk [vmem:[#allocation2 + $0x90] sm:$0xf] %vm18108_vm3, %v11698_v60  ;;  %2512 = vst.msk [vmem:[#allocation2 + $0x98] sm:$0xf] %vm18108_vm3, %v11698_v60  ;;  %1657 = vrot.lane.b32.xlu0 %v12684_v5, %s11696_s13 }
 0x194   :  { %2511 = vst.msk [vmem:[#allocation2 + $0x94] sm:$0x1] %vm18107_vm4, %v11698_v60  ;;  %2513 = vst.msk [vmem:[#allocation2 + $0x9c] sm:$0x1] %vm18107_vm4, %v11698_v60  ;;  %v1764_v60 = vsel %vm1752_vm9, %v1731_v6, %v18340_v39  ;;  %v18345_v39 = vld [vmem:[#allocation56_spill] sm:$0xff] }
 0x195   :  { %18342 = vst [vmem:[#allocation28_spill] sm:$0xff] %v13301_v18  ;;  %v1797_v46 = vsel %vm18109_vm10, %v1764_v60, %v18343_v32  ;;  %v18346_v18 = vld [vmem:[#allocation58_spill] sm:$0xff]  ;;  %v18347_v32 = vld [vmem:[#allocation61_spill] sm:$0xff]  ;;  %v13339_v5 = vpop.permute.xlu0 %1369  ;;  %1239 = vrot.lane.b32.xlu1 %v13315_v23, %s11688_s9 }
 0x196   :  { %v1830_v6 = vsel %vm1818_vm11, %v1797_v46, %v18345_v39  ;;  %v1828_v63 = vsel %vm1818_vm11, %v1795_v3, %v18346_v18  ;;  %v13326_v46 = vpop.permute.xlu1 %1371  ;;  %v18357_v39 = vld [vmem:[#allocation6_spill] sm:$0xff] }
 0x197   :  { %v1863_v60 = vsel %vm1851_vm12, %v1830_v6, %v18347_v32  ;;  %v1861_v56 = vsel %vm1851_vm12, %v1828_v63, %v18348_v28  ;;  %1237 = vrot.lane.b32.xlu0 %v13328_v27, %s11688_s9  ;;  %v18360_v32 = vld [vmem:[#allocation7_spill] sm:$0xff] }
 0x198   :  { %v1896_v41 = vsel %vm1884_vm13, %v1863_v60, %v12676_v62  ;;  %v1894_v3 = vsel %vm1884_vm13, %v1861_v56, %v12680_v25  ;;  %v18361_v60 = vld [vmem:[#allocation46_spill] sm:$0xff] }
 0x199   :  { %v1929_v18 = vsel %vm18349_vm5, %v1896_v41, %v12745_v51  ;;  %v1927_v16 = vsel %vm18351_vm14, %v1894_v3, %v12763_v59  ;;  %vm18354_vm5 = vmmov %vm18352_vm0  ;;  %vm18358_vm14 = vcmask 392192   ;;  %v13370_v30 = vpop.permute.xlu0 %1653  ;;  %1379 = vrot.lane.b32.xlu1 %v13343_v48, %s11689_s15  ;;  %v1342_v3 = vshll.u32 %v13218_v9, 16 }
 0x19a   :  { %v1962_v62 = vsel %vm18350_vm15, %v1929_v18, %v12868_v26  ;;  %v1960_v51 = vsel %vm18353_vm2, %v1927_v16, %v12886_v34  ;;  %v13355_v26 = vpop.permute.xlu1 %1655  ;;  %vm18355_vm15 = vcmask 359424   ;;  %vm18363_vm2 = vcmask 424960   ;;  %v18368_v16 = vld [vmem:[#allocation54_spill] sm:$0xff] }
 0x19b   :  { %v1995_v63 = vsel %vm18352_vm0, %v1962_v62, %v12963_v53  ;;  %v1993_v49 = vsel %vm18354_vm5, %v1960_v51, %v12971_v33  ;;  %v18356_v53 = vld [vmem:[#allocation37_spill] sm:$0xff]  ;;  %v1349_v33 = vshll.u32 %v13211_v36, 16  ;;  %vm18362_vm0 = vmmov %vm18355_vm15  ;;  %1377 = vrot.lane.b32.xlu0 %v13357_v47, %s11689_s15  ;;  %v18370_v51 = vld [vmem:[#allocation59_spill] sm:$0xff] }
 0x19c   :  { %v2028_v25 = vsel %vm2016_vm1, %v1995_v63, %v13021_v8  ;;  %v1735_v34 = vsel %vm18110_vm8, %v18357_v39, %v18356_v53  ;;  %v2026_v8 = vsel %vm2016_vm1, %v1993_v49, %v13024_v29  ;;  %vm18365_vm5 = vmmov %vm18358_vm14  ;;  %v18367_v62 = vld [vmem:[#allocation53_spill] sm:$0xff]  ;;  %v18372_v39 = vld [vmem:[#allocation60_spill] sm:$0xff] }
 0x19d   :  { %v2061_v59 = vsel %vm18355_vm15, %v2028_v25, %v13066_v55  ;;  %v1733_v55 = vsel %vm18110_vm8, %v18360_v32, %v18359_v40  ;;  %v1768_v41 = vsel %vm1752_vm9, %v1735_v34, %v18361_v60  ;;  %v2059_v29 = vsel %vm18362_vm0, %v2026_v8, %v13075_v45  ;;  %v1696_v49 = vpop.permute.xlu0 %1695  ;;  %1663 = vrot.lane.b32.xlu1 %v13231_v35, %s11696_s13  ;;  %v18373_v8 = vld [vmem:[#allocation64_spill] sm:$0xff] }
 0x19e   :  { %v2094_v6 = vsel %vm18358_vm14, %v2061_v59, %v13132_v0  ;;  %v1766_v7 = vsel %vm1752_vm9, %v1733_v55, %v18364_v20  ;;  %v2092_v28 = vsel %vm18365_vm5, %v2059_v29, %v13140_v2  ;;  %vm18366_vm15 = vcmask 457728   ;;  %v1698_v18 = vpop.permute.xlu1 %1697  ;;  %vm18369_vm14 = vmmov %vm18363_vm2 }
 0x19f   :  { %v2127_v0 = vsel %vm18363_vm2, %v2094_v6, %v13195_v4  ;;  %v1801_v45 = vsel %vm18109_vm10, %v1768_v41, %v18367_v62  ;;  %v1799_v4 = vsel %vm18109_vm10, %v1766_v7, %v18368_v16  ;;  %v2125_v63 = vsel %vm18369_vm14, %v2092_v28, %v13197_v17  ;;  %vm18371_vm0 = vmmov %vm18366_vm15  ;;  %1661 = vrot.lane.b32.xlu0 %v12734_v13, %s11696_s13 }
 0x1a0   :  { %v2160_v56 = vsel %vm18366_vm15, %v2127_v0, %v13240_v58  ;;  %v1834_v58 = vsel %vm1818_vm11, %v1801_v45, %v18370_v51  ;;  %v2158_v25 = vsel %vm18371_vm0, %v2125_v63, %v13286_v24  ;;  %v1347_v59 = vshrl.u32 %v13211_v36, 16 }
 0x1a1   :  { %v2193_v2 = vsel %vm2181_vm6, %v2160_v56, %v1698_v18  ;;  %v1351_v53 = vrot.slane %v1349_v33, 1  ;;  %v1832_v34 = vsel %vm1818_vm11, %v1799_v4, %v18372_v39  ;;  %v1867_v17 = vsel %vm1851_vm12, %v1834_v58, %v18373_v8  ;;  %v13428_v13 = vpop.permute.xlu0 %1373  ;;  %1705 = vrot.lane.b32.xlu1 %v12870_v44, %s11697_s26  ;;  %v123_v58 = vld [vmem:[%s18049_s0 + $0x350] sm:$0xff]  ;;  %v18391_v39 = vld [vmem:[#allocation26_spill] sm:$0xff] }
 0x1a2   :  { %v2191_v6 = vsel %vm2181_vm6, %v2158_v25, %v1696_v49  ;;  %v1900_v40 = vsel %vm1884_vm13, %v1867_v17, %v12717_v54  ;;  %v13416_v24 = vpop.permute.xlu1 %1375  ;;  %v1340_v35 = vshrl.u32 %v13218_v9, 16  ;;  %v1344_v33 = vrot.slane %v1342_v3, 1  ;;  %v18386_v3 = vld [vmem:[#allocation70_spill] sm:$0xff] }
 0x1a3   :  { %v11245_v32 = vcombine.low %v2191_v6, %v2193_v2  ;;  %v1865_v55 = vsel %vm1851_vm12, %v1832_v34, %v12666_v22  ;;  %vm18374_vm2 = vcmask 228352   ;;  %vm18375_vm5 = vcmask 261120   ;;  %1703 = vrot.lane.b32.xlu0 %v12757_v15, %s11697_s26  ;;  %v18390_v2 = vld [vmem:[#allocation27_spill] sm:$0xff] }
 0x1a4   :  { %v1933_v60 = vsel %vm18374_vm2, %v1900_v40, %v12833_v50  ;;  %v1898_v41 = vsel %vm1884_vm13, %v1865_v55, %v12730_v37  ;;  %v13432_v29 = vor.u32 %v1351_v53, %v1347_v59  ;;  %vm18376_vm15 = vmmov %vm18374_vm2  ;;  %vm18377_vm14 = vcmask 293888   ;;  %v18392_v40 = vld [vmem:[#allocation16_spill] sm:$0xff] }
 0x1a5   :  { %v1966_v54 = vsel %vm18375_vm5, %v1933_v60, %v12943_v14  ;;  %11517 = vmatprep.mubr.msk.bf16.mxu0 %vm2286_vm7, %v11245_v32  ;;  %v1931_v22 = vsel %vm18376_vm15, %v1898_v41, %v12850_v57  ;;  %vm18378_vm0 = vmmov %vm18375_vm5  ;;  %v13446_v44 = vor.u32 %v1344_v33, %v1340_v35  ;;  %v105_v57 = vld [vmem:[%s18049_s0 + $0x2c0] sm:$0xff]  ;;  %vm18380_vm5 = vcmask 359424   ;;  %v13462_v7 = vpop.permute.xlu0 %1417  ;;  %v18393_v35 = vld [vmem:[#allocation12_spill] sm:$0xff] }
 0x1a6   :  { %v1999_v50 = vsel %vm18377_vm14, %v1966_v54, %v13011_v12  ;;  %v1964_v37 = vsel %vm18378_vm0, %v1931_v22, %v12947_v1  ;;  %v13444_v0 = vpop.permute.xlu1 %1419  ;;  %v106_v12 = vld [vmem:[%s18049_s0 + $0x2c8] sm:$0x1]  ;;  %vm18379_vm2 = vmmov %vm18377_vm14  ;;  %vm18381_vm15 = vcmask 392192   ;;  %1383 = vrot.lane.b32.xlu1 %v13432_v29, %s11689_s15  ;;  %vm18383_vm0 = vcmask 424960   ;;  %v18394_v60 = vld [vmem:[#allocation21_spill] sm:$0xff] }
 0x1a7   :  { %v2032_v14 = vsel %vm2016_vm1, %v1999_v50, %v13058_v61  ;;  %v1997_v1 = vsel %vm18379_vm2, %v1964_v37, %v13015_v31  ;;  %vm18382_vm14 = vmmov %vm18380_vm5  ;;  %v393_v56 = vmul.f32 0.2, %v105_v57  ;;  %v394_v18 = vmul.f32 0.2, %v106_v12  ;;  %1381 = vrot.lane.b32.xlu0 %v13446_v44, %s11689_s15  ;;  %v18396_v37 = vld [vmem:[#allocation9_spill] sm:$0xff] }
 0x1a8   :  { %v2065_v61 = vsel %vm18380_vm5, %v2032_v14, %v13110_v11  ;;  %v2030_v15 = vsel %vm2016_vm1, %v1997_v1, %v13060_v42  ;;  %vm18384_vm2 = vmmov %vm18381_vm15  ;;  %vm18385_vm5 = vcmask 457728   ;;  %vm250_vm4 = vcmp.gt.f32.partialorder %v106_v12, 0.0 }
 0x1a9   :  { %v2098_v20 = vsel %vm18381_vm15, %v2065_v61, %v13173_v21  ;;  %v2063_v28 = vsel %vm18382_vm14, %v2030_v15, %v13120_v43  ;;  %vm249_vm15 = vcmp.gt.f32.partialorder %v105_v57, 0.0  ;;  %vm18387_vm3 = vmmov %vm18383_vm0  ;;  %v1700_v45 = vpop.permute.xlu0 %1699  ;;  %v538_v4 = vsel %vm250_vm4, %v106_v12, %v394_v18  ;;  %v18397_v12 = vld [vmem:[#allocation31_spill] sm:$0xff]  ;;  %v18398_v15 = vld [vmem:[#allocation14_spill] sm:$0xff] }
 0x1aa   :  { %v2131_v31 = vsel %vm18383_vm0, %v2098_v20, %v13229_v10  ;;  %v2096_v11 = vsel %vm18384_vm2, %v2063_v28, %v13183_v19  ;;  %v1702_v21 = vpop.permute.xlu1 %1701  ;;  %vm18388_vm14 = vmmov %vm18385_vm5  ;;  %v18389_v19 = vld [vmem:[#allocation19_spill] sm:$0xff]  ;;  %v537_v16 = vsel %vm249_vm15, %v105_v57, %v393_v56  ;;  %v411_v59 = vmul.f32 0.2, %v123_v58 }
 0x1ab   :  { %v2164_v42 = vsel %vm18385_vm5, %v2131_v31, %v13355_v26  ;;  %v2129_v43 = vsel %vm18387_vm3, %v2096_v11, %v18386_v3  ;;  %1427 = vrot.lane.b32.xlu1 %v18389_v19, %s11690_s30  ;;  %1425 = vrot.lane.b32.xlu0 %v18390_v2, %s11690_s30  ;;  %v637_v49 = vpack.c.bf16 %v538_v4, %v537_v16  ;;  %vm267_vm3 = vcmp.gt.f32.partialorder %v123_v58, 0.0  ;;  %v18399_v18 = vld [vmem:[#allocation23_spill] sm:$0xff] }
 0x1ac   :  { %v2197_v62 = vsel %vm2181_vm6, %v2164_v42, %v1702_v21  ;;  %v2162_v10 = vsel %vm18388_vm14, %v2129_v43, %v13370_v30  ;;  %v124_v30 = vld [vmem:[%s18049_s0 + $0x358] sm:$0x1]  ;;  %v555_v17 = vsel %vm267_vm3, %v123_v58, %v411_v59  ;;  %v141_v42 = vld [vmem:[%s18049_s0 + $0x3e0] sm:$0xff]  ;;  %v142_v21 = vld [vmem:[%s18049_s0 + $0x3e8] sm:$0x1]  ;;  %vm18440_vm14 = vcmask 228352  }
 0x1ad   :  { %v2195_v26 = vsel %vm2181_vm6, %v2162_v10, %v1700_v45  ;;  %v13495_v25 = vpop.permute.xlu0 %705  ;;  %v412_v53 = vmul.f32 0.2, %v124_v30  ;;  %vm268_vm4 = vcmp.gt.f32.partialorder %v124_v30, 0.0  ;;  %v1477_v55 = vshll.u32 %v637_v49, 16  ;;  %v18400_v43 = vld [vmem:[#allocation39_spill] sm:$0xff]  ;;  %v159_v59 = vld [vmem:[%s18049_s0 + $0x470] sm:$0xff]  ;;  %vm18441_vm3 = vmmov %vm18440_vm14 }
 0x1ae   :  { %v11246_v63 = vcombine.low %v2195_v26, %v2197_v62  ;;  %v13486_v51 = vpop.permute.xlu1 %707  ;;  %v1475_v22 = vshrl.u32 %v637_v49, 16  ;;  %v429_v10 = vmul.f32 0.2, %v141_v42  ;;  %v430_v45 = vmul.f32 0.2, %v142_v21  ;;  %v18401_v26 = vld [vmem:[#allocation25_spill] sm:$0xff] }
 0x1af   :  { %1709 = vrot.lane.b32.xlu1 %v13357_v47, %s11697_s26  ;;  %1707 = vrot.lane.b32.xlu0 %v18391_v39, %s11697_s26  ;;  %v556_v6 = vsel %vm268_vm4, %v124_v30, %v412_v53  ;;  %v1479_v50 = vrot.slane %v1477_v55, 1  ;;  %vm285_vm0 = vcmp.gt.f32.partialorder %v141_v42, 0.0  ;;  %vm286_vm2 = vcmp.gt.f32.partialorder %v142_v21, 0.0  ;;  %v18403_v30 = vld [vmem:[#allocation63_spill] sm:$0xff]  ;;  %v160_v53 = vld [vmem:[%s18049_s0 + $0x478] sm:$0x1] }
 0x1b0   :  { %11518 = vmatmul.mubr.msk.bf16.gmra.mrb[4].mxu0 %vm2286_vm7, %v11246_v63  ;;  %v646_v33 = vpack.c.bf16 %v556_v6, %v555_v17  ;;  %v573_v63 = vsel %vm285_vm0, %v141_v42, %v429_v10  ;;  %v574_v58 = vsel %vm286_vm2, %v142_v21, %v430_v45  ;;  %v18404_v17 = vld [vmem:[#allocation52_spill] sm:$0xff]  ;;  %v18405_v55 = vld [vmem:[#allocation38_spill] sm:$0xff]  ;;  %vm303_vm5 = vcmp.gt.f32.partialorder %v159_v59, 0.0  ;;  %v18409_v10 = vld [vmem:[#allocation69_spill] sm:$0xff] }
 0x1b1   :  { %v13503_v8 = vpop.permute.xlu0 %1421  ;;  %v1480_v1 = vor.u32 %v1479_v50, %v1475_v22  ;;  %v655_v6 = vpack.c.bf16 %v574_v58, %v573_v63  ;;  %vm304_vm15 = vcmp.gt.f32.partialorder %v160_v53, 0.0  ;;  %vm18442_vm4 = vcmask 261120  }
 0x1b2   :  { %v13501_v34 = vpop.permute.xlu1 %1423  ;;  %v1523_v61 = vshll.u32 %v646_v33, 16  ;;  %v1521_v31 = vshrl.u32 %v646_v33, 16  ;;  %vm2676_vm0 = vsmask.f32 7938  ;;  %vm18444_vm2 = vmmov %vm18442_vm4 }
 0x1b3   :  { %1431 = vrot.lane.b32.xlu1 %v637_v49, %s11690_s30  ;;  %1429 = vrot.lane.b32.xlu0 %v18392_v40, %s11690_s30  ;;  %v1635_v42 = vshrl.u32 %v655_v6, 16 }
 0x1b4   :  { %v1525_v56 = vrot.slane %v1523_v61, 1 }
 0x1b5   :  { %v13510_v32 = vpop.permute.xlu0 %1451 }
 0x1b6   :  { %v13508_v47 = vpop.permute.xlu1 %1453  ;;  %v1526_v62 = vor.u32 %v1525_v56, %v1521_v31  ;;  %v1637_v31 = vshll.u32 %v655_v6, 16 }
 0x1b7   :  { %1461 = vrot.lane.b32.xlu1 %v18393_v35, %s11691_s27  ;;  %1459 = vrot.lane.b32.xlu0 %v18394_v60, %s11691_s27  ;;  %v447_v35 = vmul.f32 0.2, %v159_v59 }
 0x1b8   :  { %v1639_v21 = vrot.slane %v1637_v31, 1  ;;  %v18417_v31 = vld [vmem:[#allocation33_spill] sm:$0xff] }
 0x1b9   :  { %v13518_v54 = vpop.permute.xlu0 %709  ;;  %v591_v50 = vsel %vm303_vm5, %v159_v59, %v447_v35  ;;  %vm18445_vm5 = vcmask 293888  }
 0x1ba   :  { %v13516_v41 = vpop.permute.xlu1 %711  ;;  %18395 = vst [vmem:[#allocation5_spill] sm:$0xff] %v13518_v54  ;;  %v18435_v54 = vld [vmem:[#allocation67_spill] sm:$0xff] }
 0x1bb   :  { %1465 = vrot.lane.b32.xlu1 %v646_v33, %s11691_s27  ;;  %1463 = vrot.lane.b32.xlu0 %v18396_v37, %s11691_s27  ;;  %v448_v33 = vmul.f32 0.2, %v160_v53 }
 0x1bd   :  { %v13525_v57 = vpop.permute.xlu0 %849  ;;  %v592_v37 = vsel %vm304_vm15, %v160_v53, %v448_v33  ;;  %vm2682_vm15 = vsmask.f32 256 }
 0x1be   :  { %v13523_v14 = vpop.permute.xlu1 %851 }
 0x1bf   :  { %1507 = vrot.lane.b32.xlu1 %v18397_v12, %s11692_s29  ;;  %1505 = vrot.lane.b32.xlu0 %v18398_v15, %s11692_s29  ;;  %v18406_v12 = vld [vmem:[#allocation48_spill] sm:$0xff]  ;;  %v664_v15 = vpack.c.bf16 %v592_v37, %v591_v50 }
 0x1c1   :  { %v13533_v28 = vpop.permute.xlu0 %1455  ;;  %v1681_v63 = vshrl.u32 %v664_v15, 16 }
 0x1c2   :  { %v13531_v20 = vpop.permute.xlu1 %1457 }
 0x1c3   :  { %1511 = vrot.lane.b32.xlu1 %v1480_v1, %s11692_s29  ;;  %1509 = vrot.lane.b32.xlu0 %v18399_v18, %s11692_s29 }
 0x1c5   :  { %v13546_v3 = vpop.permute.xlu0 %1497 }
 0x1c6   :  { %v13538_v11 = vpop.permute.xlu1 %1499 }
 0x1c7   :  { %1553 = vrot.lane.b32.xlu1 %v18400_v43, %s11693_s18  ;;  %1551 = vrot.lane.b32.xlu0 %v18401_v26, %s11693_s18 }
 0x1c9   :  { %v13554_v4 = vpop.permute.xlu0 %853 }
 0x1ca   :  { %v13552_v16 = vpop.permute.xlu1 %855  ;;  %18402 = vst [vmem:[#allocation29_spill] sm:$0xff] %v13554_v4  ;;  %v18425_v4 = vld [vmem:[#allocation24_spill] sm:$0xff] }
 0x1cb   :  { %1557 = vrot.lane.b32.xlu1 %v1526_v62, %s11693_s18  ;;  %1555 = vrot.lane.b32.xlu0 %v18403_v30, %s11693_s18 }
 0x1cd   :  { %v13567_v39 = vpop.permute.xlu0 %993 }
 0x1ce   :  { %v13559_v49 = vpop.permute.xlu1 %995 }
 0x1cf   :  { %1587 = vrot.lane.b32.xlu1 %v18404_v17, %s11694_s20  ;;  %1585 = vrot.lane.b32.xlu0 %v18405_v55, %s11694_s20 }
 0x1d1   :  { %v13575_v22 = vpop.permute.xlu0 %1501 }
 0x1d2   :  { %v13573_v60 = vpop.permute.xlu1 %1503 }
 0x1d3   :  { %1591 = vrot.lane.b32.xlu1 %v655_v6, %s11694_s20  ;;  %1589 = vrot.lane.b32.xlu0 %v18406_v12, %s11694_s20 }
 0x1d5   :  { %v13582_v61 = vpop.permute.xlu0 %1543 }
 0x1d6   :  { %v13580_v1 = vpop.permute.xlu1 %1545 }
 0x1d7   :  { %1621 = vrot.lane.b32.xlu1 %v13218_v9, %s11695_s12  ;;  %1619 = vrot.lane.b32.xlu0 %v13169_v52, %s11695_s12  ;;  %v1640_v9 = vor.u32 %v1639_v21, %v1635_v42  ;;  %v1683_v52 = vshll.u32 %v664_v15, 16  ;;  %v18418_v21 = vld [vmem:[#allocation3_spill] sm:$0xff] }
 0x1d9   :  { %v13590_v18 = vpop.permute.xlu0 %997 }
 0x1da   :  { %v13588_v56 = vpop.permute.xlu1 %999  ;;  %18408 = vst [vmem:[#allocation41_spill] sm:$0xff] %v13590_v18  ;;  %v18423_v18 = vld [vmem:[#allocation36_spill] sm:$0xff] }
 0x1db   :  { %18407 = vst [vmem:[#allocation4_spill] sm:$0xff] %v13588_v56  ;;  %1625 = vrot.lane.b32.xlu1 %v664_v15, %s11695_s12  ;;  %1623 = vrot.lane.b32.xlu0 %v13211_v36, %s11695_s12  ;;  %v1685_v36 = vrot.slane %v1683_v52, 1  ;;  %v18416_v15 = vld [vmem:[#allocation8_spill] sm:$0xff]  ;;  %v18431_v56 = vld [vmem:[#allocation57_spill] sm:$0xff] }
 0x1dc   :  { %v1739_v42 = vsel %vm18110_vm8, %v18417_v31, %v18416_v15  ;;  %v18426_v31 = vld [vmem:[#allocation22_spill] sm:$0xff] }
 0x1dd   :  { %v13597_v62 = vpop.permute.xlu0 %1041 }
 0x1de   :  { %v13595_v43 = vpop.permute.xlu1 %1043 }
 0x1df   :  { %1667 = vrot.lane.b32.xlu1 %v13328_v27, %s11696_s13  ;;  %1665 = vrot.lane.b32.xlu0 %v18409_v10, %s11696_s13  ;;  %v1686_v27 = vor.u32 %v1685_v36, %v1681_v63  ;;  %v18420_v10 = vld [vmem:[#allocation11_spill] sm:$0xff] }
 0x1e0   :  { %v1772_v63 = vsel %vm1752_vm9, %v1739_v42, %v18420_v10  ;;  %v18427_v42 = vld [vmem:[#allocation10_spill] sm:$0xff]  ;;  %v18428_v10 = vld [vmem:[#allocation45_spill] sm:$0xff] }
 0x1e1   :  { %v13605_v26 = vpop.permute.xlu0 %1547 }
 0x1e2   :  { %v13603_v45 = vpop.permute.xlu1 %1549 }
 0x1e3   :  { %1671 = vrot.lane.b32.xlu1 %v1640_v9, %s11696_s13  ;;  %1669 = vrot.lane.b32.xlu0 %v13315_v23, %s11696_s13  ;;  %v18419_v9 = vld [vmem:[#allocation35_spill] sm:$0xff] }
 0x1e4   :  { %v1737_v52 = vsel %vm18110_vm8, %v18419_v9, %v18418_v21 }
 0x1e5   :  { %v13612_v30 = vpop.permute.xlu0 %1577 }
 0x1e6   :  { %v13610_v58 = vpop.permute.xlu1 %1579 }
 0x1e7   :  { %1713 = vrot.lane.b32.xlu1 %v13446_v44, %s11697_s26  ;;  %1711 = vrot.lane.b32.xlu0 %v13343_v48, %s11697_s26 }
 0x1e9   :  { %v13620_v53 = vpop.permute.xlu0 %1045 }
 0x1ea   :  { %v13618_v59 = vpop.permute.xlu1 %1047  ;;  %18411 = vst [vmem:[#allocation49_spill] sm:$0xff] %v13620_v53  ;;  %v18422_v53 = vld [vmem:[#allocation20_spill] sm:$0xff] }
 0x1eb   :  { %18410 = vst [vmem:[#allocation42_spill] sm:$0xff] %v13618_v59  ;;  %1717 = vrot.lane.b32.xlu1 %v1686_v27, %s11697_s26  ;;  %1715 = vrot.lane.b32.xlu0 %v13432_v29, %s11697_s26  ;;  %v18421_v27 = vld [vmem:[#allocation13_spill] sm:$0xff] }
 0x1ed   :  { %v13627_v17 = vpop.permute.xlu0 %1089 }
 0x1ee   :  { %v13625_v23 = vpop.permute.xlu1 %1091  ;;  %18412 = vst [vmem:[#allocation51_spill] sm:$0xff] %v13627_v17  ;;  %v1741_v17 = vsel %vm18110_vm8, %v18428_v10, %v18427_v42 }
 0x1f1   :  { %v13631_v44 = vpop.permute.xlu0 %1581 }
 0x1f2   :  { %v13629_v6 = vpop.permute.xlu1 %1583 }
 0x1f5   :  { %v13633_v33 = vpop.permute.xlu0 %1611 }
 0x1f6   :  { %v1614_v35 = vpop.permute.xlu1 %1613 }
 0x1f9   :  { %v13637_v55 = vpop.permute.xlu0 %1093 }
 0x1fa   :  { %v13635_v48 = vpop.permute.xlu1 %1095  ;;  %18414 = vst [vmem:[#allocation58_spill] sm:$0xff] %v13637_v55  ;;  %v1770_v55 = vsel %vm1752_vm9, %v1737_v52, %v18421_v27  ;;  %v18429_v52 = vld [vmem:[#allocation15_spill] sm:$0xff] }
 0x1fb   :  { %18413 = vst [vmem:[#allocation56_spill] sm:$0xff] %v13635_v48  ;;  %v1805_v48 = vsel %vm18109_vm10, %v1772_v63, %v18422_v53  ;;  %v1803_v15 = vsel %vm18109_vm10, %v1770_v55, %v18425_v4  ;;  %v18430_v53 = vld [vmem:[#allocation30_spill] sm:$0xff]  ;;  %v18433_v55 = vld [vmem:[#allocation32_spill] sm:$0xff] }
 0x1fc   :  { %v1838_v21 = vsel %vm1818_vm11, %v1805_v48, %v18426_v31  ;;  %v1836_v63 = vsel %vm1818_vm11, %v1803_v15, %v18430_v53  ;;  %v18434_v31 = vld [vmem:[#allocation55_spill] sm:$0xff] }
 0x1fd   :  { %v13641_v37 = vpop.permute.xlu0 %1233  ;;  %v1869_v19 = vsel %vm1851_vm12, %v1836_v63, %v18434_v31 }
 0x1fe   :  { %v13639_v50 = vpop.permute.xlu1 %1235  ;;  %18415 = vst [vmem:[#allocation61_spill] sm:$0xff] %v13641_v37  ;;  %v18424_v37 = vld [vmem:[#allocation44_spill] sm:$0xff] }
 0x1ff   :  { %v1743_v59 = vsel %vm18110_vm8, %v18424_v37, %v18423_v18  ;;  %v1871_v18 = vsel %vm1851_vm12, %v1838_v21, %v18431_v56  ;;  %v18432_v37 = vld [vmem:[#allocation17_spill] sm:$0xff] }
 0x200   :  { %v1776_v27 = vsel %vm1752_vm9, %v1743_v59, %v18429_v52  ;;  %v1774_v4 = vsel %vm1752_vm9, %v1741_v17, %v18432_v37  ;;  %v1904_v42 = vsel %vm1884_vm13, %v1871_v18, %v18435_v54  ;;  %v18437_v59 = vld [vmem:[#allocation18_spill] sm:$0xff]  ;;  %v18439_v17 = vld [vmem:[#allocation68_spill] sm:$0xff] }
 0x201   :  { %v13645_v12 = vpop.permute.xlu0 %1615  ;;  %v1809_v48 = vsel %vm18109_vm10, %v1776_v27, %v18433_v55  ;;  %v13689_v15 = vsel %vm18109_vm10, %v1774_v4, %v18437_v59  ;;  %v18438_v52 = vld [vmem:[#allocation50_spill] sm:$0xff]  ;;  %v1902_v21 = vsel %vm1884_vm13, %v1869_v19, %v18439_v17  ;;  %v1937_v27 = vsel %vm18440_vm14, %v1904_v42, %v13326_v46  ;;  %vm18446_vm14 = vmmov %vm18445_vm5 }
 0x202   :  { %v13643_v29 = vpop.permute.xlu1 %1617  ;;  %v13693_v56 = vsel %vm1818_vm11, %v1809_v48, %v18438_v52  ;;  %v1935_v54 = vsel %vm18441_vm3, %v1902_v21, %v13339_v5  ;;  %v1970_v63 = vsel %vm18442_vm4, %v1937_v27, %v13444_v0  ;;  %vm18448_vm3 = vcmask 359424  }
 0x203   :  { %v1968_v55 = vsel %vm18444_vm2, %v1935_v54, %v13462_v7  ;;  %v2003_v19 = vsel %vm18445_vm5, %v1970_v63, %v13508_v47  ;;  %vm18449_vm4 = vmmov %vm18448_vm3  ;;  %vm18450_vm2 = vcmask 392192  }
 0x204   :  { %v2001_v5 = vsel %vm18446_vm14, %v1968_v55, %v13510_v32  ;;  %v2036_v0 = vsel %vm2016_vm1, %v2003_v19, %v13538_v11  ;;  %vm18452_vm5 = vmmov %vm18450_vm2  ;;  %vm18453_vm14 = vcmask 424960  }
 0x205   :  { %v13666_v9 = vpop.permute.xlu0 %1657  ;;  %v2034_v7 = vsel %vm2016_vm1, %v2001_v5, %v13546_v3  ;;  %v2069_v47 = vsel %vm18448_vm3, %v2036_v0, %v13580_v1  ;;  %vm18454_vm3 = vmmov %vm18453_vm14 }
 0x206   :  { %v1660_v36 = vpop.permute.xlu1 %1659  ;;  %v2067_v27 = vsel %vm18449_vm4, %v2034_v7, %v13582_v61  ;;  %v2102_v32 = vsel %vm18450_vm2, %v2069_v47, %v13610_v58  ;;  %vm18455_vm4 = vcmask 60416  }
 0x207   :  { %v2100_v63 = vsel %vm18452_vm5, %v2067_v27, %v13612_v30  ;;  %v2135_v3 = vsel %vm18453_vm14, %v2102_v32, %v1614_v35  ;;  %vm13732_vm2 = vmand %vm18455_vm4, %vm2676_vm0  ;;  %vm18458_vm5 = vcmask 457728   ;;  %vm18459_vm14 = vcmask 57344   ;;  %v2699_v32 = vld [vmem:[#allocation2 + $0x20] sm:$0xf] }
 0x208   :  { %v11515_v53 = vpop.f32.mrb[0].mxu0  ;;  %v2133_v19 = vsel %vm18454_vm3, %v2100_v63, %v13633_v33  ;;  %v2168_v35 = vsel %vm18458_vm5, %v2135_v3, %v1660_v36  ;;  %vm13741_vm10 = vmand %vm18459_vm14, %vm2682_vm15  ;;  %v2702_v36 = vld [vmem:[#allocation2 + $0x24] sm:$0x1]  ;;  %vm18467_vm15 = vcmask 228352   ;;  %vm18468_vm3 = vcmask 261120  }
 0x209   :  { %v2410_v18 = vmax.f32 %v11515_v53, 0.0  ;;  %v2345_v37 = vpop.f32.mrb[1].mxu0  ;;  %v13703_v4 = vpop.permute.xlu0 %1237  ;;  %vm18462_vm0 = vmmov %vm18458_vm5  ;;  %vm18470_vm5 = vcmask 293888  }
 0x20a   :  { %v13685_v10 = vpop.permute.xlu1 %1239  ;;  %18443 = vst [vmem:[#allocation37_spill] sm:$0xff] %v13703_v4  ;;  %v2408_v46 = vmax.f32 %v2345_v37, 0.0  ;;  %v11516_v48 = vpop.f32.mrb[2].mxu0  ;;  %v2696_v37 = vld [vmem:[#allocation2 + $0x1c] sm:$0x1]  ;;  %vm18469_vm4 = vmmov %vm18467_vm15 }
 0x20b   :  { %18436 = vst [vmem:[#allocation62_spill] sm:$0xff] %v13685_v10  ;;  %v11439_v31 = vpack.c.bf16 %v2410_v18, %v2410_v18  ;;  %v2411_v42 = vmax.f32 %v11516_v48, 0.0  ;;  %v2348_v59 = vpop.f32.mrb[3].mxu0  ;;  %v2693_v18 = vld [vmem:[#allocation2 + $0x18] sm:$0xf]  ;;  %vm18471_vm14 = vmmov %vm18468_vm3 }
 0x20c   :  { %v11437_v17 = vpack.c.bf16 %v2408_v46, %v2408_v46  ;;  %v2409_v21 = vmax.f32 %v2348_v59, 0.0  ;;  %v2678_v48 = vld [vmem:[#allocation2 + $0x8] sm:$0xf] }
 0x20d   :  { %v2531_v11 = vshrl.u32 %v11439_v31, 16  ;;  %v11440_v53 = vpack.c.bf16 %v2411_v42, %v2411_v42  ;;  %v13723_v54 = vpop.permute.xlu0 %1377  ;;  %v2534_v46 = vshll.u32 %v11439_v31, 16  ;;  %v2684_v42 = vld [vmem:[#allocation2 + $0xc] sm:$0x1] }
 0x20e   :  { %v13713_v52 = vpop.permute.xlu1 %1379  ;;  %18451 = vst [vmem:[#allocation40_spill] sm:$0xff] %v13723_v54  ;;  %v2515_v1 = vshrl.u32 %v11437_v17, 16  ;;  %v11438_v55 = vpack.c.bf16 %v2409_v21, %v2409_v21  ;;  %v2518_v31 = vshll.u32 %v11437_v17, 16 }
 0x20f   :  { %18447 = vst [vmem:[#allocation6_spill] sm:$0xff] %v13713_v52  ;;  %v2533_v61 = vrot.slane %v2531_v11, 7  ;;  %v2539_v5 = vshrl.u32 %v11440_v53, 16  ;;  %v2542_v27 = vshll.u32 %v11440_v53, 16 }
 0x210   :  { %v2517_v33 = vrot.slane %v2515_v1, 7  ;;  %v2523_v59 = vshrl.u32 %v11438_v55, 16  ;;  %v2526_v10 = vshll.u32 %v11438_v55, 16 }
 0x211   :  { %v2536_v7 = vor.u32 %v2534_v46, %v2533_v61  ;;  %v2537_v47 = vrot.slane %v2533_v61, 4  ;;  %v2541_v21 = vrot.slane %v2539_v5, 7  ;;  %v13745_v11 = vpop.permute.xlu0 %1661  ;;  %v2687_v46 = vld [vmem:[#allocation2 + $0x10] sm:$0xf]  ;;  %v2690_v61 = vld [vmem:[#allocation2 + $0x14] sm:$0x1] }
 0x212   :  { %v13736_v30 = vpop.permute.xlu1 %1663  ;;  %v2520_v63 = vor.u32 %v2518_v31, %v2517_v33  ;;  %v2521_v4 = vrot.slane %v2517_v33, 4  ;;  %v2525_v3 = vrot.slane %v2523_v59, 7 }
 0x213   :  { %v2694_v54 = vsel %vm13732_vm2, %v2536_v7, %v2693_v18  ;;  %v2697_v17 = vsel %vm13741_vm10, %v2537_v47, %v2696_v37  ;;  %v2544_v1 = vor.u32 %v2542_v27, %v2541_v21  ;;  %v2545_v52 = vrot.slane %v2541_v21, 4  ;;  %v18466_v27 = vld [vmem:[#allocation66_spill] sm:$0xff] }
 0x214   :  { %2695 = vst [vmem:[#allocation2 + $0x18] sm:$0xf] %v2694_v54  ;;  %2698 = vst [vmem:[#allocation2 + $0x1c] sm:$0x1] %v2697_v17  ;;  %v2679_v53 = vsel %vm13732_vm2, %v2520_v63, %v2678_v48  ;;  %v2685_v33 = vsel %vm13741_vm10, %v2521_v4, %v2684_v42  ;;  %v2528_v55 = vor.u32 %v2526_v10, %v2525_v3  ;;  %v2529_v31 = vrot.slane %v2525_v3, 4  ;;  %v18463_v48 = vld [vmem:[#allocation65_spill] sm:$0xff] }
 0x215   :  { %v2166_v18 = vsel %vm18462_vm0, %v2133_v19, %v13666_v9  ;;  %2680 = vst [vmem:[#allocation2 + $0x8] sm:$0xf] %v2679_v53  ;;  %2686 = vst [vmem:[#allocation2 + $0xc] sm:$0x1] %v2685_v33  ;;  %v2700_v37 = vsel %vm13732_vm2, %v2544_v1, %v2699_v32  ;;  %v2703_v54 = vsel %vm13741_vm10, %v2545_v52, %v2702_v36  ;;  %v1704_v7 = vpop.permute.xlu0 %1703  ;;  %v18464_v42 = vld [vmem:[#allocation43_spill] sm:$0xff] }
 0x216   :  { %v1706_v5 = vpop.permute.xlu1 %1705  ;;  %v1875_v4 = vsel %vm1851_vm12, %v13693_v56, %v18463_v48  ;;  %2701 = vst [vmem:[#allocation2 + $0x20] sm:$0xf] %v2700_v37  ;;  %2704 = vst [vmem:[#allocation2 + $0x24] sm:$0x1] %v2703_v54  ;;  %v2688_v9 = vsel %vm13732_vm2, %v2528_v55, %v2687_v46  ;;  %v2691_v10 = vsel %vm13741_vm10, %v2529_v31, %v2690_v61 }
 0x217   :  { %v2201_v59 = vsel %vm2181_vm6, %v2168_v35, %v1706_v5  ;;  %v2199_v19 = vsel %vm2181_vm6, %v2166_v18, %v1704_v7  ;;  %v1840_v52 = vsel %vm1818_vm11, %v13689_v15, %v18464_v42  ;;  %v18465_v35 = vld [vmem:[#allocation28_spill] sm:$0xff]  ;;  %2689 = vst [vmem:[#allocation2 + $0x10] sm:$0xf] %v2688_v9  ;;  %2692 = vst [vmem:[#allocation2 + $0x14] sm:$0x1] %v2691_v10 }
 0x218   :  { %v1908_v47 = vsel %vm1884_vm13, %v1875_v4, %v18465_v35  ;;  %v11247_v56 = vcombine.low %v2199_v19, %v2201_v59  ;;  %v1873_v32 = vsel %vm1851_vm12, %v1840_v52, %v18466_v27  ;;  %vm18472_vm0 = vmmov %vm18470_vm5 }
 0x219   :  { %v1941_v63 = vsel %vm18467_vm15, %v1908_v47, %v13416_v24  ;;  %v1906_v36 = vsel %vm1884_vm13, %v1873_v32, %v13311_v38  ;;  %v13786_v3 = vpop.permute.xlu0 %1381  ;;  %vm18473_vm15 = vcmask 359424  }
 0x21a   :  { %v13775_v21 = vpop.permute.xlu1 %1383  ;;  %v1974_v15 = vsel %vm18468_vm3, %v1941_v63, %v13501_v34  ;;  %11521 = vmatprep.mubr.msk.bf16.mxu0 %vm2286_vm7, %v11247_v56  ;;  %v1939_v17 = vsel %vm18469_vm4, %v1906_v36, %v13428_v13  ;;  %vm18474_vm3 = vcmask 392192   ;;  %vm18475_vm4 = vmmov %vm18473_vm15 }
 0x21b   :  { %v2007_v1 = vsel %vm18470_vm5, %v1974_v15, %v13531_v20  ;;  %v1972_v46 = vsel %vm18471_vm14, %v1939_v17, %v13503_v8  ;;  %vm18476_vm5 = vcmask 424960   ;;  %vm18477_vm14 = vmmov %vm18474_vm3 }
 0x21c   :  { %v2040_v24 = vsel %vm2016_vm1, %v2007_v1, %v13573_v60  ;;  %v2005_v34 = vsel %vm18472_vm0, %v1972_v46, %v13533_v28  ;;  %vm18478_vm0 = vcmask 457728   ;;  %v1747_v46 = vsel %vm18110_vm8, %v18390_v2, %v13486_v51 }
 0x21d   :  { %v2073_v61 = vsel %vm18473_vm15, %v2040_v24, %v13603_v45  ;;  %v2038_v13 = vsel %vm2016_vm1, %v2005_v34, %v13575_v22  ;;  %v13806_v5 = vpop.permute.xlu0 %1425  ;;  %v13808_v8 = vld [vmem:[#allocation2 + $0x20] sm:$0xf]  ;;  %v2786_v53 = vld [vmem:[#allocation2 + $0x24] sm:$0x1]  ;;  %vm18479_vm15 = vmmov %vm18476_vm5  ;;  %v1780_v24 = vsel %vm1752_vm9, %v1747_v46, %v13523_v14  ;;  %v1751_v2 = vsel %vm18110_vm8, %v18392_v40, %v13516_v41 }
 0x21e   :  { %v13796_v38 = vpop.permute.xlu1 %1427  ;;  %v2106_v20 = vsel %vm18474_vm3, %v2073_v61, %v13629_v6  ;;  %v2071_v60 = vsel %vm18475_vm4, %v2038_v13, %v13605_v26  ;;  %v13815_v33 = vcombine.low %v13808_v8, %v2786_v53  ;;  %vm18480_vm3 = vmmov %vm18478_vm0  ;;  %v18481_v61 = vld [vmem:[#allocation34_spill] sm:$0xff]  ;;  %vm18482_vm4 = vcmask 97280   ;;  %v18486_v41 = vld [vmem:[#allocation4_spill] sm:$0xff] }
 0x21f   :  { %v2139_v28 = vsel %vm18476_vm5, %v2106_v20, %v13643_v29  ;;  %v2104_v22 = vsel %vm18477_vm14, %v2071_v60, %v13631_v44  ;;  %v1745_v13 = vsel %vm18110_vm8, %v18481_v61, %v13495_v25  ;;  %v1813_v20 = vsel %vm18482_vm4, %v1780_v24, %v13559_v49  ;;  %vm18483_vm5 = vmmov %vm18482_vm4  ;;  %v18497_v46 = vld [vmem:[#allocation56_spill] sm:$0xff] }
 0x220   :  { %v2172_v45 = vsel %vm18478_vm0, %v2139_v28, %v13736_v30  ;;  %v2137_v55 = vsel %vm18479_vm15, %v2104_v22, %v13645_v12  ;;  %v2928_v26 = vshll.u32 %v13815_v33, 16  ;;  %v2926_v54 = vshrl.u32 %v13815_v33, 16  ;;  %v18484_v22 = vld [vmem:[#allocation5_spill] sm:$0xff]  ;;  %vm18487_vm14 = vmmov %vm18482_vm4  ;;  %v18498_v61 = vld [vmem:[#allocation40_spill] sm:$0xff] }
 0x221   :  { %v2170_v29 = vsel %vm18480_vm3, %v2137_v55, %v13745_v11  ;;  %v1708_v18 = vpop.permute.xlu0 %1707  ;;  %v1778_v53 = vsel %vm1752_vm9, %v1745_v13, %v13525_v57  ;;  %v1846_v60 = vsel %vm1818_vm11, %v1813_v20, %v13595_v43  ;;  %v1784_v14 = vsel %vm1752_vm9, %v1751_v2, %v13552_v16  ;;  %v18489_v55 = vld [vmem:[#allocation6_spill] sm:$0xff]  ;;  %vm18496_vm3 = vmmov %vm18482_vm4 }
 0x222   :  { %v1710_v6 = vpop.permute.xlu1 %1709  ;;  %v2203_v37 = vsel %vm2181_vm6, %v2170_v29, %v1708_v18  ;;  %v2930_v44 = vrot.slane %v2928_v26, 1  ;;  %v1811_v51 = vsel %vm18483_vm5, %v1778_v53, %v13567_v39  ;;  %v1879_v25 = vsel %vm1851_vm12, %v1846_v60, %v13625_v23  ;;  %v18492_v26 = vld [vmem:[#allocation42_spill] sm:$0xff]  ;;  %v18493_v29 = vld [vmem:[#allocation61_spill] sm:$0xff] }
 0x223   :  { %v2205_v31 = vsel %vm2181_vm6, %v2172_v45, %v1710_v6  ;;  %v1844_v57 = vsel %vm1818_vm11, %v1811_v51, %v13597_v62  ;;  %v1912_v49 = vsel %vm1884_vm13, %v1879_v25, %v13639_v50  ;;  %v18485_v45 = vld [vmem:[#allocation19_spill] sm:$0xff]  ;;  %v1817_v39 = vsel %vm18487_vm14, %v1784_v14, %v18486_v41  ;;  %v18501_v53 = vld [vmem:[#allocation49_spill] sm:$0xff]  ;;  %v18502_v2 = vld [vmem:[#allocation62_spill] sm:$0xff] }
 0x224   :  { %v11248_v59 = vcombine.low %v2203_v37, %v2205_v31  ;;  %v13829_v30 = vor.u32 %v2930_v44, %v2926_v54  ;;  %v1749_v40 = vsel %vm18110_vm8, %v18485_v45, %v18484_v22  ;;  %v18488_v6 = vld [vmem:[#allocation51_spill] sm:$0xff]  ;;  %vm18490_vm0 = vcmask 228352   ;;  %v18491_v31 = vld [vmem:[#allocation29_spill] sm:$0xff] }
 0x225   :  { %v13832_v12 = vpop.permute.xlu0 %1429  ;;  %v1877_v23 = vsel %vm1851_vm12, %v1844_v57, %v18488_v6  ;;  %v1945_v16 = vsel %vm18490_vm0, %v1912_v49, %v18489_v55  ;;  %v1782_v62 = vsel %vm1752_vm9, %v1749_v40, %v18491_v31  ;;  %v1850_v50 = vsel %vm1818_vm11, %v1817_v39, %v18492_v26  ;;  %v18495_v44 = vld [vmem:[#allocation41_spill] sm:$0xff]  ;;  %vm18499_vm4 = vmmov %vm18490_vm0  ;;  %v18504_v57 = vld [vmem:[#allocation58_spill] sm:$0xff] }
 0x226   :  { %v1432_v7 = vpop.permute.xlu1 %1431  ;;  %11522 = vmatmul.mubr.msk.bf16.gmra.mrb[8].mxu0 %vm2286_vm7, %v11248_v59  ;;  %3017 = vrot.lane.b32.xlu0 %v13829_v30, %s11684_s22  ;;  %v1910_v18 = vsel %vm1884_vm13, %v1877_v23, %v18493_v29  ;;  %vm18494_vm15 = vcmask 261120   ;;  %v1815_v59 = vsel %vm18496_vm3, %v1782_v62, %v18495_v44  ;;  %v1883_v24 = vsel %vm1851_vm12, %v1850_v50, %v18497_v46  ;;  %v18507_v40 = vld [vmem:[#allocation37_spill] sm:$0xff] }
 0x227   :  { %v1978_v37 = vsel %vm18494_vm15, %v1945_v16, %v13796_v38  ;;  %v1943_v13 = vsel %vm18499_vm4, %v1910_v18, %v18498_v61  ;;  %vm18500_vm5 = vcmask 293888   ;;  %v1848_v60 = vsel %vm1818_vm11, %v1815_v59, %v18501_v53  ;;  %vm18503_vm14 = vmmov %vm18494_vm15 }
 0x228   :  { %v1916_v51 = vsel %vm1884_vm13, %v1883_v24, %v18502_v2  ;;  %v1976_v38 = vsel %vm18503_vm14, %v1943_v13, %v13806_v5  ;;  %v1881_v49 = vsel %vm1851_vm12, %v1848_v60, %v18504_v57  ;;  %vm18505_vm15 = vmmov %vm18500_vm5  ;;  %vm18506_vm3 = vcmask 359424   ;;  %v2717_v60 = vld [vmem:[#allocation2 + $0x38] sm:$0xf]  ;;  %v2720_v2 = vld [vmem:[#allocation2 + $0x3c] sm:$0x1] }
 0x229   :  { %v1460_v4 = vpop.permute.xlu0 %1459  ;;  %v1949_v22 = vsel %vm18490_vm0, %v1916_v51, %v13775_v21  ;;  %v1914_v41 = vsel %vm1884_vm13, %v1881_v49, %v18507_v40  ;;  %vm18508_vm4 = vmmov %vm18503_vm14  ;;  %vm18516_vm8 = vcmask 457728   ;;  %v2705_v57 = vld [vmem:[#allocation2 + $0x28] sm:$0xf] }
 0x22a   :  { %v1462_v48 = vpop.permute.xlu1 %1461  ;;  %v1982_v39 = vsel %vm18508_vm4, %v1949_v22, %v1432_v7  ;;  %vm18510_vm14 = vmmov %vm18490_vm0 }
 0x22b   :  { %v2011_v20 = vsel %vm18500_vm5, %v1978_v37, %v1462_v48  ;;  %v2009_v48 = vsel %vm18505_vm15, %v1976_v38, %v1460_v4  ;;  %vm18509_vm5 = vcmask 392192   ;;  %v1947_v23 = vsel %vm18510_vm14, %v1914_v41, %v13786_v3  ;;  %vm18511_vm12 = vmmov %vm18505_vm15 }
 0x22c   :  { %vm18512_vm0 = vmmov %vm18506_vm3  ;;  %vm18513_vm15 = vcmask 424960  }
 0x22d   :  { %v13836_v9 = vpop.permute.xlu0 %1463  ;;  %vm18518_vm14 = vmmov %vm18512_vm0 }
 0x22e   :  { %v1466_v11 = vpop.permute.xlu1 %1465 }
 0x22f   :  { %v2015_v55 = vsel %vm18511_vm12, %v1982_v39, %v1466_v11 }
 0x231   :  { %v1506_v19 = vpop.permute.xlu0 %1505 }
 0x232   :  { %v1508_v10 = vpop.permute.xlu1 %1507  ;;  %v2042_v5 = vsel %vm2016_vm1, %v2009_v48, %v1506_v19 }
 0x233   :  { %v2044_v25 = vsel %vm2016_vm1, %v2011_v20, %v1508_v10 }
 0x235   :  { %v13838_v52 = vpop.permute.xlu0 %1509 }
 0x236   :  { %v1512_v42 = vpop.permute.xlu1 %1511 }
 0x237   :  { %v2048_v16 = vsel %vm2016_vm1, %v2015_v55, %v1512_v42 }
 0x239   :  { %v1552_v47 = vpop.permute.xlu0 %1551 }
 0x23a   :  { %v1554_v35 = vpop.permute.xlu1 %1553  ;;  %v2075_v21 = vsel %vm18512_vm0, %v2042_v5, %v1552_v47 }
 0x23b   :  { %v2077_v45 = vsel %vm18506_vm3, %v2044_v25, %v1554_v35  ;;  %vm18514_vm3 = vmmov %vm18508_vm4 }
 0x23c   :  { %v1980_v35 = vsel %vm18514_vm3, %v1947_v23, %v13832_v12  ;;  %vm18515_vm4 = vmmov %vm18509_vm5 }
 0x23d   :  { %v13840_v27 = vpop.permute.xlu0 %1555  ;;  %vm18520_vm0 = vmmov %vm18515_vm4 }
 0x23e   :  { %v1558_v56 = vpop.permute.xlu1 %1557 }
 0x23f   :  { %v2081_v3 = vsel %vm18518_vm14, %v2048_v16, %v1558_v56 }
 0x241   :  { %v1586_v63 = vpop.permute.xlu0 %1585 }
 0x242   :  { %v1588_v32 = vpop.permute.xlu1 %1587  ;;  %v2108_v7 = vsel %vm18515_vm4, %v2075_v21, %v1586_v63  ;;  %vm18524_vm4 = vmmov %vm18520_vm0  ;;  %v2726_v21 = vld [vmem:[#allocation2 + $0x44] sm:$0x1] }
 0x243   :  { %v2110_v10 = vsel %vm18509_vm5, %v2077_v45, %v1588_v32  ;;  %vm18517_vm5 = vmmov %vm18511_vm12  ;;  %v2708_v45 = vld [vmem:[#allocation2 + $0x2c] sm:$0x1] }
 0x244   :  { %v2013_v31 = vsel %vm18517_vm5, %v1980_v35, %v13836_v9  ;;  %vm18519_vm12 = vmmov %vm18513_vm15 }
 0x245   :  { %v13842_v15 = vpop.permute.xlu0 %1589  ;;  %vm18523_vm3 = vmmov %vm18519_vm12 }
 0x246   :  { %v1592_v36 = vpop.permute.xlu1 %1591 }
 0x247   :  { %v2114_v12 = vsel %vm18520_vm0, %v2081_v3, %v1592_v36  ;;  %v2714_v3 = vld [vmem:[#allocation2 + $0x34] sm:$0x1]  ;;  %vm3703_vm0 = vsmask.f32 7440 }
 0x249   :  { %v1620_v1 = vpop.permute.xlu0 %1619 }
 0x24a   :  { %v1622_v17 = vpop.permute.xlu1 %1621  ;;  %v2141_v11 = vsel %vm18519_vm12, %v2108_v7, %v1620_v1  ;;  %vm3702_vm12 = vsmask.f32 3328 }
 0x24b   :  { %v2143_v4 = vsel %vm18513_vm15, %v2110_v10, %v1622_v17  ;;  %v2046_v17 = vsel %vm2016_vm1, %v2013_v31, %v13838_v52  ;;  %vm18521_vm15 = vmmov %vm18516_vm8  ;;  %v2711_v31 = vld [vmem:[#allocation2 + $0x30] sm:$0xf] }
 0x24c   :  { %vm18525_vm5 = vmmov %vm18521_vm15 }
 0x24d   :  { %v1624_v28 = vpop.permute.xlu0 %1623  ;;  %vm18526_vm1 = vmmov %vm18523_vm3 }
 0x24e   :  { %v1626_v34 = vpop.permute.xlu1 %1625 }
 0x24f   :  { %v2147_v62 = vsel %vm18523_vm3, %v2114_v12, %v1626_v34 }
 0x251   :  { %v1666_v54 = vpop.permute.xlu0 %1665 }
 0x252   :  { %v1668_v43 = vpop.permute.xlu1 %1667  ;;  %v2174_v42 = vsel %vm18521_vm15, %v2141_v11, %v1666_v54  ;;  %vm14456_vm15 = vmor %vm3702_vm12, %vm3703_vm0 }
 0x253   :  { %v2176_v19 = vsel %vm18516_vm8, %v2143_v4, %v1668_v43  ;;  %vm18522_vm8 = vmmov %vm18518_vm14 }
 0x254   :  { %v2079_v43 = vsel %vm18522_vm8, %v2046_v17, %v13840_v27  ;;  %vm18527_vm14 = vmmov %vm18525_vm5 }
 0x255   :  { %v1670_v6 = vpop.permute.xlu0 %1669  ;;  %v2112_v56 = vsel %vm18524_vm4, %v2079_v43, %v13842_v15 }
 0x256   :  { %v1672_v14 = vpop.permute.xlu1 %1671  ;;  %v2145_v52 = vsel %vm18526_vm1, %v2112_v56, %v1624_v28 }
 0x257   :  { %v2180_v1 = vsel %vm18525_vm5, %v2147_v62, %v1672_v14  ;;  %v2178_v29 = vsel %vm18527_vm14, %v2145_v52, %v1670_v6  ;;  %v2723_v6 = vld [vmem:[#allocation2 + $0x40] sm:$0xf] }
 0x259   :  { %v1712_v63 = vpop.permute.xlu0 %1711 }
 0x25a   :  { %v1714_v32 = vpop.permute.xlu1 %1713  ;;  %v2207_v9 = vsel %vm2181_vm6, %v2174_v42, %v1712_v63 }
 0x25b   :  { %v2209_v47 = vsel %vm2181_vm6, %v2176_v19, %v1714_v32 }
 0x25c   :  { %v11249_v26 = vcombine.low %v2207_v9, %v2209_v47 }
 0x25d   :  { %v1716_v27 = vpop.permute.xlu0 %1715 }
 0x25e   :  { %v1718_v50 = vpop.permute.xlu1 %1717  ;;  %11525 = vmatprep.mubr.msk.bf16.mxu0 %vm2286_vm7, %v11249_v26  ;;  %v2211_v34 = vsel %vm2181_vm6, %v2178_v29, %v1716_v27 }
 0x25f   :  { %v2213_v36 = vsel %vm2181_vm6, %v2180_v1, %v1718_v50  ;;  %vm18534_vm6 = vcmask 261120  }
 0x260   :  { %v11250_v18 = vcombine.low %v2211_v34, %v2213_v36 }
 0x262   :  { %11526 = vmatmul.mubr.msk.bf16.gmra.mrb[12].mxu0 %vm2286_vm7, %v11250_v18  ;;  %vm18536_vm7 = vmmov %vm18534_vm6 }
 0x283   :  { %v11519_v37 = vpop.f32.mrb[4].mxu0 }
 0x284   :  { %v2414_v15 = vmax.f32 %v11519_v37, 0.0  ;;  %v2361_v54 = vpop.f32.mrb[5].mxu0 }
 0x285   :  { %v2412_v44 = vmax.f32 %v2361_v54, 0.0  ;;  %v11520_v59 = vpop.f32.mrb[6].mxu0 }
 0x286   :  { %v11443_v46 = vpack.c.bf16 %v2414_v15, %v2414_v15  ;;  %v2415_v24 = vmax.f32 %v11520_v59, 0.0  ;;  %v2364_v28 = vpop.f32.mrb[7].mxu0 }
 0x287   :  { %v11441_v61 = vpack.c.bf16 %v2412_v44, %v2412_v44  ;;  %v2413_v13 = vmax.f32 %v2364_v28, 0.0 }
 0x288   :  { %v2563_v20 = vshrl.u32 %v11443_v46, 16  ;;  %v11444_v53 = vpack.c.bf16 %v2415_v24, %v2415_v24  ;;  %v2566_v14 = vshll.u32 %v11443_v46, 16 }
 0x289   :  { %v2547_v51 = vshrl.u32 %v11441_v61, 16  ;;  %v11442_v38 = vpack.c.bf16 %v2413_v13, %v2413_v13  ;;  %v2550_v48 = vshll.u32 %v11441_v61, 16 }
 0x28a   :  { %v2565_v25 = vrot.slane %v2563_v20, 7  ;;  %v2571_v49 = vshrl.u32 %v11444_v53, 16  ;;  %v2574_v10 = vshll.u32 %v11444_v53, 16  ;;  %v11650_v53 = vld [vmem:[%s18051_s2] sm:$0xff]  }
 0x28b   :  { %v2549_v22 = vrot.slane %v2547_v51, 7  ;;  %v2555_v40 = vshrl.u32 %v11442_v38, 16  ;;  %v2558_v35 = vshll.u32 %v11442_v38, 16  ;;  %v2798_v51 = vld [vmem:[#allocation2 + $0x54] sm:$0x1]  ;;  %11609 = vmatprep.subr.bf16.mxu1 %v11650_v53  ;;  %11529 = vmatprep.subr.bf16.mxu0 %v11650_v53 }
 0x28c   :  { %v2568_v41 = vor.u32 %v2566_v14, %v2565_v25  ;;  %v2569_v39 = vrot.slane %v2565_v25, 4  ;;  %v2573_v5 = vrot.slane %v2571_v49, 7  ;;  %11611 = vmatpush3.bf16.msra.mxu1 %v11650_v53  ;;  %v11654_v25 = vld [vmem:[%s18051_s2 + $0x8] sm:$0xff]   ;;  %11530 = vmatpush3.bf16.msra.mxu0 %v11650_v53 }
 0x28d   :  { %v2552_v23 = vor.u32 %v2550_v48, %v2549_v22  ;;  %v2553_v55 = vrot.slane %v2549_v22, 4  ;;  %v2557_v4 = vrot.slane %v2555_v40, 7  ;;  %11610 = vmatprep.subr.bf16.mxu1 %v11654_v25  ;;  %11531 = vmatprep.subr.bf16.mxu0 %v11654_v25 }
 0x28e   :  { %v2718_v16 = vsel %vm13732_vm2, %v2568_v41, %v2717_v60  ;;  %v2721_v7 = vsel %vm13741_vm10, %v2569_v39, %v2720_v2  ;;  %v2576_v19 = vor.u32 %v2574_v10, %v2573_v5  ;;  %v2577_v32 = vrot.slane %v2573_v5, 4  ;;  %v13986_v2 = vld [vmem:[#allocation2 + $0x50] sm:$0xf] }
 0x28f   :  { %2719 = vst [vmem:[#allocation2 + $0x38] sm:$0xf] %v2718_v16  ;;  %2722 = vst [vmem:[#allocation2 + $0x3c] sm:$0x1] %v2721_v7  ;;  %v2706_v11 = vsel %vm13732_vm2, %v2552_v23, %v2705_v57  ;;  %v2709_v47 = vsel %vm13741_vm10, %v2553_v55, %v2708_v45  ;;  %v2560_v17 = vor.u32 %v2558_v35, %v2557_v4  ;;  %v2561_v12 = vrot.slane %v2557_v4, 4 }
 0x290   :  { %2707 = vst [vmem:[#allocation2 + $0x28] sm:$0xf] %v2706_v11  ;;  %2710 = vst [vmem:[#allocation2 + $0x2c] sm:$0x1] %v2709_v47  ;;  %v2724_v42 = vsel %vm13732_vm2, %v2576_v19, %v2723_v6  ;;  %v2727_v63 = vsel %vm13741_vm10, %v2577_v32, %v2726_v21  ;;  %v14001_v49 = vcombine.low %v13986_v2, %v2798_v51  ;;  %11612 = vmatpush3.bf16.msra.mxu1 %v11654_v25 }
 0x291   :  { %2725 = vst [vmem:[#allocation2 + $0x40] sm:$0xf] %v2724_v42  ;;  %2728 = vst [vmem:[#allocation2 + $0x44] sm:$0x1] %v2727_v63  ;;  %v2712_v43 = vsel %vm13732_vm2, %v2560_v17, %v2711_v31  ;;  %v2715_v62 = vsel %vm13741_vm10, %v2561_v12, %v2714_v3  ;;  %11532 = vmatpush3.bf16.msra.mxu0 %v11654_v25  ;;  %v2741_v17 = vld [vmem:[#allocation2 + $0x68] sm:$0xf] }
 0x292   :  { %2713 = vst [vmem:[#allocation2 + $0x30] sm:$0xf] %v2712_v43  ;;  %2716 = vst [vmem:[#allocation2 + $0x34] sm:$0x1] %v2715_v62  ;;  %v2956_v40 = vshll.u32 %v14001_v49, 16  ;;  %v2954_v39 = vshrl.u32 %v14001_v49, 16 }
 0x293   :  { %v2744_v12 = vld [vmem:[#allocation2 + $0x6c] sm:$0x1]  ;;  %v2735_v25 = vld [vmem:[#allocation2 + $0x60] sm:$0xf] }
 0x294   :  { %v2958_v5 = vrot.slane %v2956_v40, 1 }
 0x296   :  { %v13961_v9 = vld [vmem:[#allocation2 + $0x38] sm:$0xf]  ;;  %v2792_v56 = vld [vmem:[#allocation2 + $0x3c] sm:$0x1]  ;;  %v2959_v23 = vor.u32 %v2958_v5, %v2954_v39 }
 0x297   :  { %v13963_v1 = vld [vmem:[#allocation2 + $0x28] sm:$0xf]  ;;  %v2788_v26 = vld [vmem:[#allocation2 + $0x2c] sm:$0x1]  ;;  %v13966_v50 = vcombine.low %v13961_v9, %v2792_v56  ;;  %v11301_v22 = vcombine.low %v13961_v9, %v13961_v9  ;;  %v2729_v56 = vld [vmem:[#allocation2 + $0x58] sm:$0xf] }
 0x298   :  { %v13969_v52 = vcombine.low %v13963_v1, %v2788_v26  ;;  %v2793_v13 = vld [vmem:[#allocation2 + $0x40] sm:$0xf]  ;;  %v2794_v20 = vld [vmem:[#allocation2 + $0x44] sm:$0x1]  ;;  %v11299_v38 = vcombine.low %v13963_v1, %v13963_v1 }
 0x299   :  { %v13971_v36 = vld [vmem:[#allocation2 + $0x30] sm:$0xf]  ;;  %v2790_v29 = vld [vmem:[#allocation2 + $0x34] sm:$0x1]  ;;  %v2949_v18 = vshll.u32 %v13966_v50, 16  ;;  %v2947_v28 = vshrl.u32 %v13966_v50, 16  ;;  %v13997_v57 = vcombine.low %v2793_v13, %v2794_v20  ;;  %v11302_v48 = vcombine.low %v2793_v13, %v2793_v13 }
 0x29a   :  { %v2935_v27 = vshll.u32 %v13969_v52, 16  ;;  %v13975_v34 = vcombine.low %v13971_v36, %v2790_v29  ;;  %v2933_v37 = vshrl.u32 %v13969_v52, 16  ;;  %v11300_v14 = vcombine.low %v13971_v36, %v13971_v36 }
 0x29b   :  { %v2951_v59 = vrot.slane %v2949_v18, 1  ;;  %18528 = vst [vmem:[#allocation7_spill] sm:$0xff] %v13997_v57  ;;  %v3102_v45 = vshll.u32 %v13997_v57, 16  ;;  %v3100_v10 = vshrl.u32 %v13997_v57, 16  ;;  %v2732_v18 = vld [vmem:[#allocation2 + $0x5c] sm:$0x1] }
 0x29c   :  { %v2937_v15 = vrot.slane %v2935_v27, 1  ;;  %v2942_v54 = vshll.u32 %v13975_v34, 16  ;;  %v2940_v46 = vshrl.u32 %v13975_v34, 16 }
 0x29d   :  { %v2952_v60 = vor.u32 %v2951_v59, %v2947_v28  ;;  %v3104_v41 = vrot.slane %v3102_v45, 1 }
 0x29e   :  { %v2938_v44 = vor.u32 %v2937_v15, %v2933_v37  ;;  %v2944_v24 = vrot.slane %v2942_v54, 1 }
 0x29f   :  { %v14014_v6 = vor.u32 %v3104_v41, %v3100_v10 }
 0x2a0   :  { %3019 = vrot.lane.b32.xlu1 %v2938_v44, %s11684_s22  ;;  %v2945_v61 = vor.u32 %v2944_v24, %v2940_v46  ;;  %v2747_v46 = vld [vmem:[#allocation2 + $0x70] sm:$0xf] }
 0x2a2   :  { %3021 = vrot.lane.b32.xlu0 %v2945_v61, %s11684_s22 }
 0x2a4   :  { %3023 = vrot.lane.b32.xlu1 %v2952_v60, %s11684_s22 }
 0x2a6   :  { %3069 = vrot.lane.b32.xlu0 %v11299_v38, %s11686_s28 }
 0x2a8   :  { %3071 = vrot.lane.b32.xlu1 %v11300_v14, %s11686_s28  ;;  %v2738_v14 = vld [vmem:[#allocation2 + $0x64] sm:$0x1] }
 0x2aa   :  { %3073 = vrot.lane.b32.xlu0 %v11301_v22, %s11686_s28 }
 0x2ac   :  { %3075 = vrot.lane.b32.xlu1 %v11302_v48, %s11686_s28 }
 0x2ae   :  { %3121 = vrot.lane.b32.xlu0 %v2938_v44, %s11688_s9 }
 0x2b0   :  { %3123 = vrot.lane.b32.xlu1 %v2945_v61, %s11688_s9  ;;  %v2750_v61 = vld [vmem:[#allocation2 + $0x74] sm:$0x1] }
 0x2b2   :  { %3125 = vrot.lane.b32.xlu0 %v2952_v60, %s11688_s9 }
 0x2b4   :  { %3127 = vrot.lane.b32.xlu1 %v14014_v6, %s11688_s9 }
 0x2b6   :  { %3025 = vrot.lane.b32.xlu0 %v2959_v23, %s11684_s22 }
 0x2f9   :  { %v11523_v55 = vpop.f32.mrb[8].mxu0 }
 0x2fa   :  { %v2418_v21 = vmax.f32 %v11523_v55, 0.0  ;;  %v2377_v4 = vpop.f32.mrb[9].mxu0 }
 0x2fb   :  { %v2416_v35 = vmax.f32 %v2377_v4, 0.0  ;;  %v11524_v16 = vpop.f32.mrb[10].mxu0 }
 0x2fc   :  { %v11447_v7 = vpack.c.bf16 %v2418_v21, %v2418_v21  ;;  %v2419_v19 = vmax.f32 %v11524_v16, 0.0  ;;  %v2380_v32 = vpop.f32.mrb[11].mxu0 }
 0x2fd   :  { %v11445_v31 = vpack.c.bf16 %v2416_v35, %v2416_v35  ;;  %v2417_v3 = vmax.f32 %v2380_v32, 0.0 }
 0x2fe   :  { %v2595_v11 = vshrl.u32 %v11447_v7, 16  ;;  %v11448_v47 = vpack.c.bf16 %v2419_v19, %v2419_v19  ;;  %v2598_v62 = vshll.u32 %v11447_v7, 16  ;;  %v14046_v7 = vpop.permute.xlu0 %3017 }
 0x2ff   :  { %v2579_v42 = vshrl.u32 %v11445_v31, 16  ;;  %v11446_v63 = vpack.c.bf16 %v2417_v3, %v2417_v3  ;;  %v2582_v27 = vshll.u32 %v11445_v31, 16 }
 0x300   :  { %v2597_v43 = vrot.slane %v2595_v11, 7  ;;  %v2603_v26 = vshrl.u32 %v11448_v47, 16  ;;  %v2606_v59 = vshll.u32 %v11448_v47, 16 }
 0x301   :  { %v2581_v29 = vrot.slane %v2579_v42, 7  ;;  %v2587_v37 = vshrl.u32 %v11446_v63, 16  ;;  %v2590_v20 = vshll.u32 %v11446_v63, 16 }
 0x302   :  { %v2600_v15 = vor.u32 %v2598_v62, %v2597_v43  ;;  %v2601_v54 = vrot.slane %v2597_v43, 4  ;;  %v2605_v44 = vrot.slane %v2603_v26, 7 }
 0x303   :  { %v2584_v24 = vor.u32 %v2582_v27, %v2581_v29  ;;  %v2585_v28 = vrot.slane %v2581_v29, 4  ;;  %v2589_v13 = vrot.slane %v2587_v37, 7 }
 0x304   :  { %v2742_v53 = vsel %vm13732_vm2, %v2600_v15, %v2741_v17  ;;  %v2745_v60 = vsel %vm13741_vm10, %v2601_v54, %v2744_v12  ;;  %v2608_v51 = vor.u32 %v2606_v59, %v2605_v44  ;;  %v2609_v38 = vrot.slane %v2605_v44, 4  ;;  %v14067_v44 = vld [vmem:[#allocation2] sm:$0xf]  ;;  %v2778_v59 = vld [vmem:[#allocation2 + $0x4] sm:$0x1] }
 0x305   :  { %2743 = vst [vmem:[#allocation2 + $0x68] sm:$0xf] %v2742_v53  ;;  %2746 = vst [vmem:[#allocation2 + $0x6c] sm:$0x1] %v2745_v60  ;;  %v2730_v22 = vsel %vm13732_vm2, %v2584_v24, %v2729_v56  ;;  %v2733_v48 = vsel %vm13741_vm10, %v2585_v28, %v2732_v18  ;;  %v2592_v45 = vor.u32 %v2590_v20, %v2589_v13  ;;  %v2593_v40 = vrot.slane %v2589_v13, 4 }
 0x306   :  { %2731 = vst [vmem:[#allocation2 + $0x58] sm:$0xf] %v2730_v22  ;;  %2734 = vst [vmem:[#allocation2 + $0x5c] sm:$0x1] %v2733_v48  ;;  %v2748_v41 = vsel %vm13732_vm2, %v2608_v51, %v2747_v46  ;;  %v2751_v39 = vsel %vm13741_vm10, %v2609_v38, %v2750_v61  ;;  %v14075_v13 = vcombine.low %v14067_v44, %v2778_v59  ;;  %v14083_v51 = vld [vmem:[#allocation2 + $0x8] sm:$0xf] }
 0x307   :  { %2749 = vst [vmem:[#allocation2 + $0x70] sm:$0xf] %v2748_v41  ;;  %2752 = vst [vmem:[#allocation2 + $0x74] sm:$0x1] %v2751_v39  ;;  %v2736_v5 = vsel %vm13732_vm2, %v2592_v45, %v2735_v25  ;;  %v2739_v10 = vsel %vm13741_vm10, %v2593_v40, %v2738_v14  ;;  %v2780_v38 = vld [vmem:[#allocation2 + $0xc] sm:$0x1]  ;;  %v3159_v48 = vsel %vm1752_vm9, %v13808_v8, %v14046_v7 }
 0x308   :  { %2737 = vst [vmem:[#allocation2 + $0x60] sm:$0xf] %v2736_v5  ;;  %2740 = vst [vmem:[#allocation2 + $0x64] sm:$0x1] %v2739_v10  ;;  %v14088_v14 = vld [vmem:[#allocation2 + $0x18] sm:$0xf]  ;;  %v14100_v39 = vcombine.low %v14083_v51, %v2780_v38 }
 0x309   :  { %18530 = vst [vmem:[#allocation47_spill] sm:$0xff] %v14088_v14  ;;  %v2784_v22 = vld [vmem:[#allocation2 + $0x1c] sm:$0x1]  ;;  %v2900_v41 = vshll.u32 %v14075_v13, 16  ;;  %v14102_v5 = vld [vmem:[#allocation2 + $0x10] sm:$0xf] }
 0x30a   :  { %v2782_v10 = vld [vmem:[#allocation2 + $0x14] sm:$0x1] }
 0x30c   :  { %v14036_v23 = vld [vmem:[#allocation2 + $0x68] sm:$0xf]  ;;  %v2804_v55 = vld [vmem:[#allocation2 + $0x6c] sm:$0x1] }
 0x30d   :  { %v14038_v21 = vld [vmem:[#allocation2 + $0x58] sm:$0xf]  ;;  %v2800_v4 = vld [vmem:[#allocation2 + $0x5c] sm:$0x1]  ;;  %v14041_v35 = vcombine.low %v14036_v23, %v2804_v55  ;;  %v11305_v25 = vcombine.low %v14036_v23, %v14036_v23 }
 0x30e   :  { %v14044_v16 = vcombine.low %v14038_v21, %v2800_v4  ;;  %v14069_v46 = vld [vmem:[#allocation2 + $0x70] sm:$0xf]  ;;  %v2806_v24 = vld [vmem:[#allocation2 + $0x74] sm:$0x1]  ;;  %v11303_v28 = vcombine.low %v14038_v21, %v14038_v21 }
 0x30f   :  { %v14048_v19 = vld [vmem:[#allocation2 + $0x60] sm:$0xf]  ;;  %v2802_v32 = vld [vmem:[#allocation2 + $0x64] sm:$0x1]  ;;  %v2977_v47 = vshll.u32 %v14041_v35, 16  ;;  %v2975_v18 = vshrl.u32 %v14041_v35, 16  ;;  %v14081_v60 = vcombine.low %v14069_v46, %v2806_v24  ;;  %v11306_v8 = vcombine.low %v14069_v46, %v14069_v46 }
 0x310   :  { %v2963_v3 = vshll.u32 %v14044_v16, 16  ;;  %v14054_v11 = vcombine.low %v14048_v19, %v2802_v32  ;;  %v2961_v17 = vshrl.u32 %v14044_v16, 16  ;;  %v11304_v53 = vcombine.low %v14048_v19, %v14048_v19 }
 0x311   :  { %v2979_v29 = vrot.slane %v2977_v47, 1  ;;  %18529 = vst [vmem:[#allocation46_spill] sm:$0xff] %v14081_v60  ;;  %v2982_v38 = vshrl.u32 %v14081_v60, 16 }
 0x312   :  { %v14050_v31 = vpop.permute.xlu1 %3019  ;;  %v2965_v12 = vrot.slane %v2963_v3, 1  ;;  %v2970_v42 = vshll.u32 %v14054_v11, 16  ;;  %v2968_v56 = vshrl.u32 %v14054_v11, 16 }
 0x313   :  { %v2980_v54 = vor.u32 %v2979_v29, %v2975_v18  ;;  %v3162_v45 = vsel %vm1752_vm9, %v13963_v1, %v14050_v31  ;;  %v2984_v1 = vshll.u32 %v14081_v60, 16 }
 0x314   :  { %v14059_v63 = vpop.permute.xlu0 %3021  ;;  %v2966_v62 = vor.u32 %v2965_v12, %v2961_v17  ;;  %v2972_v26 = vrot.slane %v2970_v42, 1  ;;  %v14127_v42 = vcombine.low %v14102_v5, %v2782_v10 }
 0x315   :  { %v3165_v17 = vsel %vm1752_vm9, %v13971_v36, %v14059_v63  ;;  %v2898_v36 = vshrl.u32 %v14075_v13, 16 }
 0x316   :  { %v14061_v43 = vpop.permute.xlu1 %3023  ;;  %3027 = vrot.lane.b32.xlu1 %v2966_v62, %s11684_s22  ;;  %v2973_v27 = vor.u32 %v2972_v26, %v2968_v56  ;;  %v14130_v56 = vcombine.low %v14088_v14, %v2784_v22 }
 0x317   :  { %v3168_v26 = vsel %vm1752_vm9, %v13961_v9, %v14061_v43  ;;  %v2986_v9 = vrot.slane %v2984_v1, 1 }
 0x318   :  { %v3070_v37 = vpop.permute.xlu0 %3069  ;;  %3029 = vrot.lane.b32.xlu0 %v2973_v27, %s11684_s22 }
 0x319   :  { %v3202_v55 = vsel %vm1818_vm11, %v3159_v48, %v3070_v37  ;;  %v2907_v37 = vshll.u32 %v14100_v39, 16 }
 0x31a   :  { %v3072_v15 = vpop.permute.xlu1 %3071  ;;  %3031 = vrot.lane.b32.xlu1 %v2980_v54, %s11684_s22 }
 0x31b   :  { %v3204_v4 = vsel %vm1818_vm11, %v3162_v45, %v3072_v15  ;;  %v2909_v48 = vrot.slane %v2907_v37, 1  ;;  %v2921_v45 = vshll.u32 %v14130_v56, 16 }
 0x31c   :  { %v3074_v61 = vpop.permute.xlu0 %3073  ;;  %3077 = vrot.lane.b32.xlu0 %v11303_v28, %s11686_s28  ;;  %v2902_v28 = vrot.slane %v2900_v41, 1  ;;  %v2905_v41 = vshrl.u32 %v14100_v39, 16 }
 0x31d   :  { %v3206_v29 = vsel %vm1818_vm11, %v3165_v17, %v3074_v61 }
 0x31e   :  { %v3076_v20 = vpop.permute.xlu1 %3075  ;;  %3079 = vrot.lane.b32.xlu1 %v11304_v53, %s11686_s28  ;;  %v2903_v22 = vor.u32 %v2902_v28, %v2898_v36 }
 0x31f   :  { %v3208_v15 = vsel %vm1818_vm11, %v3168_v26, %v3076_v20 }
 0x320   :  { %v14096_v40 = vpop.permute.xlu0 %3121  ;;  %3081 = vrot.lane.b32.xlu0 %v11305_v25, %s11686_s28  ;;  %v2987_v25 = vor.u32 %v2986_v9, %v2982_v38 }
 0x321   :  { %v14114_v3 = vsel %vm1884_vm13, %v3202_v55, %v14096_v40  ;;  %v2912_v55 = vshrl.u32 %v14127_v42, 16 }
 0x322   :  { %v14106_v32 = vpop.permute.xlu1 %3123  ;;  %18531 = vst [vmem:[#allocation53_spill] sm:$0xff] %v14114_v3  ;;  %3083 = vrot.lane.b32.xlu1 %v11306_v8, %s11686_s28  ;;  %v2919_v8 = vshrl.u32 %v14130_v56, 16 }
 0x323   :  { %v14118_v47 = vsel %vm1884_vm13, %v3204_v4, %v14106_v32  ;;  %v2923_v4 = vrot.slane %v2921_v45, 1 }
 0x324   :  { %18532 = vst [vmem:[#allocation54_spill] sm:$0xff] %v14118_v47  ;;  %v11315_v12 = vcombine.low %v14114_v3, %v14118_v47  ;;  %v14136_v18 = vpop.permute.xlu0 %3125  ;;  %3129 = vrot.lane.b32.xlu0 %v2966_v62, %s11688_s9  ;;  %v2914_v62 = vshll.u32 %v14127_v42, 16 }
 0x325   :  { %v14143_v59 = vsel %vm1884_vm13, %v3206_v29, %v14136_v18  ;;  %v14170_v1 = vor.u32 %v2923_v4, %v2919_v8  ;;  %v2753_v4 = vld [vmem:[#allocation2 + $0x78] sm:$0xf] }
 0x326   :  { %18533 = vst [vmem:[#allocation59_spill] sm:$0xff] %v14143_v59  ;;  %v14145_v24 = vpop.permute.xlu1 %3127  ;;  %11537 = vmatprep.mubr.msk.bf16.mxu1 %vm18534_vm6, %v11315_v12  ;;  %3131 = vrot.lane.b32.xlu1 %v2973_v27, %s11688_s9  ;;  %v2916_v10 = vrot.slane %v2914_v62, 1  ;;  %v2910_v27 = vor.u32 %v2909_v48, %v2905_v41  ;;  %v2768_v48 = vld [vmem:[#allocation2 + $0x8c] sm:$0x1] }
 0x327   :  { %v14153_v53 = vsel %vm1884_vm13, %v3208_v15, %v14145_v24 }
 0x328   :  { %18535 = vst [vmem:[#allocation60_spill] sm:$0xff] %v14153_v53  ;;  %v11316_v20 = vcombine.low %v14143_v59, %v14153_v53  ;;  %3133 = vrot.lane.b32.xlu0 %v2980_v54, %s11688_s9  ;;  %v2917_v54 = vor.u32 %v2916_v10, %v2912_v55 }
 0x32a   :  { %11538 = vmatmul.mubr.msk.bf16.vlgmr.msra.gmra.mrb[0].mxu1 %vm18536_vm7, %v11316_v20  ;;  %3135 = vrot.lane.b32.xlu1 %v2987_v25, %s11688_s9 }
 0x32c   :  { %3009 = vrot.lane.b32.xlu0 %v2903_v22, %s11684_s22  ;;  %v2765_v22 = vld [vmem:[#allocation2 + $0x88] sm:$0xf] }
 0x32e   :  { %3011 = vrot.lane.b32.xlu1 %v2910_v27, %s11684_s22 }
 0x330   :  { %3013 = vrot.lane.b32.xlu0 %v2917_v54, %s11684_s22 }
 0x332   :  { %3015 = vrot.lane.b32.xlu1 %v14170_v1, %s11684_s22 }
 0x334   :  { %3526 = vrot.lane.b32.xlu0 %v14100_v39, %s11686_s28 }
 0x335   :  { %v11527_v17 = vpop.f32.mrb[12].mxu0 }
 0x336   :  { %v2422_v12 = vmax.f32 %v11527_v17, 0.0  ;;  %3528 = vrot.lane.b32.xlu1 %v14127_v42, %s11686_s28  ;;  %v2393_v26 = vpop.f32.mrb[13].mxu0 }
 0x337   :  { %v2420_v29 = vmax.f32 %v2393_v26, 0.0  ;;  %v11528_v36 = vpop.f32.mrb[14].mxu0 }
 0x338   :  { %v11451_v37 = vpack.c.bf16 %v2422_v12, %v2422_v12  ;;  %v2423_v15 = vmax.f32 %v11528_v36, 0.0  ;;  %3113 = vrot.lane.b32.xlu0 %v2910_v27, %s11688_s9  ;;  %v2396_v9 = vpop.f32.mrb[15].mxu0  ;;  %v2756_v12 = vld [vmem:[#allocation2 + $0x7c] sm:$0x1] }
 0x339   :  { %v11449_v28 = vpack.c.bf16 %v2420_v29, %v2420_v29  ;;  %v2421_v20 = vmax.f32 %v2396_v9, 0.0 }
 0x33a   :  { %v2627_v38 = vshrl.u32 %v11451_v37, 16  ;;  %v11452_v62 = vpack.c.bf16 %v2423_v15, %v2423_v15  ;;  %3115 = vrot.lane.b32.xlu1 %v2917_v54, %s11688_s9  ;;  %v2630_v55 = vshll.u32 %v11451_v37, 16  ;;  %v2771_v54 = vld [vmem:[#allocation2 + $0x90] sm:$0xf]  ;;  %v2774_v37 = vld [vmem:[#allocation2 + $0x94] sm:$0x1] }
 0x33b   :  { %v2611_v45 = vshrl.u32 %v11449_v28, 16  ;;  %v11450_v41 = vpack.c.bf16 %v2421_v20, %v2421_v20  ;;  %v2614_v27 = vshll.u32 %v11449_v28, 16 }
 0x33c   :  { %v2629_v10 = vrot.slane %v2627_v38, 7  ;;  %v2635_v8 = vshrl.u32 %v11452_v62, 16  ;;  %3530 = vrot.lane.b32.xlu0 %v14130_v56, %s11686_s28  ;;  %v2638_v9 = vshll.u32 %v11452_v62, 16 }
 0x33d   :  { %v2613_v17 = vrot.slane %v2611_v45, 7  ;;  %v2619_v26 = vshrl.u32 %v11450_v41, 16  ;;  %v2622_v53 = vshll.u32 %v11450_v41, 16 }
 0x33e   :  { %v2632_v29 = vor.u32 %v2630_v55, %v2629_v10  ;;  %v2633_v36 = vrot.slane %v2629_v10, 4  ;;  %v2637_v15 = vrot.slane %v2635_v8, 7  ;;  %3532 = vrot.lane.b32.xlu1 %v13815_v33, %s11686_s28  ;;  %v2759_v10 = vld [vmem:[#allocation2 + $0x80] sm:$0xf]  ;;  %v2762_v8 = vld [vmem:[#allocation2 + $0x84] sm:$0x1] }
 0x33f   :  { %v2616_v20 = vor.u32 %v2614_v27, %v2613_v17  ;;  %v2617_v38 = vrot.slane %v2613_v17, 4  ;;  %v2621_v61 = vrot.slane %v2619_v26, 7 }
 0x340   :  { %v2766_v59 = vsel %vm13732_vm2, %v2632_v29, %v2765_v22  ;;  %v2769_v28 = vsel %vm13741_vm10, %v2633_v36, %v2768_v48  ;;  %v2640_v45 = vor.u32 %v2638_v9, %v2637_v15  ;;  %v2641_v55 = vrot.slane %v2637_v15, 4  ;;  %3033 = vrot.lane.b32.xlu0 %v2987_v25, %s11684_s22 }
 0x341   :  { %2767 = vst [vmem:[#allocation2 + $0x88] sm:$0xf] %v2766_v59  ;;  %2770 = vst [vmem:[#allocation2 + $0x8c] sm:$0x1] %v2769_v28  ;;  %v2754_v62 = vsel %vm13732_vm2, %v2616_v20, %v2753_v4  ;;  %v2757_v41 = vsel %vm13741_vm10, %v2617_v38, %v2756_v12  ;;  %v2624_v17 = vor.u32 %v2622_v53, %v2621_v61  ;;  %v2625_v27 = vrot.slane %v2621_v61, 4 }
 0x342   :  { %2755 = vst [vmem:[#allocation2 + $0x78] sm:$0xf] %v2754_v62  ;;  %2758 = vst [vmem:[#allocation2 + $0x7c] sm:$0x1] %v2757_v41  ;;  %v2772_v22 = vsel %vm13732_vm2, %v2640_v45, %v2771_v54  ;;  %v2775_v48 = vsel %vm13741_vm10, %v2641_v55, %v2774_v37 }
 0x343   :  { %2773 = vst [vmem:[#allocation2 + $0x90] sm:$0xf] %v2772_v22  ;;  %2776 = vst [vmem:[#allocation2 + $0x94] sm:$0x1] %v2775_v48  ;;  %v2760_v59 = vsel %vm13732_vm2, %v2624_v17, %v2759_v10  ;;  %v2763_v25 = vsel %vm13741_vm10, %v2625_v27, %v2762_v8  ;;  %v11675_v10 = vld [vmem:[%s18051_s2 + $0x10] sm:$0xff]  }
 0x344   :  { %2761 = vst [vmem:[#allocation2 + $0x80] sm:$0xf] %v2760_v59  ;;  %2764 = vst [vmem:[#allocation2 + $0x84] sm:$0x1] %v2763_v25  ;;  %3117 = vrot.lane.b32.xlu0 %v14170_v1, %s11688_s9  ;;  %11549 = vmatprep.subr.bf16.mxu1 %v11675_v10 }
 0x345   :  { %11550 = vmatpush3.bf16.msra.mxu1 %v11675_v10  ;;  %v11296_v10 = vcombine.low %v14102_v5, %v14102_v5  ;;  %vm18546_vm10 = vmmov %vm18534_vm6 }
 0x346   :  { %vm18548_vm2 = vmmov %vm18534_vm6 }
 0x347   :  { %vm18557_vm8 = vmmov %vm18548_vm2 }
 0x348   :  { %v14203_v61 = vld [vmem:[#allocation2 + $0x88] sm:$0xf]  ;;  %v2812_v12 = vld [vmem:[#allocation2 + $0x8c] sm:$0x1]  ;;  %vm18558_vm3 = vmmov %vm18548_vm2 }
 0x349   :  { %v14205_v53 = vld [vmem:[#allocation2 + $0x78] sm:$0xf]  ;;  %v2808_v4 = vld [vmem:[#allocation2 + $0x7c] sm:$0x1]  ;;  %v14217_v15 = vcombine.low %v14203_v61, %v2812_v12  ;;  %v11309_v22 = vcombine.low %v14203_v61, %v14203_v61  ;;  %vm18559_vm4 = vmmov %vm18548_vm2 }
 0x34a   :  { %v14208_v26 = vcombine.low %v14205_v53, %v2808_v4  ;;  %v11307_v8 = vcombine.low %v14205_v53, %v14205_v53  ;;  %v14234_v17 = vld [vmem:[#allocation2 + $0x90] sm:$0xf]  ;;  %v2814_v27 = vld [vmem:[#allocation2 + $0x94] sm:$0x1]  ;;  %v11676_v12 = vld [vmem:[%s18051_s2 + $0x18] sm:$0xff]  }
 0x34b   :  { %v14210_v29 = vld [vmem:[#allocation2 + $0x80] sm:$0xf]  ;;  %v2810_v58 = vld [vmem:[#allocation2 + $0x84] sm:$0x1]  ;;  %18539 = vst [vmem:[#allocation27_spill] sm:$0xff] %v14217_v15  ;;  %v3005_v28 = vshll.u32 %v14217_v15, 16  ;;  %v14243_v48 = vcombine.low %v14234_v17, %v2814_v27  ;;  %v11310_v59 = vcombine.low %v14234_v17, %v14234_v17  ;;  %11551 = vmatprep.subr.bf16.mxu1 %v11676_v12  ;;  %vm18560_vm5 = vmmov %vm18548_vm2 }
 0x34c   :  { %18537 = vst [vmem:[#allocation64_spill] sm:$0xff] %v14208_v26  ;;  %v2991_v0 = vshll.u32 %v14208_v26, 16  ;;  %v14214_v36 = vcombine.low %v14210_v29, %v2810_v58  ;;  %v2989_v1 = vshrl.u32 %v14208_v26, 16  ;;  %v3003_v62 = vshrl.u32 %v14217_v15, 16  ;;  %18540 = vst [vmem:[#allocation26_spill] sm:$0xff] %v14234_v17  ;;  %11552 = vmatpush3.bf16.msra.mxu1 %v11676_v12 }
 0x34d   :  { %v3007_v55 = vrot.slane %v3005_v28, 1  ;;  %18541 = vst [vmem:[#allocation16_spill] sm:$0xff] %v14243_v48  ;;  %v3109_v25 = vshll.u32 %v14243_v48, 16  ;;  %v3107_v58 = vshrl.u32 %v14243_v48, 16  ;;  %v2815_v28 = vld [vmem:[#allocation2 + $0x98] sm:$0xf]  ;;  %vm18567_vm1 = vmmov %vm18548_vm2 }
 0x34e   :  { %18538 = vst [vmem:[#allocation70_spill] sm:$0xff] %v14214_v36  ;;  %v2993_v9 = vrot.slane %v2991_v0, 1  ;;  %v2998_v54 = vshll.u32 %v14214_v36, 16  ;;  %v2996_v38 = vshrl.u32 %v14214_v36, 16  ;;  %vm18570_vm14 = vmmov %vm18567_vm1 }
 0x34f   :  { %v3008_v41 = vor.u32 %v3007_v55, %v3003_v62  ;;  %v3111_v4 = vrot.slane %v3109_v25, 1  ;;  %v11297_v55 = vcombine.low %v14088_v14, %v14088_v14  ;;  %vm18574_vm6 = vmmov %vm18567_vm1 }
 0x350   :  { %v2994_v20 = vor.u32 %v2993_v9, %v2989_v1  ;;  %v3000_v37 = vrot.slane %v2998_v54, 1  ;;  %v2795_v1 = vld [vmem:[#allocation2 + $0x48] sm:$0xf]  ;;  %v2796_v9 = vld [vmem:[#allocation2 + $0x4c] sm:$0x1]  ;;  %v14279_v54 = vld [vmem:[%s18051_s2 + $0x30] sm:$0xff]  }
 0x351   :  { %v3112_v0 = vor.u32 %v3111_v4, %v3107_v58  ;;  %11589 = vmatprep.subr.bf16.mxu1 %v14279_v54  ;;  %vm18575_vm7 = vmmov %vm18567_vm1 }
 0x352   :  { %3035 = vrot.lane.b32.xlu1 %v2994_v20, %s11684_s22  ;;  %v3001_v45 = vor.u32 %v3000_v37, %v2996_v38  ;;  %v11295_v38 = vcombine.low %v14083_v51, %v14083_v51  ;;  %vm18580_vm12 = vmmov %vm18567_vm1 }
 0x353   :  { %vm18583_vm0 = vmmov %vm18567_vm1 }
 0x354   :  { %3037 = vrot.lane.b32.xlu0 %v3001_v45, %s11684_s22 }
 0x356   :  { %3119 = vrot.lane.b32.xlu1 %v13829_v30, %s11688_s9  ;;  %v11308_v30 = vcombine.low %v14210_v29, %v14210_v29 }
 0x358   :  { %3085 = vrot.lane.b32.xlu0 %v11307_v8, %s11686_s28  ;;  %v14296_v8 = vpop.permute.xlu0 %3025 }
 0x35a   :  { %3039 = vrot.lane.b32.xlu1 %v3008_v41, %s11684_s22 }
 0x35c   :  { %3089 = vrot.lane.b32.xlu0 %v11309_v22, %s11686_s28 }
 0x35e   :  { %3087 = vrot.lane.b32.xlu1 %v11308_v30, %s11686_s28  ;;  %v11681_v30 = vld [vmem:[#allocation2 + $0x20] sm:$0xf] }
 0x360   :  { %3137 = vrot.lane.b32.xlu0 %v2994_v20, %s11688_s9  ;;  %v11387_v20 = vcombine.low %v2795_v1, %v2796_v9 }
 0x362   :  { %3091 = vrot.lane.b32.xlu1 %v11310_v59, %s11686_s28  ;;  %v4206_v37 = vshll.u32 %v11387_v20, 16  ;;  %v4204_v62 = vshrl.u32 %v11387_v20, 16  ;;  %v11298_v59 = vcombine.low %v11681_v30, %v11681_v30 }
 0x364   :  { %3141 = vrot.lane.b32.xlu0 %v3008_v41, %s11688_s9  ;;  %v4208_v41 = vrot.slane %v4206_v37, 1 }
 0x366   :  { %3139 = vrot.lane.b32.xlu1 %v3001_v45, %s11688_s9  ;;  %v2816_v45 = vld [vmem:[#allocation2 + $0x9c] sm:$0x1]  ;;  %v4209_v25 = vor.u32 %v4208_v41, %v4204_v62  ;;  %v3171_v41 = vsel %vm1752_vm9, %v13986_v2, %v14296_v8 }
 0x367   :  { %v11388_v27 = vcombine.low %v2815_v28, %v2816_v45  ;;  %v11385_v45 = vcombine.low %v2795_v1, %v2795_v1 }
 0x368   :  { %3534 = vrot.lane.b32.xlu0 %v13969_v52, %s11686_s28 }
 0x369   :  { %v4213_v4 = vshll.u32 %v11388_v27, 16  ;;  %v4211_v9 = vshrl.u32 %v11388_v27, 16 }
 0x36a   :  { %3143 = vrot.lane.b32.xlu1 %v3112_v0, %s11688_s9 }
 0x36c   :  { %3538 = vrot.lane.b32.xlu0 %v13966_v50, %s11686_s28 }
 0x36e   :  { %3536 = vrot.lane.b32.xlu1 %v13975_v34, %s11686_s28 }
 0x370   :  { %3542 = vrot.lane.b32.xlu0 %v14044_v16, %s11686_s28 }
 0x372   :  { %3540 = vrot.lane.b32.xlu1 %v13997_v57, %s11686_s28 }
 0x374   :  { %3546 = vrot.lane.b32.xlu0 %v14041_v35, %s11686_s28 }
 0x376   :  { %3544 = vrot.lane.b32.xlu1 %v14054_v11, %s11686_s28 }
 0x378   :  { %3550 = vrot.lane.b32.xlu0 %v14208_v26, %s11686_s28 }
 0x37a   :  { %3548 = vrot.lane.b32.xlu1 %v14081_v60, %s11686_s28 }
 0x37c   :  { %3554 = vrot.lane.b32.xlu0 %v14217_v15, %s11686_s28 }
 0x37e   :  { %3552 = vrot.lane.b32.xlu1 %v14214_v36, %s11686_s28 }
 0x380   :  { %3061 = vrot.lane.b32.xlu0 %v11295_v38, %s11686_s28  ;;  %v4215_v38 = vrot.slane %v4213_v4, 1 }
 0x382   :  { %3556 = vrot.lane.b32.xlu1 %v14243_v48, %s11686_s28 }
 0x384   :  { %3065 = vrot.lane.b32.xlu0 %v11297_v55, %s11686_s28 }
 0x386   :  { %3063 = vrot.lane.b32.xlu1 %v11296_v10, %s11686_s28 }
 0x388   :  { %v14299_v22 = vpop.permute.xlu1 %3027  ;;  %4183 = vrot.lane.b32.xlu0 %v14014_v6, %s11684_s22  ;;  %v4216_v6 = vor.u32 %v4215_v38, %v4211_v9 }
 0x38a   :  { %3067 = vrot.lane.b32.xlu1 %v11298_v59, %s11686_s28  ;;  %v14304_v12 = vpop.permute.xlu0 %3029 }
 0x38b   :  { %v3177_v4 = vsel %vm1752_vm9, %v14048_v19, %v14304_v12 }
 0x38c   :  { %v14306_v58 = vpop.permute.xlu1 %3031  ;;  %4217 = vrot.lane.b32.xlu0 %v4209_v25, %s11688_s9 }
 0x38d   :  { %v3180_v38 = vsel %vm1752_vm9, %v14036_v23, %v14306_v58 }
 0x38e   :  { %4477 = vrot.lane.b32.xlu1 %v11387_v20, %s11686_s28  ;;  %v3078_v37 = vpop.permute.xlu0 %3077  ;;  %v11386_v20 = vcombine.low %v2815_v28, %v2815_v28 }
 0x38f   :  { %v3210_v1 = vsel %vm1818_vm11, %v3171_v41, %v3078_v37 }
 0x390   :  { %v3080_v55 = vpop.permute.xlu1 %3079  ;;  %4185 = vrot.lane.b32.xlu0 %v3112_v0, %s11684_s22  ;;  %v3174_v0 = vsel %vm1752_vm9, %v14038_v21, %v14299_v22 }
 0x391   :  { %v3212_v59 = vsel %vm1818_vm11, %v3174_v0, %v3080_v55 }
 0x392   :  { %4193 = vrot.lane.b32.xlu1 %v11385_v45, %s11686_s28  ;;  %v3082_v10 = vpop.permute.xlu0 %3081 }
 0x394   :  { %v3084_v62 = vpop.permute.xlu1 %3083  ;;  %4219 = vrot.lane.b32.xlu0 %v4216_v6, %s11688_s9 }
 0x395   :  { %v3216_v37 = vsel %vm1818_vm11, %v3180_v38, %v3084_v62  ;;  %v14365_v62 = vld [vmem:[%s18051_s2 + $0x20] sm:$0xff]  }
 0x396   :  { %4479 = vrot.lane.b32.xlu1 %v11388_v27, %s11686_s28  ;;  %v14317_v30 = vpop.permute.xlu0 %3129  ;;  %v3214_v27 = vsel %vm1818_vm11, %v3177_v4, %v3082_v10  ;;  %18549 = vst [vmem:[#allocation23_spill] sm:$0xff] %v14365_v62  ;;  %11569 = vmatprep.subr.bf16.mxu0 %v14365_v62 }
 0x397   :  { %v3242_v2 = vsel %vm1884_vm13, %v3210_v1, %v14317_v30 }
 0x398   :  { %v14324_v25 = vpop.permute.xlu1 %3131 }
 0x399   :  { %v14333_v28 = vsel %vm1884_vm13, %v3212_v59, %v14324_v25 }
 0x39a   :  { %18542 = vst [vmem:[#allocation12_spill] sm:$0xff] %v14333_v28  ;;  %v11317_v21 = vcombine.low %v3242_v2, %v14333_v28  ;;  %4195 = vrot.lane.b32.xlu1 %v11386_v20, %s11686_s28  ;;  %v14338_v9 = vpop.permute.xlu0 %3133 }
 0x39b   :  { %18543 = vst [vmem:[#allocation21_spill] sm:$0xff] %v14338_v9  ;;  %v14345_v19 = vsel %vm1884_vm13, %v3214_v27, %v14338_v9 }
 0x39c   :  { %18544 = vst [vmem:[#allocation9_spill] sm:$0xff] %v14345_v19  ;;  %v14350_v55 = vpop.permute.xlu1 %3135  ;;  %11541 = vmatprep.mubr.msk.bf16.mxu1 %vm18546_vm10, %v11317_v21  ;;  %vm18577_vm10 = vmmov %vm18567_vm1 }
 0x39d   :  { %18545 = vst [vmem:[#allocation31_spill] sm:$0xff] %v14350_v55  ;;  %v14355_v6 = vsel %vm1884_vm13, %v3216_v37, %v14350_v55 }
 0x39e   :  { %18547 = vst [vmem:[#allocation14_spill] sm:$0xff] %v14355_v6  ;;  %v11318_v23 = vcombine.low %v14345_v19, %v14355_v6  ;;  %v14359_v10 = vpop.permute.xlu0 %3009 }
 0x3a0   :  { %11542 = vmatmul.mubr.msk.bf16.gmra.mrb[4].mxu1 %vm18548_vm2, %v11318_v23  ;;  %v14370_v20 = vpop.permute.xlu1 %3011  ;;  %v3558_v23 = vsel %vm1752_vm9, %v14075_v13, %v14359_v10  ;;  %vm18579_vm2 = vmmov %vm18567_vm1 }
 0x3a1   :  { %v3559_v45 = vsel %vm1752_vm9, %v14100_v39, %v14370_v20 }
 0x3a2   :  { %v14368_v41 = vpop.permute.xlu0 %3013 }
 0x3a4   :  { %v14372_v1 = vpop.permute.xlu1 %3015 }
 0x3a5   :  { %18550 = vst [vmem:[#allocation39_spill] sm:$0xff] %v14372_v1  ;;  %v3561_v39 = vsel %vm1752_vm9, %v14130_v56, %v14372_v1 }
 0x3a6   :  { %v3527_v0 = vpop.permute.xlu0 %3526 }
 0x3a7   :  { %v3575_v48 = vsel %vm1818_vm11, %v3558_v23, %v3527_v0 }
 0x3a8   :  { %v3529_v4 = vpop.permute.xlu1 %3528 }
 0x3a9   :  { %v3577_v17 = vsel %vm1818_vm11, %v3559_v45, %v3529_v4 }
 0x3aa   :  { %v14374_v59 = vpop.permute.xlu0 %3113 }
 0x3ab   :  { %18551 = vst [vmem:[#allocation25_spill] sm:$0xff] %v14374_v59  ;;  %v3606_v57 = vsel %vm1884_vm13, %v3575_v48, %v14374_v59 }
 0x3ac   :  { %v14376_v27 = vpop.permute.xlu1 %3115  ;;  %v11331_v45 = vcombine.low %v3606_v57, %v3606_v57 }
 0x3ad   :  { %18552 = vst [vmem:[#allocation63_spill] sm:$0xff] %v14376_v27  ;;  %v3607_v28 = vsel %vm1884_vm13, %v3577_v17, %v14376_v27  ;;  %v3560_v17 = vsel %vm1752_vm9, %v14127_v42, %v14368_v41 }
 0x3ae   :  { %v3531_v2 = vpop.permute.xlu0 %3530  ;;  %v11333_v3 = vcombine.low %v3607_v28, %v3607_v28  ;;  %v3706_v1 = vshrl.u32 %v11331_v45, 16  ;;  %v3709_v59 = vshll.u32 %v11331_v45, 16 }
 0x3af   :  { %v3579_v14 = vsel %vm1818_vm11, %v3560_v17, %v3531_v2  ;;  %v11332_v2 = vcombine.high %v3606_v57, %v3606_v57 }
 0x3b0   :  { %v3533_v38 = vpop.permute.xlu1 %3532  ;;  %v3720_v23 = vshrl.u32 %v11333_v3, 16  ;;  %v3723_v62 = vshll.u32 %v11333_v3, 16  ;;  %v3708_v17 = vrot.slane %v3706_v1, 4 }
 0x3b1   :  { %v3581_v0 = vsel %vm1818_vm11, %v3561_v39, %v3533_v38  ;;  %v3715_v1 = vshll.u32 %v11332_v2, 16 }
 0x3b2   :  { %v14378_v21 = vpop.permute.xlu0 %3033  ;;  %v3722_v42 = vrot.slane %v3720_v23, 4  ;;  %v3725_v9 = vrot.slane %v3723_v62, 5 }
 0x3b3   :  { %v3183_v39 = vsel %vm1752_vm9, %v14069_v46, %v14378_v21 }
 0x3b4   :  { %v3726_v23 = vor.u32 %v3725_v9, %v3722_v42 }
 0x3b6   :  { %v14380_v37 = vpop.permute.xlu0 %3117 }
 0x3b7   :  { %18553 = vst [vmem:[#allocation52_spill] sm:$0xff] %v14380_v37  ;;  %v14414_v56 = vsel %vm1884_vm13, %v3579_v14, %v14380_v37 }
 0x3b8   :  { %v11335_v3 = vcombine.low %v14414_v56, %v14414_v56 }
 0x3ba   :  { %v3734_v26 = vshrl.u32 %v11335_v3, 16  ;;  %v3737_v46 = vshll.u32 %v11335_v3, 16 }
 0x3bc   :  { %v3736_v57 = vrot.slane %v3734_v26, 4 }
 0x3c4   :  { %v14389_v19 = vpop.permute.xlu1 %3035 }
 0x3c6   :  { %v14394_v47 = vpop.permute.xlu0 %3037 }
 0x3c7   :  { %v3189_v9 = vsel %vm1752_vm9, %v14210_v29, %v14394_v47 }
 0x3c8   :  { %v14398_v13 = vpop.permute.xlu1 %3119 }
 0x3c9   :  { %18554 = vst [vmem:[#allocation38_spill] sm:$0xff] %v14398_v13  ;;  %v3609_v48 = vsel %vm1884_vm13, %v3581_v0, %v14398_v13  ;;  %v3711_v0 = vrot.slane %v3709_v59, 5  ;;  %v11334_v13 = vcombine.high %v3607_v28, %v3607_v28 }
 0x3ca   :  { %v3086_v4 = vpop.permute.xlu0 %3085  ;;  %v11337_v55 = vcombine.low %v3609_v48, %v3609_v48 }
 0x3cb   :  { %v3218_v14 = vsel %vm1818_vm11, %v3183_v39, %v3086_v4  ;;  %v3712_v28 = vor.u32 %v3711_v0, %v3708_v17  ;;  %v3729_v59 = vshll.u32 %v11334_v13, 16  ;;  %v3739_v13 = vrot.slane %v3737_v46, 5 }
 0x3cc   :  { %v14410_v27 = vpop.permute.xlu1 %3039  ;;  %v3748_v45 = vshrl.u32 %v11337_v55, 16  ;;  %v3751_v36 = vshll.u32 %v11337_v55, 16  ;;  %v3186_v55 = vsel %vm1752_vm9, %v14205_v53, %v14389_v19  ;;  %v11338_v0 = vcombine.high %v3609_v48, %v3609_v48 }
 0x3cd   :  { %v3713_v29 = vrot.slane %v3712_v28, 4  ;;  %v3192_v46 = vsel %vm1752_vm9, %v14203_v61, %v14410_v27  ;;  %v3717_v28 = vrot.slane %v3715_v1, 5  ;;  %v3562_v61 = vsel %vm1752_vm9, %v13815_v33, %v14046_v7 }
 0x3ce   :  { %v3090_v15 = vpop.permute.xlu0 %3089  ;;  %v3750_v42 = vrot.slane %v3748_v45, 4  ;;  %v3753_v39 = vrot.slane %v3751_v36, 5  ;;  %v3731_v36 = vrot.slane %v3729_v59, 5  ;;  %v11336_v45 = vcombine.high %v14414_v56, %v14414_v56 }
 0x3cf   :  { %v3222_v3 = vsel %vm1818_vm11, %v3189_v9, %v3090_v15  ;;  %v3718_v1 = vsel %vm14456_vm15, %v3713_v29, %v3717_v28  ;;  %v3563_v33 = vsel %vm1752_vm9, %v13969_v52, %v14050_v31 }
 0x3d0   :  { %v3088_v38 = vpop.permute.xlu1 %3087 }
 0x3d1   :  { %v3220_v17 = vsel %vm1818_vm11, %v3186_v55, %v3088_v38 }
 0x3d2   :  { %v14422_v37 = vpop.permute.xlu0 %3137 }
 0x3d3   :  { %v14426_v62 = vsel %vm1884_vm13, %v3218_v14, %v14422_v37  ;;  %v3727_v14 = vrot.slane %v3726_v23, 4  ;;  %v3754_v23 = vor.u32 %v3753_v39, %v3750_v42  ;;  %v3743_v39 = vshll.u32 %v11336_v45, 16 }
 0x3d4   :  { %v3092_v60 = vpop.permute.xlu1 %3091 }
 0x3d5   :  { %v14467_v59 = vsel %vm14456_vm15, %v3727_v14, %v3731_v36  ;;  %v3224_v55 = vsel %vm1818_vm11, %v3192_v46, %v3092_v60  ;;  %v3755_v14 = vrot.slane %v3754_v23, 4  ;;  %v3745_v23 = vrot.slane %v3743_v39, 5 }
 0x3d6   :  { %v14430_v4 = vpop.permute.xlu0 %3141 }
 0x3d7   :  { %v14444_v6 = vsel %vm1884_vm13, %v3222_v3, %v14430_v4  ;;  %v3740_v3 = vor.u32 %v3739_v13, %v3736_v57  ;;  %v11367_v13 = vcombine.low %v3718_v1, %v14467_v59 }
 0x3d8   :  { %v14440_v2 = vpop.permute.xlu1 %3139 }
 0x3d9   :  { %v14448_v53 = vsel %vm1884_vm13, %v3220_v17, %v14440_v2  ;;  %v3757_v17 = vshll.u32 %v11338_v0, 16  ;;  %v3741_v7 = vrot.slane %v3740_v3, 4  ;;  %v11678_v3 = vld [vmem:[%s18051_s2 + $0x38] sm:$0xff]  }
 0x3da   :  { %v11319_v26 = vcombine.low %v14426_v62, %v14448_v53  ;;  %v11399_v15 = vcombine.low %v14448_v53, %v14444_v6  ;;  %v3535_v38 = vpop.permute.xlu0 %3534 }
 0x3db   :  { %v3583_v57 = vsel %vm1818_vm11, %v3562_v61, %v3535_v38  ;;  %v3759_v36 = vrot.slane %v3757_v17, 5  ;;  %v3564_v38 = vsel %vm1752_vm9, %v13975_v34, %v14059_v63  ;;  %v14504_v28 = vsel %vm14456_vm15, %v3741_v7, %v3745_v23  ;;  %v18562_v7 = vld [vmem:[#allocation64_spill] sm:$0xff] }
 0x3dc   :  { %v14470_v9 = vpop.permute.xlu1 %3143  ;;  %11545 = vmatprep.mubr.msk.bf16.mxu1 %vm18557_vm8, %v11319_v26  ;;  %v3610_v29 = vsel %vm1884_vm13, %v3583_v57, %v14096_v40  ;;  %v3565_v34 = vsel %vm1752_vm9, %v13966_v50, %v14061_v43  ;;  %v3569_v57 = vsel %vm1752_vm9, %v14041_v35, %v14306_v58  ;;  %vm18587_vm8 = vmmov %vm18583_vm0 }
 0x3dd   :  { %v14475_v56 = vsel %vm1884_vm13, %v3224_v55, %v14470_v9  ;;  %v14499_v46 = vsel %vm14456_vm15, %v3755_v14, %v3759_v36  ;;  %v11339_v40 = vcombine.low %v3610_v29, %v3610_v29  ;;  %v14572_v36 = vsel %vm1752_vm9, %v18562_v7, %v14389_v19 }
 0x3de   :  { %v11320_v60 = vcombine.low %v14444_v6, %v14475_v56  ;;  %v3539_v42 = vpop.permute.xlu0 %3538  ;;  %v11368_v63 = vcombine.low %v14504_v28, %v14499_v46 }
 0x3df   :  { %v3587_v52 = vsel %vm1818_vm11, %v3564_v38, %v3539_v42  ;;  %v3765_v39 = vshll.u32 %v11339_v40, 16 }
 0x3e0   :  { %v3537_v0 = vpop.permute.xlu1 %3536  ;;  %11546 = vmatmul.mubr.msk.bf16.gmra.mrb[8].mxu1 %vm18558_vm3, %v11320_v60  ;;  %v3612_v17 = vsel %vm1884_vm13, %v3587_v52, %v14136_v18  ;;  %v3762_v60 = vshrl.u32 %v11339_v40, 16  ;;  %v3567_v18 = vsel %vm1752_vm9, %v14044_v16, %v14299_v22  ;;  %v14550_v16 = vsel %vm1752_vm9, %v14083_v51, %v14370_v20  ;;  %vm18588_vm3 = vmmov %vm18583_vm0 }
 0x3e1   :  { %11553 = vmatprep.mubr.msk.bf16.mxu1 %vm18559_vm4, %v11367_v13  ;;  %v3585_v26 = vsel %vm1818_vm11, %v3563_v33, %v3537_v0  ;;  %v11343_v14 = vcombine.low %v3612_v17, %v3612_v17  ;;  %v3767_v20 = vrot.slane %v3765_v39, 5  ;;  %v11344_v0 = vcombine.high %v3612_v17, %v3612_v17  ;;  %vm18590_vm4 = vmmov %vm18583_vm0 }
 0x3e2   :  { %v3543_v45 = vpop.permute.xlu0 %3542  ;;  %v14508_v55 = vsel %vm1884_vm13, %v3585_v26, %v14106_v32  ;;  %v3566_v32 = vsel %vm1752_vm9, %v14001_v49, %v14296_v8  ;;  %v3568_v8 = vsel %vm1752_vm9, %v14054_v11, %v14304_v12  ;;  %v11340_v11 = vcombine.high %v3610_v29, %v3610_v29 }
 0x3e3   :  { %v11341_v50 = vcombine.low %v14508_v55, %v14508_v55  ;;  %v3591_v42 = vsel %vm1818_vm11, %v3566_v32, %v3543_v45  ;;  %v3764_v12 = vrot.slane %v3762_v60, 4  ;;  %v3790_v33 = vshrl.u32 %v11343_v14, 16  ;;  %v18563_v45 = vld [vmem:[#allocation70_spill] sm:$0xff] }
 0x3e4   :  { %v3541_v31 = vpop.permute.xlu1 %3540  ;;  %v3614_v35 = vsel %vm1884_vm13, %v3591_v42, %v14317_v30  ;;  %v3793_v29 = vshll.u32 %v11343_v14, 16  ;;  %v14577_v38 = vsel %vm1752_vm9, %v18563_v45, %v14394_v47  ;;  %v14579_v23 = vshll.u32 %v11340_v11, 16 }
 0x3e5   :  { %v3589_v61 = vsel %vm1818_vm11, %v3565_v34, %v3541_v31  ;;  %v3776_v22 = vshrl.u32 %v11341_v50, 16  ;;  %v3779_v58 = vshll.u32 %v11341_v50, 16  ;;  %v11347_v26 = vcombine.low %v3614_v35, %v3614_v35 }
 0x3e6   :  { %v3547_v1 = vpop.permute.xlu0 %3546  ;;  %v14534_v49 = vsel %vm1884_vm13, %v3589_v61, %v14145_v24  ;;  %v14555_v24 = vsel %vm1752_vm9, %v14102_v5, %v14368_v41  ;;  %v18561_v41 = vld [vmem:[#allocation46_spill] sm:$0xff]  ;;  %v3768_v19 = vor.u32 %v3767_v20, %v3764_v12  ;;  %v11342_v17 = vcombine.high %v14508_v55, %v14508_v55  ;;  %v18565_v12 = vld [vmem:[#allocation31_spill] sm:$0xff] }
 0x3e7   :  { %v3570_v30 = vsel %vm1752_vm9, %v18561_v41, %v14378_v21  ;;  %v3781_v31 = vrot.slane %v3779_v58, 5  ;;  %v3595_v34 = vsel %vm1818_vm11, %v3568_v8, %v3547_v1  ;;  %v3795_v47 = vrot.slane %v3793_v29, 5  ;;  %v18566_v58 = vld [vmem:[#allocation27_spill] sm:$0xff] }
 0x3e8   :  { %v3545_v43 = vpop.permute.xlu1 %3544  ;;  %11554 = vmatmul.mubr.msk.bf16.vlgmr.msra.gmra.mrb[12].mxu1 %vm18560_vm5, %v11368_v63  ;;  %v3792_v63 = vrot.slane %v3790_v33, 4  ;;  %v3818_v61 = vshrl.u32 %v11347_v26, 16  ;;  %v3821_v32 = vshll.u32 %v11347_v26, 16  ;;  %v11348_v42 = vcombine.high %v3614_v35, %v3614_v35  ;;  %vm18592_vm5 = vmmov %vm18583_vm0 }
 0x3e9   :  { %11590 = vmatpush3.bf16.msra.mxu1 %v14279_v54  ;;  %v14545_v54 = vsel %vm1752_vm9, %v14067_v44, %v14359_v10  ;;  %v11345_v44 = vcombine.low %v14534_v49, %v14534_v49  ;;  %v3593_v10 = vsel %vm1818_vm11, %v3567_v18, %v3545_v43  ;;  %v18564_v18 = vld [vmem:[#allocation21_spill] sm:$0xff]  ;;  %v3773_v35 = vrot.slane %v14579_v23, 5 }
 0x3ea   :  { %11591 = vmatprep.subr.bf16.mxu1 %v11678_v3  ;;  %v3551_v13 = vpop.permute.xlu0 %3550  ;;  %v14564_v5 = vsel %vm1884_vm13, %v3593_v10, %v14324_v25  ;;  %v3778_v25 = vrot.slane %v3776_v22, 4  ;;  %v14593_v39 = vsel %vm1884_vm13, %v3595_v34, %v18564_v18  ;;  %v11346_v10 = vcombine.high %v14534_v49, %v14534_v49 }
 0x3eb   :  { %v11349_v52 = vcombine.low %v14564_v5, %v14564_v5  ;;  %v3804_v21 = vshrl.u32 %v11345_v44, 16  ;;  %v3807_v40 = vshll.u32 %v11345_v44, 16  ;;  %v3785_v44 = vshll.u32 %v11342_v17, 16 }
 0x3ec   :  { %v3549_v51 = vpop.permute.xlu1 %3548  ;;  %v3782_v8 = vor.u32 %v3781_v31, %v3778_v25  ;;  %v3820_v20 = vrot.slane %v3818_v61, 4  ;;  %v11351_v33 = vcombine.low %v14593_v39, %v14593_v39  ;;  %v14609_v41 = vshll.u32 %v11348_v42, 16 }
 0x3ed   :  { %11592 = vmatpush3.bf16.msra.mxu1 %v11678_v3  ;;  %v14584_v3 = vshll.u32 %v11344_v0, 16  ;;  %v3597_v50 = vsel %vm1818_vm11, %v3569_v57, %v3549_v51  ;;  %v3832_v1 = vshrl.u32 %v11349_v52, 16  ;;  %v3835_v14 = vshll.u32 %v11349_v52, 16 }
 0x3ee   :  { %v14589_v43 = vpop.permute.xlu0 %3554  ;;  %v3806_v11 = vrot.slane %v3804_v21, 4  ;;  %v3809_v22 = vrot.slane %v3807_v40, 5  ;;  %v14597_v55 = vsel %vm1884_vm13, %v3597_v50, %v18565_v12  ;;  %v14602_v57 = vsel %vm1752_vm9, %v18566_v58, %v14410_v27 }
 0x3ef   :  { %v3796_v51 = vor.u32 %v3795_v47, %v3792_v63  ;;  %v3823_v0 = vrot.slane %v3821_v32, 5  ;;  %v3834_v7 = vrot.slane %v3832_v1, 4  ;;  %v3837_v29 = vrot.slane %v3835_v14, 5 }
 0x3f0   :  { %v3553_v60 = vpop.permute.xlu1 %3552  ;;  %v11353_v27 = vcombine.low %v14597_v55, %v14597_v55  ;;  %v3769_v26 = vrot.slane %v3768_v19, 4  ;;  %v3801_v45 = vrot.slane %v14584_v3, 5  ;;  %v3783_v23 = vrot.slane %v3782_v8, 4 }
 0x3f1   :  { %v3810_v25 = vor.u32 %v3809_v22, %v3806_v11  ;;  %v3787_v31 = vrot.slane %v3785_v44, 5  ;;  %v3813_v21 = vshll.u32 %v11346_v10, 16  ;;  %v11350_v40 = vcombine.high %v14564_v5, %v14564_v5 }
 0x3f2   :  { %v3062_v52 = vpop.permute.xlu0 %3061  ;;  %v3599_v34 = vsel %vm1818_vm11, %v3570_v30, %v3551_v13  ;;  %v3797_v63 = vrot.slane %v3796_v51, 4  ;;  %v3824_v17 = vor.u32 %v3823_v0, %v3820_v20  ;;  %v3846_v47 = vshrl.u32 %v11351_v33, 16 }
 0x3f3   :  { %v3849_v61 = vshll.u32 %v11351_v33, 16  ;;  %v3829_v19 = vrot.slane %v14609_v41, 5  ;;  %v3838_v3 = vor.u32 %v3837_v29, %v3834_v7  ;;  %v3860_v50 = vshrl.u32 %v11353_v27, 16 }
 0x3f4   :  { %v3557_v49 = vpop.permute.xlu1 %3556  ;;  %v3863_v42 = vshll.u32 %v11353_v27, 16  ;;  %v3811_v1 = vrot.slane %v3810_v25, 4  ;;  %v11352_v14 = vcombine.high %v14593_v39, %v14593_v39  ;;  %v14626_v13 = vsel %vm1884_vm13, %v3599_v34, %v14422_v37  ;;  %v18568_v25 = vld [vmem:[#allocation52_spill] sm:$0xff] }
 0x3f5   :  { %v14630_v5 = vsel %vm14456_vm15, %v3783_v23, %v3787_v31  ;;  %v3815_v8 = vrot.slane %v3813_v21, 5  ;;  %v3841_v11 = vshll.u32 %v11350_v40, 16  ;;  %v3601_v22 = vsel %vm1818_vm11, %v14572_v36, %v3553_v60  ;;  %v18569_v21 = vld [vmem:[#allocation25_spill] sm:$0xff] }
 0x3f6   :  { %v14638_v12 = vsel %vm14456_vm15, %v3769_v26, %v3773_v35  ;;  %v3825_v58 = vrot.slane %v3824_v17, 4  ;;  %v3848_v37 = vrot.slane %v3846_v47, 4  ;;  %v3851_v44 = vrot.slane %v3849_v61, 5  ;;  %v3066_v51 = vpop.permute.xlu0 %3065  ;;  %v18572_v17 = vld [vmem:[#allocation39_spill] sm:$0xff] }
 0x3f7   :  { %v11369_v10 = vcombine.low %v14638_v12, %v14630_v5  ;;  %v3839_v0 = vrot.slane %v3838_v3, 4  ;;  %v11355_v33 = vcombine.low %v14626_v13, %v14626_v13  ;;  %v3862_v41 = vrot.slane %v3860_v50, 4  ;;  %v18573_v47 = vld [vmem:[#allocation47_spill] sm:$0xff] }
 0x3f8   :  { %v3064_v20 = vpop.permute.xlu1 %3063  ;;  %v3865_v36 = vrot.slane %v3863_v42, 5  ;;  %v14648_v60 = vsel %vm1884_vm13, %v3601_v22, %v14440_v2  ;;  %v3194_v35 = vsel %vm1818_vm11, %v14545_v54, %v3062_v52  ;;  %v14655_v7 = vsel %vm14456_vm15, %v3797_v63, %v3801_v45 }
 0x3f9   :  { %11557 = vmatprep.mubr.msk.bf16.mxu1 %vm18567_vm1, %v11369_v10  ;;  %v14659_v29 = vsel %vm14456_vm15, %v3811_v1, %v3815_v8  ;;  %v3843_v27 = vrot.slane %v3841_v11, 5  ;;  %v11354_v26 = vcombine.high %v14597_v55, %v14597_v55  ;;  %v3198_v23 = vsel %vm1818_vm11, %v14555_v24, %v3066_v51  ;;  %v18571_v24 = vld [vmem:[#allocation63_spill] sm:$0xff]  ;;  %vm18596_vm1 = vmmov %vm18583_vm0 }
 0x3fa   :  { %v11370_v2 = vcombine.low %v14655_v7, %v14659_v29  ;;  %v3603_v54 = vsel %vm1818_vm11, %v14577_v38, %v14589_v43  ;;  %v3605_v45 = vsel %vm1818_vm11, %v14602_v57, %v3557_v49  ;;  %v3230_v52 = vsel %vm1884_vm13, %v3198_v23, %v18568_v25 }
 0x3fb   :  { %v3196_v31 = vsel %vm1818_vm11, %v14550_v16, %v3064_v20  ;;  %v11357_v55 = vcombine.low %v14648_v60, %v14648_v60  ;;  %v3226_v40 = vsel %vm1884_vm13, %v3194_v35, %v18569_v21  ;;  %v14685_v43 = vsel %vm14456_vm15, %v3839_v0, %v3843_v27 }
 0x3fc   :  { %11558 = vmatmul.mubr.msk.bf16.gmra.mrb[16].mxu1 %vm18570_vm14, %v11370_v2  ;;  %v3228_v38 = vsel %vm1884_vm13, %v3196_v31, %v18571_v24  ;;  %v3852_v57 = vor.u32 %v3851_v44, %v3848_v37  ;;  %v3866_v49 = vor.u32 %v3865_v36, %v3862_v41  ;;  %v3830_v16 = vsel %vm14456_vm15, %v3825_v58, %v3829_v19  ;;  %v3068_v63 = vpop.permute.xlu1 %3067  ;;  %vm18597_vm14 = vmmov %vm18583_vm0 }
 0x3fd   :  { %v14617_v32 = vpop.f32.mrb[0].mxu1  ;;  %v11313_v34 = vcombine.low %v3226_v40, %v3228_v38  ;;  %v3156_v61 = vsel %vm1752_vm9, %v18573_v47, %v18572_v17  ;;  %v14694_v3 = vsel %vm1884_vm13, %v3605_v45, %v14470_v9  ;;  %v11393_v50 = vcombine.low %v3228_v38, %v3230_v52  ;;  %v18578_v40 = vld [vmem:[#allocation23_spill] sm:$0xff] }
 0x3fe   :  { %v14620_v18 = vpop.f32.mrb[1].mxu1  ;;  %v11371_v42 = vcombine.low %v3830_v16, %v14685_v43  ;;  %v3855_v1 = vshll.u32 %v11352_v14, 16  ;;  %v3874_v8 = vshrl.u32 %v11355_v33, 16  ;;  %v3869_v11 = vshll.u32 %v11354_v26, 16  ;;  %v18576_v14 = vld [vmem:[#allocation38_spill] sm:$0xff]  ;;  %v4184_v16 = vpop.permute.xlu0 %4183 }
 0x3ff   :  { %v14632_v30 = vpop.f32.mrb[2].mxu1  ;;  %v3620_v22 = vsel %vm1884_vm13, %v3603_v54, %v14430_v4  ;;  %11533 = vmatprep.mubr.msk.bf16.mxu0 %vm18574_vm6, %v11313_v34  ;;  %v3877_v19 = vshll.u32 %v11355_v33, 16  ;;  %v3888_v58 = vshrl.u32 %v11357_v55, 16  ;;  %v3891_v37 = vshll.u32 %v11357_v55, 16  ;;  %v11680_v33 = vld [vmem:[%s18051_s2 + $0x28] sm:$0xff]   ;;  %vm18601_vm6 = vmmov %vm18583_vm0 }
 0x400   :  { %v14640_v39 = vpop.f32.mrb[3].mxu1  ;;  %11561 = vmatprep.mubr.msk.bf16.mxu1 %vm18575_vm7, %v11371_v42  ;;  %v3200_v44 = vsel %vm1818_vm11, %v3156_v61, %v3068_v63  ;;  %v3853_v9 = vrot.slane %v3852_v57, 4  ;;  %v3867_v10 = vrot.slane %v3866_v49, 4  ;;  %v11361_v51 = vcombine.low %v14694_v3, %v14694_v3  ;;  %v18581_v42 = vld [vmem:[#allocation53_spill] sm:$0xff]  ;;  %vm18602_vm7 = vmmov %vm18583_vm0 }
 0x401   :  { %v3232_v20 = vsel %vm1884_vm13, %v3200_v44, %v18576_v14  ;;  %v11359_v0 = vcombine.low %v3620_v22, %v3620_v22  ;;  %v3857_v41 = vrot.slane %v3855_v1, 5  ;;  %v3871_v4 = vrot.slane %v3869_v11, 5  ;;  %v4478_v1 = vpop.permute.xlu1 %4477  ;;  %v18585_v14 = vld [vmem:[#allocation59_spill] sm:$0xff] }
 0x402   :  { %v11314_v36 = vcombine.low %v3230_v52, %v3232_v20  ;;  %v3876_v35 = vrot.slane %v3874_v8, 4  ;;  %v3879_v27 = vrot.slane %v3877_v19, 5  ;;  %v3890_v26 = vrot.slane %v3888_v58, 4  ;;  %v18582_v58 = vld [vmem:[#allocation7_spill] sm:$0xff] }
 0x403   :  { %v3893_v2 = vrot.slane %v3891_v37, 5  ;;  %v3916_v23 = vshrl.u32 %v11361_v51, 16  ;;  %v3919_v54 = vshll.u32 %v11361_v51, 16  ;;  %v14711_v45 = vsel %vm14456_vm15, %v3853_v9, %v3857_v41  ;;  %v18584_v51 = vld [vmem:[#allocation54_spill] sm:$0xff] }
 0x404   :  { %v14715_v25 = vsel %vm14456_vm15, %v3867_v10, %v3871_v4  ;;  %11534 = vmatmul.mubr.msk.bf16.vlgmr.msra.gmra.mrb[16].mxu0 %vm18577_vm10, %v11314_v36  ;;  %v3902_v52 = vshrl.u32 %v11359_v0, 16  ;;  %v3905_v31 = vshll.u32 %v11359_v0, 16  ;;  %v11358_v55 = vcombine.high %v14648_v60, %v14648_v60  ;;  %vm18603_vm10 = vmmov %vm18583_vm0 }
 0x405   :  { %v11372_v21 = vcombine.low %v14711_v45, %v14715_v25  ;;  %11570 = vmatpush3.bf16.msra.mxu0 %v18578_v40  ;;  %v11356_v24 = vcombine.high %v14626_v13, %v14626_v13  ;;  %11573 = vmatprep.mubr.msk.bf16.mxu0 %vm18579_vm2, %v11393_v50  ;;  %v3894_v38 = vor.u32 %v3893_v2, %v3890_v26  ;;  %v3918_v49 = vrot.slane %v3916_v23, 4  ;;  %vm18604_vm2 = vmmov %vm18583_vm0 }
 0x406   :  { %11571 = vmatprep.subr.bf16.mxu0 %v11680_v33  ;;  %v3880_v57 = vor.u32 %v3879_v27, %v3876_v35  ;;  %v3921_v34 = vrot.slane %v3919_v54, 5  ;;  %v3904_v63 = vrot.slane %v3902_v52, 4  ;;  %v3907_v60 = vrot.slane %v3905_v31, 5  ;;  %v4194_v27 = vpop.permute.xlu1 %4193  ;;  %v11682_v52 = vld [vmem:[#allocation2 + $0x40] sm:$0xf] }
 0x407   :  { %11562 = vmatmul.mubr.msk.bf16.gmra.mrb[20].mxu1 %vm18580_vm12, %v11372_v21  ;;  %v3897_v17 = vshll.u32 %v11358_v55, 16  ;;  %v3883_v47 = vshll.u32 %v11356_v24, 16  ;;  %v11362_v61 = vcombine.high %v14694_v3, %v14694_v3  ;;  %v11394_v13 = vcombine.low %v3232_v20, %v18581_v42  ;;  %vm18607_vm12 = vmmov %vm18583_vm0 }
 0x408   :  { %v11360_v50 = vcombine.high %v3620_v22, %v3620_v22  ;;  %v3895_v8 = vrot.slane %v3894_v38, 4  ;;  %v3881_v11 = vrot.slane %v3880_v57, 4  ;;  %v3922_v19 = vor.u32 %v3921_v34, %v3918_v49  ;;  %v4218_v22 = vpop.permute.xlu0 %4217  ;;  %v18589_v34 = vld [vmem:[#allocation60_spill] sm:$0xff] }
 0x409   :  { %11572 = vmatpush3.bf16.msra.mxu0 %v11680_v33  ;;  %v4481_v37 = vsel %vm1752_vm9, %v18582_v58, %v4184_v16  ;;  %v3908_v44 = vor.u32 %v3907_v60, %v3904_v63  ;;  %v3899_v9 = vrot.slane %v3897_v17, 5  ;;  %v18586_v0 = vcombine.low %v18584_v51, %v18585_v14  ;;  %v18598_v51 = vld [vmem:[#allocation26_spill] sm:$0xff] }
 0x40a   :  { %v4484_v10 = vsel %vm1818_vm11, %v4481_v37, %v4478_v1  ;;  %v3885_v3 = vrot.slane %v3883_v47, 5  ;;  %v3925_v20 = vshll.u32 %v11362_v61, 16  ;;  %v3911_v41 = vshll.u32 %v11360_v50, 16  ;;  %v18591_v50 = vld [vmem:[#allocation16_spill] sm:$0xff] }
 0x40b   :  { %v4487_v4 = vsel %vm1884_vm13, %v4484_v10, %v4218_v22  ;;  %v14741_v36 = vsel %vm14456_vm15, %v3895_v8, %v3899_v9  ;;  %v3923_v33 = vrot.slane %v3922_v19, 4  ;;  %v3909_v26 = vrot.slane %v3908_v44, 4  ;;  %v18594_v19 = vld [vmem:[#allocation9_spill] sm:$0xff] }
 0x40c   :  { %11574 = vmatmul.mubr.msk.bf16.vlgmr.msra.gmra.mrb[20].mxu0 %vm18583_vm0, %v11394_v13  ;;  %v14745_v35 = vsel %vm14456_vm15, %v3881_v11, %v3885_v3  ;;  %v11411_v2 = vcombine.low %v4487_v4, %v4487_v4  ;;  %v3927_v54 = vrot.slane %v3925_v20, 5  ;;  %v4223_v31 = vsel %vm1752_vm9, %v11682_v52, %v4184_v16  ;;  %v4186_v49 = vpop.permute.xlu0 %4185  ;;  %v4480_v16 = vpop.permute.xlu1 %4479  ;;  %v18593_v11 = vld [vmem:[#allocation12_spill] sm:$0xff] }
 0x40d   :  { %11577 = vmatprep.mubr.msk.bf16.mxu0 %vm18587_vm8, %v18586_v0  ;;  %v11373_v23 = vcombine.low %v14745_v35, %v14741_v36  ;;  %v3913_v55 = vrot.slane %v3911_v41, 5  ;;  %v4228_v24 = vsel %vm1818_vm11, %v4223_v31, %v4194_v27  ;;  %v11421_v47 = vcombine.low %v14630_v5, %v14655_v7  ;;  %vm18609_vm8 = vmmov %vm18583_vm0 }
 0x40e   :  { %v4500_v21 = vshrl.u32 %v11411_v2, 16  ;;  %v4503_v40 = vshll.u32 %v11411_v2, 16  ;;  %v4232_v38 = vsel %vm1884_vm13, %v4228_v24, %v4218_v22  ;;  %v3928_v57 = vsel %vm14456_vm15, %v3923_v33, %v3927_v54  ;;  %v18599_v22 = vld [vmem:[#allocation14_spill] sm:$0xff] }
 0x40f   :  { %11565 = vmatprep.mubr.msk.bf16.mxu1 %vm18588_vm3, %v11373_v23  ;;  %v11396_v63 = vcombine.low %v18589_v34, %v4232_v38  ;;  %v3914_v60 = vsel %vm14456_vm15, %v3909_v26, %v3913_v55  ;;  %v11419_v13 = vcombine.low %v14467_v59, %v14504_v28  ;;  %v11423_v1 = vcombine.low %v14685_v43, %v14711_v45 }
 0x410   :  { %v11374_v17 = vcombine.low %v3914_v60, %v3928_v57  ;;  %v4502_v61 = vrot.slane %v4500_v21, 4  ;;  %v4505_v42 = vrot.slane %v4503_v40, 5  ;;  %v4482_v8 = vsel %vm1752_vm9, %v18591_v50, %v4186_v49  ;;  %v4220_v28 = vpop.permute.xlu0 %4219  ;;  %v4196_v44 = vpop.permute.xlu1 %4195 }
 0x411   :  { %v18595_v58 = vcombine.low %v18593_v11, %v18594_v19  ;;  %v11412_v5 = vcombine.high %v4487_v4, %v4487_v4  ;;  %v4486_v59 = vsel %vm1818_vm11, %v4482_v8, %v4480_v16  ;;  %v11424_v7 = vcombine.low %v14715_v25, %v14745_v35 }
 0x412   :  { %11566 = vmatmul.mubr.msk.bf16.gmra.mrb[24].mxu1 %vm18592_vm5, %v11374_v17  ;;  %v11425_v43 = vcombine.low %v14741_v36, %v3914_v60  ;;  %v4506_v45 = vor.u32 %v4505_v42, %v4502_v61  ;;  %v4488_v37 = vsel %vm1884_vm13, %v4486_v59, %v4220_v28  ;;  %v11420_v10 = vcombine.low %v14499_v46, %v14638_v12 }
 0x413   :  { %11593 = vmatprep.mubr.msk.bf16.mxu1 %vm18597_vm14, %v11419_v13  ;;  %v4509_v9 = vshll.u32 %v11412_v5, 16  ;;  %v4226_v14 = vsel %vm1752_vm9, %v18598_v51, %v4186_v49  ;;  %v11413_v3 = vcombine.low %v4488_v37, %v4488_v37  ;;  %v18600_v25 = vcombine.low %v18599_v22, %v14426_v62  ;;  %vm18605_vm9 = vmmov %vm18583_vm0 }
 0x414   :  { %11578 = vmatmul.mubr.msk.bf16.gmra.mrb[24].mxu0 %vm18590_vm4, %v11396_v63  ;;  %v4507_v0 = vrot.slane %v4506_v45, 4  ;;  %v4230_v20 = vsel %vm1818_vm11, %v4226_v14, %v4196_v44  ;;  %vm18606_vm11 = vmmov %vm18583_vm0  ;;  %v11414_v6 = vcombine.high %v4488_v37, %v4488_v37  ;;  %v11699_v55 = vmov 1966171168  }
 0x415   :  { %11581 = vmatprep.mubr.msk.bf16.mxu0 %vm18596_vm1, %v18595_v58  ;;  %v4511_v46 = vrot.slane %v4509_v9, 5  ;;  %v4234_v12 = vsel %vm1884_vm13, %v4230_v20, %v4220_v28  ;;  %v4514_v41 = vshrl.u32 %v11413_v3, 16  ;;  %v4517_v4 = vshll.u32 %v11413_v3, 16  ;;  %vm18608_vm13 = vmmov %vm18583_vm0 }
 0x416   :  { %v11400_v62 = vcombine.low %v14475_v56, %v4234_v12  ;;  %v4789_v21 = vunpack.c.l.s4 %v11699_v55  ;;  %v4791_v40 = vlaneseq  ;;  %v4983_v63 = vcombine.high %v14620_v18, %v14620_v18 }
 0x417   :  { %v4512_v36 = vsel %vm14456_vm15, %v4507_v0, %v4511_v46  ;;  %v4516_v35 = vrot.slane %v4514_v41, 4  ;;  %v4519_v27 = vrot.slane %v4517_v4, 5  ;;  %v5130_v16 = vcombine.high %v14632_v30, %v14632_v30 }
 0x418   :  { %v11422_v33 = vcombine.low %v14659_v29, %v4512_v36  ;;  %v4790_v24 = vunpack.c.0.s8 %v4789_v21  ;;  %v14814_v38 = vshrl.u32 %v4791_v40, 7  ;;  %v3476_v42 = vmul.f32 %v14620_v18, %v14620_v18 }
 0x419   :  { %v4520_v53 = vor.u32 %v4519_v27, %v4516_v35  ;;  %v5032_v13 = vcombine.high %v14640_v39, %v14640_v39  ;;  %v3479_v37 = vmul.f32 %v14632_v30, %v14632_v30 }
 0x41a   :  { %11594 = vmatmul.mubr.msk.bf16.vlgmr.msra.gmra.mrb[28].mxu1 %vm18602_vm7, %v11420_v10  ;;  %v14817_v48 = vsub.s32 %v4790_v24, %v14814_v38 }
 0x41b   :  { %11597 = vmatprep.mubr.msk.bf16.mxu1 %vm18604_vm2, %v11421_v47  ;;  %v4521_v26 = vrot.slane %v4520_v53, 4  ;;  %v3478_v47 = vmul.f32 %v14617_v32, %v14617_v32 }
 0x41c   :  { %11582 = vmatmul.mubr.msk.bf16.gmra.mrb[28].mxu0 %vm18601_vm6, %v18600_v25  ;;  %v5088_v49 = vrot.slane %v14617_v32, %v14817_v48  ;;  %v4990_v17 = vrot.slane %v14620_v18, %v14817_v48  ;;  %v4997_v8 = vrot.slane %v4983_v63, %v14817_v48  ;;  %v5137_v11 = vrot.slane %v14632_v30, %v14817_v48 }
 0x41d   :  { %11585 = vmatprep.mubr.msk.bf16.mxu0 %vm18603_vm10, %v11399_v15  ;;  %v4523_v15 = vshll.u32 %v11414_v6, 16  ;;  %v5144_v59 = vrot.slane %v5130_v16, %v14817_v48  ;;  %v5039_v44 = vrot.slane %v14640_v39, %v14817_v48  ;;  %v5046_v9 = vrot.slane %v5032_v13, %v14817_v48 }
 0x41e   :  { %v5096_v60 = vcombine.high %v5088_v49, %v5088_v49  ;;  %v14841_v50 = vrot.slane %v5088_v49, %v14817_v48  ;;  %v4998_v5 = vcombine.high %v4990_v17, %v4990_v17  ;;  %v4999_v51 = vcombine.high %v4997_v8, %v4997_v8 }
 0x41f   :  { %v4525_v2 = vrot.slane %v4523_v15, 5  ;;  %v5145_v14 = vcombine.high %v5137_v11, %v5137_v11  ;;  %v5146_v22 = vcombine.high %v5144_v59, %v5144_v59  ;;  %v14898_v4 = vrot.slane %v5137_v11, %v14817_v48 }
 0x420   :  { %v14850_v58 = vrot.slane %v5096_v60, %v14817_v48  ;;  %v14884_v20 = vrot.slane %v4998_v5, %v14817_v48  ;;  %v5047_v36 = vcombine.high %v5039_v44, %v5039_v44  ;;  %v14906_v27 = vrot.slane %v5144_v59, %v14817_v48 }
 0x421   :  { %v4526_v56 = vsel %vm14456_vm15, %v4521_v26, %v4525_v2  ;;  %vm18610_vm15 = vcmask 31744   ;;  %v14914_v53 = vrot.slane %v5146_v22, %v14817_v48  ;;  %v3477_v15 = vmul.f32 %v14640_v39, %v14640_v39 }
 0x422   :  { %11598 = vmatmul.mubr.msk.bf16.gmra.mrb[32].mxu1 %vm18606_vm11, %v11422_v33  ;;  %v11426_v29 = vcombine.low %v3928_v57, %v4526_v56  ;;  %v5081_v57 = vcombine.high %v14617_v32, %v14617_v32  ;;  %vm18612_vm3 = vmmov %vm18610_vm15  ;;  %v14901_v33 = vrot.slane %v4999_v51, %v14817_v48  ;;  %v11700_v26 = vmov 1983009808  }
 0x423   :  { %11601 = vmatprep.mubr.msk.bf16.mxu1 %vm18607_vm12, %v11423_v1  ;;  %v14838_v1 = vsel %vm18610_vm15, %v14617_v32, 0.0  ;;  %v14854_v32 = vsel %vm18612_vm3, %v3478_v47, 0.0  ;;  %vm18614_vm4 = vmmov %vm18612_vm3  ;;  %v10022_v2 = vunpack.c.l.s4 %v11700_v26  ;;  %v14926_v55 = vrot.slane %v5046_v9, %v14817_v48 }
 0x424   :  { %11586 = vmatmul.mubr.msk.bf16.gmra.mrb[32].mxu0 %vm18605_vm9, %v11400_v62  ;;  %v5095_v34 = vrot.slane %v5081_v57, %v14817_v48  ;;  %18611 = vst [vmem:[#allocation48_spill] sm:$0xff] %v14838_v1  ;;  %18613 = vst [vmem:[#allocation69_spill] sm:$0xff] %v14854_v32  ;;  %v5048_v62 = vcombine.high %v5046_v9, %v5046_v9  ;;  %v14931_v40 = vrot.slane %v5047_v36, %v14817_v48 }
 0x425   :  { %vm18616_vm5 = vmmov %vm18612_vm3  ;;  %v14974_v22 = vsub.s32 0, %v14814_v38 }
 0x426   :  { %v5097_v61 = vcombine.high %v5095_v34, %v5095_v34  ;;  %v14847_v19 = vrot.slane %v5095_v34, %v14817_v48  ;;  %v14867_v45 = vsel %vm18616_vm5, %v3476_v42, 0.0  ;;  %vm18618_vm1 = vmmov %vm18612_vm3  ;;  %v14934_v24 = vrot.slane %v5048_v62, %v14817_v48 }
 0x427   :  { %18617 = vst [vmem:[#allocation33_spill] sm:$0xff] %v14867_v45  ;;  %v14892_v12 = vsel %vm18618_vm1, %v14632_v30, 0.0  ;;  %vm18620_vm14 = vmmov %vm18618_vm1  ;;  %v14909_v30 = vrot.slane %v5145_v14, %v14817_v48 }
 0x428   :  { %v14857_v28 = vrot.slane %v5097_v61, %v14817_v48  ;;  %18619 = vst [vmem:[#allocation3_spill] sm:$0xff] %v14892_v12  ;;  %v14895_v41 = vsel %vm18620_vm14, %v3479_v37, 0.0  ;;  %vm18622_vm6 = vmmov %vm18618_vm1  ;;  %v10023_v61 = vunpack.c.0.s8 %v10022_v2 }
 0x429   :  { %18621 = vst [vmem:[#allocation35_spill] sm:$0xff] %v14895_v41  ;;  %v14920_v56 = vsel %vm18622_vm6, %v14640_v39, 0.0  ;;  %vm18624_vm7 = vmmov %vm18618_vm1 }
 0x42a   :  { %11602 = vmatmul.mubr.msk.bf16.gmra.mrb[36].mxu1 %vm18608_vm13, %v11424_v7  ;;  %v14861_v7 = vsel %vm18614_vm4, %v14620_v18, 0.0  ;;  %v14877_v18 = vrot.slane %v4997_v8, %v14817_v48  ;;  %18623 = vst [vmem:[#allocation11_spill] sm:$0xff] %v14920_v56  ;;  %v14951_v16 = vsel %vm18624_vm7, %v3477_v15, 0.0  ;;  %v14982_v26 = vsub.s32 %v10023_v61, %v14814_v38  ;;  %vm18626_vm10 = vmmov %vm18618_vm1 }
 0x42b   :  { %11605 = vmatprep.mubr.msk.bf16.mxu1 %vm18583_vm0, %v11425_v43  ;;  %18615 = vst [vmem:[#allocation8_spill] sm:$0xff] %v14861_v7  ;;  %v14864_v43 = vrot.slane %v4990_v17, %v14817_v48  ;;  %18625 = vst [vmem:[#allocation13_spill] sm:$0xff] %v14951_v16 }
 0x42c   :  { %vm18628_vm2 = vmmov %vm18618_vm1 }
 0x42d   :  { %vm18630_vm9 = vmmov %vm18618_vm1 }
 0x42e   :  { %vm18632_vm11 = vmmov %vm18618_vm1 }
 0x42f   :  { %vm18634_vm12 = vmmov %vm18618_vm1 }
 0x430   :  { %vm18638_vm13 = vmmov %vm18618_vm1 }
 0x431   :  { %vm18640_vm0 = vmmov %vm18618_vm1 }
 0x432   :  { %11606 = vmatmul.mubr.msk.bf16.gmra.mrb[40].mxu1 %vm18609_vm8, %v11426_v29  ;;  %v14923_v29 = vrot.slane %v5039_v44, %v14817_v48  ;;  %vm18642_vm8 = vmmov %vm18640_vm0 }
 0x433   :  { %vm18653_vm15 = vmmov %vm18640_vm0 }
 0x434   :  { %vm18655_vm3 = vmmov %vm18640_vm0 }
 0x435   :  { %vm18657_vm4 = vmmov %vm18640_vm0 }
 0x436   :  { %vm18659_vm5 = vmmov %vm18640_vm0 }
 0x437   :  { %vm18663_vm1 = vmmov %vm18640_vm0 }
 0x438   :  { %vm18673_vm14 = vmmov %vm18640_vm0 }
 0x439   :  { %vm18676_vm6 = vmmov %vm18640_vm0 }
 0x43a   :  { %vm18678_vm7 = vmmov %vm18640_vm0 }
 0x473   :  { %v14806_v23 = vpop.f32.mrb[4].mxu1 }
 0x474   :  { %v14808_v54 = vpop.f32.mrb[5].mxu1  ;;  %v5277_v21 = vcombine.high %v14806_v23, %v14806_v23  ;;  %v5284_v57 = vrot.slane %v14806_v23, %v14817_v48  ;;  %v3482_v9 = vmul.f32 %v14806_v23, %v14806_v23 }
 0x475   :  { %v14810_v52 = vpop.f32.mrb[6].mxu1  ;;  %v5179_v39 = vcombine.high %v14808_v54, %v14808_v54  ;;  %v5186_v47 = vrot.slane %v14808_v54, %v14817_v48  ;;  %v3480_v51 = vmul.f32 %v14808_v54, %v14808_v54  ;;  %v15000_v38 = vsel %vm18628_vm2, %v14808_v54, 0.0  ;;  %vm18684_vm2 = vmmov %vm18640_vm0 }
 0x476   :  { %v14812_v31 = vpop.f32.mrb[7].mxu1  ;;  %v5291_v8 = vrot.slane %v5277_v21, %v14817_v48  ;;  %v5326_v11 = vcombine.high %v14810_v52, %v14810_v52  ;;  %v5292_v37 = vcombine.high %v5284_v57, %v5284_v57  ;;  %v5333_v14 = vrot.slane %v14810_v52, %v14817_v48  ;;  %18629 = vst [vmem:[#allocation36_spill] sm:$0xff] %v15000_v38 }
 0x477   :  { %v5193_v44 = vrot.slane %v5179_v39, %v14817_v48  ;;  %v14977_v36 = vrot.slane %v5284_v57, %v14817_v48  ;;  %v5194_v62 = vcombine.high %v5186_v47, %v5186_v47  ;;  %v5228_v15 = vcombine.high %v14812_v31, %v14812_v31 }
 0x478   :  { %v5293_v2 = vcombine.high %v5291_v8, %v5291_v8  ;;  %v14985_v21 = vrot.slane %v5291_v8, %v14817_v48  ;;  %v14988_v39 = vrot.slane %v5186_v47, %v14817_v48  ;;  %v5340_v59 = vrot.slane %v5326_v11, %v14817_v48 }
 0x479   :  { %v14993_v57 = vsel %vm18626_vm10, %v14806_v23, 0.0  ;;  %v14996_v5 = vrot.slane %v5292_v37, %v14817_v48  ;;  %v5195_v61 = vcombine.high %v5193_v44, %v5193_v44  ;;  %v15003_v8 = vsel %vm18630_vm9, %v3482_v9, 0.0  ;;  %vm18681_vm10 = vmmov %vm18640_vm0 }
 0x47a   :  { %18627 = vst [vmem:[#allocation20_spill] sm:$0xff] %v14993_v57  ;;  %18631 = vst [vmem:[#allocation44_spill] sm:$0xff] %v15003_v8  ;;  %v15006_v47 = vsel %vm18632_vm11, %v3480_v51, 0.0  ;;  %v5341_v13 = vcombine.high %v5333_v14, %v5333_v14  ;;  %v5235_v11 = vrot.slane %v14812_v31, %v14817_v48  ;;  %v15013_v37 = vrot.slane %v5193_v44, %v14817_v48 }
 0x47b   :  { %18633 = vst [vmem:[#allocation24_spill] sm:$0xff] %v15006_v47  ;;  %v15016_v54 = vrot.slane %v5194_v62, %v14817_v48  ;;  %v5242_v42 = vrot.slane %v5228_v15, %v14817_v48  ;;  %v15020_v9 = vrot.slane %v5293_v2, %v14817_v48  ;;  %v5342_v63 = vcombine.high %v5340_v59, %v5340_v59  ;;  %vm18694_vm9 = vmmov %vm18640_vm0 }
 0x47c   :  { %v15029_v44 = vrot.slane %v5195_v61, %v14817_v48  ;;  %v3483_v62 = vmul.f32 %v14810_v52, %v14810_v52  ;;  %v3481_v15 = vmul.f32 %v14812_v31, %v14812_v31  ;;  %v15036_v2 = vrot.slane %v5333_v14, %v14817_v48  ;;  %vm18697_vm11 = vmmov %vm18640_vm0 }
 0x47d   :  { %v15039_v51 = vrot.slane %v5340_v59, %v14817_v48  ;;  %v15042_v17 = vrot.slane %v5341_v13, %v14817_v48  ;;  %v5243_v60 = vcombine.high %v5235_v11, %v5235_v11  ;;  %v15048_v23 = vsel %vm18634_vm12, %v14810_v52, 0.0  ;;  %vm18700_vm12 = vmmov %vm18640_vm0 }
 0x47e   :  { %18635 = vst [vmem:[#allocation22_spill] sm:$0xff] %v15048_v23  ;;  %v5244_v34 = vcombine.high %v5242_v42, %v5242_v42  ;;  %v15051_v49 = vrot.slane %v5235_v11, %v14817_v48  ;;  %v15058_v13 = vrot.slane %v5342_v63, %v14817_v48  ;;  %v15061_v35 = vrot.slane %v5242_v42, %v14817_v48 }
 0x47f   :  { %v15066_v61 = vsel %vm18638_vm13, %v3483_v62, 0.0  ;;  %v15070_v11 = vsel %vm18640_vm0, %v14812_v31, 0.0  ;;  %v15073_v14 = vsel %vm18642_vm8, %v3481_v15, 0.0  ;;  %v15082_v52 = vrot.slane %v5243_v60, %v14817_v48  ;;  %vm18713_vm8 = vmmov %vm18640_vm0 }
 0x480   :  { %18636 = vst [vmem:[#allocation10_spill] sm:$0xff] %v15051_v49  ;;  %18637 = vst [vmem:[#allocation45_spill] sm:$0xff] %v15061_v35  ;;  %v15085_v6 = vrot.slane %v5244_v34, %v14817_v48  ;;  %vm4767_vm13 = vcmask 1040384  }
 0x481   :  { %18639 = vst [vmem:[#allocation15_spill] sm:$0xff] %v15066_v61  ;;  %18641 = vst [vmem:[#allocation30_spill] sm:$0xff] %v15070_v11 }
 0x482   :  { %18643 = vst [vmem:[#allocation57_spill] sm:$0xff] %v15073_v14  ;;  %18644 = vst [vmem:[#allocation17_spill] sm:$0xff] %v15082_v52 }
 0x483   :  { %18645 = vst [vmem:[#allocation32_spill] sm:$0xff] %v15085_v6 }
 0x4b3   :  { %v11547_v62 = vpop.f32.mrb[8].mxu1 }
 0x4b4   :  { %v5473_v15 = vcombine.high %v11547_v62, %v11547_v62  ;;  %v5480_v46 = vrot.slane %v11547_v62, %v14817_v48  ;;  %v3419_v63 = vpop.f32.mrb[9].mxu1  ;;  %v3486_v0 = vmul.f32 %v11547_v62, %v11547_v62  ;;  %v15122_v41 = vsel %vm18653_vm15, %v11547_v62, 0.0  ;;  %vm18715_vm15 = vmmov %vm18640_vm0 }
 0x4b5   :  { %v5375_v25 = vcombine.high %v3419_v63, %v3419_v63  ;;  %v5382_v60 = vrot.slane %v3419_v63, %v14817_v48  ;;  %v11548_v3 = vpop.f32.mrb[10].mxu1  ;;  %v3484_v61 = vmul.f32 %v3419_v63, %v3419_v63  ;;  %18654 = vst [vmem:[#allocation28_spill] sm:$0xff] %v15122_v41 }
 0x4b6   :  { %v5487_v34 = vrot.slane %v5473_v15, %v14817_v48  ;;  %v5488_v10 = vcombine.high %v5480_v46, %v5480_v46  ;;  %v15096_v31 = vpop.f32.mrb[11].mxu1  ;;  %v15099_v8 = vrot.slane %v5480_v46, %v14817_v48  ;;  %v15125_v59 = vsel %vm18655_vm3, %v3486_v0, 0.0  ;;  %vm18723_vm3 = vmmov %vm18640_vm0 }
 0x4b7   :  { %18646 = vst [vmem:[#allocation55_spill] sm:$0xff] %v15096_v31  ;;  %v5389_v23 = vrot.slane %v5375_v25, %v14817_v48  ;;  %v5390_v42 = vcombine.high %v5382_v60, %v5382_v60  ;;  %v15103_v14 = vrot.slane %v5382_v60, %v14817_v48  ;;  %18656 = vst [vmem:[#allocation66_spill] sm:$0xff] %v15125_v59 }
 0x4b8   :  { %18647 = vst [vmem:[#allocation67_spill] sm:$0xff] %v15099_v8  ;;  %v5489_v57 = vcombine.high %v5487_v34, %v5487_v34  ;;  %v15108_v47 = vrot.slane %v5487_v34, %v14817_v48  ;;  %v15111_v15 = vrot.slane %v5488_v10, %v14817_v48  ;;  %v15128_v34 = vsel %vm18657_vm4, %v3419_v63, 0.0  ;;  %vm18724_vm4 = vmmov %vm18640_vm0 }
 0x4b9   :  { %18648 = vst [vmem:[#allocation18_spill] sm:$0xff] %v15103_v14  ;;  %v5391_v11 = vcombine.high %v5389_v23, %v5389_v23  ;;  %v15116_v25 = vrot.slane %v5389_v23, %v14817_v48  ;;  %v15119_v60 = vrot.slane %v5390_v42, %v14817_v48  ;;  %18658 = vst [vmem:[#allocation34_spill] sm:$0xff] %v15128_v34  ;;  %v15131_v10 = vsel %vm18659_vm5, %v3484_v61, 0.0 }
 0x4ba   :  { %18649 = vst [vmem:[#allocation50_spill] sm:$0xff] %v15108_v47  ;;  %18650 = vst [vmem:[#allocation68_spill] sm:$0xff] %v15111_v15  ;;  %v15134_v46 = vrot.slane %v5489_v57, %v14817_v48  ;;  %v5522_v59 = vcombine.high %v11548_v3, %v11548_v3  ;;  %v5529_v57 = vrot.slane %v11548_v3, %v14817_v48 }
 0x4bb   :  { %18651 = vst [vmem:[#allocation65_spill] sm:$0xff] %v15116_v25  ;;  %18652 = vst [vmem:[#allocation43_spill] sm:$0xff] %v15119_v60  ;;  %v15139_v42 = vrot.slane %v5391_v11, %v14817_v48  ;;  %v11555_v0 = vpop.f32.mrb[12].mxu1  ;;  %v5424_v62 = vcombine.high %v15096_v31, %v15096_v31  ;;  %v5431_v23 = vrot.slane %v15096_v31, %v14817_v48 }
 0x4bc   :  { %18660 = vst [vmem:[#allocation5_spill] sm:$0xff] %v15131_v10  ;;  %18661 = vst [vmem:[#allocation19_spill] sm:$0xff] %v15134_v46  ;;  %v4028_v41 = vpop.f32.mrb[13].mxu1  ;;  %v15153_v10 = vsel %vm18663_vm1, %v11548_v3, 0.0  ;;  %v5536_v61 = vrot.slane %v5522_v59, %v14817_v48  ;;  %v5537_v14 = vcombine.high %v5529_v57, %v5529_v57  ;;  %v15161_v47 = vrot.slane %v5529_v57, %v14817_v48 }
 0x4bd   :  { %18662 = vst [vmem:[#allocation4_spill] sm:$0xff] %v15139_v42  ;;  %18664 = vst [vmem:[#allocation51_spill] sm:$0xff] %v15153_v10  ;;  %v15157_v63 = vpop.f32.mrb[14].mxu1  ;;  %v15171_v60 = vmul.f32 %v11548_v3, %v11548_v3  ;;  %v5438_v34 = vrot.slane %v5424_v62, %v14817_v48  ;;  %v4131_v8 = vmul.f32 %v11555_v0, %v11555_v0 }
 0x4be   :  { %18665 = vst [vmem:[#allocation6_spill] sm:$0xff] %v15161_v47  ;;  %v15165_v25 = vpop.f32.mrb[15].mxu1  ;;  %v5538_v59 = vcombine.high %v5536_v61, %v5536_v61  ;;  %v15175_v15 = vrot.slane %v5536_v61, %v14817_v48  ;;  %v15178_v57 = vrot.slane %v5537_v14, %v14817_v48  ;;  %v5439_v38 = vcombine.high %v5431_v23, %v5431_v23  ;;  %vm18730_vm5 = vmmov %vm18640_vm0 }
 0x4bf   :  { %18666 = vst [vmem:[#allocation29_spill] sm:$0xff] %v15171_v60  ;;  %v5440_v32 = vcombine.high %v5438_v34, %v5438_v34  ;;  %v15181_v12 = vrot.slane %v5431_v23, %v14817_v48  ;;  %v15184_v11 = vrot.slane %v5438_v34, %v14817_v48  ;;  %v15193_v61 = vmul.f32 %v15096_v31, %v15096_v31  ;;  %vm18731_vm1 = vmmov %vm18640_vm0 }
 0x4c0   :  { %18667 = vst [vmem:[#allocation42_spill] sm:$0xff] %v15175_v15  ;;  %18668 = vst [vmem:[#allocation61_spill] sm:$0xff] %v15178_v57  ;;  %v15187_v3 = vrot.slane %v5538_v59, %v14817_v48  ;;  %v15196_v14 = vsel %vm18673_vm14, %v11555_v0, 0.0  ;;  %v15203_v10 = vrot.slane %v5439_v38, %v14817_v48  ;;  %v5813_v31 = vcombine.high %v11555_v0, %v11555_v0 }
 0x4c1   :  { %18669 = vst [vmem:[#allocation41_spill] sm:$0xff] %v15181_v12  ;;  %18670 = vst [vmem:[#allocation56_spill] sm:$0xff] %v15184_v11  ;;  %v15206_v59 = vrot.slane %v5440_v32, %v14817_v48  ;;  %v5820_v60 = vrot.slane %v11555_v0, %v14817_v48  ;;  %v4129_v38 = vmul.f32 %v4028_v41, %v4028_v41  ;;  %v4091_v23 = vsel %vm18678_vm7, %v4028_v41, 0.0 }
 0x4c2   :  { %18671 = vst [vmem:[#allocation40_spill] sm:$0xff] %v15187_v3  ;;  %18672 = vst [vmem:[#allocation49_spill] sm:$0xff] %v15193_v61  ;;  %v15211_v61 = vsel %vm18676_vm6, %v4131_v8, 0.0  ;;  %v5715_v15 = vcombine.high %v4028_v41, %v4028_v41  ;;  %v5827_v32 = vrot.slane %v5813_v31, %v14817_v48  ;;  %v5722_v8 = vrot.slane %v4028_v41, %v14817_v48 }
 0x4c3   :  { %18674 = vst [vmem:[#allocation62_spill] sm:$0xff] %v15203_v10  ;;  %18675 = vst [vmem:[#allocation58_spill] sm:$0xff] %v15206_v59  ;;  %v5828_v57 = vcombine.high %v5820_v60, %v5820_v60  ;;  %v15220_v47 = vrot.slane %v5820_v60, %v14817_v48  ;;  %v4145_v3 = vsel %vm18681_vm10, %v4129_v38, 0.0  ;;  %v4092_v7 = vsel %vm18694_vm9, %v15165_v25, 0.0 }
 0x4c4   :  { %v5729_v34 = vrot.slane %v5715_v15, %v14817_v48  ;;  %v5829_v11 = vcombine.high %v5827_v32, %v5827_v32  ;;  %v15230_v12 = vrot.slane %v5827_v32, %v14817_v48  ;;  %v5730_v62 = vcombine.high %v5722_v8, %v5722_v8  ;;  %vm18732_vm14 = vmmov %vm18640_vm0 }
 0x4c5   :  { %18677 = vst [vmem:[#allocation37_spill] sm:$0xff] %v15220_v47  ;;  %v15233_v31 = vrot.slane %v5828_v57, %v14817_v48  ;;  %v5858_v60 = vcombine.high %v15220_v47, %v15220_v47  ;;  %v15239_v0 = vrot.slane %v5722_v8, %v14817_v48  ;;  %v15250_v32 = vsel %vm18684_vm2, %v15157_v63, 0.0  ;;  %vm18733_vm6 = vmmov %vm18640_vm0 }
 0x4c6   :  { %18679 = vst [vmem:[#allocation46_spill] sm:$0xff] %v15230_v12  ;;  %v5731_v10 = vcombine.high %v5729_v34, %v5729_v34  ;;  %v15242_v41 = vrot.slane %v5829_v11, %v14817_v48  ;;  %v5859_v15 = vcombine.high %v15230_v12, %v15230_v12  ;;  %v15255_v59 = vrot.slane %v5729_v34, %v14817_v48  ;;  %vm18734_vm7 = vmmov %vm18640_vm0 }
 0x4c7   :  { %18680 = vst [vmem:[#allocation64_spill] sm:$0xff] %v15233_v31  ;;  %18682 = vst [vmem:[#allocation70_spill] sm:$0xff] %v15239_v0  ;;  %v5860_v57 = vcombine.high %v15233_v31, %v15233_v31  ;;  %v15258_v8 = vrot.slane %v5730_v62, %v14817_v48  ;;  %v4132_v11 = vmul.f32 %v15157_v63, %v15157_v63 }
 0x4c8   :  { %18683 = vst [vmem:[#allocation21_spill] sm:$0xff] %v15242_v41  ;;  %18685 = vst [vmem:[#allocation31_spill] sm:$0xff] %v15255_v59  ;;  %v5861_v42 = vcombine.high %v15242_v41, %v15242_v41  ;;  %v15267_v16 = vrot.slane %v5858_v60, %v14974_v22  ;;  %v15275_v62 = vrot.slane %v5731_v10, %v14817_v48 }
 0x4c9   :  { %18686 = vst [vmem:[#allocation27_spill] sm:$0xff] %v15258_v8  ;;  %v15272_v34 = vrot.slane %v5860_v57, %v14974_v22  ;;  %v5760_v1 = vcombine.high %v15239_v0, %v15239_v0  ;;  %v5762_v45 = vcombine.high %v15258_v8, %v15258_v8  ;;  %v15284_v60 = vrot.slane %v5859_v15, %v14974_v22  ;;  %vm18738_vm10 = vmmov %vm18640_vm0 }
 0x4ca   :  { %18687 = vst [vmem:[#allocation52_spill] sm:$0xff] %v15267_v16  ;;  %18689 = vst [vmem:[#allocation63_spill] sm:$0xff] %v15275_v62  ;;  %v15287_v38 = vrot.slane %v5861_v42, %v14974_v22  ;;  %v5761_v57 = vcombine.high %v15255_v59, %v15255_v59  ;;  %v5763_v10 = vcombine.high %v15275_v62, %v15275_v62 }
 0x4cb   :  { %18688 = vst [vmem:[#allocation25_spill] sm:$0xff] %v15272_v34  ;;  %18690 = vst [vmem:[#allocation39_spill] sm:$0xff] %v15284_v60  ;;  %v15300_v15 = vrot.slane %v5760_v1, %v14974_v22  ;;  %v15303_v42 = vrot.slane %v5762_v45, %v14974_v22  ;;  %v5869_v34 = vrot.slane %v15157_v63, %v14817_v48 }
 0x4cc   :  { %18691 = vst [vmem:[#allocation47_spill] sm:$0xff] %v15287_v38  ;;  %v5862_v38 = vcombine.high %v15157_v63, %v15157_v63  ;;  %v4130_v46 = vmul.f32 %v15165_v25, %v15165_v25  ;;  %v5764_v1 = vcombine.high %v15165_v25, %v15165_v25  ;;  %v15322_v63 = vrot.slane %v5761_v57, %v14974_v22  ;;  %vm18739_vm2 = vmmov %vm18640_vm0 }
 0x4cd   :  { %18692 = vst [vmem:[#allocation38_spill] sm:$0xff] %v15300_v15  ;;  %18693 = vst [vmem:[#allocation23_spill] sm:$0xff] %v15303_v42  ;;  %v5877_v42 = vcombine.high %v5869_v34, %v5869_v34  ;;  %v15319_v59 = vrot.slane %v5869_v34, %v14817_v48  ;;  %v4093_v15 = vadd.f32 %v4092_v7, %v4091_v23  ;;  %v4150_v23 = vsel %vm18700_vm12, %v4132_v11, 0.0 }
 0x4ce   :  { %v5876_v45 = vrot.slane %v5862_v38, %v14817_v48  ;;  %18696 = vst [vmem:[#allocation7_spill] sm:$0xff] %v15322_v63  ;;  %v4146_v56 = vsel %vm18697_vm11, %v4130_v46, 0.0  ;;  %v5771_v62 = vrot.slane %v15165_v25, %v14817_v48  ;;  %v5778_v8 = vrot.slane %v5764_v1, %v14817_v48  ;;  %vm18741_vm9 = vmmov %vm18640_vm0 }
 0x4cf   :  { %18695 = vst [vmem:[#allocation53_spill] sm:$0xff] %v15319_v59  ;;  %v15332_v38 = vrot.slane %v5877_v42, %v14817_v48  ;;  %v5907_v7 = vcombine.high %v15319_v59, %v15319_v59  ;;  %v4095_v34 = vadd.f32 %v15196_v14, %v4093_v15  ;;  %v4147_v46 = vadd.f32 %v4146_v56, %v4145_v3  ;;  %v11559_v11 = vpop.f32.mrb[16].mxu1  ;;  %vm18742_vm11 = vmmov %vm18640_vm0 }
 0x4d0   :  { %v5878_v0 = vcombine.high %v5876_v45, %v5876_v45  ;;  %v15329_v60 = vrot.slane %v5876_v45, %v14817_v48  ;;  %v5779_v57 = vcombine.high %v5771_v62, %v5771_v62  ;;  %v15339_v25 = vrot.slane %v5763_v10, %v14974_v22  ;;  %v4044_v63 = vpop.f32.mrb[17].mxu1  ;;  %vm18747_vm12 = vmmov %vm18640_vm0 }
 0x4d1   :  { %18699 = vst [vmem:[#allocation59_spill] sm:$0xff] %v15332_v38  ;;  %v5909_v42 = vcombine.high %v15332_v38, %v15332_v38  ;;  %v4149_v56 = vadd.f32 %v15211_v61, %v4147_v46  ;;  %v5780_v3 = vcombine.high %v5778_v8, %v5778_v8  ;;  %v15356_v10 = vrot.slane %v5907_v7, %v14974_v22  ;;  %v15375_v7 = vpop.f32.mrb[18].mxu1 }
 0x4d2   :  { %18698 = vst [vmem:[#allocation54_spill] sm:$0xff] %v15329_v60  ;;  %18701 = vst [vmem:[#allocation60_spill] sm:$0xff] %v15339_v25  ;;  %v15342_v1 = vrot.slane %v5878_v0, %v14817_v48  ;;  %v5908_v45 = vcombine.high %v15329_v60, %v15329_v60  ;;  %v15364_v59 = vrot.slane %v5771_v62, %v14817_v48 }
 0x4d3   :  { %18703 = vst [vmem:[#allocation12_spill] sm:$0xff] %v15356_v10  ;;  %v15359_v15 = vrot.slane %v5909_v42, %v14974_v22  ;;  %v15367_v61 = vrot.slane %v5778_v8, %v14817_v48  ;;  %v15370_v46 = vrot.slane %v5779_v57, %v14817_v48  ;;  %v15373_v14 = vrot.slane %v5780_v3, %v14817_v48 }
 0x4d4   :  { %18702 = vst [vmem:[#allocation16_spill] sm:$0xff] %v15342_v1  ;;  %v5910_v0 = vcombine.high %v15342_v1, %v15342_v1  ;;  %18705 = vst [vmem:[#allocation26_spill] sm:$0xff] %v15364_v59  ;;  %v15380_v25 = vrot.slane %v5908_v45, %v14974_v22  ;;  %v6009_v8 = vcombine.high %v11559_v11, %v11559_v11  ;;  %v15394_v42 = vsel %vm18640_vm0, %v11559_v11, 0.0 }
 0x4d5   :  { %18704 = vst [vmem:[#allocation9_spill] sm:$0xff] %v15359_v15  ;;  %18706 = vst [vmem:[#allocation14_spill] sm:$0xff] %v15367_v61  ;;  %v15385_v15 = vpop.f32.mrb[19].mxu1  ;;  %v5809_v57 = vcombine.high %v15364_v59, %v15364_v59  ;;  %v5810_v3 = vcombine.high %v15367_v61, %v15367_v61  ;;  %v5811_v60 = vcombine.high %v15370_v46, %v15370_v46 }
 0x4d6   :  { %18707 = vst [vmem:[#allocation71_spill] sm:$0xff] %v15370_v46  ;;  %18708 = vst [vmem:[#allocation72_spill] sm:$0xff] %v15380_v25  ;;  %v15383_v62 = vrot.slane %v5910_v0, %v14974_v22  ;;  %v15402_v25 = vmul.f32 %v11559_v11, %v11559_v11  ;;  %v6016_v0 = vrot.slane %v11559_v11, %v14817_v48 }
 0x4d7   :  { %v15405_v1 = vrot.slane %v5809_v57, %v14974_v22  ;;  %v15408_v10 = vrot.slane %v5811_v60, %v14974_v22  ;;  %v15415_v41 = vrot.slane %v5810_v3, %v14974_v22  ;;  %v4097_v46 = vadd.f32 %v15250_v32, %v4095_v34  ;;  %v15423_v61 = vpop.f32.mrb[16].mxu0 }
 0x4d8   :  { %18709 = vst [vmem:[#allocation73_spill] sm:$0xff] %v15383_v62  ;;  %v6023_v62 = vrot.slane %v6009_v8, %v14817_v48  ;;  %v4098_v57 = vsel %vm18713_vm8, %v4044_v63, 0.0  ;;  %v4151_v60 = vadd.f32 %v4150_v23, %v4149_v56  ;;  %v6024_v59 = vcombine.high %v6016_v0, %v6016_v0  ;;  %18714 = vst [vmem:[#allocation77_spill] sm:$0xff] %v15423_v61  ;;  %v15430_v34 = vpop.f32.mrb[17].mxu0 }
 0x4d9   :  { %18710 = vst [vmem:[#allocation74_spill] sm:$0xff] %v15405_v1  ;;  %18711 = vst [vmem:[#allocation75_spill] sm:$0xff] %v15408_v10  ;;  %v4133_v1 = vmul.f32 %v4044_v63, %v4044_v63  ;;  %v5911_v10 = vcombine.high %v4044_v63, %v4044_v63  ;;  %v6032_v38 = vrot.slane %v6016_v0, %v14817_v48  ;;  %v15434_v31 = vpop.f32.mrb[18].mxu0 }
 0x4da   :  { %18712 = vst [vmem:[#allocation76_spill] sm:$0xff] %v15415_v41  ;;  %v6025_v16 = vcombine.high %v6023_v62, %v6023_v62  ;;  %v6039_v45 = vrot.slane %v6023_v62, %v14817_v48  ;;  %v15425_v3 = vadd.f32 %v4098_v57, %v4097_v46  ;;  %v5918_v8 = vrot.slane %v4044_v63, %v14817_v48  ;;  %v15440_v63 = vpop.f32.mrb[20].mxu1  ;;  %vm18752_vm8 = vmmov %vm18640_vm0 }
 0x4db   :  { %v4152_v11 = vsel %vm18715_vm15, %v4133_v1, 0.0  ;;  %v5925_v32 = vrot.slane %v5911_v10, %v14817_v48  ;;  %18716 = vst [vmem:[#allocation78_spill] sm:$0xff] %v15430_v34  ;;  %v6046_v23 = vrot.slane %v6024_v59, %v14817_v48  ;;  %v6054_v41 = vcombine.high %v6032_v38, %v6032_v38  ;;  %18717 = vst [vmem:[#allocation79_spill] sm:$0xff] %v15434_v31  ;;  %v15442_v10 = vpop.f32.mrb[19].mxu0  ;;  %v15446_v47 = vpop.f32.mrb[21].mxu1 }
 0x4dc   :  { %v6053_v56 = vrot.slane %v6025_v16, %v14817_v48  ;;  %v6055_v0 = vcombine.high %v6039_v45, %v6039_v45  ;;  %v6694_v62 = vrot.slane %v6032_v38, %v14974_v22  ;;  %v6710_v46 = vrot.slane %v6039_v45, %v14974_v22  ;;  %18718 = vst [vmem:[#allocation80_spill] sm:$0xff] %v15442_v10  ;;  %vm18753_vm15 = vmmov %vm18640_vm0 }
 0x4dd   :  { %v15438_v57 = vadd.f32 %v4152_v11, %v4151_v60  ;;  %v5926_v1 = vcombine.high %v5918_v8, %v5918_v8  ;;  %v6056_v34 = vcombine.high %v6046_v23, %v6046_v23  ;;  %v6698_v59 = vrot.slane %v6046_v23, %v14974_v22  ;;  %v15454_v11 = vpop.f32.mrb[22].mxu1 }
 0x4de   :  { %v6057_v12 = vcombine.high %v6053_v56, %v6053_v56  ;;  %v6702_v16 = vrot.slane %v6054_v41, %v14974_v22  ;;  %v6714_v31 = vrot.slane %v6053_v56, %v14974_v22  ;;  %v6718_v38 = vrot.slane %v6055_v0, %v14974_v22  ;;  %v15464_v6 = vpop.f32.mrb[23].mxu1 }
 0x4df   :  { %v7187_v45 = vsel %vm4767_vm13, %v14841_v50, %v6694_v62  ;;  %v7191_v60 = vsel %vm4767_vm13, %v14847_v19, %v6710_v46  ;;  %v6706_v10 = vrot.slane %v6056_v34, %v14974_v22  ;;  %v7188_v41 = vsel %vm4767_vm13, %v14850_v58, %v6698_v59 }
 0x4e0   :  { %v6722_v23 = vrot.slane %v6057_v12, %v14974_v22  ;;  %v18719_v56 = vcombine.high %v14841_v50, %v14841_v50  ;;  %v7192_v62 = vsel %vm4767_vm13, %v14857_v28, %v6714_v31  ;;  %v18720_v46 = vcombine.high %v14847_v19, %v14847_v19 }
 0x4e1   :  { %v10427_v35 = vcombine.low %v7187_v45, %v7188_v41  ;;  %v5927_v12 = vcombine.high %v5925_v32, %v5925_v32  ;;  %v18721_v59 = vcombine.high %v14850_v58, %v14850_v58  ;;  %v18722_v50 = vcombine.high %v14857_v28, %v14857_v28 }
 0x4e2   :  { %v7189_v0 = vsel %vm4767_vm13, %v18719_v56, %v6702_v16  ;;  %v7193_v34 = vsel %vm4767_vm13, %v18720_v46, %v6718_v38  ;;  %v10444_v56 = vcombine.low %v7191_v60, %v7192_v62  ;;  %v5934_v31 = vrot.slane %v5918_v8, %v14817_v48 }
 0x4e3   :  { %v7190_v52 = vsel %vm4767_vm13, %v18721_v59, %v6706_v10  ;;  %v7194_v16 = vsel %vm4767_vm13, %v18722_v50, %v6722_v23  ;;  %v10435_v19 = vrot.slane %v10427_v35, %v14982_v26  ;;  %v5941_v38 = vrot.slane %v5925_v32, %v14817_v48 }
 0x4e4   :  { %v10428_v49 = vcombine.low %v7189_v0, %v7190_v52  ;;  %v10445_v61 = vcombine.low %v7193_v34, %v7194_v16  ;;  %v10452_v45 = vrot.slane %v10444_v56, %v14982_v26  ;;  %v5948_v58 = vrot.slane %v5926_v1, %v14817_v48 }
 0x4e5   :  { %v5955_v10 = vrot.slane %v5927_v12, %v14817_v48  ;;  %v5956_v41 = vcombine.high %v5934_v31, %v5934_v31  ;;  %v5957_v60 = vcombine.high %v5941_v38, %v5941_v38  ;;  %v6630_v8 = vrot.slane %v5934_v31, %v14974_v22 }
 0x4e6   :  { %v10442_v28 = vrot.slane %v10428_v49, %v14982_v26  ;;  %v10459_v23 = vrot.slane %v10445_v61, %v14982_v26  ;;  %v5958_v52 = vcombine.high %v5948_v58, %v5948_v58  ;;  %v6634_v35 = vrot.slane %v5948_v58, %v14974_v22 }
 0x4e7   :  { %v5959_v0 = vcombine.high %v5955_v10, %v5955_v10  ;;  %v6638_v32 = vrot.slane %v5956_v41, %v14974_v22  ;;  %v6646_v1 = vrot.slane %v5941_v38, %v14974_v22  ;;  %v6650_v34 = vrot.slane %v5955_v10, %v14974_v22 }
 0x4e8   :  { %v10443_v62 = vcombine.low %v10435_v19, %v10442_v28  ;;  %v10460_v46 = vcombine.low %v10452_v45, %v10459_v23  ;;  %v6642_v12 = vrot.slane %v5958_v52, %v14974_v22  ;;  %v6654_v49 = vrot.slane %v5957_v60, %v14974_v22 }
 0x4e9   :  { %v6658_v61 = vrot.slane %v5959_v0, %v14974_v22  ;;  %v7171_v59 = vsel %vm4767_vm13, %v14864_v43, %v6630_v8  ;;  %v7172_v50 = vsel %vm4767_vm13, %v14884_v20, %v6634_v35  ;;  %v18725_v16 = vcombine.high %v14864_v43, %v14864_v43 }
 0x4ea   :  { %11195 = vst.msk [vmem:[%s18052_s3 + $0xc0] sm:$0xff] %vm18723_vm3, %v10443_v62  ;;  %v7175_v31 = vsel %vm4767_vm13, %v14877_v18, %v6646_v1  ;;  %v7176_v19 = vsel %vm4767_vm13, %v14901_v33, %v6650_v34  ;;  %v18726_v38 = vcombine.high %v14884_v20, %v14884_v20  ;;  %v18727_v58 = vcombine.high %v14877_v18, %v14877_v18  ;;  %vm18754_vm3 = vmmov %vm18640_vm0 }
 0x4eb   :  { %11196 = vst.msk [vmem:[%s18052_s3 + $0xc8] sm:$0xff] %vm18724_vm4, %v10460_v46  ;;  %v7173_v56 = vsel %vm4767_vm13, %v18725_v16, %v6638_v32  ;;  %v18728_v43 = vcombine.high %v14901_v33, %v14901_v33  ;;  %v10291_v28 = vcombine.low %v7171_v59, %v7172_v50  ;;  %v18729_v23 = vcombine.high %v15373_v14, %v15373_v14  ;;  %vm18755_vm4 = vmmov %vm18640_vm0 }
 0x4ec   :  { %v7174_v45 = vsel %vm4767_vm13, %v18726_v38, %v6642_v12  ;;  %v7177_v10 = vsel %vm4767_vm13, %v18727_v58, %v6654_v49  ;;  %v10308_v8 = vcombine.low %v7175_v31, %v7176_v19  ;;  %v4156_v18 = vsel %vm18730_vm5, %v15402_v25, 0.0  ;;  %vm18756_vm5 = vmmov %vm18640_vm0 }
 0x4ed   :  { %v7178_v41 = vsel %vm4767_vm13, %v18728_v43, %v6658_v61  ;;  %v15532_v60 = vrot.slane %v18729_v23, %v14974_v22  ;;  %v10292_v20 = vcombine.low %v7173_v56, %v7174_v45  ;;  %v10299_v0 = vrot.slane %v10291_v28, %v14982_v26  ;;  %v15550_v61 = vpop.f32.mrb[24].mxu1 }
 0x4ee   :  { %v10309_v52 = vcombine.low %v7177_v10, %v7178_v41  ;;  %v6058_v33 = vcombine.high %v15375_v7, %v15375_v7  ;;  %v6065_v35 = vrot.slane %v15375_v7, %v14817_v48  ;;  %v10316_v62 = vrot.slane %v10308_v8, %v14982_v26  ;;  %v15555_v31 = vpop.f32.mrb[25].mxu1 }
 0x4ef   :  { %v10306_v32 = vrot.slane %v10292_v20, %v14982_v26  ;;  %v4100_v1 = vsel %vm18731_vm1, %v15385_v15, 0.0  ;;  %v4136_v25 = vmul.f32 %v15375_v7, %v15375_v7  ;;  %v4134_v56 = vmul.f32 %v15385_v15, %v15385_v15  ;;  %v15559_v10 = vpop.f32.mrb[26].mxu1  ;;  %vm18757_vm1 = vmmov %vm18640_vm0 }
 0x4f0   :  { %v10323_v46 = vrot.slane %v10309_v52, %v14982_v26  ;;  %v6072_v34 = vrot.slane %v6058_v33, %v14817_v48  ;;  %v6073_v12 = vcombine.high %v6065_v35, %v6065_v35  ;;  %v6081_v49 = vrot.slane %v6065_v35, %v14817_v48  ;;  %v15576_v23 = vpop.f32.mrb[27].mxu1 }
 0x4f1   :  { %v10307_v59 = vcombine.low %v10299_v0, %v10306_v32  ;;  %v4101_v16 = vadd.f32 %v4100_v1, %v15425_v3  ;;  %v4154_v41 = vsel %vm18734_vm7, %v4134_v56, 0.0  ;;  %v5960_v28 = vcombine.high %v15385_v15, %v15385_v15  ;;  %vm18766_vm7 = vmmov %vm18640_vm0 }
 0x4f2   :  { %v10324_v50 = vcombine.low %v10316_v62, %v10323_v46  ;;  %v6074_v19 = vcombine.high %v6072_v34, %v6072_v34  ;;  %v6088_v38 = vrot.slane %v6072_v34, %v14817_v48  ;;  %v6095_v45 = vrot.slane %v6073_v12, %v14817_v48 }
 0x4f3   :  { %v6103_v58 = vcombine.high %v6081_v49, %v6081_v49  ;;  %11187 = vst.msk [vmem:[%s18052_s3 + $0x80] sm:$0xff] %vm18732_vm14, %v10307_v59  ;;  %v6726_v3 = vrot.slane %v6081_v49, %v14974_v22  ;;  %v15571_v43 = vadd.f32 %v15394_v42, %v4101_v16  ;;  %v4155_v32 = vadd.f32 %v4154_v41, %v15438_v57  ;;  %vm18758_vm14 = vmmov %vm18640_vm0 }
 0x4f4   :  { %11188 = vst.msk [vmem:[%s18052_s3 + $0x88] sm:$0xff] %vm18733_vm6, %v10324_v50  ;;  %v6102_v20 = vrot.slane %v6074_v19, %v14817_v48  ;;  %v6104_v8 = vcombine.high %v6088_v38, %v6088_v38  ;;  %v6105_v52 = vcombine.high %v6095_v45, %v6095_v45  ;;  %v6730_v0 = vrot.slane %v6095_v45, %v14974_v22  ;;  %vm18763_vm6 = vmmov %vm18640_vm0 }
 0x4f5   :  { %v6734_v33 = vrot.slane %v6103_v58, %v14974_v22  ;;  %v6742_v35 = vrot.slane %v6088_v38, %v14974_v22  ;;  %v7195_v42 = vsel %vm4767_vm13, %v14898_v4, %v6726_v3  ;;  %v18735_v49 = vcombine.high %v14898_v4, %v14898_v4 }
 0x4f6   :  { %v6106_v62 = vcombine.high %v6102_v20, %v6102_v20  ;;  %v6738_v46 = vrot.slane %v6105_v52, %v14974_v22  ;;  %v6746_v1 = vrot.slane %v6102_v20, %v14974_v22  ;;  %v6750_v34 = vrot.slane %v6104_v8, %v14974_v22 }
 0x4f7   :  { %v7196_v12 = vsel %vm4767_vm13, %v14909_v30, %v6730_v0  ;;  %v7197_v59 = vsel %vm4767_vm13, %v18735_v49, %v6734_v33  ;;  %v7199_v50 = vsel %vm4767_vm13, %v14906_v27, %v6742_v35  ;;  %v15596_v16 = vadd.f32 %v4156_v18, %v4155_v32 }
 0x4f8   :  { %v6754_v57 = vrot.slane %v6106_v62, %v14974_v22  ;;  %v18736_v56 = vcombine.high %v14909_v30, %v14909_v30  ;;  %v7200_v38 = vsel %vm4767_vm13, %v14914_v53, %v6746_v1  ;;  %v18737_v4 = vcombine.high %v14906_v27, %v14906_v27  ;;  %v15633_v1 = vpop.f32.mrb[20].mxu0 }
 0x4f9   :  { %v10495_v58 = vcombine.low %v7195_v42, %v7196_v12  ;;  %v10512_v41 = vcombine.low %v7199_v50, %v7200_v38  ;;  %v5967_v18 = vrot.slane %v15385_v15, %v14817_v48  ;;  %v4104_v20 = vsel %vm18738_vm10, %v15375_v7, 0.0  ;;  %vm18769_vm10 = vmmov %vm18640_vm0 }
 0x4fa   :  { %v7198_v19 = vsel %vm4767_vm13, %v18736_v56, %v6738_v46  ;;  %v7201_v45 = vsel %vm4767_vm13, %v18737_v4, %v6750_v34  ;;  %v15614_v30 = vsel %vm18739_vm2, %v4136_v25, 0.0  ;;  %v18740_v8 = vcombine.high %v14914_v53, %v14914_v53  ;;  %vm18770_vm2 = vmmov %vm18640_vm0 }
 0x4fb   :  { %v10496_v3 = vcombine.low %v7197_v59, %v7198_v19  ;;  %v5974_v27 = vrot.slane %v5960_v28, %v14817_v48  ;;  %v10503_v0 = vrot.slane %v10495_v58, %v14982_v26  ;;  %v15625_v15 = vmul.f32 %v15440_v63, %v15440_v63 }
 0x4fc   :  { %v7202_v52 = vsel %vm4767_vm13, %v18740_v8, %v6754_v57  ;;  %v5975_v7 = vcombine.high %v5967_v18, %v5967_v18  ;;  %v5983_v25 = vrot.slane %v5967_v18, %v14817_v48  ;;  %v10520_v62 = vrot.slane %v10512_v41, %v14982_v26 }
 0x4fd   :  { %v10510_v33 = vrot.slane %v10496_v3, %v14982_v26  ;;  %v10513_v35 = vcombine.low %v7201_v45, %v7202_v52  ;;  %v5976_v42 = vcombine.high %v5974_v27, %v5974_v27  ;;  %v5990_v32 = vrot.slane %v5974_v27, %v14817_v48 }
 0x4fe   :  { %v6205_v46 = vcombine.high %v15440_v63, %v15440_v63  ;;  %v5997_v34 = vrot.slane %v5975_v7, %v14817_v48  ;;  %v6005_v49 = vcombine.high %v5983_v25, %v5983_v25  ;;  %v6662_v57 = vrot.slane %v5983_v25, %v14974_v22 }
 0x4ff   :  { %v10511_v53 = vcombine.low %v10503_v0, %v10510_v33  ;;  %v10527_v28 = vrot.slane %v10513_v35, %v14982_v26  ;;  %v6004_v12 = vrot.slane %v5976_v42, %v14817_v48  ;;  %v6006_v59 = vcombine.high %v5990_v32, %v5990_v32 }
 0x500   :  { %v6678_v56 = vrot.slane %v5990_v32, %v14974_v22  ;;  %v6212_v19 = vrot.slane %v15440_v63, %v14817_v48  ;;  %v6007_v38 = vcombine.high %v5997_v34, %v5997_v34  ;;  %v6666_v45 = vrot.slane %v5997_v34, %v14974_v22 }
 0x501   :  { %v10528_v50 = vcombine.low %v10520_v62, %v10527_v28  ;;  %11199 = vst.msk [vmem:[%s18052_s3 + $0xe0] sm:$0xff] %vm18741_vm9, %v10511_v53  ;;  %v6008_v4 = vcombine.high %v6004_v12, %v6004_v12  ;;  %v6670_v58 = vrot.slane %v6005_v49, %v14974_v22  ;;  %v6682_v3 = vrot.slane %v6004_v12, %v14974_v22  ;;  %vm18771_vm9 = vmmov %vm18640_vm0 }
 0x502   :  { %v6686_v41 = vrot.slane %v6006_v59, %v14974_v22  ;;  %v7179_v18 = vsel %vm4767_vm13, %v14923_v29, %v6662_v57  ;;  %v7183_v8 = vsel %vm4767_vm13, %v14926_v55, %v6678_v56  ;;  %v6674_v52 = vrot.slane %v6007_v38, %v14974_v22 }
 0x503   :  { %11200 = vst.msk [vmem:[%s18052_s3 + $0xe8] sm:$0xff] %vm18742_vm11, %v10528_v50  ;;  %v6690_v27 = vrot.slane %v6008_v4, %v14974_v22  ;;  %v7180_v0 = vsel %vm4767_vm13, %v14931_v40, %v6666_v45  ;;  %v18743_v33 = vcombine.high %v14923_v29, %v14923_v29  ;;  %v7184_v7 = vsel %vm4767_vm13, %v14934_v24, %v6682_v3  ;;  %vm18772_vm11 = vmmov %vm18640_vm0 }
 0x504   :  { %v18744_v42 = vcombine.high %v14926_v55, %v14926_v55  ;;  %v10359_v32 = vcombine.low %v7179_v18, %v7180_v0  ;;  %v6219_v53 = vrot.slane %v6205_v46, %v14817_v48  ;;  %v18745_v62 = vcombine.high %v14931_v40, %v14931_v40 }
 0x505   :  { %v7181_v35 = vsel %vm4767_vm13, %v18743_v33, %v6670_v58  ;;  %v18746_v29 = vcombine.high %v14934_v24, %v14934_v24  ;;  %v10376_v12 = vcombine.low %v7183_v8, %v7184_v7  ;;  %v6220_v49 = vcombine.high %v6212_v19, %v6212_v19 }
 0x506   :  { %v7185_v25 = vsel %vm4767_vm13, %v18744_v42, %v6686_v41  ;;  %v7182_v28 = vsel %vm4767_vm13, %v18745_v62, %v6674_v52  ;;  %v10367_v55 = vrot.slane %v10359_v32, %v14982_v26  ;;  %v6221_v57 = vcombine.high %v6219_v53, %v6219_v53  ;;  %v15690_v52 = vpop.f32.mrb[21].mxu0 }
 0x507   :  { %v7186_v34 = vsel %vm4767_vm13, %v18746_v29, %v6690_v27  ;;  %v10360_v59 = vcombine.low %v7181_v35, %v7182_v28  ;;  %v10384_v56 = vrot.slane %v10376_v12, %v14982_v26  ;;  %v6228_v46 = vrot.slane %v6212_v19, %v14817_v48 }
 0x508   :  { %v10377_v50 = vcombine.low %v7185_v25, %v7186_v34  ;;  %v6235_v40 = vrot.slane %v6219_v53, %v14817_v48  ;;  %v6242_v38 = vrot.slane %v6220_v49, %v14817_v48  ;;  %v6249_v45 = vrot.slane %v6221_v57, %v14817_v48 }
 0x509   :  { %v10374_v4 = vrot.slane %v10360_v59, %v14982_v26  ;;  %v4105_v58 = vadd.f32 %v4104_v20, %v15571_v43  ;;  %v6250_v3 = vcombine.high %v6228_v46, %v6228_v46  ;;  %v6822_v8 = vrot.slane %v6228_v46, %v14974_v22  ;;  %v15723_v59 = vpop.f32.mrb[22].mxu0 }
 0x50a   :  { %v10391_v24 = vrot.slane %v10377_v50, %v14982_v26  ;;  %v6251_v41 = vcombine.high %v6235_v40, %v6235_v40  ;;  %v6252_v18 = vcombine.high %v6242_v38, %v6242_v38  ;;  %v6253_v0 = vcombine.high %v6249_v45, %v6249_v45 }
 0x50b   :  { %v10375_v19 = vcombine.low %v10367_v55, %v10374_v4  ;;  %v6826_v33 = vrot.slane %v6242_v38, %v14974_v22  ;;  %v6830_v35 = vrot.slane %v6250_v3, %v14974_v22  ;;  %v6838_v42 = vrot.slane %v6235_v40, %v14974_v22 }
 0x50c   :  { %v10392_v27 = vcombine.low %v10384_v56, %v10391_v24  ;;  %v6834_v7 = vrot.slane %v6252_v18, %v14974_v22  ;;  %v6842_v43 = vrot.slane %v6249_v45, %v14974_v22  ;;  %v6846_v20 = vrot.slane %v6251_v41, %v14974_v22 }
 0x50d   :  { %11191 = vst.msk [vmem:[%s18052_s3 + $0xa0] sm:$0xff] %vm18747_vm12, %v10375_v19  ;;  %v6850_v25 = vrot.slane %v6253_v0, %v14974_v22  ;;  %v7219_v32 = vsel %vm4767_vm13, %v14977_v36, %v6822_v8  ;;  %v7220_v53 = vsel %vm4767_vm13, %v14996_v5, %v6826_v33  ;;  %v18748_v62 = vcombine.high %v14977_v36, %v14977_v36  ;;  %v15748_v19 = vpop.f32.mrb[23].mxu0  ;;  %vm18773_vm12 = vmmov %vm18640_vm0 }
 0x50e   :  { %11192 = vst.msk [vmem:[%s18052_s3 + $0xa8] sm:$0xff] %vm18640_vm0, %v10392_v27  ;;  %v18749_v29 = vcombine.high %v14996_v5, %v14996_v5  ;;  %v7223_v12 = vsel %vm4767_vm13, %v14985_v21, %v6838_v42  ;;  %v7224_v49 = vsel %vm4767_vm13, %v15020_v9, %v6842_v43  ;;  %v18750_v55 = vcombine.high %v14985_v21, %v14985_v21 }
 0x50f   :  { %v7221_v28 = vsel %vm4767_vm13, %v18748_v62, %v6830_v35  ;;  %v18751_v50 = vcombine.high %v15020_v9, %v15020_v9  ;;  %v10699_v57 = vcombine.low %v7219_v32, %v7220_v53  ;;  %v10716_v46 = vcombine.low %v7223_v12, %v7224_v49  ;;  %v15786_v53 = vpop.f32.mrb[28].mxu1 }
 0x510   :  { %v7222_v34 = vsel %vm4767_vm13, %v18749_v29, %v6834_v7  ;;  %v7225_v36 = vsel %vm4767_vm13, %v18750_v55, %v6846_v20  ;;  %v4106_v38 = vsel %vm18752_vm8, %v15446_v47, 0.0  ;;  %v4137_v4 = vmul.f32 %v15446_v47, %v15446_v47  ;;  %vm18793_vm8 = vmmov %vm18640_vm0 }
 0x511   :  { %v7226_v5 = vsel %vm4767_vm13, %v18751_v50, %v6850_v25  ;;  %v10700_v56 = vcombine.low %v7221_v28, %v7222_v34  ;;  %v10707_v24 = vrot.slane %v10699_v57, %v14982_v26  ;;  %v15739_v45 = vadd.f32 %v4106_v38, %v4105_v58 }
 0x512   :  { %v10717_v40 = vcombine.low %v7225_v36, %v7226_v5  ;;  %v4159_v9 = vadd.f32 %v15614_v30, %v15596_v16  ;;  %v10724_v3 = vrot.slane %v10716_v46, %v14982_v26  ;;  %v4160_v18 = vsel %vm18753_vm15, %v4137_v4, 0.0  ;;  %vm18796_vm15 = vmmov %vm18640_vm0 }
 0x513   :  { %v10714_v21 = vrot.slane %v10700_v56, %v14982_v26  ;;  %v6107_v8 = vcombine.high %v15446_v47, %v15446_v47  ;;  %v15752_v27 = vsel %vm18754_vm3, %v15440_v63, 0.0  ;;  %v6114_v16 = vrot.slane %v15446_v47, %v14817_v48  ;;  %vm18797_vm3 = vmmov %vm18640_vm0 }
 0x514   :  { %v10731_v41 = vrot.slane %v10717_v40, %v14982_v26  ;;  %v15754_v0 = vadd.f32 %v4160_v18, %v4159_v9  ;;  %v15760_v30 = vsel %vm18755_vm4, %v15625_v15, 0.0  ;;  %v6254_v7 = vcombine.high %v15454_v11, %v15454_v11  ;;  %v15808_v18 = vpop.f32.mrb[29].mxu1  ;;  %vm18799_vm4 = vmmov %vm18640_vm0 }
 0x515   :  { %v10715_v58 = vcombine.low %v10707_v24, %v10714_v21  ;;  %v6121_v35 = vrot.slane %v6107_v8, %v14817_v48  ;;  %v6122_v63 = vcombine.high %v6114_v16, %v6114_v16  ;;  %v6130_v42 = vrot.slane %v6114_v16, %v14817_v48 }
 0x516   :  { %v10732_v33 = vcombine.low %v10724_v3, %v10731_v41  ;;  %v15772_v47 = vmul.f32 %v15454_v11, %v15454_v11  ;;  %v6261_v15 = vrot.slane %v15454_v11, %v14817_v48  ;;  %v6268_v25 = vrot.slane %v6254_v7, %v14817_v48 }
 0x517   :  { %11211 = vst.msk [vmem:[%s18052_s3 + $0x140] sm:$0xff] %vm18756_vm5, %v10715_v58  ;;  %v6123_v43 = vcombine.high %v6121_v35, %v6121_v35  ;;  %v6137_v20 = vrot.slane %v6121_v35, %v14817_v48  ;;  %v15784_v32 = vsel %vm18758_vm14, %v15464_v6, 0.0  ;;  %v6144_v62 = vrot.slane %v6122_v63, %v14817_v48  ;;  %vm18800_vm5 = vmmov %vm18640_vm0 }
 0x518   :  { %11212 = vst.msk [vmem:[%s18052_s3 + $0x148] sm:$0xff] %vm18757_vm1, %v10732_v33  ;;  %v6152_v28 = vcombine.high %v6130_v42, %v6130_v42  ;;  %v6758_v29 = vrot.slane %v6130_v42, %v14974_v22  ;;  %v6269_v34 = vcombine.high %v6261_v15, %v6261_v15  ;;  %v6270_v36 = vcombine.high %v6268_v25, %v6268_v25  ;;  %vm18802_vm1 = vmmov %vm18640_vm0 }
 0x519   :  { %v6151_v12 = vrot.slane %v6123_v43, %v14817_v48  ;;  %v6153_v49 = vcombine.high %v6137_v20, %v6137_v20  ;;  %v6774_v55 = vrot.slane %v6137_v20, %v14974_v22  ;;  %v6154_v50 = vcombine.high %v6144_v62, %v6144_v62  ;;  %vm18803_vm14 = vmmov %vm18640_vm0 }
 0x51a   :  { %v6762_v5 = vrot.slane %v6144_v62, %v14974_v22  ;;  %v6766_v57 = vrot.slane %v6152_v28, %v14974_v22  ;;  %v7203_v56 = vsel %vm4767_vm13, %v14988_v39, %v6758_v29  ;;  %v18759_v9 = vcombine.high %v14988_v39, %v14988_v39 }
 0x51b   :  { %v6155_v46 = vcombine.high %v6151_v12, %v6151_v12  ;;  %v6778_v40 = vrot.slane %v6151_v12, %v14974_v22  ;;  %v6782_v38 = vrot.slane %v6153_v49, %v14974_v22  ;;  %v7207_v4 = vsel %vm4767_vm13, %v15013_v37, %v6774_v55 }
 0x51c   :  { %v6770_v24 = vrot.slane %v6154_v50, %v14974_v22  ;;  %v7204_v21 = vsel %vm4767_vm13, %v15016_v54, %v6762_v5  ;;  %v7205_v3 = vsel %vm4767_vm13, %v18759_v9, %v6766_v57  ;;  %v6277_v41 = vrot.slane %v6261_v15, %v14817_v48 }
 0x51d   :  { %v6786_v8 = vrot.slane %v6155_v46, %v14974_v22  ;;  %v7208_v58 = vsel %vm4767_vm13, %v15029_v44, %v6778_v40  ;;  %v18760_v16 = vcombine.high %v15013_v37, %v15013_v37  ;;  %v10563_v35 = vcombine.low %v7203_v56, %v7204_v21 }
 0x51e   :  { %v18761_v39 = vcombine.high %v15016_v54, %v15016_v54  ;;  %v10580_v63 = vcombine.low %v7207_v4, %v7208_v58  ;;  %v6284_v42 = vrot.slane %v6268_v25, %v14817_v48  ;;  %v6291_v15 = vrot.slane %v6269_v34, %v14817_v48 }
 0x51f   :  { %v7209_v33 = vsel %vm4767_vm13, %v18760_v16, %v6782_v38  ;;  %v18762_v43 = vcombine.high %v15029_v44, %v15029_v44  ;;  %v10571_v37 = vrot.slane %v10563_v35, %v14982_v26  ;;  %v6298_v28 = vrot.slane %v6270_v36, %v14817_v48 }
 0x520   :  { %v7206_v7 = vsel %vm4767_vm13, %v18761_v39, %v6770_v24  ;;  %v10588_v54 = vrot.slane %v10580_v63, %v14982_v26  ;;  %v6299_v12 = vcombine.high %v6277_v41, %v6277_v41  ;;  %v6300_v49 = vcombine.high %v6284_v42, %v6284_v42 }
 0x521   :  { %v7210_v20 = vsel %vm4767_vm13, %v18762_v43, %v6786_v8  ;;  %v10564_v62 = vcombine.low %v7205_v3, %v7206_v7  ;;  %v6301_v25 = vcombine.high %v6291_v15, %v6291_v15  ;;  %v6302_v50 = vcombine.high %v6298_v28, %v6298_v28 }
 0x522   :  { %v10581_v29 = vcombine.low %v7209_v33, %v7210_v20  ;;  %v6854_v34 = vrot.slane %v6277_v41, %v14974_v22  ;;  %v6858_v5 = vrot.slane %v6291_v15, %v14974_v22  ;;  %v6862_v57 = vrot.slane %v6299_v12, %v14974_v22 }
 0x523   :  { %v10578_v55 = vrot.slane %v10564_v62, %v14982_v26  ;;  %v6870_v56 = vrot.slane %v6284_v42, %v14974_v22  ;;  %v6866_v46 = vrot.slane %v6301_v25, %v14974_v22  ;;  %v6874_v40 = vrot.slane %v6298_v28, %v14974_v22  ;;  %v15876_v62 = vpop.f32.mrb[30].mxu1 }
 0x524   :  { %v10595_v44 = vrot.slane %v10581_v29, %v14982_v26  ;;  %v6878_v38 = vrot.slane %v6300_v49, %v14974_v22  ;;  %v6882_v24 = vrot.slane %v6302_v50, %v14974_v22  ;;  %v7227_v21 = vsel %vm4767_vm13, %v15036_v2, %v6854_v34 }
 0x525   :  { %v10579_v36 = vcombine.low %v10571_v37, %v10578_v55  ;;  %v7228_v9 = vsel %vm4767_vm13, %v15042_v17, %v6858_v5  ;;  %v18764_v3 = vcombine.high %v15036_v2, %v15036_v2  ;;  %v18765_v8 = vcombine.high %v15042_v17, %v15042_v17 }
 0x526   :  { %v10596_v4 = vcombine.low %v10588_v54, %v10595_v44  ;;  %v7231_v16 = vsel %vm4767_vm13, %v15039_v51, %v6870_v56  ;;  %v7232_v33 = vsel %vm4767_vm13, %v15058_v13, %v6874_v40  ;;  %v18767_v2 = vcombine.high %v15039_v51, %v15039_v51  ;;  %v18774_v56 = vld [vmem:[#allocation77_spill] sm:$0xff] }
 0x527   :  { %11203 = vst.msk [vmem:[%s18052_s3 + $0x100] sm:$0xff] %vm18763_vm6, %v10579_v36  ;;  %v7229_v41 = vsel %vm4767_vm13, %v18764_v3, %v6862_v57  ;;  %v7230_v58 = vsel %vm4767_vm13, %v18765_v8, %v6866_v46  ;;  %v18768_v17 = vcombine.high %v15058_v13, %v15058_v13  ;;  %v10767_v7 = vcombine.low %v7227_v21, %v7228_v9  ;;  %v18775_v9 = vld [vmem:[#allocation10_spill] sm:$0xff]  ;;  %vm18828_vm6 = vmmov %vm18640_vm0 }
 0x528   :  { %11204 = vst.msk [vmem:[%s18052_s3 + $0x108] sm:$0xff] %vm18766_vm7, %v10596_v4  ;;  %v7233_v35 = vsel %vm4767_vm13, %v18767_v2, %v6878_v38  ;;  %v10768_v63 = vcombine.low %v7229_v41, %v7230_v58  ;;  %v10784_v42 = vcombine.low %v7231_v16, %v7232_v33  ;;  %v4109_v43 = vadd.f32 %v15784_v32, %v15739_v45  ;;  %v18776_v2 = vld [vmem:[#allocation17_spill] sm:$0xff]  ;;  %vm18830_vm7 = vmmov %vm18640_vm0 }
 0x529   :  { %v7234_v39 = vsel %vm4767_vm13, %v18768_v17, %v6882_v24  ;;  %v4138_v20 = vmul.f32 %v15464_v6, %v15464_v6  ;;  %v10775_v51 = vrot.slane %v10767_v7, %v14982_v26  ;;  %v6156_v13 = vcombine.high %v15464_v6, %v15464_v6  ;;  %v18778_v7 = vld [vmem:[#allocation45_spill] sm:$0xff] }
 0x52a   :  { %v10785_v15 = vcombine.low %v7233_v35, %v7234_v39  ;;  %v10782_v37 = vrot.slane %v10768_v63, %v14982_v26  ;;  %v6163_v28 = vrot.slane %v15464_v6, %v14817_v48  ;;  %v10792_v29 = vrot.slane %v10784_v42, %v14982_v26 }
 0x52b   :  { %v15887_v45 = vadd.f32 %v15752_v27, %v4109_v43  ;;  %v4162_v32 = vsel %vm18769_vm10, %v4138_v20, 0.0  ;;  %v6170_v55 = vrot.slane %v6156_v13, %v14817_v48  ;;  %v15894_v50 = vsel %vm18770_vm2, %v15454_v11, 0.0  ;;  %vm18831_vm10 = vmmov %vm18640_vm0 }
 0x52c   :  { %v10799_v54 = vrot.slane %v10785_v15, %v14982_v26  ;;  %v10783_v12 = vcombine.low %v10775_v51, %v10782_v37  ;;  %v4163_v49 = vadd.f32 %v4162_v32, %v15754_v0  ;;  %v6171_v25 = vcombine.high %v6163_v28, %v6163_v28  ;;  %v15939_v15 = vpop.f32.mrb[31].mxu1  ;;  %v18780_v37 = vld [vmem:[#allocation32_spill] sm:$0xff]  ;;  %vm18832_vm2 = vmmov %vm18640_vm0 }
 0x52d   :  { %v15898_v6 = vsel %vm18771_vm9, %v15772_v47, 0.0  ;;  %v6179_v27 = vrot.slane %v6163_v28, %v14817_v48  ;;  %v6172_v44 = vcombine.high %v6170_v55, %v6170_v55  ;;  %v6186_v5 = vrot.slane %v6170_v55, %v14817_v48  ;;  %vm18833_vm9 = vmmov %vm18640_vm0 }
 0x52e   :  { %v10800_v34 = vcombine.low %v10792_v29, %v10799_v54  ;;  %11215 = vst.msk [vmem:[%s18052_s3 + $0x160] sm:$0xff] %vm18772_vm11, %v10783_v12  ;;  %v15906_v0 = vadd.f32 %v15760_v30, %v4163_v49  ;;  %v6193_v11 = vrot.slane %v6171_v25, %v14817_v48  ;;  %v3474_v36 = vmul.f32 %v18774_v56, %v18774_v56  ;;  %vm18834_vm11 = vmmov %vm18640_vm0 }
 0x52f   :  { %v6201_v47 = vcombine.high %v6179_v27, %v6179_v27  ;;  %v6790_v57 = vrot.slane %v6179_v27, %v14974_v22  ;;  %v4885_v30 = vcombine.high %v18774_v56, %v18774_v56  ;;  %v6200_v46 = vrot.slane %v6172_v44, %v14817_v48 }
 0x530   :  { %11216 = vst.msk [vmem:[%s18052_s3 + $0x168] sm:$0xff] %vm18773_vm12, %v10800_v34  ;;  %v6202_v40 = vcombine.high %v6186_v5, %v6186_v5  ;;  %v6203_v38 = vcombine.high %v6193_v11, %v6193_v11  ;;  %v6794_v4 = vrot.slane %v6193_v11, %v14974_v22  ;;  %v6806_v21 = vrot.slane %v6186_v5, %v14974_v22  ;;  %vm18835_vm12 = vmmov %vm18640_vm0 }
 0x531   :  { %v6798_v24 = vrot.slane %v6201_v47, %v14974_v22  ;;  %v7211_v3 = vsel %vm4767_vm13, %v18775_v9, %v6790_v57  ;;  %v4892_v41 = vrot.slane %v18774_v56, %v14817_v48  ;;  %v6204_v8 = vcombine.high %v6200_v46, %v6200_v46 }
 0x532   :  { %v6802_v58 = vrot.slane %v6203_v38, %v14974_v22  ;;  %v6810_v16 = vrot.slane %v6200_v46, %v14974_v22  ;;  %v6814_v33 = vrot.slane %v6202_v40, %v14974_v22  ;;  %v7212_v35 = vsel %vm4767_vm13, %v18776_v2, %v6794_v4 }
 0x533   :  { %v18777_v17 = vcombine.high %v18775_v9, %v18775_v9  ;;  %v7215_v63 = vsel %vm4767_vm13, %v18778_v7, %v6806_v21  ;;  %v4899_v42 = vrot.slane %v4885_v30, %v14817_v48  ;;  %v6818_v43 = vrot.slane %v6204_v8, %v14974_v22  ;;  %v18783_v21 = vld [vmem:[#allocation37_spill] sm:$0xff] }
 0x534   :  { %v18779_v20 = vcombine.high %v18776_v2, %v18776_v2  ;;  %v7216_v13 = vsel %vm4767_vm13, %v18780_v37, %v6810_v16  ;;  %v18781_v28 = vcombine.high %v18778_v7, %v18778_v7  ;;  %v10631_v54 = vcombine.low %v7211_v3, %v7212_v35  ;;  %v18787_v2 = vld [vmem:[#allocation64_spill] sm:$0xff] }
 0x535   :  { %v7213_v39 = vsel %vm4767_vm13, %v18777_v17, %v6798_v24  ;;  %v10648_v12 = vcombine.low %v7215_v63, %v7216_v13  ;;  %v4900_v49 = vcombine.high %v4892_v41, %v4892_v41  ;;  %v18782_v55 = vcombine.high %v18780_v37, %v18780_v37 }
 0x536   :  { %v7214_v51 = vsel %vm4767_vm13, %v18779_v20, %v6802_v58  ;;  %v7217_v29 = vsel %vm4767_vm13, %v18781_v28, %v6814_v33  ;;  %v4901_v34 = vcombine.high %v4899_v42, %v4899_v42  ;;  %v4908_v27 = vrot.slane %v4892_v41, %v14817_v48  ;;  %v18785_v41 = vld [vmem:[#allocation46_spill] sm:$0xff] }
 0x537   :  { %v10632_v32 = vcombine.low %v7213_v39, %v7214_v51  ;;  %v7218_v25 = vsel %vm4767_vm13, %v18782_v55, %v6818_v43  ;;  %v4915_v44 = vrot.slane %v4899_v42, %v14817_v48  ;;  %v10639_v5 = vrot.slane %v10631_v54, %v14982_v26  ;;  %v18789_v39 = vld [vmem:[#allocation52_spill] sm:$0xff]  ;;  %v18790_v42 = vld [vmem:[#allocation21_spill] sm:$0xff]  ;;  %v18792_v51 = vld [vmem:[#allocation39_spill] sm:$0xff] }
 0x538   :  { %v10649_v47 = vcombine.low %v7217_v29, %v7218_v25  ;;  %v10656_v57 = vrot.slane %v10648_v12, %v14982_v26  ;;  %v4922_v30 = vrot.slane %v4900_v49, %v14817_v48  ;;  %v4929_v46 = vrot.slane %v4901_v34, %v14817_v48  ;;  %v18794_v29 = vld [vmem:[#allocation25_spill] sm:$0xff] }
 0x539   :  { %v10646_v11 = vrot.slane %v10632_v32, %v14982_v26  ;;  %v4930_v40 = vcombine.high %v4908_v27, %v4908_v27  ;;  %v4931_v38 = vcombine.high %v4915_v44, %v4915_v44  ;;  %v18784_v9 = vrot.slane %v18783_v21, %v14974_v22  ;;  %v18795_v32 = vld [vmem:[#allocation47_spill] sm:$0xff] }
 0x53a   :  { %v10663_v24 = vrot.slane %v10649_v47, %v14982_v26  ;;  %v18786_v8 = vrot.slane %v18785_v41, %v14974_v22  ;;  %v4932_v16 = vcombine.high %v4922_v30, %v4922_v30  ;;  %v4933_v33 = vcombine.high %v4929_v46, %v4929_v46  ;;  %v18801_v21 = vld [vmem:[#allocation79_spill] sm:$0xff] }
 0x53b   :  { %v10647_v4 = vcombine.low %v10639_v5, %v10646_v11  ;;  %v7155_v3 = vsel %vm4767_vm13, %v4908_v27, %v18784_v9  ;;  %v18788_v35 = vrot.slane %v18787_v2, %v14974_v22  ;;  %v7157_v7 = vsel %vm4767_vm13, %v4930_v40, %v18789_v39  ;;  %v18798_v27 = vld [vmem:[#allocation78_spill] sm:$0xff]  ;;  %v16020_v40 = vpop.f32.mrb[24].mxu0 }
 0x53c   :  { %v7159_v58 = vsel %vm4767_vm13, %v4915_v44, %v18786_v8  ;;  %v10664_v63 = vcombine.low %v10656_v57, %v10663_v24  ;;  %v18791_v43 = vrot.slane %v18790_v42, %v14974_v22  ;;  %v7161_v37 = vsel %vm4767_vm13, %v4931_v38, %v18792_v51 }
 0x53d   :  { %v7156_v17 = vsel %vm4767_vm13, %v4922_v30, %v18788_v35  ;;  %11207 = vst.msk [vmem:[%s18052_s3 + $0x120] sm:$0xff] %vm18640_vm0, %v10647_v4  ;;  %v15990_v28 = vsel %vm18793_vm8, %v18774_v56, 0.0  ;;  %v7158_v54 = vsel %vm4767_vm13, %v4932_v16, %v18794_v29  ;;  %v7162_v12 = vsel %vm4767_vm13, %v4933_v33, %v18795_v32  ;;  %v18808_v32 = vld [vmem:[#allocation38_spill] sm:$0xff]  ;;  %vm18853_vm8 = vmmov %vm18640_vm0 }
 0x53e   :  { %v7160_v20 = vsel %vm4767_vm13, %v4929_v46, %v18791_v43  ;;  %v10155_v13 = vcombine.low %v7155_v3, %v7156_v17  ;;  %11208 = vst.msk [vmem:[%s18052_s3 + $0x128] sm:$0xff] %vm18796_vm15, %v10664_v63  ;;  %v16001_v55 = vsel %vm18797_vm3, %v3474_v36, 0.0  ;;  %v10156_v25 = vcombine.low %v7157_v7, %v7158_v54  ;;  %v18804_v17 = vld [vmem:[#allocation70_spill] sm:$0xff]  ;;  %vm18858_vm15 = vmmov %vm18640_vm0 }
 0x53f   :  { %v10172_v49 = vcombine.low %v7159_v58, %v7160_v20  ;;  %v10173_v34 = vcombine.low %v7161_v37, %v7162_v12  ;;  %v3472_v56 = vmul.f32 %v18798_v27, %v18798_v27  ;;  %v16008_v5 = vsel %vm18799_vm4, %v18798_v27, 0.0  ;;  %vm18859_vm3 = vmmov %vm18640_vm0 }
 0x540   :  { %v10163_v44 = vrot.slane %v10155_v13, %v14982_v26  ;;  %v4787_v11 = vcombine.high %v18798_v27, %v18798_v27  ;;  %v4794_v47 = vrot.slane %v18798_v27, %v14817_v48  ;;  %v10170_v36 = vrot.slane %v10156_v25, %v14982_v26  ;;  %v18806_v13 = vld [vmem:[#allocation27_spill] sm:$0xff]  ;;  %vm18877_vm4 = vmmov %vm18640_vm0 }
 0x541   :  { %v10180_v57 = vrot.slane %v10172_v49, %v14982_v26  ;;  %v10187_v30 = vrot.slane %v10173_v34, %v14982_v26  ;;  %v16018_v46 = vsel %vm18800_vm5, %v3472_v56, 0.0  ;;  %v4934_v9 = vcombine.high %v18801_v21, %v18801_v21  ;;  %v18809_v49 = vld [vmem:[#allocation31_spill] sm:$0xff]  ;;  %vm18878_vm5 = vmmov %vm18640_vm0 }
 0x542   :  { %v4801_v38 = vrot.slane %v4787_v11, %v14817_v48  ;;  %v4802_v4 = vcombine.high %v4794_v47, %v4794_v47  ;;  %v4810_v24 = vrot.slane %v4794_v47, %v14817_v48  ;;  %v10171_v3 = vcombine.low %v10163_v44, %v10170_v36  ;;  %v18811_v11 = vld [vmem:[#allocation23_spill] sm:$0xff] }
 0x543   :  { %v10188_v41 = vcombine.low %v10180_v57, %v10187_v30  ;;  %v16028_v8 = vmul.f32 %v18801_v21, %v18801_v21  ;;  %v4941_v58 = vrot.slane %v18801_v21, %v14817_v48  ;;  %v18805_v39 = vrot.slane %v18804_v17, %v14974_v22  ;;  %v18812_v36 = vld [vmem:[#allocation63_spill] sm:$0xff] }
 0x544   :  { %v4803_v16 = vcombine.high %v4801_v38, %v4801_v38  ;;  %v4817_v33 = vrot.slane %v4801_v38, %v14817_v48  ;;  %v4824_v2 = vrot.slane %v4802_v4, %v14817_v48  ;;  %v4832_v35 = vcombine.high %v4810_v24, %v4810_v24  ;;  %11179 = vst.msk [vmem:[%s18052_s3 + $0x40] sm:$0xff] %vm18802_vm1, %v10171_v3  ;;  %v18814_v38 = vld [vmem:[#allocation7_spill] sm:$0xff]  ;;  %vm18879_vm1 = vmmov %vm18640_vm0 }
 0x545   :  { %11180 = vst.msk [vmem:[%s18052_s3 + $0x48] sm:$0xff] %vm18803_vm14, %v10188_v41  ;;  %v7139_v7 = vsel %vm4767_vm13, %v4810_v24, %v18805_v39  ;;  %v4948_v63 = vrot.slane %v4934_v9, %v14817_v48  ;;  %v4949_v42 = vcombine.high %v4941_v58, %v4941_v58  ;;  %v4957_v43 = vrot.slane %v4941_v58, %v14817_v48  ;;  %v18815_v58 = vld [vmem:[#allocation60_spill] sm:$0xff]  ;;  %vm18880_vm14 = vmmov %vm18640_vm0 }
 0x546   :  { %v4831_v20 = vrot.slane %v4803_v16, %v14817_v48  ;;  %v4833_v51 = vcombine.high %v4817_v33, %v4817_v33  ;;  %v4834_v37 = vcombine.high %v4824_v2, %v4824_v2  ;;  %v18807_v29 = vrot.slane %v18806_v13, %v14974_v22 }
 0x547   :  { %v7141_v12 = vsel %vm4767_vm13, %v4832_v35, %v18808_v32  ;;  %v18810_v25 = vrot.slane %v18809_v49, %v14974_v22  ;;  %v4950_v56 = vcombine.high %v4948_v63, %v4948_v63  ;;  %v18813_v57 = vrot.slane %v18812_v36, %v14974_v22  ;;  %v18818_v32 = vld [vmem:[#allocation59_spill] sm:$0xff] }
 0x548   :  { %v7140_v54 = vsel %vm4767_vm13, %v4824_v2, %v18807_v29  ;;  %v4835_v44 = vcombine.high %v4831_v20, %v4831_v20  ;;  %v7142_v47 = vsel %vm4767_vm13, %v4834_v37, %v18811_v11  ;;  %v7145_v4 = vsel %vm4767_vm13, %v4833_v51, %v18814_v38  ;;  %v16075_v51 = vpop.f32.mrb[25].mxu0  ;;  %v18816_v29 = vld [vmem:[#allocation53_spill] sm:$0xff]  ;;  %v18826_v38 = vld [vmem:[#allocation72_spill] sm:$0xff] }
 0x549   :  { %v7143_v34 = vsel %vm4767_vm13, %v4817_v33, %v18810_v25  ;;  %v10019_v27 = vcombine.low %v7139_v7, %v7140_v54  ;;  %v7144_v30 = vsel %vm4767_vm13, %v4831_v20, %v18813_v57  ;;  %v10020_v24 = vcombine.low %v7141_v12, %v7142_v47  ;;  %v18823_v47 = vld [vmem:[#allocation9_spill] sm:$0xff] }
 0x54a   :  { %v10036_v3 = vcombine.low %v7143_v34, %v7144_v30  ;;  %v4964_v41 = vrot.slane %v4948_v63, %v14817_v48  ;;  %v7146_v16 = vsel %vm4767_vm13, %v4835_v44, %v18815_v58  ;;  %v4971_v33 = vrot.slane %v4949_v42, %v14817_v48  ;;  %v18820_v34 = vld [vmem:[#allocation12_spill] sm:$0xff] }
 0x54b   :  { %v10027_v9 = vrot.slane %v10019_v27, %v14982_v26  ;;  %v4978_v2 = vrot.slane %v4950_v56, %v14817_v48  ;;  %v4979_v35 = vcombine.high %v4957_v43, %v4957_v43  ;;  %v10034_v17 = vrot.slane %v10020_v24, %v14982_v26  ;;  %v18821_v56 = vld [vmem:[#allocation54_spill] sm:$0xff]  ;;  %v18827_v24 = vld [vmem:[#allocation73_spill] sm:$0xff] }
 0x54c   :  { %v10037_v39 = vcombine.low %v7145_v4, %v7146_v16  ;;  %v10044_v7 = vrot.slane %v10036_v3, %v14982_v26  ;;  %v4980_v20 = vcombine.high %v4964_v41, %v4964_v41  ;;  %v4981_v37 = vcombine.high %v4971_v33, %v4971_v33 }
 0x54d   :  { %v4982_v13 = vcombine.high %v4978_v2, %v4978_v2  ;;  %v18817_v63 = vrot.slane %v18816_v29, %v14974_v22  ;;  %v18819_v42 = vrot.slane %v18818_v32, %v14974_v22  ;;  %v10035_v49 = vcombine.low %v10027_v9, %v10034_v17  ;;  %v16120_v29 = vpop.f32.mrb[26].mxu0 }
 0x54e   :  { %v10051_v25 = vrot.slane %v10037_v39, %v14982_v26  ;;  %v7165_v27 = vsel %vm4767_vm13, %v4979_v35, %v18820_v34  ;;  %v18822_v44 = vrot.slane %v18821_v56, %v14974_v22  ;;  %v7166_v36 = vsel %vm4767_vm13, %v4981_v37, %v18823_v47  ;;  %v18829_v35 = vld [vmem:[#allocation80_spill] sm:$0xff] }
 0x54f   :  { %v7163_v54 = vsel %vm4767_vm13, %v4957_v43, %v18817_v63  ;;  %v7164_v12 = vsel %vm4767_vm13, %v4971_v33, %v18819_v42  ;;  %v18824_v43 = vld [vmem:[#allocation16_spill] sm:$0xff]  ;;  %v7169_v4 = vsel %vm4767_vm13, %v4980_v20, %v18826_v38  ;;  %v7170_v9 = vsel %vm4767_vm13, %v4982_v13, %v18827_v24  ;;  %11171 = vst.msk [vmem:[%s18052_s3] sm:$0xff] %vm18828_vm6, %v10035_v49  ;;  %vm18881_vm6 = vmmov %vm18640_vm0 }
 0x550   :  { %v7167_v11 = vsel %vm4767_vm13, %v4964_v41, %v18822_v44  ;;  %v18825_v57 = vrot.slane %v18824_v43, %v14974_v22  ;;  %v10052_v3 = vcombine.low %v10044_v7, %v10051_v25  ;;  %v10223_v41 = vcombine.low %v7163_v54, %v7164_v12  ;;  %v16127_v12 = vpop.f32.mrb[27].mxu0 }
 0x551   :  { %v10224_v58 = vcombine.low %v7165_v27, %v7166_v36  ;;  %v10241_v33 = vcombine.low %v7169_v4, %v7170_v9  ;;  %v3435_v17 = vsel %vm18830_vm7, %v18829_v35, 0.0  ;;  %v4836_v39 = vcombine.high %v18829_v35, %v18829_v35  ;;  %v18838_v4 = vld [vmem:[#allocation8_spill] sm:$0xff]  ;;  %vm18890_vm7 = vmmov %vm18640_vm0 }
 0x552   :  { %v7168_v30 = vsel %vm4767_vm13, %v4978_v2, %v18825_v57  ;;  %v3473_v2 = vmul.f32 %v18829_v35, %v18829_v35  ;;  %11172 = vst.msk [vmem:[%s18052_s3 + $0x8] sm:$0xff] %vm18831_vm10, %v10052_v3  ;;  %v10231_v7 = vrot.slane %v10223_v41, %v14982_v26  ;;  %v3436_v13 = vadd.f32 %v3435_v17, %v16008_v5  ;;  %v18836_v57 = vld [vmem:[#allocation26_spill] sm:$0xff]  ;;  %vm18894_vm10 = vmmov %vm18640_vm0 }
 0x553   :  { %v10240_v16 = vcombine.low %v7167_v11, %v7168_v30  ;;  %v10238_v20 = vrot.slane %v10224_v58, %v14982_v26  ;;  %v10255_v63 = vrot.slane %v10241_v33, %v14982_v26  ;;  %v4843_v32 = vrot.slane %v18829_v35, %v14817_v48  ;;  %v18839_v3 = vld [vmem:[#allocation14_spill] sm:$0xff]  ;;  %v18841_v35 = vld [vmem:[#allocation71_spill] sm:$0xff] }
 0x554   :  { %v3489_v54 = vsel %vm18832_vm2, %v3473_v2, 0.0  ;;  %v4850_v42 = vrot.slane %v4836_v39, %v14817_v48  ;;  %v3439_v49 = vsel %vm18833_vm9, %v18801_v21, 0.0  ;;  %v3438_v34 = vadd.f32 %v15990_v28, %v3436_v13  ;;  %v18843_v39 = vld [vmem:[#allocation74_spill] sm:$0xff]  ;;  %v18845_v13 = vld [vmem:[#allocation33_spill] sm:$0xff]  ;;  %vm18900_vm2 = vmmov %vm18640_vm0 }
 0x555   :  { %v10248_v37 = vrot.slane %v10240_v16, %v14982_v26  ;;  %v10239_v25 = vcombine.low %v10231_v7, %v10238_v20  ;;  %v3490_v5 = vadd.f32 %v3489_v54, %v16018_v46  ;;  %v4851_v56 = vcombine.high %v4843_v32, %v4843_v32  ;;  %v18844_v20 = vld [vmem:[#allocation11_spill] sm:$0xff]  ;;  %vm18901_vm9 = vmmov %vm18640_vm0 }
 0x556   :  { %v4852_v44 = vcombine.high %v4850_v42, %v4850_v42  ;;  %v4859_v11 = vrot.slane %v4843_v32, %v14817_v48  ;;  %v3493_v47 = vsel %vm18834_vm11, %v16028_v8, 0.0  ;;  %v3440_v36 = vadd.f32 %v3439_v49, %v3438_v34  ;;  %v18848_v34 = vld [vmem:[#allocation75_spill] sm:$0xff]  ;;  %vm18902_vm11 = vmmov %vm18640_vm0 }
 0x557   :  { %v10256_v27 = vcombine.low %v10248_v37, %v10255_v63  ;;  %11183 = vst.msk [vmem:[%s18052_s3 + $0x60] sm:$0xff] %vm18835_vm12, %v10239_v25  ;;  %v3492_v21 = vadd.f32 %v16001_v55, %v3490_v5  ;;  %v4866_v28 = vrot.slane %v4850_v42, %v14817_v48  ;;  %v4873_v46 = vrot.slane %v4851_v56, %v14817_v48  ;;  %v18847_v42 = vld [vmem:[#allocation76_spill] sm:$0xff]  ;;  %v16171_v25 = vpop.f32.mrb[32].mxu1  ;;  %vm18903_vm12 = vmmov %vm18640_vm0 }
 0x558   :  { %v4880_v43 = vrot.slane %v4852_v44, %v14817_v48  ;;  %v4881_v8 = vcombine.high %v4859_v11, %v4859_v11  ;;  %v18837_v30 = vrot.slane %v18836_v57, %v14974_v22  ;;  %v3442_v24 = vadd.f32 %v18838_v4, %v3440_v36  ;;  %v18850_v36 = vld [vmem:[#allocation13_spill] sm:$0xff] }
 0x559   :  { %11184 = vst.msk [vmem:[%s18052_s3 + $0x68] sm:$0xff] %vm18640_vm0, %v10256_v27  ;;  %v3494_v55 = vadd.f32 %v3493_v47, %v3492_v21  ;;  %v4882_v9 = vcombine.high %v4866_v28, %v4866_v28  ;;  %v18840_v41 = vrot.slane %v18839_v3, %v14974_v22  ;;  %v4883_v16 = vcombine.high %v4873_v46, %v4873_v46 }
 0x55a   :  { %v7147_v38 = vsel %vm4767_vm13, %v4859_v11, %v18837_v30  ;;  %v4884_v33 = vcombine.high %v4880_v43, %v4880_v43  ;;  %v18842_v17 = vrot.slane %v18841_v35, %v14974_v22  ;;  %v7149_v7 = vsel %vm4767_vm13, %v4881_v8, %v18843_v39  ;;  %v18849_v11 = vld [vmem:[#allocation48_spill] sm:$0xff] }
 0x55b   :  { %v7151_v58 = vsel %vm4767_vm13, %v4866_v28, %v18840_v41  ;;  %v3444_v37 = vadd.f32 %v18844_v20, %v3442_v24  ;;  %v3496_v63 = vadd.f32 %v18845_v13, %v3494_v55  ;;  %v18846_v54 = vrot.slane %v15373_v14, %v14974_v22 }
 0x55c   :  { %v7148_v2 = vsel %vm4767_vm13, %v4873_v46, %v18842_v17  ;;  %v7153_v49 = vsel %vm4767_vm13, %v4882_v9, %v18847_v42  ;;  %v7150_v5 = vsel %vm4767_vm13, %v4883_v16, %v18848_v34  ;;  %v7154_v27 = vsel %vm4767_vm13, %v4884_v33, %v15532_v60  ;;  %v18851_v60 = vld [vmem:[#allocation3_spill] sm:$0xff]  ;;  %v16198_v16 = vpop.f32.mrb[33].mxu1  ;;  %v18854_v33 = vld [vmem:[#allocation36_spill] sm:$0xff] }
 0x55d   :  { %v7152_v32 = vsel %vm4767_vm13, %v4880_v43, %v18846_v54  ;;  %v10087_v56 = vcombine.low %v7147_v38, %v7148_v2  ;;  %v3446_v47 = vadd.f32 %v18849_v11, %v3444_v37  ;;  %v3498_v21 = vadd.f32 %v18850_v36, %v3496_v63  ;;  %v18852_v38 = vld [vmem:[#allocation69_spill] sm:$0xff]  ;;  %v18855_v17 = vld [vmem:[#allocation35_spill] sm:$0xff]  ;;  %v18856_v54 = vld [vmem:[#allocation30_spill] sm:$0xff] }
 0x55e   :  { %v10104_v44 = vcombine.low %v7151_v58, %v7152_v32  ;;  %v10088_v14 = vcombine.low %v7149_v7, %v7150_v5  ;;  %v10105_v28 = vcombine.low %v7153_v49, %v7154_v27  ;;  %v16183_v8 = vmul.f32 %v15550_v61, %v15550_v61 }
 0x55f   :  { %v10095_v46 = vrot.slane %v10087_v56, %v14982_v26  ;;  %v6401_v57 = vcombine.high %v15550_v61, %v15550_v61  ;;  %v3448_v30 = vadd.f32 %v18851_v60, %v3446_v47  ;;  %v3500_v4 = vadd.f32 %v18852_v38, %v3498_v21  ;;  %v18861_v47 = vld [vmem:[#allocation57_spill] sm:$0xff]  ;;  %v18862_v60 = vld [vmem:[#allocation22_spill] sm:$0xff]  ;;  %v18863_v38 = vld [vmem:[#allocation44_spill] sm:$0xff] }
 0x560   :  { %v10112_v43 = vrot.slane %v10104_v44, %v14982_v26  ;;  %v10102_v24 = vrot.slane %v10088_v14, %v14982_v26  ;;  %v10119_v55 = vrot.slane %v10105_v28, %v14982_v26  ;;  %v6408_v9 = vrot.slane %v15550_v61, %v14817_v48  ;;  %v18860_v44 = vld [vmem:[#allocation20_spill] sm:$0xff] }
 0x561   :  { %v6415_v3 = vrot.slane %v6401_v57, %v14817_v48  ;;  %v4113_v41 = vadd.f32 %v15894_v50, %v15887_v45  ;;  %v4114_v58 = vsel %vm18853_vm8, %v15555_v31, 0.0  ;;  %v3450_v35 = vadd.f32 %v18854_v33, %v3448_v30  ;;  %v18857_v45 = vld [vmem:[#allocation24_spill] sm:$0xff]  ;;  %vm18904_vm8 = vmmov %vm18640_vm0 }
 0x562   :  { %v3502_v2 = vadd.f32 %v18855_v17, %v3500_v4  ;;  %v10103_v39 = vcombine.low %v10095_v46, %v10102_v24  ;;  %v10120_v7 = vcombine.low %v10112_v43, %v10119_v55  ;;  %v6416_v20 = vcombine.high %v6408_v9, %v6408_v9  ;;  %v18865_v33 = vld [vmem:[#allocation68_spill] sm:$0xff]  ;;  %v18866_v17 = vld [vmem:[#allocation34_spill] sm:$0xff] }
 0x563   :  { %v6417_v37 = vcombine.high %v6415_v3, %v6415_v3  ;;  %v6424_v13 = vrot.slane %v6408_v9, %v14817_v48  ;;  %v6431_v63 = vrot.slane %v6415_v3, %v14817_v48  ;;  %v3452_v32 = vadd.f32 %v18856_v54, %v3450_v35 }
 0x564   :  { %v3504_v50 = vadd.f32 %v18857_v45, %v3502_v2  ;;  %11175 = vst.msk [vmem:[%s18052_s3 + $0x20] sm:$0xff] %vm18858_vm15, %v10103_v39  ;;  %v16214_v42 = vadd.f32 %v4114_v58, %v4113_v41  ;;  %v4141_v49 = vmul.f32 %v15555_v31, %v15555_v31  ;;  %v6438_v34 = vrot.slane %v6416_v20, %v14817_v48  ;;  %v18864_v41 = vld [vmem:[#allocation67_spill] sm:$0xff]  ;;  %vm18914_vm15 = vmmov %vm18640_vm0 }
 0x565   :  { %11176 = vst.msk [vmem:[%s18052_s3 + $0x28] sm:$0xff] %vm18859_vm3, %v10120_v7  ;;  %v6445_v5 = vrot.slane %v6417_v37, %v14817_v48  ;;  %v6446_v27 = vcombine.high %v6424_v13, %v6424_v13  ;;  %v6447_v56 = vcombine.high %v6431_v63, %v6431_v63  ;;  %v3454_v11 = vadd.f32 %v18860_v44, %v3452_v32  ;;  %v18868_v39 = vld [vmem:[#allocation15_spill] sm:$0xff]  ;;  %v18875_v44 = vld [vmem:[#allocation5_spill] sm:$0xff]  ;;  %vm18917_vm3 = vmmov %vm18640_vm0 }
 0x566   :  { %v3506_v36 = vadd.f32 %v18861_v47, %v3504_v50  ;;  %v6950_v21 = vrot.slane %v6424_v13, %v14974_v22  ;;  %v6966_v14 = vrot.slane %v6431_v63, %v14974_v22  ;;  %v6448_v28 = vcombine.high %v6438_v34, %v6438_v34  ;;  %v18870_v13 = vld [vmem:[#allocation50_spill] sm:$0xff]  ;;  %v18872_v45 = vld [vmem:[#allocation19_spill] sm:$0xff] }
 0x567   :  { %v6449_v46 = vcombine.high %v6445_v5, %v6445_v5  ;;  %v6954_v43 = vrot.slane %v6438_v34, %v14974_v22  ;;  %v6958_v57 = vrot.slane %v6446_v27, %v14974_v22  ;;  %v3456_v30 = vadd.f32 %v18862_v60, %v3454_v11 }
 0x568   :  { %v3508_v4 = vadd.f32 %v18863_v38, %v3506_v36  ;;  %v6970_v24 = vrot.slane %v6445_v5, %v14974_v22  ;;  %v6974_v55 = vrot.slane %v6447_v56, %v14974_v22  ;;  %v6962_v9 = vrot.slane %v6448_v28, %v14974_v22 }
 0x569   :  { %v6978_v3 = vrot.slane %v6449_v46, %v14974_v22  ;;  %v7251_v58 = vsel %vm4767_vm13, %v18864_v41, %v6950_v21  ;;  %v7252_v35 = vsel %vm4767_vm13, %v18865_v33, %v6954_v43  ;;  %v16237_v2 = vadd.f32 %v18866_v17, %v3456_v30 }
 0x56a   :  { %v3510_v7 = vadd.f32 %v18868_v39, %v3508_v4  ;;  %v18869_v20 = vcombine.high %v18864_v41, %v18864_v41  ;;  %v7255_v63 = vsel %vm4767_vm13, %v18870_v13, %v6966_v14  ;;  %v18871_v54 = vcombine.high %v18865_v33, %v18865_v33 }
 0x56b   :  { %18867 = vst [vmem:[#allocation77_spill] sm:$0xff] %v16237_v2  ;;  %v7256_v50 = vsel %vm4767_vm13, %v18872_v45, %v6970_v24  ;;  %v18873_v34 = vcombine.high %v18870_v13, %v18870_v13  ;;  %v18874_v27 = vcombine.high %v18872_v45, %v18872_v45  ;;  %v10971_v47 = vcombine.low %v7251_v58, %v7252_v35  ;;  %v18882_v45 = vld [vmem:[#allocation18_spill] sm:$0xff] }
 0x56c   :  { %v7253_v37 = vsel %vm4767_vm13, %v18869_v20, %v6958_v57  ;;  %v7254_v32 = vsel %vm4767_vm13, %v18871_v54, %v6962_v9  ;;  %v16261_v11 = vadd.f32 %v18875_v44, %v3510_v7  ;;  %v10988_v21 = vcombine.low %v7255_v63, %v7256_v50  ;;  %v16268_v57 = vpop.f32.mrb[34].mxu1 }
 0x56d   :  { %v7257_v5 = vsel %vm4767_vm13, %v18873_v34, %v6974_v55  ;;  %v7258_v56 = vsel %vm4767_vm13, %v18874_v27, %v6978_v3  ;;  %v10972_v36 = vcombine.low %v7253_v37, %v7254_v32  ;;  %v4167_v28 = vadd.f32 %v15898_v6, %v15906_v0 }
 0x56e   :  { %18876 = vst [vmem:[#allocation10_spill] sm:$0xff] %v16261_v11  ;;  %v10989_v14 = vcombine.low %v7257_v5, %v7258_v56  ;;  %v4168_v46 = vsel %vm18877_vm4, %v4141_v49, 0.0  ;;  %v6303_v43 = vcombine.high %v15555_v31, %v15555_v31  ;;  %v16272_v60 = vsel %vm18878_vm5, %v15550_v61, 0.0  ;;  %v18883_v56 = vld [vmem:[#allocation65_spill] sm:$0xff]  ;;  %vm18920_vm4 = vmmov %vm18640_vm0 }
 0x56f   :  { %v10979_v30 = vrot.slane %v10971_v47, %v14982_v26  ;;  %v10986_v38 = vrot.slane %v10972_v36, %v14982_v26  ;;  %v6310_v4 = vrot.slane %v15555_v31, %v14817_v48  ;;  %v10996_v6 = vrot.slane %v10988_v21, %v14982_v26  ;;  %v18884_v36 = vld [vmem:[#allocation43_spill] sm:$0xff]  ;;  %vm18922_vm5 = vmmov %vm18640_vm0 }
 0x570   :  { %v11003_v0 = vrot.slane %v10989_v14, %v14982_v26  ;;  %v16280_v49 = vadd.f32 %v4168_v46, %v4167_v28  ;;  %v6317_v24 = vrot.slane %v6303_v43, %v14817_v48  ;;  %v16285_v55 = vsel %vm18879_vm1, %v16183_v8, 0.0  ;;  %v16325_v43 = vpop.f32.mrb[35].mxu1  ;;  %vm18923_vm1 = vmmov %vm18640_vm0 }
 0x571   :  { %v10987_v61 = vcombine.low %v10979_v30, %v10986_v38  ;;  %v6318_v9 = vcombine.high %v6310_v4, %v6310_v4  ;;  %v6326_v3 = vrot.slane %v6310_v4, %v14817_v48  ;;  %v16291_v33 = vmul.f32 %v15559_v10, %v15559_v10  ;;  %v18886_v38 = vld [vmem:[#allocation4_spill] sm:$0xff] }
 0x572   :  { %v11004_v41 = vcombine.low %v10996_v6, %v11003_v0  ;;  %v6319_v58 = vcombine.high %v6317_v24, %v6317_v24  ;;  %v6333_v31 = vrot.slane %v6317_v24, %v14817_v48  ;;  %v6450_v39 = vcombine.high %v15559_v10, %v15559_v10 }
 0x573   :  { %11227 = vst.msk [vmem:[%s18052_s3 + $0x1c0] sm:$0xff] %vm18880_vm14, %v10987_v61  ;;  %v6340_v8 = vrot.slane %v6318_v9, %v14817_v48  ;;  %v6348_v35 = vcombine.high %v6326_v3, %v6326_v3  ;;  %v6886_v17 = vrot.slane %v6326_v3, %v14974_v22  ;;  %v6457_v13 = vrot.slane %v15559_v10, %v14817_v48  ;;  %vm18925_vm14 = vmmov %vm18640_vm0 }
 0x574   :  { %11228 = vst.msk [vmem:[%s18052_s3 + $0x1c8] sm:$0xff] %vm18881_vm6, %v11004_v41  ;;  %v6347_v7 = vrot.slane %v6319_v58, %v14817_v48  ;;  %v6349_v20 = vcombine.high %v6333_v31, %v6333_v31  ;;  %v6902_v37 = vrot.slane %v6333_v31, %v14974_v22  ;;  %v18885_v14 = vcombine.high %v18882_v45, %v18882_v45  ;;  %vm18926_vm6 = vmmov %vm18640_vm0 }
 0x575   :  { %v6350_v63 = vcombine.high %v6340_v8, %v6340_v8  ;;  %v6890_v54 = vrot.slane %v6340_v8, %v14974_v22  ;;  %v6894_v32 = vrot.slane %v6348_v35, %v14974_v22  ;;  %v7235_v50 = vsel %vm4767_vm13, %v18882_v45, %v6886_v17 }
 0x576   :  { %v6351_v34 = vcombine.high %v6347_v7, %v6347_v7  ;;  %v6906_v5 = vrot.slane %v6347_v7, %v14974_v22  ;;  %v6910_v27 = vrot.slane %v6349_v20, %v14974_v22  ;;  %v7239_v44 = vsel %vm4767_vm13, %v18883_v56, %v6902_v37 }
 0x577   :  { %v6898_v47 = vrot.slane %v6350_v63, %v14974_v22  ;;  %v7236_v21 = vsel %vm4767_vm13, %v18884_v36, %v6890_v54  ;;  %v7237_v28 = vsel %vm4767_vm13, %v18885_v14, %v6894_v32  ;;  %v6464_v46 = vrot.slane %v6450_v39, %v14817_v48 }
 0x578   :  { %v6914_v30 = vrot.slane %v6351_v34, %v14974_v22  ;;  %v7240_v4 = vsel %vm4767_vm13, %v18886_v38, %v6906_v5  ;;  %v18887_v6 = vcombine.high %v18883_v56, %v18883_v56  ;;  %v10835_v24 = vcombine.low %v7235_v50, %v7236_v21 }
 0x579   :  { %v18888_v61 = vcombine.high %v18884_v36, %v18884_v36  ;;  %v10852_v3 = vcombine.low %v7239_v44, %v7240_v4  ;;  %v6465_v41 = vcombine.high %v6457_v13, %v6457_v13  ;;  %v6466_v58 = vcombine.high %v6464_v46, %v6464_v46 }
 0x57a   :  { %v7241_v0 = vsel %vm4767_vm13, %v18887_v6, %v6910_v27  ;;  %v18889_v31 = vcombine.high %v18886_v38, %v18886_v38  ;;  %v10843_v17 = vrot.slane %v10835_v24, %v14982_v26  ;;  %v6473_v39 = vrot.slane %v6457_v13, %v14817_v48  ;;  %v18891_v38 = vld [vmem:[#allocation6_spill] sm:$0xff]  ;;  %v18892_v6 = vld [vmem:[#allocation61_spill] sm:$0xff] }
 0x57b   :  { %v7238_v9 = vsel %vm4767_vm13, %v18888_v61, %v6898_v47  ;;  %v10860_v20 = vrot.slane %v10852_v3, %v14982_v26  ;;  %v6480_v37 = vrot.slane %v6464_v46, %v14817_v48  ;;  %v6487_v63 = vrot.slane %v6465_v41, %v14817_v48  ;;  %v18896_v41 = vld [vmem:[#allocation42_spill] sm:$0xff] }
 0x57c   :  { %v7242_v8 = vsel %vm4767_vm13, %v18889_v31, %v6914_v30  ;;  %v10836_v35 = vcombine.low %v7237_v28, %v7238_v9  ;;  %v6494_v32 = vrot.slane %v6466_v58, %v14817_v48  ;;  %v6495_v45 = vcombine.high %v6473_v39, %v6473_v39  ;;  %v18897_v31 = vld [vmem:[#allocation40_spill] sm:$0xff] }
 0x57d   :  { %v10853_v7 = vcombine.low %v7241_v0, %v7242_v8  ;;  %v6982_v50 = vrot.slane %v6473_v39, %v14974_v22  ;;  %v6496_v5 = vcombine.high %v6480_v37, %v6480_v37  ;;  %v6497_v27 = vcombine.high %v6487_v63, %v6487_v63 }
 0x57e   :  { %v10850_v54 = vrot.slane %v10836_v35, %v14982_v26  ;;  %v6986_v13 = vrot.slane %v6487_v63, %v14974_v22  ;;  %v6498_v44 = vcombine.high %v6494_v32, %v6494_v32  ;;  %v6990_v47 = vrot.slane %v6495_v45, %v14974_v22 }
 0x57f   :  { %v10867_v34 = vrot.slane %v10853_v7, %v14982_v26  ;;  %v6998_v36 = vrot.slane %v6480_v37, %v14974_v22  ;;  %v6994_v14 = vrot.slane %v6497_v27, %v14974_v22  ;;  %v7002_v28 = vrot.slane %v6494_v32, %v14974_v22 }
 0x580   :  { %v10851_v56 = vcombine.low %v10843_v17, %v10850_v54  ;;  %v7006_v46 = vrot.slane %v6496_v5, %v14974_v22  ;;  %v7010_v30 = vrot.slane %v6498_v44, %v14974_v22  ;;  %v7259_v4 = vsel %vm4767_vm13, %v18891_v38, %v6982_v50 }
 0x581   :  { %v10868_v21 = vcombine.low %v10860_v20, %v10867_v34  ;;  %v7260_v0 = vsel %vm4767_vm13, %v18892_v6, %v6986_v13  ;;  %v18893_v24 = vcombine.high %v18891_v38, %v18891_v38  ;;  %v18895_v9 = vcombine.high %v18892_v6, %v18892_v6 }
 0x582   :  { %11219 = vst.msk [vmem:[%s18052_s3 + $0x180] sm:$0xff] %vm18890_vm7, %v10851_v56  ;;  %v7263_v58 = vsel %vm4767_vm13, %v18896_v41, %v6998_v36  ;;  %v7264_v8 = vsel %vm4767_vm13, %v18897_v31, %v7002_v28  ;;  %v18898_v35 = vcombine.high %v18896_v41, %v18896_v41  ;;  %v18899_v39 = vcombine.high %v18897_v31, %v18897_v31  ;;  %vm18927_vm7 = vmmov %vm18640_vm0 }
 0x583   :  { %v7261_v61 = vsel %vm4767_vm13, %v18893_v24, %v6990_v47  ;;  %11220 = vst.msk [vmem:[%s18052_s3 + $0x188] sm:$0xff] %vm18894_vm10, %v10868_v21  ;;  %v7262_v3 = vsel %vm4767_vm13, %v18895_v9, %v6994_v14  ;;  %v11039_v20 = vcombine.low %v7259_v4, %v7260_v0  ;;  %v11056_v63 = vcombine.low %v7263_v58, %v7264_v8  ;;  %v16405_v21 = vpop.f32.mrb[28].mxu0  ;;  %vm18929_vm10 = vmmov %vm18640_vm0 }
 0x584   :  { %v7265_v17 = vsel %vm4767_vm13, %v18898_v35, %v7006_v46  ;;  %v7266_v7 = vsel %vm4767_vm13, %v18899_v39, %v7010_v30  ;;  %v11040_v37 = vcombine.low %v7261_v61, %v7262_v3  ;;  %v4116_v32 = vsel %vm18900_vm2, %v15576_v23, 0.0  ;;  %vm18930_vm2 = vmmov %vm18640_vm0 }
 0x585   :  { %v11057_v54 = vcombine.low %v7265_v17, %v7266_v7  ;;  %v4142_v45 = vmul.f32 %v15576_v23, %v15576_v23  ;;  %v6352_v50 = vcombine.high %v15576_v23, %v15576_v23  ;;  %v11047_v34 = vrot.slane %v11039_v20, %v14982_v26  ;;  %v16430_v17 = vpop.f32.mrb[29].mxu0 }
 0x586   :  { %v11054_v5 = vrot.slane %v11040_v37, %v14982_v26  ;;  %v11064_v27 = vrot.slane %v11056_v63, %v14982_v26  ;;  %v4117_v13 = vadd.f32 %v4116_v32, %v16214_v42  ;;  %v6359_v47 = vrot.slane %v15576_v23, %v14817_v48  ;;  %v18905_v32 = vld [vmem:[#allocation41_spill] sm:$0xff] }
 0x587   :  { %v11071_v56 = vrot.slane %v11057_v54, %v14982_v26  ;;  %v4170_v44 = vsel %vm18901_vm9, %v4142_v45, 0.0  ;;  %v6366_v36 = vrot.slane %v6352_v50, %v14817_v48  ;;  %v4120_v14 = vsel %vm18902_vm11, %v15559_v10, 0.0  ;;  %v18906_v50 = vld [vmem:[#allocation62_spill] sm:$0xff]  ;;  %vm18931_vm9 = vmmov %vm18640_vm0 }
 0x588   :  { %v11055_v28 = vcombine.low %v11047_v34, %v11054_v5  ;;  %v4119_v46 = vadd.f32 %v16272_v60, %v4117_v13  ;;  %v4171_v30 = vadd.f32 %v4170_v44, %v16280_v49  ;;  %v6367_v38 = vcombine.high %v6359_v47, %v6359_v47  ;;  %v18908_v44 = vld [vmem:[#allocation56_spill] sm:$0xff]  ;;  %vm18932_vm11 = vmmov %vm18640_vm0 }
 0x589   :  { %v11072_v42 = vcombine.low %v11064_v27, %v11071_v56  ;;  %v6368_v4 = vcombine.high %v6366_v36, %v6366_v36  ;;  %v6375_v6 = vrot.slane %v6359_v47, %v14817_v48  ;;  %v4174_v23 = vsel %vm18903_vm12, %v16291_v33, 0.0  ;;  %vm18933_vm12 = vmmov %vm18640_vm0 }
 0x58a   :  { %11231 = vst.msk [vmem:[%s18052_s3 + $0x1e0] sm:$0xff] %vm18640_vm0, %v11055_v28  ;;  %v4121_v0 = vadd.f32 %v4120_v14, %v4119_v46  ;;  %v4173_v10 = vadd.f32 %v16285_v55, %v4171_v30  ;;  %v6382_v60 = vrot.slane %v6366_v36, %v14817_v48  ;;  %v6389_v49 = vrot.slane %v6367_v38, %v14817_v48  ;;  %v18910_v28 = vld [vmem:[#allocation58_spill] sm:$0xff] }
 0x58b   :  { %11232 = vst.msk [vmem:[%s18052_s3 + $0x1e8] sm:$0xff] %vm18904_vm8, %v11072_v42  ;;  %v6396_v24 = vrot.slane %v6368_v4, %v14817_v48  ;;  %v6397_v33 = vcombine.high %v6375_v6, %v6375_v6  ;;  %v6918_v61 = vrot.slane %v6375_v6, %v14974_v22  ;;  %v18907_v13 = vcombine.high %v18905_v32, %v18905_v32  ;;  %vm18934_vm8 = vmmov %vm18640_vm0 }
 0x58c   :  { %v4122_v9 = vrot.slane %v4121_v0, 4  ;;  %v4175_v3 = vadd.f32 %v4174_v23, %v4173_v10  ;;  %v6398_v41 = vcombine.high %v6382_v60, %v6382_v60  ;;  %v6934_v58 = vrot.slane %v6382_v60, %v14974_v22 }
 0x58d   :  { %v6399_v55 = vcombine.high %v6389_v49, %v6389_v49  ;;  %v6400_v31 = vcombine.high %v6396_v24, %v6396_v24  ;;  %v6922_v8 = vrot.slane %v6389_v49, %v14974_v22  ;;  %v6926_v35 = vrot.slane %v6397_v33, %v14974_v22 }
 0x58e   :  { %v4123_v39 = vadd.f32 %v4122_v9, %v4121_v0  ;;  %v4176_v7 = vrot.slane %v4175_v3, 4  ;;  %v6938_v20 = vrot.slane %v6396_v24, %v14974_v22  ;;  %v6942_v37 = vrot.slane %v6398_v41, %v14974_v22 }
 0x58f   :  { %v6930_v63 = vrot.slane %v6399_v55, %v14974_v22  ;;  %v6946_v54 = vrot.slane %v6400_v31, %v14974_v22  ;;  %v7243_v45 = vsel %vm4767_vm13, %v18905_v32, %v6918_v61  ;;  %v7244_v34 = vsel %vm4767_vm13, %v18906_v50, %v6922_v8 }
 0x590   :  { %v4124_v5 = vrot.slane %v4123_v39, 2  ;;  %v4177_v27 = vadd.f32 %v4176_v7, %v4175_v3  ;;  %v7245_v56 = vsel %vm4767_vm13, %v18907_v13, %v6926_v35  ;;  %v7247_v47 = vsel %vm4767_vm13, %v18908_v44, %v6934_v58  ;;  %v16471_v35 = vpop.f32.mrb[30].mxu0 }
 0x591   :  { %v18909_v36 = vcombine.high %v18906_v50, %v18906_v50  ;;  %v7248_v46 = vsel %vm4767_vm13, %v18910_v28, %v6938_v20  ;;  %v18911_v30 = vcombine.high %v18908_v44, %v18908_v44  ;;  %v18912_v38 = vcombine.high %v18910_v28, %v18910_v28  ;;  %v18916_v20 = vld [vmem:[#allocation55_spill] sm:$0xff]  ;;  %v16481_v32 = vpop.f32.mrb[31].mxu0 }
 0x592   :  { %v4125_v6 = vadd.f32 %v4124_v5, %v4123_v39  ;;  %v4178_v23 = vrot.slane %v4177_v27, 2  ;;  %v10903_v0 = vcombine.low %v7243_v45, %v7244_v34  ;;  %v10920_v60 = vcombine.low %v7247_v47, %v7248_v46  ;;  %v18913_v39 = vld [vmem:[#allocation29_spill] sm:$0xff] }
 0x593   :  { %v7246_v14 = vsel %vm4767_vm13, %v18909_v36, %v6930_v63  ;;  %v7249_v42 = vsel %vm4767_vm13, %v18911_v30, %v6942_v37  ;;  %v7250_v4 = vsel %vm4767_vm13, %v18912_v38, %v6946_v54  ;;  %v4425_v24 = vmul.f32 %v15633_v1, %v15633_v1 }
 0x594   :  { %v10904_v10 = vcombine.low %v7245_v56, %v7246_v14  ;;  %v10921_v49 = vcombine.low %v7249_v42, %v7250_v4  ;;  %v7381_v33 = vcombine.high %v15633_v1, %v15633_v1  ;;  %v4126_v61 = vrot.slane %v4125_v6, 1 }
 0x595   :  { %v4179_v9 = vadd.f32 %v4178_v23, %v4177_v27  ;;  %v10911_v3 = vrot.slane %v10903_v0, %v14982_v26  ;;  %v10928_v58 = vrot.slane %v10920_v60, %v14982_v26  ;;  %v7388_v31 = vrot.slane %v15633_v1, %v14817_v48  ;;  %v18919_v27 = vld [vmem:[#allocation49_spill] sm:$0xff] }
 0x596   :  { %v10918_v41 = vrot.slane %v10904_v10, %v14982_v26  ;;  %v10935_v55 = vrot.slane %v10921_v49, %v14982_v26  ;;  %v7395_v8 = vrot.slane %v7381_v33, %v14817_v48  ;;  %v16475_v7 = vsel %vm18914_vm15, %v18913_v39, 0.0  ;;  %vm18940_vm15 = vmmov %vm18640_vm0 }
 0x597   :  { %18915 = vst [vmem:[#allocation17_spill] sm:$0xff] %v16475_v7  ;;  %v16479_v37 = vsel %vm18917_vm3, %v18916_v20, 0.0  ;;  %v4180_v63 = vrot.slane %v4179_v9, 1  ;;  %v7396_v50 = vcombine.high %v7388_v31, %v7388_v31  ;;  %v16484_v5 = vrot.slane %v7388_v31, %v14817_v48  ;;  %vm18942_vm3 = vmmov %vm18640_vm0 }
 0x598   :  { %18918 = vst [vmem:[#allocation45_spill] sm:$0xff] %v16479_v37  ;;  %v10919_v54 = vcombine.low %v10911_v3, %v10918_v41  ;;  %v10936_v45 = vcombine.low %v10928_v58, %v10935_v55  ;;  %v7397_v34 = vcombine.high %v7395_v8, %v7395_v8  ;;  %v16488_v13 = vsel %vm18920_vm4, %v18919_v27, 0.0  ;;  %v16542_v3 = vpop.f32.mrb[36].mxu1  ;;  %vm18946_vm4 = vmmov %vm18640_vm0 }
 0x599   :  { %18921 = vst [vmem:[#allocation32_spill] sm:$0xff] %v16488_v13  ;;  %v4388_v56 = vsel %vm18923_vm1, %v15633_v1, 0.0  ;;  %v16497_v44 = vrot.slane %v7395_v8, %v14817_v48  ;;  %v7283_v47 = vcombine.high %v15690_v52, %v15690_v52  ;;  %v16501_v36 = vadd.f32 %v4126_v61, %v4125_v6  ;;  %vm18948_vm1 = vmmov %vm18640_vm0 }
 0x59a   :  { %11223 = vst.msk [vmem:[%s18052_s3 + $0x1a0] sm:$0xff] %vm18922_vm5, %v10919_v54  ;;  %v4442_v14 = vsel %vm18926_vm6, %v4425_v24, 0.0  ;;  %v4423_v28 = vmul.f32 %v15690_v52, %v15690_v52  ;;  %v7290_v1 = vrot.slane %v15690_v52, %v14817_v48  ;;  %v16513_v46 = vrot.slane %v7396_v50, %v14817_v48  ;;  %vm18947_vm5 = vmmov %vm18640_vm0 }
 0x59b   :  { %18924 = vst [vmem:[#allocation37_spill] sm:$0xff] %v16501_v36  ;;  %11224 = vst.msk [vmem:[%s18052_s3 + $0x1a8] sm:$0xff] %vm18925_vm14, %v10936_v45  ;;  %v16516_v30 = vrot.slane %v7397_v34, %v14817_v48  ;;  %v4385_v42 = vsel %vm18927_vm7, %v15690_v52, 0.0  ;;  %v7297_v38 = vrot.slane %v7283_v47, %v14817_v48  ;;  %v16521_v4 = vadd.f32 %v4180_v63, %v4179_v9 }
 0x59c   :  { %v7298_v23 = vcombine.high %v7290_v1, %v7290_v1  ;;  %v16526_v0 = vrot.slane %v7290_v1, %v14817_v48  ;;  %v7430_v52 = vcombine.high %v15723_v59, %v15723_v59  ;;  %v4439_v24 = vsel %vm18929_vm10, %v4423_v28, 0.0  ;;  %vm18949_vm14 = vmmov %vm18640_vm0 }
 0x59d   :  { %18928 = vst [vmem:[#allocation46_spill] sm:$0xff] %v16521_v4  ;;  %v7299_v60 = vcombine.high %v7297_v38, %v7297_v38  ;;  %v16531_v49 = vrot.slane %v7297_v38, %v14817_v48  ;;  %v4426_v33 = vmul.f32 %v15723_v59, %v15723_v59  ;;  %v7437_v61 = vrot.slane %v15723_v59, %v14817_v48  ;;  %vm18950_vm6 = vmmov %vm18640_vm0 }
 0x59e   :  { %v4386_v9 = vsel %vm18930_vm2, %v15748_v19, 0.0  ;;  %v16550_v55 = vsel %vm18931_vm9, %v15723_v59, 0.0  ;;  %v7444_v31 = vrot.slane %v7430_v52, %v14817_v48  ;;  %v16554_v8 = vrot.slane %v7298_v23, %v14817_v48  ;;  %vm18951_vm7 = vmmov %vm18640_vm0 }
 0x59f   :  { %v7445_v20 = vcombine.high %v7437_v61, %v7437_v61  ;;  %v4387_v63 = vadd.f32 %v4386_v9, %v4385_v42  ;;  %v16559_v54 = vrot.slane %v7299_v60, %v14817_v48  ;;  %v4424_v59 = vmul.f32 %v15748_v19, %v15748_v19  ;;  %v16584_v60 = vpop.f32.mrb[37].mxu1  ;;  %vm18956_vm10 = vmmov %vm18640_vm0 }
 0x5a0   :  { %v7446_v50 = vcombine.high %v7444_v31, %v7444_v31  ;;  %v16566_v34 = vsel %vm18932_vm11, %v4426_v33, 0.0  ;;  %v16569_v27 = vrot.slane %v7437_v61, %v14817_v48  ;;  %v7332_v28 = vcombine.high %v15748_v19, %v15748_v19  ;;  %v16662_v11 = vpop.f32.mrb[38].mxu1  ;;  %vm18957_vm2 = vmmov %vm18640_vm0 }
 0x5a1   :  { %v16571_v47 = vadd.f32 %v4388_v56, %v4387_v63  ;;  %v16576_v1 = vrot.slane %v7444_v31, %v14817_v48  ;;  %v16579_v42 = vrot.slane %v7445_v20, %v14817_v48  ;;  %v4440_v38 = vsel %vm18933_vm12, %v4424_v59, 0.0  ;;  %18936 = vst [vmem:[#allocation64_spill] sm:$0xff] %v16662_v11  ;;  %vm18959_vm9 = vmmov %vm18640_vm0 }
 0x5a2   :  { %v7339_v23 = vrot.slane %v15748_v19, %v14817_v48  ;;  %v16589_v52 = vrot.slane %v7446_v50, %v14817_v48  ;;  %v4441_v33 = vadd.f32 %v4440_v38, %v4439_v24  ;;  %v7346_v61 = vrot.slane %v7332_v28, %v14817_v48  ;;  %vm18960_vm11 = vmmov %vm18640_vm0 }
 0x5a3   :  { %v4715_v19 = vmul.f32 %v15786_v53, %v15786_v53  ;;  %v8309_v24 = vcombine.high %v15786_v53, %v15786_v53  ;;  %v8316_v9 = vrot.slane %v15786_v53, %v14817_v48  ;;  %vm18961_vm12 = vmmov %vm18640_vm0 }
 0x5a4   :  { %v7347_v31 = vcombine.high %v7339_v23, %v7339_v23  ;;  %v16595_v20 = vrot.slane %v7339_v23, %v14817_v48  ;;  %v16601_v59 = vadd.f32 %v4442_v14, %v4441_v33  ;;  %v7348_v50 = vcombine.high %v7346_v61, %v7346_v61 }
 0x5a5   :  { %v16611_v23 = vsel %vm18640_vm0, %v15786_v53, 0.0  ;;  %v16618_v33 = vrot.slane %v7346_v61, %v14817_v48  ;;  %v8323_v28 = vrot.slane %v8309_v24, %v14817_v48  ;;  %v16627_v45 = vsel %vm18934_vm8, %v4715_v19, 0.0  ;;  %vm18962_vm8 = vmmov %vm18640_vm0 }
 0x5a6   :  { %v16621_v63 = vrot.slane %v7347_v31, %v14817_v48  ;;  %v8324_v56 = vcombine.high %v8316_v9, %v8316_v9  ;;  %v8332_v53 = vrot.slane %v8316_v9, %v14817_v48  ;;  %v16631_v39 = vrot.slane %v7348_v50, %v14817_v48 }
 0x5a7   :  { %v8325_v14 = vcombine.high %v8323_v28, %v8323_v28  ;;  %v8339_v61 = vrot.slane %v8323_v28, %v14817_v48  ;;  %v16636_v31 = vmul.f32 %v15808_v18, %v15808_v18  ;;  %v8211_v19 = vcombine.high %v15808_v18, %v15808_v18 }
 0x5a8   :  { %v8346_v24 = vrot.slane %v8324_v56, %v14817_v48  ;;  %v8354_v58 = vcombine.high %v8332_v53, %v8332_v53  ;;  %v9062_v38 = vrot.slane %v8332_v53, %v14974_v22  ;;  %v8218_v28 = vrot.slane %v15808_v18, %v14817_v48 }
 0x5a9   :  { %v8353_v9 = vrot.slane %v8325_v14, %v14817_v48  ;;  %v8355_v41 = vcombine.high %v8339_v61, %v8339_v61  ;;  %v9078_v50 = vrot.slane %v8339_v61, %v14974_v22 }
 0x5aa   :  { %v8356_v10 = vcombine.high %v8346_v24, %v8346_v24  ;;  %v9066_v6 = vrot.slane %v8346_v24, %v14974_v22  ;;  %v9070_v4 = vrot.slane %v8354_v58, %v14974_v22  ;;  %v9651_v56 = vsel %vm4767_vm13, %v16484_v5, %v9062_v38 }
 0x5ab   :  { %v8357_v53 = vcombine.high %v8353_v9, %v8353_v9  ;;  %v9082_v36 = vrot.slane %v8353_v9, %v14974_v22  ;;  %v9086_v7 = vrot.slane %v8355_v41, %v14974_v22  ;;  %v9655_v14 = vsel %vm4767_vm13, %v16497_v44, %v9078_v50 }
 0x5ac   :  { %v9074_v61 = vrot.slane %v8356_v10, %v14974_v22  ;;  %v9652_v13 = vsel %vm4767_vm13, %v16513_v46, %v9066_v6  ;;  %v18935_v24 = vcombine.high %v16484_v5, %v16484_v5  ;;  %v8225_v38 = vrot.slane %v8211_v19, %v14817_v48 }
 0x5ad   :  { %v9090_v9 = vrot.slane %v8357_v53, %v14974_v22  ;;  %v9656_v41 = vsel %vm4767_vm13, %v16516_v30, %v9082_v36  ;;  %v18937_v10 = vcombine.high %v16497_v44, %v16497_v44  ;;  %v10189_v6 = vcombine.low %v9651_v56, %v9652_v13 }
 0x5ae   :  { %v9653_v58 = vsel %vm4767_vm13, %v18935_v24, %v9070_v4  ;;  %v18938_v5 = vcombine.high %v16513_v46, %v16513_v46  ;;  %v10206_v24 = vcombine.low %v9655_v14, %v9656_v41  ;;  %v8226_v19 = vcombine.high %v8218_v28, %v8218_v28 }
 0x5af   :  { %v9657_v50 = vsel %vm4767_vm13, %v18937_v10, %v9086_v7  ;;  %v8227_v37 = vcombine.high %v8225_v38, %v8225_v38  ;;  %v18939_v53 = vcombine.high %v16516_v30, %v16516_v30  ;;  %v10197_v11 = vrot.slane %v10189_v6, %v14982_v26 }
 0x5b0   :  { %v9654_v4 = vsel %vm4767_vm13, %v18938_v5, %v9074_v61  ;;  %v8234_v44 = vrot.slane %v8218_v28, %v14817_v48  ;;  %v10214_v13 = vrot.slane %v10206_v24, %v14982_v26  ;;  %v8241_v46 = vrot.slane %v8225_v38, %v14817_v48 }
 0x5b1   :  { %v9658_v2 = vsel %vm4767_vm13, %v18939_v53, %v9090_v9  ;;  %v10190_v36 = vcombine.low %v9653_v58, %v9654_v4  ;;  %v8248_v56 = vrot.slane %v8226_v19, %v14817_v48  ;;  %v8255_v61 = vrot.slane %v8227_v37, %v14817_v48 }
 0x5b2   :  { %v10207_v7 = vcombine.low %v9657_v50, %v9658_v2  ;;  %v8256_v41 = vcombine.high %v8234_v44, %v8234_v44  ;;  %v8998_v30 = vrot.slane %v8234_v44, %v14974_v22  ;;  %v8257_v9 = vcombine.high %v8241_v46, %v8241_v46 }
 0x5b3   :  { %v10204_v14 = vrot.slane %v10190_v36, %v14982_v26  ;;  %v8258_v10 = vcombine.high %v8248_v56, %v8248_v56  ;;  %v9002_v28 = vrot.slane %v8248_v56, %v14974_v22  ;;  %v8259_v50 = vcombine.high %v8255_v61, %v8255_v61 }
 0x5b4   :  { %v10221_v58 = vrot.slane %v10207_v7, %v14982_v26  ;;  %v9006_v6 = vrot.slane %v8256_v41, %v14974_v22  ;;  %v9014_v38 = vrot.slane %v8241_v46, %v14974_v22  ;;  %v9018_v37 = vrot.slane %v8255_v61, %v14974_v22  ;;  %v16707_v7 = vpop.f32.mrb[39].mxu1 }
 0x5b5   :  { %v10205_v2 = vcombine.low %v10197_v11, %v10204_v14  ;;  %v9010_v4 = vrot.slane %v8258_v10, %v14974_v22  ;;  %v9022_v24 = vrot.slane %v8257_v9, %v14974_v22  ;;  %v9026_v19 = vrot.slane %v8259_v50, %v14974_v22 }
 0x5b6   :  { %v10222_v5 = vcombine.low %v10214_v13, %v10221_v58  ;;  %v9635_v11 = vsel %vm4767_vm13, %v16526_v0, %v8998_v30  ;;  %v9636_v53 = vsel %vm4767_vm13, %v16554_v8, %v9002_v28  ;;  %v18941_v36 = vcombine.high %v16526_v0, %v16526_v0 }
 0x5b7   :  { %11181 = vst.msk [vmem:[%s18052_s3 + $0x50] sm:$0xff] %vm18940_vm15, %v10205_v2  ;;  %v18943_v13 = vcombine.high %v16554_v8, %v16554_v8  ;;  %v9639_v56 = vsel %vm4767_vm13, %v16531_v49, %v9014_v38  ;;  %v9640_v0 = vsel %vm4767_vm13, %v16559_v54, %v9018_v37  ;;  %v18944_v14 = vcombine.high %v16531_v49, %v16531_v49  ;;  %vm18963_vm15 = vmmov %vm18640_vm0 }
 0x5b8   :  { %v9637_v44 = vsel %vm4767_vm13, %v18941_v36, %v9006_v6  ;;  %11182 = vst.msk [vmem:[%s18052_s3 + $0x58] sm:$0xff] %vm18942_vm3, %v10222_v5  ;;  %v18945_v41 = vcombine.high %v16559_v54, %v16559_v54  ;;  %v10053_v58 = vcombine.low %v9635_v11, %v9636_v53  ;;  %v10070_v9 = vcombine.low %v9639_v56, %v9640_v0  ;;  %vm18964_vm3 = vmmov %vm18640_vm0 }
 0x5b9   :  { %v9638_v46 = vsel %vm4767_vm13, %v18943_v13, %v9010_v4  ;;  %v9641_v61 = vsel %vm4767_vm13, %v18944_v14, %v9022_v24  ;;  %v7378_v10 = vcombine.high %v16618_v33, %v16618_v33  ;;  %v4675_v28 = vsel %vm18946_vm4, %v15808_v18, 0.0  ;;  %vm18965_vm4 = vmmov %vm18640_vm0 }
 0x5ba   :  { %v9642_v30 = vsel %vm4767_vm13, %v18945_v41, %v9026_v19  ;;  %v10054_v8 = vcombine.low %v9637_v44, %v9638_v46  ;;  %v8358_v49 = vcombine.high %v15876_v62, %v15876_v62  ;;  %v4729_v50 = vsel %vm18947_vm5, %v16636_v31, 0.0  ;;  %vm18966_vm5 = vmmov %vm18640_vm0 }
 0x5bb   :  { %v10071_v2 = vcombine.low %v9641_v61, %v9642_v30  ;;  %v10061_v54 = vrot.slane %v10053_v58, %v14982_v26  ;;  %v8365_v38 = vrot.slane %v15876_v62, %v14817_v48  ;;  %v10078_v5 = vrot.slane %v10070_v9, %v14982_v26 }
 0x5bc   :  { %v10068_v6 = vrot.slane %v10054_v8, %v14982_v26  ;;  %v8372_v18 = vrot.slane %v8358_v49, %v14817_v48  ;;  %v4676_v37 = vsel %vm18948_vm1, %v15939_v15, 0.0  ;;  %v4714_v13 = vmul.f32 %v15939_v15, %v15939_v15  ;;  %vm18967_vm1 = vmmov %vm18640_vm0 }
 0x5bd   :  { %v10085_v4 = vrot.slane %v10071_v2, %v14982_v26  ;;  %v8373_v19 = vcombine.high %v8365_v38, %v8365_v38  ;;  %v8381_v31 = vrot.slane %v8365_v38, %v14817_v48  ;;  %v4677_v11 = vadd.f32 %v4676_v37, %v4675_v28 }
 0x5be   :  { %v10069_v24 = vcombine.low %v10061_v54, %v10068_v6  ;;  %v8374_v36 = vcombine.high %v8372_v18, %v8372_v18  ;;  %v8388_v44 = vrot.slane %v8372_v18, %v14817_v48  ;;  %v4730_v58 = vsel %vm18951_vm7, %v4714_v13, 0.0  ;;  %vm18970_vm7 = vmmov %vm18640_vm0 }
 0x5bf   :  { %v10086_v53 = vcombine.low %v10078_v5, %v10085_v4  ;;  %v8395_v46 = vrot.slane %v8373_v19, %v14817_v48  ;;  %v8403_v56 = vcombine.high %v8381_v31, %v8381_v31  ;;  %v9094_v0 = vrot.slane %v8381_v31, %v14974_v22 }
 0x5c0   :  { %11173 = vst.msk [vmem:[%s18052_s3 + $0x10] sm:$0xff] %vm18949_vm14, %v10069_v24  ;;  %v16757_v14 = vadd.f32 %v16611_v23, %v4677_v11  ;;  %v8402_v61 = vrot.slane %v8374_v36, %v14817_v48  ;;  %v8404_v41 = vcombine.high %v8388_v44, %v8388_v44  ;;  %v9110_v30 = vrot.slane %v8388_v44, %v14974_v22  ;;  %vm18968_vm14 = vmmov %vm18640_vm0 }
 0x5c1   :  { %11174 = vst.msk [vmem:[%s18052_s3 + $0x18] sm:$0xff] %vm18950_vm6, %v10086_v53  ;;  %v8405_v8 = vcombine.high %v8395_v46, %v8395_v46  ;;  %v9098_v9 = vrot.slane %v8395_v46, %v14974_v22  ;;  %v9102_v28 = vrot.slane %v8403_v56, %v14974_v22  ;;  %v9659_v23 = vsel %vm4767_vm13, %v16569_v27, %v9094_v0  ;;  %v16797_v46 = vpop.f32.mrb[32].mxu0  ;;  %vm18969_vm6 = vmmov %vm18640_vm0 }
 0x5c2   :  { %v8406_v2 = vcombine.high %v8402_v61, %v8402_v61  ;;  %v9114_v49 = vrot.slane %v8402_v61, %v14974_v22  ;;  %v9118_v54 = vrot.slane %v8404_v41, %v14974_v22  ;;  %v9663_v6 = vsel %vm4767_vm13, %v16576_v1, %v9110_v30 }
 0x5c3   :  { %v9106_v38 = vrot.slane %v8405_v8, %v14974_v22  ;;  %v9660_v5 = vsel %vm4767_vm13, %v16579_v42, %v9098_v9  ;;  %v18952_v4 = vcombine.high %v16569_v27, %v16569_v27  ;;  %v4731_v37 = vadd.f32 %v4730_v58, %v4729_v50 }
 0x5c4   :  { %v9122_v24 = vrot.slane %v8406_v2, %v14974_v22  ;;  %v9664_v19 = vsel %vm4767_vm13, %v16589_v52, %v9114_v49  ;;  %v18953_v31 = vcombine.high %v16576_v1, %v16576_v1  ;;  %v10257_v53 = vcombine.low %v9659_v23, %v9660_v5 }
 0x5c5   :  { %v9661_v18 = vsel %vm4767_vm13, %v18952_v4, %v9102_v28  ;;  %v18954_v36 = vcombine.high %v16579_v42, %v16579_v42  ;;  %v10274_v27 = vcombine.low %v9663_v6, %v9664_v19  ;;  %v16793_v13 = vadd.f32 %v16627_v45, %v4731_v37  ;;  %v16822_v19 = vpop.f32.mrb[33].mxu0 }
 0x5c6   :  { %v9665_v11 = vsel %vm4767_vm13, %v18953_v31, %v9118_v54  ;;  %v8260_v50 = vcombine.high %v15939_v15, %v15939_v15  ;;  %v7379_v1 = vcombine.high %v16621_v63, %v16621_v63  ;;  %v18955_v56 = vcombine.high %v16589_v52, %v16589_v52 }
 0x5c7   :  { %v9662_v44 = vsel %vm4767_vm13, %v18954_v36, %v9106_v38  ;;  %v8267_v61 = vrot.slane %v15939_v15, %v14817_v48  ;;  %v7380_v45 = vcombine.high %v16631_v39, %v16631_v39  ;;  %v10265_v41 = vrot.slane %v10257_v53, %v14982_v26 }
 0x5c8   :  { %v9666_v0 = vsel %vm4767_vm13, %v18955_v56, %v9122_v24  ;;  %v10258_v42 = vcombine.low %v9661_v18, %v9662_v44  ;;  %v8274_v58 = vrot.slane %v8260_v50, %v14817_v48  ;;  %v10282_v9 = vrot.slane %v10274_v27, %v14982_v26 }
 0x5c9   :  { %v10275_v30 = vcombine.low %v9665_v11, %v9666_v0  ;;  %v8275_v28 = vcombine.high %v8267_v61, %v8267_v61  ;;  %v8283_v52 = vrot.slane %v8267_v61, %v14817_v48  ;;  %v7577_v49 = vcombine.high %v16020_v40, %v16020_v40 }
 0x5ca   :  { %v10272_v8 = vrot.slane %v10258_v42, %v14982_v26  ;;  %v8276_v2 = vcombine.high %v8274_v58, %v8274_v58  ;;  %v8290_v15 = vrot.slane %v8274_v58, %v14817_v48  ;;  %v4716_v0 = vmul.f32 %v15876_v62, %v15876_v62 }
 0x5cb   :  { %v10289_v23 = vrot.slane %v10275_v30, %v14982_v26  ;;  %v8297_v6 = vrot.slane %v8275_v28, %v14817_v48  ;;  %v8305_v38 = vcombine.high %v8283_v52, %v8283_v52  ;;  %v9030_v5 = vrot.slane %v8283_v52, %v14974_v22 }
 0x5cc   :  { %v10273_v54 = vcombine.low %v10265_v41, %v10272_v8  ;;  %v8304_v18 = vrot.slane %v8276_v2, %v14817_v48  ;;  %v8306_v37 = vcombine.high %v8290_v15, %v8290_v15  ;;  %v9046_v24 = vrot.slane %v8290_v15, %v14974_v22 }
 0x5cd   :  { %v10290_v4 = vcombine.low %v10282_v9, %v10289_v23  ;;  %v8307_v31 = vcombine.high %v8297_v6, %v8297_v6  ;;  %v9034_v11 = vrot.slane %v8297_v6, %v14974_v22  ;;  %v9038_v53 = vrot.slane %v8305_v38, %v14974_v22  ;;  %v16872_v38 = vpop.f32.mrb[34].mxu0 }
 0x5ce   :  { %11185 = vst.msk [vmem:[%s18052_s3 + $0x70] sm:$0xff] %vm18956_vm10, %v10273_v54  ;;  %v9643_v36 = vsel %vm4767_vm13, %v16595_v20, %v9030_v5  ;;  %v8308_v44 = vcombine.high %v8304_v18, %v8304_v18  ;;  %v9050_v27 = vrot.slane %v8304_v18, %v14974_v22  ;;  %v9054_v50 = vrot.slane %v8306_v37, %v14974_v22  ;;  %vm18971_vm10 = vmmov %vm18640_vm0 }
 0x5cf   :  { %11186 = vst.msk [vmem:[%s18052_s3 + $0x78] sm:$0xff] %vm18957_vm2, %v10290_v4  ;;  %v9647_v56 = vsel %vm4767_vm13, %v16618_v33, %v9046_v24  ;;  %v9042_v42 = vrot.slane %v8307_v31, %v14974_v22  ;;  %v9644_v61 = vsel %vm4767_vm13, %v16621_v63, %v9034_v11  ;;  %v18958_v41 = vcombine.high %v16595_v20, %v16595_v20  ;;  %vm18972_vm2 = vmmov %vm18640_vm0 }
 0x5d0   :  { %v9058_v58 = vrot.slane %v8308_v44, %v14974_v22  ;;  %v9648_v8 = vsel %vm4767_vm13, %v16631_v39, %v9050_v27  ;;  %v9649_v9 = vsel %vm4767_vm13, %v7378_v10, %v9054_v50  ;;  %v10121_v28 = vcombine.low %v9643_v36, %v9644_v61 }
 0x5d1   :  { %v9645_v30 = vsel %vm4767_vm13, %v18958_v41, %v9038_v53  ;;  %v9646_v52 = vsel %vm4767_vm13, %v7379_v1, %v9042_v42  ;;  %v10138_v23 = vcombine.low %v9647_v56, %v9648_v8  ;;  %v7584_v63 = vrot.slane %v16020_v40, %v14817_v48 }
 0x5d2   :  { %v7591_v20 = vrot.slane %v7577_v49, %v14817_v48  ;;  %v9650_v2 = vsel %vm4767_vm13, %v7380_v45, %v9058_v58  ;;  %v10122_v15 = vcombine.low %v9645_v30, %v9646_v52  ;;  %v4429_v39 = vmul.f32 %v16020_v40, %v16020_v40 }
 0x5d3   :  { %v4391_v33 = vadd.f32 %v16550_v55, %v16571_v47  ;;  %v16867_v10 = vsel %vm18959_vm9, %v15876_v62, 0.0  ;;  %v16870_v1 = vsel %vm18960_vm11, %v4716_v0, 0.0  ;;  %v10139_v54 = vcombine.low %v9649_v9, %v9650_v2  ;;  %vm18973_vm9 = vmmov %vm18640_vm0 }
 0x5d4   :  { %v7592_v6 = vcombine.high %v7584_v63, %v7584_v63  ;;  %v10129_v45 = vrot.slane %v10121_v28, %v14982_v26  ;;  %v10136_v49 = vrot.slane %v10122_v15, %v14982_v26  ;;  %v7593_v5 = vcombine.high %v7591_v20, %v7591_v20  ;;  %vm18975_vm11 = vmmov %vm18640_vm0 }
 0x5d5   :  { %v4392_v4 = vsel %vm18961_vm12, %v16075_v51, 0.0  ;;  %v10146_v55 = vrot.slane %v10138_v23, %v14982_v26  ;;  %v10153_v62 = vrot.slane %v10139_v54, %v14982_v26  ;;  %v16881_v47 = vrot.slane %v7584_v63, %v14817_v48  ;;  %vm18976_vm12 = vmmov %vm18640_vm0 }
 0x5d6   :  { %v4393_v18 = vadd.f32 %v4392_v4, %v4391_v33  ;;  %v10137_v37 = vcombine.low %v10129_v45, %v10136_v49  ;;  %v4396_v24 = vsel %vm18640_vm0, %v16020_v40, 0.0  ;;  %v4450_v31 = vsel %vm18962_vm8, %v4429_v39, 0.0  ;;  %v16955_v4 = vpop.f32.mrb[35].mxu0  ;;  %vm18983_vm8 = vmmov %vm18640_vm0 }
 0x5d7   :  { %v4427_v11 = vmul.f32 %v16075_v51, %v16075_v51  ;;  %v10154_v53 = vcombine.low %v10146_v55, %v10153_v62  ;;  %v16889_v36 = vrot.slane %v7591_v20, %v14817_v48  ;;  %v16892_v44 = vrot.slane %v7592_v6, %v14817_v48  ;;  %v16957_v55 = vpop.f32.mrb[40].mxu1 }
 0x5d8   :  { %v4445_v27 = vadd.f32 %v16566_v34, %v16601_v59  ;;  %11177 = vst.msk [vmem:[%s18052_s3 + $0x30] sm:$0xff] %vm18963_vm15, %v10137_v37  ;;  %v16901_v40 = vrot.slane %v7593_v5, %v14817_v48  ;;  %v7479_v56 = vcombine.high %v16075_v51, %v16075_v51  ;;  %v7486_v0 = vrot.slane %v16075_v51, %v14817_v48  ;;  %vm18986_vm15 = vmmov %vm18640_vm0 }
 0x5d9   :  { %v4446_v50 = vsel %vm18964_vm3, %v4427_v11, 0.0  ;;  %11178 = vst.msk [vmem:[%s18052_s3 + $0x38] sm:$0xff] %vm18965_vm4, %v10154_v53  ;;  %v7622_v34 = vcombine.high %v16881_v47, %v16881_v47  ;;  %v7626_v42 = vcombine.high %v16120_v29, %v16120_v29  ;;  %v7633_v61 = vrot.slane %v16120_v29, %v14817_v48  ;;  %vm18987_vm3 = vmmov %vm18640_vm0 }
 0x5da   :  { %v4447_v59 = vadd.f32 %v4446_v50, %v4445_v27  ;;  %v7493_v41 = vrot.slane %v7479_v56, %v14817_v48  ;;  %v7494_v30 = vcombine.high %v7486_v0, %v7486_v0  ;;  %v16920_v51 = vrot.slane %v7486_v0, %v14817_v48  ;;  %vm18988_vm4 = vmmov %vm18640_vm0 }
 0x5db   :  { %v4430_v58 = vmul.f32 %v16120_v29, %v16120_v29  ;;  %v7640_v8 = vrot.slane %v7626_v42, %v14817_v48  ;;  %v7641_v9 = vcombine.high %v7633_v61, %v7633_v61  ;;  %v16926_v28 = vrot.slane %v7633_v61, %v14817_v48 }
 0x5dc   :  { %v4394_v52 = vsel %vm18966_vm5, %v16127_v12, 0.0  ;;  %v7623_v23 = vcombine.high %v16889_v36, %v16889_v36  ;;  %v7624_v63 = vcombine.high %v16892_v44, %v16892_v44  ;;  %v7495_v2 = vcombine.high %v7493_v41, %v7493_v41  ;;  %vm18989_vm5 = vmmov %vm18640_vm0 }
 0x5dd   :  { %v16937_v15 = vrot.slane %v7493_v41, %v14817_v48  ;;  %v16940_v39 = vrot.slane %v7494_v30, %v14817_v48  ;;  %v7642_v33 = vcombine.high %v7640_v8, %v7640_v8  ;;  %v16943_v54 = vrot.slane %v7640_v8, %v14817_v48 }
 0x5de   :  { %v16947_v6 = vsel %vm18967_vm1, %v16120_v29, 0.0  ;;  %v16950_v45 = vsel %vm18968_vm14, %v4430_v58, 0.0  ;;  %v16953_v49 = vrot.slane %v7641_v9, %v14817_v48  ;;  %v4395_v5 = vadd.f32 %v4394_v52, %v4393_v18  ;;  %vm18990_vm1 = vmmov %vm18640_vm0 }
 0x5df   :  { %v16960_v62 = vrot.slane %v7495_v2, %v14817_v48  ;;  %v4428_v11 = vmul.f32 %v16127_v12, %v16127_v12  ;;  %v16969_v53 = vrot.slane %v7642_v33, %v14817_v48  ;;  %v7528_v27 = vcombine.high %v16127_v12, %v16127_v12  ;;  %vm18991_vm14 = vmmov %vm18640_vm0 }
 0x5e0   :  { %v16971_v18 = vadd.f32 %v4396_v24, %v4395_v5  ;;  %v7535_v50 = vrot.slane %v16127_v12, %v14817_v48  ;;  %v4719_v12 = vmul.f32 %v16171_v25, %v16171_v25  ;;  %v8505_v8 = vcombine.high %v16171_v25, %v16171_v25 }
 0x5e1   :  { %v4448_v61 = vsel %vm18969_vm6, %v4428_v11, 0.0  ;;  %v7542_v30 = vrot.slane %v7528_v27, %v14817_v48  ;;  %v8512_v9 = vrot.slane %v16171_v25, %v14817_v48  ;;  %v4681_v52 = vadd.f32 %v16867_v10, %v16757_v14  ;;  %vm18992_vm6 = vmmov %vm18640_vm0 }
 0x5e2   :  { %v4449_v41 = vadd.f32 %v4448_v61, %v4447_v59  ;;  %v7543_v33 = vcombine.high %v7535_v50, %v7535_v50  ;;  %v17003_v5 = vsel %vm18970_vm7, %v16171_v25, 0.0  ;;  %v17006_v11 = vrot.slane %v7535_v50, %v14817_v48  ;;  %vm18993_vm7 = vmmov %vm18640_vm0 }
 0x5e3   :  { %v8519_v27 = vrot.slane %v8505_v8, %v14817_v48  ;;  %v8520_v61 = vcombine.high %v8512_v9, %v8512_v9  ;;  %v8528_v42 = vrot.slane %v8512_v9, %v14817_v48  ;;  %v7544_v24 = vcombine.high %v7542_v30, %v7542_v30 }
 0x5e4   :  { %v16999_v2 = vadd.f32 %v4450_v31, %v4449_v41  ;;  %v17011_v14 = vrot.slane %v7542_v30, %v14817_v48  ;;  %v17014_v10 = vsel %vm18971_vm10, %v4719_v12, 0.0  ;;  %v4682_v31 = vsel %vm18972_vm2, %v16198_v16, 0.0  ;;  %vm18994_vm10 = vmmov %vm18640_vm0 }
 0x5e5   :  { %v8521_v25 = vcombine.high %v8519_v27, %v8519_v27  ;;  %v8535_v41 = vrot.slane %v8519_v27, %v14817_v48  ;;  %v8542_v50 = vrot.slane %v8520_v61, %v14817_v48  ;;  %v8550_v59 = vcombine.high %v8528_v42, %v8528_v42  ;;  %v17030_v27 = vpop.f32.mrb[41].mxu1  ;;  %vm18995_vm2 = vmmov %vm18640_vm0 }
 0x5e6   :  { %v17021_v8 = vrot.slane %v7543_v33, %v14817_v48  ;;  %v9190_v9 = vrot.slane %v8528_v42, %v14974_v22  ;;  %v17024_v29 = vadd.f32 %v4682_v31, %v4681_v52  ;;  %v4717_v30 = vmul.f32 %v16198_v16, %v16198_v16 }
 0x5e7   :  { %v8549_v12 = vrot.slane %v8521_v25, %v14817_v48  ;;  %v8551_v58 = vcombine.high %v8535_v41, %v8535_v41  ;;  %v8552_v56 = vcombine.high %v8542_v50, %v8542_v50  ;;  %v9194_v0 = vrot.slane %v8542_v50, %v14974_v22 }
 0x5e8   :  { %v9198_v61 = vrot.slane %v8550_v59, %v14974_v22  ;;  %v9206_v33 = vrot.slane %v8535_v41, %v14974_v22  ;;  %v9683_v42 = vsel %vm4767_vm13, %v16881_v47, %v9190_v9  ;;  %v4735_v52 = vadd.f32 %v16870_v1, %v16793_v13 }
 0x5e9   :  { %v8553_v31 = vcombine.high %v8549_v12, %v8549_v12  ;;  %v9202_v37 = vrot.slane %v8552_v56, %v14974_v22  ;;  %v9210_v25 = vrot.slane %v8549_v12, %v14974_v22  ;;  %v9214_v20 = vrot.slane %v8551_v58, %v14974_v22 }
 0x5ea   :  { %v9684_v50 = vsel %vm4767_vm13, %v16892_v44, %v9194_v0  ;;  %v9685_v59 = vsel %vm4767_vm13, %v7622_v34, %v9198_v61  ;;  %v9687_v41 = vsel %vm4767_vm13, %v16889_v36, %v9206_v33  ;;  %v4736_v13 = vsel %vm18973_vm9, %v4717_v30, 0.0  ;;  %vm18996_vm9 = vmmov %vm18640_vm0 }
 0x5eb   :  { %v9218_v1 = vrot.slane %v8553_v31, %v14974_v22  ;;  %v9686_v56 = vsel %vm4767_vm13, %v7624_v63, %v9202_v37  ;;  %v9688_v0 = vsel %vm4767_vm13, %v16901_v40, %v9210_v25  ;;  %v9689_v47 = vsel %vm4767_vm13, %v7623_v23, %v9214_v20 }
 0x5ec   :  { %v10461_v34 = vcombine.low %v9683_v42, %v9684_v50  ;;  %v10462_v58 = vcombine.low %v9685_v59, %v9686_v56  ;;  %v10478_v9 = vcombine.low %v9687_v41, %v9688_v0  ;;  %v17061_v12 = vadd.f32 %v4736_v13, %v4735_v52 }
 0x5ed   :  { %v7573_v30 = vcombine.high %v17006_v11, %v17006_v11  ;;  %v18974_v44 = vcombine.high %v16901_v40, %v16901_v40  ;;  %v8407_v37 = vcombine.high %v16198_v16, %v16198_v16  ;;  %v8414_v36 = vrot.slane %v16198_v16, %v14817_v48 }
 0x5ee   :  { %v17074_v23 = vrot.slane %v7544_v24, %v14817_v48  ;;  %v10469_v20 = vrot.slane %v10461_v34, %v14982_v26  ;;  %v10476_v61 = vrot.slane %v10462_v58, %v14982_v26  ;;  %v10486_v42 = vrot.slane %v10478_v9, %v14982_v26 }
 0x5ef   :  { %v9690_v63 = vsel %vm4767_vm13, %v18974_v44, %v9218_v1  ;;  %v8421_v40 = vrot.slane %v8407_v37, %v14817_v48  ;;  %v8422_v52 = vcombine.high %v8414_v36, %v8414_v36  ;;  %v8430_v31 = vrot.slane %v8414_v36, %v14817_v48  ;;  %v17098_v37 = vpop.f32.mrb[42].mxu1 }
 0x5f0   :  { %v10479_v33 = vcombine.low %v9689_v47, %v9690_v63  ;;  %v10477_v25 = vcombine.low %v10469_v20, %v10476_v61  ;;  %v8554_v16 = vcombine.high %v16268_v57, %v16268_v57  ;;  %v8561_v24 = vrot.slane %v16268_v57, %v14817_v48 }
 0x5f1   :  { %v8423_v59 = vcombine.high %v8421_v40, %v8421_v40  ;;  %v8437_v41 = vrot.slane %v8421_v40, %v14817_v48  ;;  %v8444_v13 = vrot.slane %v8422_v52, %v14817_v48  ;;  %v8452_v1 = vcombine.high %v8430_v31, %v8430_v31 }
 0x5f2   :  { %v10493_v50 = vrot.slane %v10479_v33, %v14982_v26  ;;  %v7574_v56 = vcombine.high %v17011_v14, %v17011_v14  ;;  %11197 = vst.msk [vmem:[%s18052_s3 + $0xd0] sm:$0xff] %vm18975_vm11, %v10477_v25  ;;  %v9126_v47 = vrot.slane %v8430_v31, %v14974_v22  ;;  %v8568_v34 = vrot.slane %v8554_v16, %v14817_v48  ;;  %vm18997_vm11 = vmmov %vm18640_vm0 }
 0x5f3   :  { %v8451_v58 = vrot.slane %v8423_v59, %v14817_v48  ;;  %v8453_v9 = vcombine.high %v8437_v41, %v8437_v41  ;;  %v8454_v44 = vcombine.high %v8444_v13, %v8444_v13  ;;  %v9130_v63 = vrot.slane %v8444_v13, %v14974_v22 }
 0x5f4   :  { %v10494_v0 = vcombine.low %v10486_v42, %v10493_v50  ;;  %v9134_v36 = vrot.slane %v8452_v1, %v14974_v22  ;;  %v9142_v20 = vrot.slane %v8437_v41, %v14974_v22  ;;  %v9667_v61 = vsel %vm4767_vm13, %v16920_v51, %v9126_v47 }
 0x5f5   :  { %v8569_v33 = vcombine.high %v8561_v24, %v8561_v24  ;;  %v8455_v42 = vcombine.high %v8451_v58, %v8451_v58  ;;  %v9138_v40 = vrot.slane %v8454_v44, %v14974_v22  ;;  %v9146_v52 = vrot.slane %v8451_v58, %v14974_v22 }
 0x5f6   :  { %11198 = vst.msk [vmem:[%s18052_s3 + $0xd8] sm:$0xff] %vm18976_vm12, %v10494_v0  ;;  %v9150_v31 = vrot.slane %v8453_v9, %v14974_v22  ;;  %v9668_v25 = vsel %vm4767_vm13, %v16940_v39, %v9130_v63  ;;  %v18977_v50 = vcombine.high %v16920_v51, %v16920_v51  ;;  %v9671_v59 = vsel %vm4767_vm13, %v16937_v15, %v9142_v20  ;;  %vm18998_vm12 = vmmov %vm18640_vm0 }
 0x5f7   :  { %v8570_v41 = vcombine.high %v8568_v34, %v8568_v34  ;;  %v9154_v13 = vrot.slane %v8455_v42, %v14974_v22  ;;  %v18978_v1 = vcombine.high %v16940_v39, %v16940_v39  ;;  %v9672_v47 = vsel %vm4767_vm13, %v16960_v62, %v9146_v52 }
 0x5f8   :  { %v9669_v16 = vsel %vm4767_vm13, %v18977_v50, %v9134_v36  ;;  %v18979_v58 = vcombine.high %v16937_v15, %v16937_v15  ;;  %v10325_v9 = vcombine.low %v9667_v61, %v9668_v25  ;;  %v10342_v63 = vcombine.low %v9671_v59, %v9672_v47 }
 0x5f9   :  { %v9670_v0 = vsel %vm4767_vm13, %v18978_v1, %v9138_v40  ;;  %v8577_v36 = vrot.slane %v8561_v24, %v14817_v48  ;;  %v18980_v20 = vcombine.high %v16960_v62, %v16960_v62  ;;  %v8584_v42 = vrot.slane %v8568_v34, %v14817_v48  ;;  %v17144_v1 = vpop.f32.mrb[43].mxu1 }
 0x5fa   :  { %v9673_v51 = vsel %vm4767_vm13, %v18979_v58, %v9150_v31  ;;  %v10326_v44 = vcombine.low %v9669_v16, %v9670_v0  ;;  %v8591_v40 = vrot.slane %v8569_v33, %v14817_v48  ;;  %v8598_v52 = vrot.slane %v8570_v41, %v14817_v48 }
 0x5fb   :  { %v9674_v39 = vsel %vm4767_vm13, %v18980_v20, %v9154_v13  ;;  %v10333_v15 = vrot.slane %v10325_v9, %v14982_v26  ;;  %v10350_v25 = vrot.slane %v10342_v63, %v14982_v26  ;;  %v8599_v50 = vcombine.high %v8577_v36, %v8577_v36 }
 0x5fc   :  { %v10340_v31 = vrot.slane %v10326_v44, %v14982_v26  ;;  %v10343_v61 = vcombine.low %v9673_v51, %v9674_v39  ;;  %v8600_v24 = vcombine.high %v8584_v42, %v8584_v42  ;;  %v8601_v16 = vcombine.high %v8591_v40, %v8591_v40 }
 0x5fd   :  { %v8602_v59 = vcombine.high %v8598_v52, %v8598_v52  ;;  %v9222_v34 = vrot.slane %v8577_v36, %v14974_v22  ;;  %v9226_v33 = vrot.slane %v8591_v40, %v14974_v22  ;;  %v9230_v41 = vrot.slane %v8599_v50, %v14974_v22 }
 0x5fe   :  { %v10341_v62 = vcombine.low %v10333_v15, %v10340_v31  ;;  %v10357_v13 = vrot.slane %v10343_v61, %v14982_v26  ;;  %v9234_v0 = vrot.slane %v8601_v16, %v14974_v22  ;;  %v9238_v47 = vrot.slane %v8584_v42, %v14974_v22 }
 0x5ff   :  { %v9242_v58 = vrot.slane %v8598_v52, %v14974_v22  ;;  %v9246_v9 = vrot.slane %v8600_v24, %v14974_v22  ;;  %v9250_v44 = vrot.slane %v8602_v59, %v14974_v22  ;;  %v9691_v63 = vsel %vm4767_vm13, %v16926_v28, %v9222_v34 }
 0x600   :  { %v10358_v51 = vcombine.low %v10350_v25, %v10357_v13  ;;  %11189 = vst.msk [vmem:[%s18052_s3 + $0x90] sm:$0xff] %vm18640_vm0, %v10341_v62  ;;  %v9692_v36 = vsel %vm4767_vm13, %v16953_v49, %v9226_v33  ;;  %v18981_v20 = vcombine.high %v16926_v28, %v16926_v28  ;;  %v18982_v42 = vcombine.high %v16953_v49, %v16953_v49 }
 0x601   :  { %v9695_v52 = vsel %vm4767_vm13, %v16943_v54, %v9238_v47  ;;  %v9696_v15 = vsel %vm4767_vm13, %v16969_v53, %v9242_v58  ;;  %v18984_v28 = vcombine.high %v16943_v54, %v16943_v54  ;;  %v18985_v49 = vcombine.high %v16969_v53, %v16969_v53 }
 0x602   :  { %v9693_v39 = vsel %vm4767_vm13, %v18981_v20, %v9230_v41  ;;  %v9694_v40 = vsel %vm4767_vm13, %v18982_v42, %v9234_v0  ;;  %11190 = vst.msk [vmem:[%s18052_s3 + $0x98] sm:$0xff] %vm18983_vm8, %v10358_v51  ;;  %v10529_v25 = vcombine.low %v9691_v63, %v9692_v36  ;;  %v10546_v24 = vcombine.low %v9695_v52, %v9696_v15  ;;  %vm18999_vm8 = vmmov %vm18640_vm0 }
 0x603   :  { %v9697_v31 = vsel %vm4767_vm13, %v18984_v28, %v9246_v9  ;;  %v9698_v61 = vsel %vm4767_vm13, %v18985_v49, %v9250_v44  ;;  %v10530_v50 = vcombine.low %v9693_v39, %v9694_v40  ;;  %v4684_v59 = vsel %vm18986_vm15, %v16325_v43, 0.0  ;;  %vm19000_vm15 = vmmov %vm18640_vm0 }
 0x604   :  { %v10547_v16 = vcombine.low %v9697_v31, %v9698_v61  ;;  %v10537_v62 = vrot.slane %v10529_v25, %v14982_v26  ;;  %v4685_v13 = vadd.f32 %v4684_v59, %v17024_v29  ;;  %v4718_v54 = vmul.f32 %v16325_v43, %v16325_v43 }
 0x605   :  { %v8456_v34 = vcombine.high %v16325_v43, %v16325_v43  ;;  %v10544_v53 = vrot.slane %v10530_v50, %v14982_v26  ;;  %v10554_v33 = vrot.slane %v10546_v24, %v14982_v26  ;;  %v8463_v0 = vrot.slane %v16325_v43, %v14817_v48 }
 0x606   :  { %v10561_v41 = vrot.slane %v10547_v16, %v14982_v26  ;;  %v7575_v47 = vcombine.high %v17021_v8, %v17021_v8  ;;  %v17200_v29 = vadd.f32 %v17003_v5, %v4685_v13  ;;  %v4738_v58 = vsel %vm18987_vm3, %v4718_v54, 0.0  ;;  %vm19001_vm3 = vmmov %vm18640_vm0 }
 0x607   :  { %v8470_v51 = vrot.slane %v8456_v34, %v14817_v48  ;;  %v10545_v9 = vcombine.low %v10537_v62, %v10544_v53  ;;  %v4739_v63 = vadd.f32 %v4738_v58, %v17061_v12  ;;  %v8471_v36 = vcombine.high %v8463_v0, %v8463_v0 }
 0x608   :  { %v10562_v44 = vcombine.low %v10554_v33, %v10561_v41  ;;  %v7576_v20 = vcombine.high %v17074_v23, %v17074_v23  ;;  %v8479_v43 = vrot.slane %v8463_v0, %v14817_v48  ;;  %v4720_v5 = vmul.f32 %v16268_v57, %v16268_v57 }
 0x609   :  { %v8472_v39 = vcombine.high %v8470_v51, %v8470_v51  ;;  %v8486_v42 = vrot.slane %v8470_v51, %v14817_v48  ;;  %11201 = vst.msk [vmem:[%s18052_s3 + $0xf0] sm:$0xff] %vm18988_vm4, %v10545_v9  ;;  %v17220_v12 = vadd.f32 %v17014_v10, %v4739_v63  ;;  %v8493_v40 = vrot.slane %v8471_v36, %v14817_v48  ;;  %vm19002_vm4 = vmmov %vm18640_vm0 }
 0x60a   :  { %11202 = vst.msk [vmem:[%s18052_s3 + $0xf8] sm:$0xff] %vm18989_vm5, %v10562_v44  ;;  %v7773_v52 = vcombine.high %v16405_v21, %v16405_v21  ;;  %v8501_v28 = vcombine.high %v8479_v43, %v8479_v43  ;;  %v9158_v49 = vrot.slane %v8479_v43, %v14974_v22  ;;  %v7780_v10 = vrot.slane %v16405_v21, %v14817_v48  ;;  %vm19003_vm5 = vmmov %vm18640_vm0 }
 0x60b   :  { %v8500_v15 = vrot.slane %v8472_v39, %v14817_v48  ;;  %v8502_v31 = vcombine.high %v8486_v42, %v8486_v42  ;;  %v8503_v61 = vcombine.high %v8493_v40, %v8493_v40  ;;  %v9162_v25 = vrot.slane %v8493_v40, %v14974_v22 }
 0x60c   :  { %v9174_v50 = vrot.slane %v8486_v42, %v14974_v22  ;;  %v9166_v16 = vrot.slane %v8501_v28, %v14974_v22  ;;  %v9675_v54 = vsel %vm4767_vm13, %v17006_v11, %v9158_v49  ;;  %v7787_v44 = vrot.slane %v7773_v52, %v14817_v48 }
 0x60d   :  { %v8504_v24 = vcombine.high %v8500_v15, %v8500_v15  ;;  %v9178_v59 = vrot.slane %v8500_v15, %v14974_v22  ;;  %v9182_v62 = vrot.slane %v8502_v31, %v14974_v22  ;;  %v9170_v13 = vrot.slane %v8503_v61, %v14974_v22 }
 0x60e   :  { %v9676_v34 = vsel %vm4767_vm13, %v17021_v8, %v9162_v25  ;;  %v9679_v53 = vsel %vm4767_vm13, %v17011_v14, %v9174_v50  ;;  %v9677_v41 = vsel %vm4767_vm13, %v7573_v30, %v9166_v16  ;;  %v17256_v63 = vsel %vm18990_vm1, %v16268_v57, 0.0  ;;  %vm19005_vm1 = vmmov %vm18640_vm0 }
 0x60f   :  { %v9186_v33 = vrot.slane %v8504_v24, %v14974_v22  ;;  %v9680_v0 = vsel %vm4767_vm13, %v17074_v23, %v9178_v59  ;;  %v9681_v58 = vsel %vm4767_vm13, %v7574_v56, %v9182_v62  ;;  %v9678_v8 = vsel %vm4767_vm13, %v7575_v47, %v9170_v13 }
 0x610   :  { %v10393_v51 = vcombine.low %v9675_v54, %v9676_v34  ;;  %v10410_v9 = vcombine.low %v9679_v53, %v9680_v0  ;;  %v10394_v30 = vcombine.low %v9677_v41, %v9678_v8  ;;  %v4433_v23 = vmul.f32 %v16405_v21, %v16405_v21 }
 0x611   :  { %v9682_v11 = vsel %vm4767_vm13, %v7576_v20, %v9186_v33  ;;  %v17262_v14 = vsel %vm18991_vm14, %v4720_v5, 0.0  ;;  %v4404_v47 = vsel %vm18992_vm6, %v16405_v21, 0.0  ;;  %v7788_v36 = vcombine.high %v7780_v10, %v7780_v10  ;;  %vm19006_vm14 = vmmov %vm18640_vm0 }
 0x612   :  { %v10411_v56 = vcombine.low %v9681_v58, %v9682_v11  ;;  %v10401_v39 = vrot.slane %v10393_v51, %v14982_v26  ;;  %v10408_v43 = vrot.slane %v10394_v30, %v14982_v26  ;;  %v7789_v57 = vcombine.high %v7787_v44, %v7787_v44  ;;  %vm19007_vm6 = vmmov %vm18640_vm0 }
 0x613   :  { %v17269_v42 = vrot.slane %v7780_v10, %v14817_v48  ;;  %v10418_v20 = vrot.slane %v10410_v9, %v14982_v26  ;;  %v4399_v5 = vadd.f32 %v16947_v6, %v16971_v18  ;;  %v4400_v52 = vsel %vm18993_vm7, %v16430_v17, 0.0  ;;  %vm19009_vm7 = vmmov %vm18640_vm0 }
 0x614   :  { %v10425_v40 = vrot.slane %v10411_v56, %v14982_v26  ;;  %v10409_v21 = vcombine.low %v10401_v39, %v10408_v43  ;;  %v4458_v15 = vsel %vm18994_vm10, %v4433_v23, 0.0  ;;  %v17279_v28 = vrot.slane %v7787_v44, %v14817_v48  ;;  %vm19012_vm10 = vmmov %vm18640_vm0 }
 0x615   :  { %v4431_v31 = vmul.f32 %v16430_v17, %v16430_v17  ;;  %v17284_v61 = vrot.slane %v7788_v36, %v14817_v48  ;;  %v4401_v25 = vadd.f32 %v4400_v52, %v4399_v5  ;;  %v4453_v6 = vadd.f32 %v16950_v45, %v16999_v2 }
 0x616   :  { %v10426_v49 = vcombine.low %v10418_v20, %v10425_v40  ;;  %11193 = vst.msk [vmem:[%s18052_s3 + $0xb0] sm:$0xff] %vm18995_vm2, %v10409_v21  ;;  %v17293_v18 = vrot.slane %v7789_v57, %v14817_v48  ;;  %v7675_v10 = vcombine.high %v16430_v17, %v16430_v17  ;;  %v7682_v24 = vrot.slane %v16430_v17, %v14817_v48  ;;  %vm19013_vm2 = vmmov %vm18640_vm0 }
 0x617   :  { %v4454_v50 = vsel %vm18996_vm9, %v4431_v31, 0.0  ;;  %v7818_v45 = vcombine.high %v17269_v42, %v17269_v42  ;;  %v7822_v16 = vcombine.high %v16471_v35, %v16471_v35  ;;  %v7829_v59 = vrot.slane %v16471_v35, %v14817_v48  ;;  %vm19014_vm9 = vmmov %vm18640_vm0 }
 0x618   :  { %11194 = vst.msk [vmem:[%s18052_s3 + $0xb8] sm:$0xff] %vm18997_vm11, %v10426_v49  ;;  %v4455_v2 = vadd.f32 %v4454_v50, %v4453_v6  ;;  %v7819_v62 = vcombine.high %v17279_v28, %v17279_v28  ;;  %v7689_v17 = vrot.slane %v7675_v10, %v14817_v48  ;;  %v7690_v13 = vcombine.high %v7682_v24, %v7682_v24  ;;  %vm19015_vm11 = vmmov %vm18640_vm0 }
 0x619   :  { %v17314_v54 = vrot.slane %v7682_v24, %v14817_v48  ;;  %v7836_v34 = vrot.slane %v7822_v16, %v14817_v48  ;;  %v7837_v53 = vcombine.high %v7829_v59, %v7829_v59  ;;  %v17318_v33 = vrot.slane %v7829_v59, %v14817_v48 }
 0x61a   :  { %v4402_v41 = vsel %vm18998_vm12, %v16481_v32, 0.0  ;;  %v7820_v0 = vcombine.high %v17284_v61, %v17284_v61  ;;  %v7821_v58 = vcombine.high %v17293_v18, %v17293_v18  ;;  %v7691_v8 = vcombine.high %v7689_v17, %v7689_v17  ;;  %vm19017_vm12 = vmmov %vm18640_vm0 }
 0x61b   :  { %v17327_v51 = vrot.slane %v7689_v17, %v14817_v48  ;;  %v17330_v9 = vrot.slane %v7690_v13, %v14817_v48  ;;  %v17334_v44 = vsel %vm18640_vm0, %v16471_v35, 0.0  ;;  %v7838_v11 = vcombine.high %v7836_v34, %v7836_v34 }
 0x61c   :  { %v17337_v30 = vrot.slane %v7836_v34, %v14817_v48  ;;  %v7720_v23 = vcombine.high %v17314_v54, %v17314_v54  ;;  %v17343_v56 = vmul.f32 %v16471_v35, %v16471_v35  ;;  %v17346_v36 = vrot.slane %v7837_v53, %v14817_v48 }
 0x61d   :  { %v4403_v39 = vadd.f32 %v4402_v41, %v4401_v25  ;;  %v17349_v43 = vrot.slane %v7691_v8, %v14817_v48  ;;  %v7721_v57 = vcombine.high %v17327_v51, %v17327_v51  ;;  %v7867_v20 = vcombine.high %v17318_v33, %v17318_v33 }
 0x61e   :  { %v4432_v40 = vmul.f32 %v16481_v32, %v16481_v32  ;;  %v17358_v5 = vrot.slane %v7838_v11, %v14817_v48  ;;  %v7724_v52 = vcombine.high %v16481_v32, %v16481_v32  ;;  %v7731_v21 = vrot.slane %v16481_v32, %v14817_v48 }
 0x61f   :  { %v17360_v35 = vadd.f32 %v4404_v47, %v4403_v39  ;;  %v7722_v31 = vcombine.high %v17330_v9, %v17330_v9  ;;  %v4723_v6 = vmul.f32 %v16542_v3, %v16542_v3  ;;  %v7723_v32 = vcombine.high %v17349_v43, %v17349_v43 }
 0x620   :  { %v4456_v25 = vsel %vm18999_vm8, %v4432_v40, 0.0  ;;  %v7738_v10 = vrot.slane %v7724_v52, %v14817_v48  ;;  %v7739_v24 = vcombine.high %v7731_v21, %v7731_v21  ;;  %v8701_v16 = vcombine.high %v16542_v3, %v16542_v3  ;;  %vm19018_vm8 = vmmov %vm18640_vm0 }
 0x621   :  { %v4457_v50 = vadd.f32 %v4456_v25, %v4455_v2  ;;  %v8708_v59 = vrot.slane %v16542_v3, %v14817_v48  ;;  %v4689_v17 = vadd.f32 %v17256_v63, %v17200_v29  ;;  %v17389_v2 = vrot.slane %v7731_v21, %v14817_v48 }
 0x622   :  { %v17393_v53 = vsel %vm19000_vm15, %v16542_v3, 0.0  ;;  %v17396_v41 = vsel %vm19001_vm3, %v4723_v6, 0.0  ;;  %v8715_v8 = vrot.slane %v8701_v16, %v14817_v48  ;;  %v7740_v63 = vcombine.high %v7738_v10, %v7738_v10  ;;  %vm19019_vm15 = vmmov %vm18640_vm0 }
 0x623   :  { %v17386_v34 = vadd.f32 %v4458_v15, %v4457_v50  ;;  %v8716_v11 = vcombine.high %v8708_v59, %v8708_v59  ;;  %v8724_v29 = vrot.slane %v8708_v59, %v14817_v48  ;;  %v17401_v39 = vrot.slane %v7738_v10, %v14817_v48  ;;  %vm19020_vm3 = vmmov %vm18640_vm0 }
 0x624   :  { %v17404_v15 = vrot.slane %v7739_v24, %v14817_v48  ;;  %v4690_v40 = vsel %vm19002_vm4, %v16584_v60, 0.0  ;;  %v8717_v3 = vcombine.high %v8715_v8, %v8715_v8  ;;  %v8731_v52 = vrot.slane %v8715_v8, %v14817_v48  ;;  %vm19021_vm4 = vmmov %vm18640_vm0 }
 0x625   :  { %v8738_v21 = vrot.slane %v8716_v11, %v14817_v48  ;;  %v8746_v25 = vcombine.high %v8724_v29, %v8724_v29  ;;  %v9318_v50 = vrot.slane %v8724_v29, %v14974_v22  ;;  %v17413_v16 = vadd.f32 %v4690_v40, %v4689_v17 }
 0x626   :  { %v4721_v10 = vmul.f32 %v16584_v60, %v16584_v60  ;;  %v8745_v24 = vrot.slane %v8717_v3, %v14817_v48  ;;  %v8747_v59 = vcombine.high %v8731_v52, %v8731_v52  ;;  %v9334_v11 = vrot.slane %v8731_v52, %v14974_v22 }
 0x627   :  { %v8748_v13 = vcombine.high %v8738_v21, %v8738_v21  ;;  %v9322_v49 = vrot.slane %v8738_v21, %v14974_v22  ;;  %v9326_v8 = vrot.slane %v8746_v25, %v14974_v22  ;;  %v9715_v6 = vsel %vm4767_vm13, %v17269_v42, %v9318_v50 }
 0x628   :  { %v4743_v17 = vadd.f32 %v17262_v14, %v17220_v12  ;;  %v8749_v29 = vcombine.high %v8745_v24, %v8745_v24  ;;  %v9338_v47 = vrot.slane %v8745_v24, %v14974_v22  ;;  %v9342_v3 = vrot.slane %v8747_v59, %v14974_v22 }
 0x629   :  { %v9330_v40 = vrot.slane %v8748_v13, %v14974_v22  ;;  %v9716_v21 = vsel %vm4767_vm13, %v17284_v61, %v9322_v49  ;;  %v9717_v52 = vsel %vm4767_vm13, %v7818_v45, %v9326_v8  ;;  %v9719_v25 = vsel %vm4767_vm13, %v17279_v28, %v9334_v11 }
 0x62a   :  { %v4744_v12 = vsel %vm19003_vm5, %v4721_v10, 0.0  ;;  %v9346_v14 = vrot.slane %v8749_v29, %v14974_v22  ;;  %v9720_v49 = vsel %vm4767_vm13, %v17293_v18, %v9338_v47  ;;  %v9721_v42 = vsel %vm4767_vm13, %v7819_v62, %v9342_v3  ;;  %vm19022_vm5 = vmmov %vm18640_vm0 }
 0x62b   :  { %v9718_v13 = vsel %vm4767_vm13, %v7820_v0, %v9330_v40  ;;  %v10733_v45 = vcombine.low %v9715_v6, %v9716_v21  ;;  %v10750_v24 = vcombine.low %v9719_v25, %v9720_v49  ;;  %v17448_v59 = vadd.f32 %v4744_v12, %v4743_v17  ;;  %v19004_v40 = vld [vmem:[#allocation64_spill] sm:$0xff] }
 0x62c   :  { %v10734_v50 = vcombine.low %v9717_v52, %v9718_v13  ;;  %v17451_v10 = vrot.slane %v7740_v63, %v14817_v48  ;;  %v9722_v61 = vsel %vm4767_vm13, %v7821_v58, %v9346_v14  ;;  %v8603_v0 = vcombine.high %v16584_v60, %v16584_v60 }
 0x62d   :  { %v8610_v28 = vrot.slane %v16584_v60, %v14817_v48  ;;  %v7770_v62 = vcombine.high %v17401_v39, %v17401_v39  ;;  %v10741_v47 = vrot.slane %v10733_v45, %v14982_v26  ;;  %v10751_v63 = vcombine.low %v9721_v42, %v9722_v61 }
 0x62e   :  { %v10748_v6 = vrot.slane %v10734_v50, %v14982_v26  ;;  %v10758_v8 = vrot.slane %v10750_v24, %v14982_v26  ;;  %v8617_v18 = vrot.slane %v8603_v0, %v14817_v48  ;;  %v8750_v60 = vcombine.high %v19004_v40, %v19004_v40 }
 0x62f   :  { %v8618_v11 = vcombine.high %v8610_v28, %v8610_v28  ;;  %v8626_v58 = vrot.slane %v8610_v28, %v14817_v48  ;;  %v10765_v29 = vrot.slane %v10751_v63, %v14982_v26  ;;  %v8757_v3 = vrot.slane %v19004_v40, %v14817_v48 }
 0x630   :  { %v10749_v17 = vcombine.low %v10741_v47, %v10748_v6  ;;  %v8619_v21 = vcombine.high %v8617_v18, %v8617_v18  ;;  %v8633_v52 = vrot.slane %v8617_v18, %v14817_v48  ;;  %v7771_v14 = vcombine.high %v17404_v15, %v17404_v15 }
 0x631   :  { %v8640_v25 = vrot.slane %v8618_v11, %v14817_v48  ;;  %v8648_v12 = vcombine.high %v8626_v58, %v8626_v58  ;;  %v10766_v13 = vcombine.low %v10758_v8, %v10765_v29  ;;  %v9254_v49 = vrot.slane %v8626_v58, %v14974_v22 }
 0x632   :  { %11213 = vst.msk [vmem:[%s18052_s3 + $0x150] sm:$0xff] %vm19005_vm1, %v10749_v17  ;;  %v8764_v42 = vrot.slane %v8750_v60, %v14817_v48  ;;  %v8647_v45 = vrot.slane %v8619_v21, %v14817_v48  ;;  %v8649_v50 = vcombine.high %v8633_v52, %v8633_v52  ;;  %v9270_v28 = vrot.slane %v8633_v52, %v14974_v22  ;;  %vm19023_vm1 = vmmov %vm18640_vm0 }
 0x633   :  { %v8650_v24 = vcombine.high %v8640_v25, %v8640_v25  ;;  %v9258_v61 = vrot.slane %v8640_v25, %v14974_v22  ;;  %11214 = vst.msk [vmem:[%s18052_s3 + $0x158] sm:$0xff] %vm19006_vm14, %v10766_v13  ;;  %v9262_v0 = vrot.slane %v8648_v12, %v14974_v22  ;;  %v9699_v47 = vsel %vm4767_vm13, %v17314_v54, %v9254_v49  ;;  %vm19026_vm14 = vmmov %vm18640_vm0 }
 0x634   :  { %v8765_v6 = vcombine.high %v8757_v3, %v8757_v3  ;;  %v8651_v63 = vcombine.high %v8647_v45, %v8647_v45  ;;  %v9274_v18 = vrot.slane %v8647_v45, %v14974_v22  ;;  %v9278_v11 = vrot.slane %v8649_v50, %v14974_v22 }
 0x635   :  { %v9266_v8 = vrot.slane %v8650_v24, %v14974_v22  ;;  %v9700_v58 = vsel %vm4767_vm13, %v17330_v9, %v9258_v61  ;;  %v9701_v17 = vsel %vm4767_vm13, %v7720_v23, %v9262_v0  ;;  %v9703_v29 = vsel %vm4767_vm13, %v17327_v51, %v9270_v28 }
 0x636   :  { %v8766_v60 = vcombine.high %v8764_v42, %v8764_v42  ;;  %v9282_v21 = vrot.slane %v8651_v63, %v14974_v22  ;;  %v9704_v25 = vsel %vm4767_vm13, %v17349_v43, %v9274_v18  ;;  %v9705_v54 = vsel %vm4767_vm13, %v7721_v57, %v9278_v11 }
 0x637   :  { %v9702_v52 = vsel %vm4767_vm13, %v7722_v31, %v9266_v8  ;;  %v10597_v23 = vcombine.low %v9699_v47, %v9700_v58  ;;  %v10614_v13 = vcombine.low %v9703_v29, %v9704_v25  ;;  %v8773_v49 = vrot.slane %v8757_v3, %v14817_v48 }
 0x638   :  { %v10598_v12 = vcombine.low %v9701_v17, %v9702_v52  ;;  %v9706_v9 = vsel %vm4767_vm13, %v7723_v32, %v9282_v21  ;;  %v8780_v31 = vrot.slane %v8764_v42, %v14817_v48  ;;  %v8787_v45 = vrot.slane %v8765_v6, %v14817_v48 }
 0x639   :  { %v8794_v50 = vrot.slane %v8766_v60, %v14817_v48  ;;  %v10605_v51 = vrot.slane %v10597_v23, %v14982_v26  ;;  %v10615_v24 = vcombine.low %v9705_v54, %v9706_v9  ;;  %v10622_v61 = vrot.slane %v10614_v13, %v14982_v26 }
 0x63a   :  { %v10612_v57 = vrot.slane %v10598_v12, %v14982_v26  ;;  %v8795_v0 = vcombine.high %v8773_v49, %v8773_v49  ;;  %v8796_v3 = vcombine.high %v8780_v31, %v8780_v31  ;;  %v8797_v28 = vcombine.high %v8787_v45, %v8787_v45 }
 0x63b   :  { %v8798_v47 = vcombine.high %v8794_v50, %v8794_v50  ;;  %v10629_v32 = vrot.slane %v10615_v24, %v14982_v26  ;;  %v9350_v42 = vrot.slane %v8773_v49, %v14974_v22  ;;  %v9354_v6 = vrot.slane %v8787_v45, %v14974_v22 }
 0x63c   :  { %v10613_v43 = vcombine.low %v10605_v51, %v10612_v57  ;;  %v9358_v63 = vrot.slane %v8795_v0, %v14974_v22  ;;  %v9362_v8 = vrot.slane %v8797_v28, %v14974_v22  ;;  %v9366_v18 = vrot.slane %v8780_v31, %v14974_v22 }
 0x63d   :  { %v9370_v11 = vrot.slane %v8794_v50, %v14974_v22  ;;  %v10630_v58 = vcombine.low %v10622_v61, %v10629_v32  ;;  %v9374_v17 = vrot.slane %v8796_v3, %v14974_v22  ;;  %v9378_v29 = vrot.slane %v8798_v47, %v14974_v22 }
 0x63e   :  { %11205 = vst.msk [vmem:[%s18052_s3 + $0x110] sm:$0xff] %vm19007_vm6, %v10613_v43  ;;  %v9723_v60 = vsel %vm4767_vm13, %v17318_v33, %v9350_v42  ;;  %v9724_v21 = vsel %vm4767_vm13, %v17346_v36, %v9354_v6  ;;  %v9725_v52 = vsel %vm4767_vm13, %v7867_v20, %v9358_v63  ;;  %v19008_v25 = vcombine.high %v17346_v36, %v17346_v36  ;;  %vm19027_vm6 = vmmov %vm18640_vm0 }
 0x63f   :  { %v9727_v23 = vsel %vm4767_vm13, %v17337_v30, %v9366_v18  ;;  %11206 = vst.msk [vmem:[%s18052_s3 + $0x118] sm:$0xff] %vm19009_vm7, %v10630_v58  ;;  %v9728_v12 = vsel %vm4767_vm13, %v17358_v5, %v9370_v11  ;;  %v19010_v33 = vcombine.high %v17337_v30, %v17337_v30  ;;  %v19011_v36 = vcombine.high %v17358_v5, %v17358_v5  ;;  %vm19028_vm7 = vmmov %vm18640_vm0 }
 0x640   :  { %v9726_v54 = vsel %vm4767_vm13, %v19008_v25, %v9362_v8  ;;  %v10801_v49 = vcombine.low %v9723_v60, %v9724_v21  ;;  %v10818_v31 = vcombine.low %v9727_v23, %v9728_v12  ;;  %v4692_v50 = vsel %vm19012_vm10, %v16707_v7, 0.0  ;;  %vm19034_vm10 = vmmov %vm18640_vm0 }
 0x641   :  { %v9729_v20 = vsel %vm4767_vm13, %v19010_v33, %v9374_v17  ;;  %v9730_v13 = vsel %vm4767_vm13, %v19011_v36, %v9378_v29  ;;  %v10802_v9 = vcombine.low %v9725_v52, %v9726_v54  ;;  %v4693_v57 = vadd.f32 %v4692_v50, %v17413_v16 }
 0x642   :  { %v10819_v45 = vcombine.low %v9729_v20, %v9730_v13  ;;  %v10809_v51 = vrot.slane %v10801_v49, %v14982_v26  ;;  %v4722_v30 = vmul.f32 %v16707_v7, %v16707_v7  ;;  %v8652_v24 = vcombine.high %v16707_v7, %v16707_v7 }
 0x643   :  { %v10816_v5 = vrot.slane %v10802_v9, %v14982_v26  ;;  %v10826_v61 = vrot.slane %v10818_v31, %v14982_v26  ;;  %v8659_v3 = vrot.slane %v16707_v7, %v14817_v48  ;;  %v7772_v28 = vcombine.high %v17451_v10, %v17451_v10 }
 0x644   :  { %v10833_v0 = vrot.slane %v10819_v45, %v14982_v26  ;;  %v17583_v16 = vadd.f32 %v17393_v53, %v4693_v57  ;;  %v4746_v47 = vsel %vm19013_vm2, %v4722_v30, 0.0  ;;  %v8666_v43 = vrot.slane %v8652_v24, %v14817_v48  ;;  %vm19036_vm2 = vmmov %vm18640_vm0 }
 0x645   :  { %v10817_v32 = vcombine.low %v10809_v51, %v10816_v5  ;;  %v4747_v6 = vadd.f32 %v4746_v47, %v17448_v59  ;;  %v8667_v63 = vcombine.high %v8659_v3, %v8659_v3  ;;  %v4724_v8 = vmul.f32 %v19004_v40, %v19004_v40 }
 0x646   :  { %v10834_v42 = vcombine.low %v10826_v61, %v10833_v0  ;;  %v8668_v18 = vcombine.high %v8666_v43, %v8666_v43  ;;  %v8675_v7 = vrot.slane %v8659_v3, %v14817_v48  ;;  %v8682_v11 = vrot.slane %v8666_v43, %v14817_v48 }
 0x647   :  { %11217 = vst.msk [vmem:[%s18052_s3 + $0x170] sm:$0xff] %vm19014_vm9, %v10817_v32  ;;  %v17601_v53 = vadd.f32 %v17396_v41, %v4747_v6  ;;  %v8689_v59 = vrot.slane %v8667_v63, %v14817_v48  ;;  %v4437_v58 = vmul.f32 %v16797_v46, %v16797_v46  ;;  %v7969_v17 = vcombine.high %v16797_v46, %v16797_v46  ;;  %vm19037_vm9 = vmmov %vm18640_vm0 }
 0x648   :  { %11218 = vst.msk [vmem:[%s18052_s3 + $0x178] sm:$0xff] %vm19015_vm11, %v10834_v42  ;;  %v8696_v29 = vrot.slane %v8668_v18, %v14817_v48  ;;  %v8697_v60 = vcombine.high %v8675_v7, %v8675_v7  ;;  %v8698_v21 = vcombine.high %v8682_v11, %v8682_v11  ;;  %v9286_v52 = vrot.slane %v8675_v7, %v14974_v22  ;;  %vm19040_vm11 = vmmov %vm18640_vm0 }
 0x649   :  { %v8699_v25 = vcombine.high %v8689_v59, %v8689_v59  ;;  %v9290_v54 = vrot.slane %v8689_v59, %v14974_v22  ;;  %v9302_v41 = vrot.slane %v8682_v11, %v14974_v22  ;;  %v7976_v23 = vrot.slane %v16797_v46, %v14817_v48 }
 0x64a   :  { %v8700_v12 = vcombine.high %v8696_v29, %v8696_v29  ;;  %v9294_v33 = vrot.slane %v8697_v60, %v14974_v22  ;;  %v9306_v20 = vrot.slane %v8696_v29, %v14974_v22  ;;  %v9310_v36 = vrot.slane %v8698_v21, %v14974_v22 }
 0x64b   :  { %v9298_v13 = vrot.slane %v8699_v25, %v14974_v22  ;;  %v9707_v49 = vsel %vm4767_vm13, %v17389_v2, %v9286_v52  ;;  %v9708_v9 = vsel %vm4767_vm13, %v17404_v15, %v9290_v54  ;;  %v9711_v31 = vsel %vm4767_vm13, %v17401_v39, %v9302_v41  ;;  %v19024_v41 = vld [vmem:[#allocation77_spill] sm:$0xff] }
 0x64c   :  { %v9314_v45 = vrot.slane %v8700_v12, %v14974_v22  ;;  %v19016_v50 = vcombine.high %v17389_v2, %v17389_v2  ;;  %v9712_v57 = vsel %vm4767_vm13, %v17451_v10, %v9306_v20  ;;  %v9713_v30 = vsel %vm4767_vm13, %v7770_v62, %v9310_v36 }
 0x64d   :  { %v9710_v24 = vsel %vm4767_vm13, %v7771_v14, %v9298_v13  ;;  %v10665_v5 = vcombine.low %v9707_v49, %v9708_v9  ;;  %v10682_v61 = vcombine.low %v9711_v31, %v9712_v57  ;;  %v7983_v0 = vrot.slane %v7969_v17, %v14817_v48 }
 0x64e   :  { %v9709_v51 = vsel %vm4767_vm13, %v19016_v50, %v9294_v33  ;;  %v9714_v2 = vsel %vm4767_vm13, %v7772_v28, %v9314_v45  ;;  %v7984_v47 = vcombine.high %v7976_v23, %v7976_v23  ;;  %v17642_v10 = vrot.slane %v7976_v23, %v14817_v48  ;;  %v19025_v23 = vld [vmem:[#allocation45_spill] sm:$0xff] }
 0x64f   :  { %v10666_v3 = vcombine.low %v9709_v51, %v9710_v24  ;;  %v4460_v39 = vsel %vm19017_vm12, %v17343_v56, 0.0  ;;  %v17648_v62 = vsel %vm18640_vm0, %v19004_v40, 0.0  ;;  %v10683_v15 = vcombine.low %v9713_v30, %v9714_v2  ;;  %vm19041_vm12 = vmmov %vm18640_vm0 }
 0x650   :  { %v7985_v14 = vcombine.high %v7983_v0, %v7983_v0  ;;  %v17651_v43 = vsel %vm19018_vm8, %v4724_v8, 0.0  ;;  %v10673_v32 = vrot.slane %v10665_v5, %v14982_v26  ;;  %v17657_v42 = vsel %vm19019_vm15, %v16797_v46, 0.0  ;;  %vm19042_vm8 = vmmov %vm18640_vm0 }
 0x651   :  { %v10680_v28 = vrot.slane %v10666_v3, %v14982_v26  ;;  %v10690_v6 = vrot.slane %v10682_v61, %v14982_v26  ;;  %v10697_v56 = vrot.slane %v10683_v15, %v14982_v26  ;;  %v17662_v40 = vsel %vm19020_vm3, %v4437_v58, 0.0  ;;  %vm19043_vm15 = vmmov %vm18640_vm0 }
 0x652   :  { %v17665_v63 = vrot.slane %v7983_v0, %v14817_v48  ;;  %v17668_v18 = vrot.slane %v7984_v47, %v14817_v48  ;;  %v8014_v7 = vcombine.high %v17642_v10, %v17642_v10  ;;  %v7871_v46 = vcombine.high %v16822_v19, %v16822_v19  ;;  %v19029_v0 = vld [vmem:[#allocation28_spill] sm:$0xff]  ;;  %vm19044_vm3 = vmmov %vm18640_vm0 }
 0x653   :  { %v10681_v8 = vcombine.low %v10673_v32, %v10680_v28  ;;  %v10698_v11 = vcombine.low %v10690_v6, %v10697_v56  ;;  %v17675_v59 = vrot.slane %v7985_v14, %v14817_v48  ;;  %v4408_v58 = vsel %vm19021_vm4, %v16822_v19, 0.0  ;;  %v19031_v14 = vld [vmem:[#allocation32_spill] sm:$0xff]  ;;  %v19032_v56 = vld [vmem:[#allocation51_spill] sm:$0xff]  ;;  %vm19047_vm4 = vmmov %vm18640_vm0 }
 0x654   :  { %v7878_v17 = vrot.slane %v16822_v19, %v14817_v48  ;;  %v4435_v29 = vmul.f32 %v16822_v19, %v16822_v19  ;;  %v7885_v60 = vrot.slane %v7871_v46, %v14817_v48  ;;  %v4438_v21 = vmul.f32 %v16872_v38, %v16872_v38 }
 0x655   :  { %11209 = vst.msk [vmem:[%s18052_s3 + $0x130] sm:$0xff] %vm19022_vm5, %v10681_v8  ;;  %v8018_v52 = vcombine.high %v16872_v38, %v16872_v38  ;;  %v8025_v19 = vrot.slane %v16872_v38, %v14817_v48  ;;  %v3460_v12 = vadd.f32 %v19025_v23, %v19024_v41  ;;  %v8015_v33 = vcombine.high %v17665_v63, %v17665_v63  ;;  %vm19048_vm5 = vmmov %vm18640_vm0 }
 0x656   :  { %11210 = vst.msk [vmem:[%s18052_s3 + $0x138] sm:$0xff] %vm19023_vm1, %v10698_v11  ;;  %v7886_v25 = vcombine.high %v7878_v17, %v7878_v17  ;;  %v17697_v54 = vrot.slane %v7878_v17, %v14817_v48  ;;  %v7887_v20 = vcombine.high %v7885_v60, %v7885_v60  ;;  %v17706_v36 = vrot.slane %v7885_v60, %v14817_v48  ;;  %v19033_v11 = vld [vmem:[#allocation66_spill] sm:$0xff]  ;;  %vm19049_vm1 = vmmov %vm18640_vm0 }
 0x657   :  { %v8032_v13 = vrot.slane %v8018_v52, %v14817_v48  ;;  %v8016_v49 = vcombine.high %v17668_v18, %v17668_v18  ;;  %v8033_v31 = vcombine.high %v8025_v19, %v8025_v19  ;;  %v17715_v45 = vrot.slane %v8025_v19, %v14817_v48 }
 0x658   :  { %v17712_v9 = vrot.slane %v7886_v25, %v14817_v48  ;;  %v8017_v50 = vcombine.high %v17675_v59, %v17675_v59  ;;  %v4462_v51 = vsel %vm19026_vm14, %v4435_v29, 0.0  ;;  %v4414_v57 = vsel %vm19027_vm6, %v16872_v38, 0.0  ;;  %v19030_v38 = vld [vmem:[#allocation10_spill] sm:$0xff]  ;;  %vm19050_vm14 = vmmov %vm18640_vm0 }
 0x659   :  { %v4468_v30 = vsel %vm19028_vm7, %v4438_v21, 0.0  ;;  %v17724_v24 = vrot.slane %v7887_v20, %v14817_v48  ;;  %v7916_v5 = vcombine.high %v17697_v54, %v17697_v54  ;;  %v7917_v61 = vcombine.high %v17706_v36, %v17706_v36  ;;  %vm19051_vm6 = vmmov %vm18640_vm0 }
 0x65a   :  { %v3462_v2 = vadd.f32 %v19029_v0, %v3460_v12  ;;  %v7918_v3 = vcombine.high %v17712_v9, %v17712_v9  ;;  %v8034_v47 = vcombine.high %v8032_v13, %v8032_v13  ;;  %v17734_v15 = vrot.slane %v8032_v13, %v14817_v48  ;;  %vm19052_vm7 = vmmov %vm18640_vm0 }
 0x65b   :  { %v3514_v32 = vadd.f32 %v19031_v14, %v19030_v38  ;;  %v17739_v28 = vrot.slane %v8033_v31, %v14817_v48  ;;  %v8063_v6 = vcombine.high %v17715_v45, %v17715_v45  ;;  %v4407_v46 = vadd.f32 %v17334_v44, %v17360_v35  ;;  %v19035_v35 = vld [vmem:[#allocation17_spill] sm:$0xff] }
 0x65c   :  { %v3464_v8 = vadd.f32 %v19032_v56, %v3462_v2  ;;  %v4410_v29 = vsel %vm19034_vm10, %v16955_v4, 0.0  ;;  %v4436_v60 = vmul.f32 %v16955_v4, %v16955_v4  ;;  %v4461_v21 = vadd.f32 %v4460_v39, %v17386_v34  ;;  %vm19053_vm10 = vmmov %vm18640_vm0 }
 0x65d   :  { %v3516_v17 = vadd.f32 %v19033_v11, %v3514_v32  ;;  %v4409_v25 = vadd.f32 %v4408_v58, %v4407_v46  ;;  %v7920_v19 = vcombine.high %v16955_v4, %v16955_v4  ;;  %v7927_v41 = vrot.slane %v16955_v4, %v14817_v48 }
 0x65e   :  { %v3465_v52 = vrot.slane %v3464_v8, 4  ;;  %v17757_v44 = vrot.slane %v8034_v47, %v14817_v48  ;;  %v4463_v12 = vadd.f32 %v4462_v51, %v4461_v21  ;;  %v4464_v20 = vsel %vm19036_vm2, %v4436_v60, 0.0  ;;  %vm19056_vm2 = vmmov %vm18640_vm0 }
 0x65f   :  { %v3518_v23 = vadd.f32 %v19035_v35, %v3516_v17  ;;  %v7919_v13 = vcombine.high %v17724_v24, %v17724_v24  ;;  %v4411_v39 = vadd.f32 %v4410_v29, %v4409_v25  ;;  %v7934_v58 = vrot.slane %v7920_v19, %v14817_v48 }
 0x660   :  { %v3466_v34 = vadd.f32 %v3465_v52, %v3464_v8  ;;  %v4465_v4 = vadd.f32 %v4464_v20, %v4463_v12  ;;  %v7935_v2 = vcombine.high %v7927_v41, %v7927_v41  ;;  %v8065_v47 = vcombine.high %v17739_v28, %v17739_v28 }
 0x661   :  { %v3519_v0 = vrot.slane %v3518_v23, 4  ;;  %v4413_v51 = vadd.f32 %v17657_v42, %v4411_v39  ;;  %v17770_v14 = vrot.slane %v7927_v41, %v14817_v48  ;;  %v7936_v46 = vcombine.high %v7934_v58, %v7934_v58 }
 0x662   :  { %v3467_v38 = vrot.slane %v3466_v34, 2  ;;  %v4467_v8 = vadd.f32 %v17662_v40, %v4465_v4  ;;  %v17776_v29 = vrot.slane %v7934_v58, %v14817_v48  ;;  %v17780_v60 = vsel %vm19037_vm9, %v16957_v55, 0.0  ;;  %vm19057_vm9 = vmmov %vm18640_vm0 }
 0x663   :  { %v3520_v56 = vadd.f32 %v3519_v0, %v3518_v23  ;;  %v4415_v17 = vadd.f32 %v4414_v57, %v4413_v51  ;;  %v17783_v52 = vrot.slane %v7935_v2, %v14817_v48  ;;  %v17787_v25 = vmul.f32 %v16957_v55, %v16957_v55  ;;  %v19038_v51 = vld [vmem:[#allocation37_spill] sm:$0xff] }
 0x664   :  { %v3468_v11 = vadd.f32 %v3467_v38, %v3466_v34  ;;  %v4469_v21 = vadd.f32 %v4468_v30, %v4467_v8  ;;  %v8897_v41 = vcombine.high %v16957_v55, %v16957_v55  ;;  %v17794_v12 = vrot.slane %v7936_v46, %v14817_v48 }
 0x665   :  { %v3521_v42 = vrot.slane %v3520_v56, 2  ;;  %v4416_v19 = vrot.slane %v4415_v17, 4  ;;  %v8904_v30 = vrot.slane %v16957_v55, %v14817_v48 }
 0x666   :  { %v3469_v40 = vrot.slane %v3468_v11, 1  ;;  %v4470_v23 = vrot.slane %v4469_v21, 4  ;;  %v8911_v58 = vrot.slane %v8897_v41, %v14817_v48 }
 0x667   :  { %v3522_v35 = vadd.f32 %v3521_v42, %v3520_v56  ;;  %v4417_v34 = vadd.f32 %v4416_v19, %v4415_v17  ;;  %v8912_v2 = vcombine.high %v8904_v30, %v8904_v30  ;;  %v8920_v38 = vrot.slane %v8904_v30, %v14817_v48 }
 0x668   :  { %v3470_v20 = vadd.f32 %v3469_v40, %v3468_v11  ;;  %v4471_v4 = vadd.f32 %v4470_v23, %v4469_v21  ;;  %v8913_v46 = vcombine.high %v8911_v58, %v8911_v58  ;;  %v8927_v42 = vrot.slane %v8911_v58, %v14817_v48  ;;  %v19039_v23 = vld [vmem:[#allocation46_spill] sm:$0xff] }
 0x669   :  { %v3523_v0 = vrot.slane %v3522_v35, 1  ;;  %v4418_v8 = vrot.slane %v4417_v34, 2  ;;  %v8934_v11 = vrot.slane %v8912_v2, %v14817_v48  ;;  %v8942_v17 = vcombine.high %v8920_v38, %v8920_v38 }
 0x66a   :  { %v4128_v56 = vadd.f32 %v19038_v51, %v3470_v20  ;;  %v4472_v55 = vrot.slane %v4471_v4, 2  ;;  %v8941_v19 = vrot.slane %v8913_v46, %v14817_v48  ;;  %v8943_v41 = vcombine.high %v8927_v42, %v8927_v42 }
 0x66b   :  { %v3524_v57 = vadd.f32 %v3523_v0, %v3522_v35  ;;  %v4419_v40 = vadd.f32 %v4418_v8, %v4417_v34  ;;  %v9446_v21 = vrot.slane %v8920_v38, %v14974_v22  ;;  %v8944_v32 = vcombine.high %v8934_v11, %v8934_v11 }
 0x66c   :  { %v4473_v30 = vadd.f32 %v4472_v55, %v4471_v4  ;;  %v9450_v20 = vrot.slane %v8934_v11, %v14974_v22  ;;  %v8945_v31 = vcombine.high %v8941_v19, %v8941_v19  ;;  %v9454_v35 = vrot.slane %v8942_v17, %v14974_v22 }
 0x66d   :  { %v4182_v39 = vadd.f32 %v19039_v23, %v3524_v57  ;;  %v4420_v51 = vrot.slane %v4419_v40, 1  ;;  %v9462_v58 = vrot.slane %v8927_v42, %v14974_v22  ;;  %v9458_v34 = vrot.slane %v8944_v32, %v14974_v22 }
 0x66e   :  { %v4474_v0 = vrot.slane %v4473_v30, 1  ;;  %v9466_v2 = vrot.slane %v8941_v19, %v14974_v22  ;;  %v9470_v8 = vrot.slane %v8943_v41, %v14974_v22  ;;  %v9474_v57 = vrot.slane %v8945_v31, %v14974_v22 }
 0x66f   :  { %v4421_v38 = vadd.f32 %v4420_v51, %v4419_v40  ;;  %v9747_v4 = vsel %vm4767_vm13, %v17642_v10, %v9446_v21  ;;  %v9748_v46 = vsel %vm4767_vm13, %v17668_v18, %v9450_v20  ;;  %v9749_v42 = vsel %vm4767_vm13, %v8014_v7, %v9454_v35 }
 0x670   :  { %v4475_v55 = vadd.f32 %v4474_v0, %v4473_v30  ;;  %v9750_v32 = vsel %vm4767_vm13, %v8016_v49, %v9458_v34  ;;  %v9751_v31 = vsel %vm4767_vm13, %v17665_v63, %v9462_v58  ;;  %v9752_v17 = vsel %vm4767_vm13, %v17675_v59, %v9466_v2 }
 0x671   :  { %v17829_v11 = vadd.f32 %v4421_v38, %v4128_v56  ;;  %v9753_v10 = vsel %vm4767_vm13, %v8015_v33, %v9470_v8  ;;  %v9754_v18 = vsel %vm4767_vm13, %v8017_v50, %v9474_v57  ;;  %v11005_v49 = vcombine.low %v9747_v4, %v9748_v46 }
 0x672   :  { %v17841_v7 = vadd.f32 %v4475_v55, %v4182_v39  ;;  %v11006_v40 = vcombine.low %v9749_v42, %v9750_v32  ;;  %v11022_v19 = vcombine.low %v9751_v31, %v9752_v17  ;;  %v7967_v56 = vcombine.high %v17783_v52, %v17783_v52 }
 0x673   :  { %v11023_v41 = vcombine.low %v9753_v10, %v9754_v18  ;;  %v8799_v21 = vcombine.high %v17030_v27, %v17030_v27  ;;  %v8806_v63 = vrot.slane %v17030_v27, %v14817_v48  ;;  %v11013_v33 = vrot.slane %v11005_v49, %v14982_v26 }
 0x674   :  { %v11020_v59 = vrot.slane %v11006_v40, %v14982_v26  ;;  %v11030_v50 = vrot.slane %v11022_v19, %v14982_v26  ;;  %v4725_v39 = vmul.f32 %v17030_v27, %v17030_v27  ;;  %v17859_v58 = vsel %vm19040_vm11, %v17030_v27, 0.0 }
 0x675   :  { %v11037_v23 = vrot.slane %v11023_v41, %v14982_v26  ;;  %v8813_v30 = vrot.slane %v8799_v21, %v14817_v48  ;;  %v8814_v20 = vcombine.high %v8806_v63, %v8806_v63  ;;  %v8822_v51 = vrot.slane %v8806_v63, %v14817_v48 }
 0x676   :  { %v11021_v35 = vcombine.low %v11013_v33, %v11020_v59  ;;  %v8946_v0 = vcombine.high %v17098_v37, %v17098_v37  ;;  %v8953_v34 = vrot.slane %v17098_v37, %v14817_v48  ;;  %v17872_v27 = vsel %vm18640_vm0, %v4725_v39, 0.0 }
 0x677   :  { %v11038_v2 = vcombine.low %v11030_v50, %v11037_v23  ;;  %v8815_v8 = vcombine.high %v8813_v30, %v8813_v30  ;;  %v8829_v38 = vrot.slane %v8813_v30, %v14817_v48  ;;  %v8836_v57 = vrot.slane %v8814_v20, %v14817_v48 }
 0x678   :  { %11229 = vst.msk [vmem:[%s18052_s3 + $0x1d0] sm:$0xff] %vm19041_vm12, %v11021_v35  ;;  %v8844_v4 = vcombine.high %v8822_v51, %v8822_v51  ;;  %v9382_v46 = vrot.slane %v8822_v51, %v14974_v22  ;;  %v8960_v55 = vrot.slane %v8946_v0, %v14817_v48  ;;  %v8961_v40 = vcombine.high %v8953_v34, %v8953_v34 }
 0x679   :  { %11230 = vst.msk [vmem:[%s18052_s3 + $0x1d8] sm:$0xff] %vm19042_vm8, %v11038_v2  ;;  %v8843_v42 = vrot.slane %v8815_v8, %v14817_v48  ;;  %v8845_v32 = vcombine.high %v8829_v38, %v8829_v38  ;;  %v8846_v31 = vcombine.high %v8836_v57, %v8836_v57  ;;  %v9386_v17 = vrot.slane %v8836_v57, %v14974_v22 }
 0x67a   :  { %v9390_v10 = vrot.slane %v8844_v4, %v14974_v22  ;;  %v9398_v18 = vrot.slane %v8829_v38, %v14974_v22  ;;  %v9731_v49 = vsel %vm4767_vm13, %v17697_v54, %v9382_v46  ;;  %v8962_v39 = vcombine.high %v8960_v55, %v8960_v55 }
 0x67b   :  { %v8847_v19 = vcombine.high %v8843_v42, %v8843_v42  ;;  %v9394_v41 = vrot.slane %v8846_v31, %v14974_v22  ;;  %v9402_v21 = vrot.slane %v8843_v42, %v14974_v22  ;;  %v9406_v63 = vrot.slane %v8845_v32, %v14974_v22 }
 0x67c   :  { %v9732_v33 = vsel %vm4767_vm13, %v17712_v9, %v9386_v17  ;;  %v9733_v59 = vsel %vm4767_vm13, %v7916_v5, %v9390_v10  ;;  %v9735_v50 = vsel %vm4767_vm13, %v17706_v36, %v9398_v18  ;;  %v8969_v0 = vrot.slane %v8953_v34, %v14817_v48 }
 0x67d   :  { %v9410_v23 = vrot.slane %v8847_v19, %v14974_v22  ;;  %v9734_v30 = vsel %vm4767_vm13, %v7918_v3, %v9394_v41  ;;  %v9736_v20 = vsel %vm4767_vm13, %v17724_v24, %v9402_v21  ;;  %v9737_v54 = vsel %vm4767_vm13, %v7917_v61, %v9406_v63 }
 0x67e   :  { %v10869_v5 = vcombine.low %v9731_v49, %v9732_v33  ;;  %v10870_v51 = vcombine.low %v9733_v59, %v9734_v30  ;;  %v10886_v35 = vcombine.low %v9735_v50, %v9736_v20  ;;  %v8976_v3 = vrot.slane %v8960_v55, %v14817_v48 }
 0x67f   :  { %v9738_v9 = vsel %vm4767_vm13, %v7919_v13, %v9410_v23  ;;  %v8983_v2 = vrot.slane %v8961_v40, %v14817_v48  ;;  %v8990_v8 = vrot.slane %v8962_v39, %v14817_v48  ;;  %v8991_v4 = vcombine.high %v8969_v0, %v8969_v0 }
 0x680   :  { %v10877_v36 = vrot.slane %v10869_v5, %v14982_v26  ;;  %v10884_v61 = vrot.slane %v10870_v51, %v14982_v26  ;;  %v10887_v38 = vcombine.low %v9737_v54, %v9738_v9  ;;  %v10894_v57 = vrot.slane %v10886_v35, %v14982_v26 }
 0x681   :  { %v8992_v34 = vcombine.high %v8976_v3, %v8976_v3  ;;  %v8993_v46 = vcombine.high %v8983_v2, %v8983_v2  ;;  %v8994_v42 = vcombine.high %v8990_v8, %v8990_v8  ;;  %v9478_v55 = vrot.slane %v8969_v0, %v14974_v22 }
 0x682   :  { %v10885_v24 = vcombine.low %v10877_v36, %v10884_v61  ;;  %v10901_v13 = vrot.slane %v10887_v38, %v14982_v26  ;;  %v9482_v32 = vrot.slane %v8983_v2, %v14974_v22  ;;  %v9486_v31 = vrot.slane %v8991_v4, %v14974_v22 }
 0x683   :  { %v9490_v17 = vrot.slane %v8993_v46, %v14974_v22  ;;  %v9494_v10 = vrot.slane %v8976_v3, %v14974_v22  ;;  %v9498_v18 = vrot.slane %v8990_v8, %v14974_v22  ;;  %v9502_v40 = vrot.slane %v8992_v34, %v14974_v22 }
 0x684   :  { %v10902_v49 = vcombine.low %v10894_v57, %v10901_v13  ;;  %11221 = vst.msk [vmem:[%s18052_s3 + $0x190] sm:$0xff] %vm19043_vm15, %v10885_v24  ;;  %v9506_v19 = vrot.slane %v8994_v42, %v14974_v22  ;;  %v9755_v41 = vsel %vm4767_vm13, %v17715_v45, %v9478_v55  ;;  %v9756_v21 = vsel %vm4767_vm13, %v17739_v28, %v9482_v32 }
 0x685   :  { %v9757_v63 = vsel %vm4767_vm13, %v8063_v6, %v9486_v31  ;;  %v9758_v33 = vsel %vm4767_vm13, %v8065_v47, %v9490_v17  ;;  %v9759_v59 = vsel %vm4767_vm13, %v17734_v15, %v9494_v10  ;;  %v9760_v50 = vsel %vm4767_vm13, %v17757_v44, %v9498_v18 }
 0x686   :  { %11222 = vst.msk [vmem:[%s18052_s3 + $0x198] sm:$0xff] %vm19044_vm3, %v10902_v49  ;;  %v19045_v45 = vcombine.high %v17734_v15, %v17734_v15  ;;  %v19046_v28 = vcombine.high %v17757_v44, %v17757_v44  ;;  %v11073_v39 = vcombine.low %v9755_v41, %v9756_v21  ;;  %v11074_v23 = vcombine.low %v9757_v63, %v9758_v33 }
 0x687   :  { %v11090_v30 = vcombine.low %v9759_v59, %v9760_v50  ;;  %v4697_v54 = vadd.f32 %v17648_v62, %v17583_v16  ;;  %v4700_v51 = vsel %vm19047_vm4, %v17144_v1, 0.0  ;;  %v4726_v15 = vmul.f32 %v17144_v1, %v17144_v1 }
 0x688   :  { %v9761_v6 = vsel %vm4767_vm13, %v19045_v45, %v9502_v40  ;;  %v9762_v47 = vsel %vm4767_vm13, %v19046_v28, %v9506_v19  ;;  %v11081_v5 = vrot.slane %v11073_v39, %v14982_v26  ;;  %v4751_v44 = vadd.f32 %v17651_v43, %v17601_v53 }
 0x689   :  { %v11091_v20 = vcombine.low %v9761_v6, %v9762_v47  ;;  %v11088_v35 = vrot.slane %v11074_v23, %v14982_v26  ;;  %v11098_v0 = vrot.slane %v11090_v30, %v14982_v26  ;;  %v4699_v3 = vadd.f32 %v17859_v58, %v4697_v54 }
 0x68a   :  { %v4728_v16 = vmul.f32 %v17098_v37, %v17098_v37  ;;  %v4753_v62 = vadd.f32 %v17872_v27, %v4751_v44  ;;  %v4754_v2 = vsel %vm19048_vm5, %v4726_v15, 0.0  ;;  %v8848_v8 = vcombine.high %v17144_v1, %v17144_v1 }
 0x68b   :  { %v11105_v9 = vrot.slane %v11091_v20, %v14982_v26  ;;  %v11089_v36 = vcombine.low %v11081_v5, %v11088_v35  ;;  %v4701_v43 = vadd.f32 %v4700_v51, %v4699_v3  ;;  %v8855_v61 = vrot.slane %v17144_v1, %v14817_v48 }
 0x68c   :  { %v7968_v38 = vcombine.high %v17794_v12, %v17794_v12  ;;  %v4756_v58 = vsel %vm19049_vm1, %v17787_v25, 0.0  ;;  %v4755_v57 = vadd.f32 %v4754_v2, %v4753_v62  ;;  %v8862_v27 = vrot.slane %v8848_v8, %v14817_v48 }
 0x68d   :  { %v11106_v53 = vcombine.low %v11098_v0, %v11105_v9  ;;  %v4704_v4 = vsel %vm19050_vm14, %v17098_v37, 0.0  ;;  %11233 = vst.msk [vmem:[%s18052_s3 + $0x1f0] sm:$0xff] %vm19051_vm6, %v11089_v36  ;;  %v4703_v1 = vadd.f32 %v17780_v60, %v4701_v43  ;;  %v8863_v34 = vcombine.high %v8855_v61, %v8855_v61 }
 0x68e   :  { %v8871_v25 = vrot.slane %v8855_v61, %v14817_v48  ;;  %v4758_v46 = vsel %vm19053_vm10, %v4728_v16, 0.0  ;;  %v4757_v42 = vadd.f32 %v4756_v58, %v4755_v57  ;;  %v8864_v24 = vcombine.high %v8862_v27, %v8862_v27 }
 0x68f   :  { %11234 = vst.msk [vmem:[%s18052_s3 + $0x1f8] sm:$0xff] %vm19052_vm7, %v11106_v53  ;;  %v8878_v37 = vrot.slane %v8862_v27, %v14817_v48  ;;  %v4705_v13 = vadd.f32 %v4704_v4, %v4703_v1  ;;  %v8885_v55 = vrot.slane %v8863_v34, %v14817_v48  ;;  %v19054_v39 = vcombine.high %v17770_v14, %v17770_v14 }
 0x690   :  { %v8893_v32 = vcombine.high %v8871_v25, %v8871_v25  ;;  %v9414_v31 = vrot.slane %v8871_v25, %v14974_v22  ;;  %v4759_v17 = vadd.f32 %v4758_v46, %v4757_v42  ;;  %v8892_v10 = vrot.slane %v8864_v24, %v14817_v48 }
 0x691   :  { %v8894_v18 = vcombine.high %v8878_v37, %v8878_v37  ;;  %v9430_v60 = vrot.slane %v8878_v37, %v14974_v22  ;;  %v4706_v49 = vrot.slane %v4705_v13, 4  ;;  %v8895_v40 = vcombine.high %v8885_v55, %v8885_v55 }
 0x692   :  { %v9418_v19 = vrot.slane %v8885_v55, %v14974_v22  ;;  %v9422_v41 = vrot.slane %v8893_v32, %v14974_v22  ;;  %v4760_v21 = vrot.slane %v4759_v17, 4  ;;  %v8896_v63 = vcombine.high %v8892_v10, %v8892_v10 }
 0x693   :  { %v9434_v33 = vrot.slane %v8892_v10, %v14974_v22  ;;  %v9438_v59 = vrot.slane %v8894_v18, %v14974_v22  ;;  %v4707_v50 = vadd.f32 %v4706_v49, %v4705_v13  ;;  %v9426_v45 = vrot.slane %v8895_v40, %v14974_v22 }
 0x694   :  { %v9739_v48 = vsel %vm4767_vm13, %v17770_v14, %v9414_v31  ;;  %v9740_v6 = vsel %vm4767_vm13, %v17783_v52, %v9418_v19  ;;  %v4761_v28 = vadd.f32 %v4760_v21, %v4759_v17  ;;  %v9442_v47 = vrot.slane %v8896_v63, %v14974_v22 }
 0x695   :  { %v9741_v23 = vsel %vm4767_vm13, %v19054_v39, %v9422_v41  ;;  %v9743_v30 = vsel %vm4767_vm13, %v17776_v29, %v9430_v60  ;;  %v4708_v20 = vrot.slane %v4707_v50, 2  ;;  %v9742_v54 = vsel %vm4767_vm13, %v7967_v56, %v9426_v45 }
 0x696   :  { %v9744_v5 = vsel %vm4767_vm13, %v17794_v12, %v9434_v33  ;;  %v19055_v22 = vcombine.high %v17776_v29, %v17776_v29  ;;  %v4762_v14 = vrot.slane %v4761_v28, 2  ;;  %v9746_v15 = vsel %vm4767_vm13, %v7968_v38, %v9442_v47 }
 0x697   :  { %v10937_v44 = vcombine.low %v9739_v48, %v9740_v6  ;;  %v10938_v35 = vcombine.low %v9741_v23, %v9742_v54  ;;  %v4709_v0 = vadd.f32 %v4708_v20, %v4707_v50  ;;  %v10954_v9 = vcombine.low %v9743_v30, %v9744_v5 }
 0x698   :  { %v9745_v51 = vsel %vm4767_vm13, %v19055_v22, %v9438_v59  ;;  %v4763_v16 = vadd.f32 %v4762_v14, %v4761_v28  ;;  %vm4769_vm11 = vcmask 25600  }
 0x699   :  { %v10955_v3 = vcombine.low %v9745_v51, %v9746_v15  ;;  %v10945_v52 = vrot.slane %v10937_v44, %v14982_v26  ;;  %v10952_v56 = vrot.slane %v10938_v35, %v14982_v26  ;;  %v4710_v62 = vrot.slane %v4709_v0, 1 }
 0x69a   :  { %v10962_v12 = vrot.slane %v10954_v9, %v14982_v26  ;;  %v4764_v2 = vrot.slane %v4763_v16, 1 }
 0x69b   :  { %v10969_v29 = vrot.slane %v10955_v3, %v14982_v26  ;;  %v10953_v8 = vcombine.low %v10945_v52, %v10952_v56  ;;  %v4711_v36 = vadd.f32 %v4710_v62, %v4709_v0 }
 0x69c   :  { %v4765_v43 = vadd.f32 %v4764_v2, %v4763_v16 }
 0x69d   :  { %v10970_v53 = vcombine.low %v10962_v12, %v10969_v29  ;;  %11225 = vst.msk [vmem:[%s18052_s3 + $0x1b0] sm:$0xff] %vm19056_vm2, %v10953_v8  ;;  %v4712_v61 = vadd.f32 %v4711_v36, %v17829_v11 }
 0x69e   :  { %v4766_v38 = vadd.f32 %v4765_v43, %v17841_v7 }
 0x69f   :  { %11226 = vst.msk [vmem:[%s18052_s3 + $0x1b8] sm:$0xff] %vm19057_vm9, %v10970_v53 }
 0x6a0   :  { %v4768_v26 = vsel %vm4767_vm13, %v4712_v61, %v4766_v38 }
 0x6a1   :  { %4770 = vst.msk [vmem:[%s18053_s4] sm:$0x3] %vm4769_vm11, %v4768_v26 }

</bundles_post_ra>
